<compile_context>
chip_gen: v7x
topology: tpu7x:2x2x1
jax: 0.10.0
libtpu: 0.0.40
codegen_flags: <defaults>
</compile_context>

<pallas_src>
import functools

import jax
import jax.numpy as jnp
import numpy as np
from jax.experimental import pallas as pl
from jax.experimental.pallas import tpu as pltpu


# ---------------------------------------------------------------------------
# In-kernel helpers (traced inside the Pallas kernel body)
# ---------------------------------------------------------------------------
def _layernorm(x, scale, shift, eps=1e-5):
    # Matches the PyTorch LayerNorm: mean / biased variance over last dim.
    mean = jnp.mean(x, axis=-1, keepdims=True)
    var = jnp.mean((x - mean) ** 2, axis=-1, keepdims=True)
    # rsqrt -> EUP slot instead of a VALU divide.
    return scale * ((x - mean) * jax.lax.rsqrt(var + eps)) + shift


def _gelu(x):
    # Matches the custom tanh-approximation GELU in the PyTorch module.
    c = jnp.float32(np.sqrt(2.0 / np.pi))
    return 0.5 * x * (1.0 + jnp.tanh(c * (x + 0.044715 * (x * x * x))))


# ---------------------------------------------------------------------------
# Fused kernel: ALL transformer layers + final LayerNorm + lm head.
# grid = (batch_blocks, n_layers); the residual stream lives in VMEM scratch.
# ---------------------------------------------------------------------------
def _gpt_fused_kernel(
    x_ref,                      # (Bb, T, E)  f32   embedded input (tok + pos)
    mask_ref,                   # (T, T)      f32   additive causal bias
    wqkv_ref,                   # (1, E, 3E)  bf16  fused Wq|Wk|Wv (Wq pre-scaled)
    wo_ref, bo_ref,             # (1, E, E) bf16, (1, 1, E) f32
    w1_ref, b1_ref,             # (1, E, 4E) bf16, (1, 1, 4E) f32
    w2_ref, b2_ref,             # (1, 4E, E) bf16, (1, 1, E) f32
    sc1_ref, sh1_ref,           # LayerNorm1 scale/shift (1, 1, E) f32
    sc2_ref, sh2_ref,           # LayerNorm2 scale/shift (1, 1, E) f32
    fsc_ref, fsh_ref,           # final LayerNorm scale/shift (1, E) f32
    wout_ref,                   # (E, V)      bf16  lm head
    o_ref,                      # (Bb, T, V)  f32   logits
    xres_ref,                   # scratch VMEM (Bb*T, E) f32 residual stream
    *, num_heads,
):
    l = pl.program_id(1)
    Bb, T, E = x_ref.shape
    hd = E // num_heads
    M = Bb * T                                   # batch folded into matmul M dim

    @pl.when(l == 0)
    def _():
        xres_ref[...] = x_ref[...].reshape(M, E)

    x = xres_ref[...]                            # (M, E) f32 residual stream

    # ----- LayerNorm 1 + fused QKV (1/sqrt(hd) pre-folded into Wq) -----
    xn = _layernorm(x, sc1_ref[0], sh1_ref[0])
    qkv = jnp.dot(xn.astype(jnp.bfloat16), wqkv_ref[0],
                  preferred_element_type=jnp.float32)            # (M, 3E)

    def to_heads(t):        # (M, E) -> (H*Bb, T, hd), head-major leading dim
        t = jnp.transpose(t.reshape(M, num_heads, hd), (1, 0, 2))  # (H, M, hd)
        return t.reshape(num_heads * Bb, T, hd)

    qh = to_heads(qkv[:, :E]).astype(jnp.bfloat16)
    kh = to_heads(qkv[:, E:2 * E]).astype(jnp.bfloat16)
    vh = to_heads(qkv[:, 2 * E:]).astype(jnp.bfloat16)

    # ----- batched attention over the (head, batch) axis -----
    scores = jnp.einsum("bqd,bkd->bqk", qh, kh,
                        preferred_element_type=jnp.float32)      # (H*Bb, T, T)
    scores = scores + mask_ref[...][None, :, :]   # precomputed, loop-invariant
    m = jnp.max(scores, axis=-1, keepdims=True)
    p = jnp.exp(scores - m)
    denom = jnp.sum(p, axis=-1, keepdims=True)
    p = p * pl.reciprocal(denom, approx=True)                    # EUP reciprocal

    ctx = jnp.einsum("bqk,bkd->bqd", p.astype(jnp.bfloat16), vh,
                     preferred_element_type=jnp.float32)         # (H*Bb, T, hd)
    ctx = ctx.astype(jnp.bfloat16)

    # ----- head re-merge fused into the Wo projection -----
    # Per-head (M, hd) @ (hd, E) matmuls with static slices (unrolled at trace
    # time): head accumulation in f32, no XLU transpose / lane-merge of ctx.
    wo = wo_ref[0]
    attn = jnp.dot(ctx[0:Bb].reshape(M, hd), wo[0:hd, :],
                   preferred_element_type=jnp.float32)
    for h in range(1, num_heads):
        attn = attn + jnp.dot(ctx[h * Bb:(h + 1) * Bb].reshape(M, hd),
                              wo[h * hd:(h + 1) * hd, :],
                              preferred_element_type=jnp.float32)
    x1 = attn + bo_ref[0] + x          # drop_shortcut p=0.0 -> identity

    # ----- LayerNorm 2 + FeedForward -----
    xn2 = _layernorm(x1, sc2_ref[0], sh2_ref[0])
    h1 = jnp.dot(xn2.astype(jnp.bfloat16), w1_ref[0],
                 preferred_element_type=jnp.float32) + b1_ref[0]
    h1 = _gelu(h1)
    ff = jnp.dot(h1.astype(jnp.bfloat16), w2_ref[0],
                 preferred_element_type=jnp.float32) + b2_ref[0]
    x2 = ff + x1                       # drop_shortcut p=0.0 -> identity
    xres_ref[...] = x2                 # residual stays resident in VMEM

    # ----- final LayerNorm + lm head fused into the last layer step -----
    @pl.when(l == pl.num_programs(1) - 1)
    def _():
        xf = _layernorm(x2, fsc_ref[...], fsh_ref[...])
        logits = jnp.dot(xf.astype(jnp.bfloat16), wout_ref[...],
                         preferred_element_type=jnp.float32)     # (M, V)
        o_ref[...] = logits.reshape(Bb, T, -1).astype(o_ref.dtype)


# ---------------------------------------------------------------------------
# Wrapper: embedding (XLA) + one fused pallas_call for the whole model.
# ---------------------------------------------------------------------------
def gpt_forward(in_idx, params, num_heads, single_buffer_consts=True):
    B, T = in_idx.shape
    tok_emb = params["tok_emb"]
    E = tok_emb.shape[1]
    st = params["stacked"]
    L = st["wqkv"].shape[0]
    H4 = st["w1"].shape[2]
    V = params["w_out"].shape[1]

    # Embedding gather + positional add stay in XLA (see TODO at top of file).
    x = jnp.take(tok_emb, in_idx, axis=0) + params["pos_emb"][:T][None]
    # drop_emb with p=0.0 -> identity

    # Additive causal bias built ONCE outside the kernel (loop-invariant;
    # finite large-negative value keeps the softmax NaN-safe).
    rows = jax.lax.broadcasted_iota(jnp.int32, (T, T), 0)
    cols = jax.lax.broadcasted_iota(jnp.int32, (T, T), 1)
    mask_bias = jnp.where(cols > rows, jnp.float32(-1e30), jnp.float32(0.0))

    # Fold the whole batch into one block so Bb*T rows feed every dense matmul.
    # TODO(synk): at real sizes pick Bb so Bb*T ~ 256, flash-tile attention and
    #             vocab-tile the lm head; re-derive per generation (v7x 64 MiB).
    Bb = B
    nb = B // Bb

    def layer_spec(r, c):
        # Per-layer stacked weights: streamed (double-buffered) over the layer
        # grid axis -> layer l+1 weights DMA while layer l computes.
        return pl.BlockSpec((1, r, c), lambda b, l: (l, 0, 0))

    def const_spec(shape):
        # Layer-invariant inputs: fetched once; single-buffered so no second
        # VMEM buffer is wasted (falls back on jax versions without
        # pipeline_mode support).
        idx = lambda b, l: (0,) * len(shape)
        if single_buffer_consts and hasattr(pl, "Buffered"):
            try:
                return pl.BlockSpec(shape, idx, pipeline_mode=pl.Buffered(1))
            except TypeError:
                pass
        return pl.BlockSpec(shape, idx)

    in_specs = [
        pl.BlockSpec((Bb, T, E), lambda b, l: (b, 0, 0)),   # x (embedded)
        const_spec((T, T)),                                 # causal bias
        layer_spec(E, 3 * E),                               # Wqkv  (bf16)
        layer_spec(E, E),                                   # Wo    (bf16)
        layer_spec(1, E),                                   # bo
        layer_spec(E, H4),                                  # W1    (bf16)
        layer_spec(1, H4),                                  # b1
        layer_spec(H4, E),                                  # W2    (bf16)
        layer_spec(1, E),                                   # b2
        layer_spec(1, E),                                   # LN1 scale
        layer_spec(1, E),                                   # LN1 shift
        layer_spec(1, E),                                   # LN2 scale
        layer_spec(1, E),                                   # LN2 shift
        const_spec((1, E)),                                 # final LN scale
        const_spec((1, E)),                                 # final LN shift
        const_spec((E, V)),                                 # lm head (bf16)
    ]
    out_spec = pl.BlockSpec((Bb, T, V), lambda b, l: (b, 0, 0))

    # Advisory whole-model cost estimate for XLA scheduling.
    dense_flops = 2 * B * T * E * (3 * E + E + 2 * H4)
    attn_flops = 4 * B * T * T * E
    flops = L * (dense_flops + attn_flops) + 2 * B * T * E * V
    transc = L * (B * num_heads * T * T + B * T * H4) + B * T * E
    bytes_accessed = (L * (2 * (4 * E * E + 2 * E * H4) + 4 * (6 * E + 2 * H4))
                      + 2 * E * V + 4 * B * T * (E + V) + 4 * T * T)
    cost = pl.CostEstimate(flops=flops, transcendentals=transc,
                           bytes_accessed=bytes_accessed)

    kernel = functools.partial(_gpt_fused_kernel, num_heads=num_heads)
    return pl.pallas_call(
        kernel,
        out_shape=jax.ShapeDtypeStruct((B, T, V), jnp.float32),
        grid=(nb, L),
        in_specs=in_specs,
        out_specs=out_spec,
        scratch_shapes=[pltpu.VMEM((Bb * T, E), jnp.float32)],
        compiler_params=pltpu.CompilerParams(
            # Batch blocks are independent (megacore-parallel on v7x); layers
            # form a sequential carried dependency through the VMEM residual.
            dimension_semantics=("parallel", "arbitrary"),
            # 32 MiB is safe on every generation (v7x physical VMEM is 64 MiB).
            vmem_limit_bytes=32 * 1024 * 1024,
        ),
        cost_estimate=cost,
    )(x, mask_bias,
      st["wqkv"], st["wo"], st["bo"], st["w1"], st["b1"], st["w2"], st["b2"],
      st["sc1"], st["sh1"], st["sc2"], st["sh2"],
      params["final_scale"], params["final_shift"], params["w_out"])


# ---------------------------------------------------------------------------
# Pure-JAX f32 reference (mirrors the PyTorch forward exactly)
# ---------------------------------------------------------------------------
def gpt_ref(in_idx, tok_emb, pos_emb, blocks, fsc, fsh, w_out, num_heads):
    B, T = in_idx.shape
    E = tok_emb.shape[1]
    hd = E // num_heads

    def ln(x, s, sh):
        m = jnp.mean(x, -1, keepdims=True)
        v = jnp.mean((x - m) ** 2, -1, keepdims=True)
        return s * (x - m) / jnp.sqrt(v + 1e-5) + sh

    x = tok_emb[in_idx] + pos_emb[:T][None]
    for (wq, wk, wv, wo, bo, w1, b1, w2, b2, sc1, sh1, sc2, sh2) in blocks:
        shortcut = x
        xn = ln(x, sc1, sh1)
        q = (xn @ wq).reshape(B, T, num_heads, hd).transpose(0, 2, 1, 3)
        k = (xn @ wk).reshape(B, T, num_heads, hd).transpose(0, 2, 1, 3)
        v = (xn @ wv).reshape(B, T, num_heads, hd).transpose(0, 2, 1, 3)
        scores = jnp.einsum("bhqd,bhkd->bhqk", q, k)
        mask = jnp.triu(jnp.ones((T, T), bool), 1)
        scores = jnp.where(mask, -jnp.inf, scores)
        w = jax.nn.softmax(scores / jnp.sqrt(jnp.float32(hd)), axis=-1)
        ctx = jnp.einsum("bhqk,bhkd->bhqd", w, v).transpose(0, 2, 1, 3)
        ctx = ctx.reshape(B, T, E)
        x = ctx @ wo + bo + shortcut
        shortcut = x
        xn2 = ln(x, sc2, sh2)
        c = jnp.sqrt(2.0 / jnp.pi)
        h = xn2 @ w1 + b1
        h = 0.5 * h * (1 + jnp.tanh(c * (h + 0.044715 * h ** 3)))
        x = h @ w2 + b2 + shortcut
    return ln(x, fsc, fsh) @ w_out


# ---------------------------------------------------------------------------
if __name__ == "__main__":
    # Lane-dense small config: emb_dim multiple of 128, vocab multiple of 128.
    cfg = dict(vocab_size=256, context_length=16, emb_dim=128,
               n_heads=4, n_layers=2, drop_rate=0.0, qkv_bias=False)
    B, T = 2, cfg["context_length"]
    V, E, H, L = cfg["vocab_size"], cfg["emb_dim"], cfg["n_heads"], cfg["n_layers"]
    H4 = 4 * E
    hd = E // H

    key = jax.random.PRNGKey(0)
    k_idx, k_tok, k_pos, k_fin, key = jax.random.split(key, 5)
    wscale = 0.05

    in_idx = jax.random.randint(k_idx, (B, T), 0, V)
    tok_emb = 0.1 * jax.random.normal(k_tok, (V, E), jnp.float32)
    pos_emb = 0.1 * jax.random.normal(k_pos, (cfg["context_length"], E), jnp.float32)

    kf = jax.random.split(k_fin, 3)
    final_scale = 1.0 + 0.1 * jax.random.normal(kf[0], (1, E), jnp.float32)
    final_shift = 0.1 * jax.random.normal(kf[1], (1, E), jnp.float32)
    w_out = wscale * jax.random.normal(kf[2], (E, V), jnp.float32)

    ref_blocks = []
    lists = {k: [] for k in ("wqkv", "wo", "bo", "w1", "b1", "w2", "b2",
                             "sc1", "sh1", "sc2", "sh2")}
    inv_scale = jnp.float32(1.0 / np.sqrt(hd))
    for _ in range(L):
        ks = jax.random.split(key, 14)
        key = ks[13]
        wq = wscale * jax.random.normal(ks[0], (E, E), jnp.float32)
        wk = wscale * jax.random.normal(ks[1], (E, E), jnp.float32)
        wv = wscale * jax.random.normal(ks[2], (E, E), jnp.float32)
        wo = wscale * jax.random.normal(ks[3], (E, E), jnp.float32)
        bo = wscale * jax.random.normal(ks[4], (1, E), jnp.float32)
        w1 = wscale * jax.random.normal(ks[5], (E, H4), jnp.float32)
        b1 = wscale * jax.random.normal(ks[6], (1, H4), jnp.float32)
        w2 = wscale * jax.random.normal(ks[7], (H4, E), jnp.float32)
        b2 = wscale * jax.random.normal(ks[8], (1, E), jnp.float32)
        sc1 = 1.0 + 0.1 * jax.random.normal(ks[9], (1, E), jnp.float32)
        sh1 = 0.1 * jax.random.normal(ks[10], (1, E), jnp.float32)
        sc2 = 1.0 + 0.1 * jax.random.normal(ks[11], (1, E), jnp.float32)
        sh2 = 0.1 * jax.random.normal(ks[12], (1, E), jnp.float32)

        ref_blocks.append((wq, wk, wv, wo, bo, w1, b1, w2, b2,
                           sc1, sh1, sc2, sh2))
        # 1/sqrt(head_dim) folded into Wq at packing time (one-time transform).
        lists["wqkv"].append(jnp.concatenate([wq * inv_scale, wk, wv],
                                             axis=1).astype(jnp.bfloat16))
        lists["wo"].append(wo.astype(jnp.bfloat16)); lists["bo"].append(bo)
        lists["w1"].append(w1.astype(jnp.bfloat16)); lists["b1"].append(b1)
        lists["w2"].append(w2.astype(jnp.bfloat16)); lists["b2"].append(b2)
        lists["sc1"].append(sc1); lists["sh1"].append(sh1)
        lists["sc2"].append(sc2); lists["sh2"].append(sh2)

    stacked = {k: jnp.stack(v) for k, v in lists.items()}
    params = dict(tok_emb=tok_emb, pos_emb=pos_emb, stacked=stacked,
                  final_scale=final_scale, final_shift=final_shift,
                  w_out=w_out.astype(jnp.bfloat16))

    fwd = jax.jit(functools.partial(gpt_forward, num_heads=H,
                                    single_buffer_consts=True))
    try:
        logits = jax.block_until_ready(fwd(in_idx, params))
    except Exception:
        # Compatibility fallback: jax versions where pipeline_mode/Buffered(1)
        # is not supported on top-level pallas_call BlockSpecs.
        fwd = jax.jit(functools.partial(gpt_forward, num_heads=H,
                                        single_buffer_consts=False))
        logits = jax.block_until_ready(fwd(in_idx, params))

    ref = gpt_ref(in_idx, tok_emb, pos_emb, ref_blocks,
                  final_scale, final_shift, w_out, H)

    # Kernel runs matmuls in bf16 (f32 accumulation) + approx EUP reciprocal,
    # so compare against the exact-f32 reference with mixed-precision tolerance.
    np.testing.assert_allclose(np.asarray(logits), np.asarray(ref),
                               rtol=3e-2, atol=3e-2)
    print("KERNEL_OK")
</pallas_src>

<mosaic_0001>
module attributes {stable_mosaic.version = 11 : i64} {
  func.func @_gpt_fused_kernel(%arg0: i32, %arg1: i32, %arg2: memref<2x16x128xf32, #tpu.memory_space<vmem>>, %arg3: memref<16x16xf32, #tpu.memory_space<vmem>>, %arg4: memref<1x128x384xbf16, #tpu.memory_space<vmem>>, %arg5: memref<1x128x128xbf16, #tpu.memory_space<vmem>>, %arg6: memref<1x1x128xf32, #tpu.memory_space<vmem>>, %arg7: memref<1x128x512xbf16, #tpu.memory_space<vmem>>, %arg8: memref<1x1x512xf32, #tpu.memory_space<vmem>>, %arg9: memref<1x512x128xbf16, #tpu.memory_space<vmem>>, %arg10: memref<1x1x128xf32, #tpu.memory_space<vmem>>, %arg11: memref<1x1x128xf32, #tpu.memory_space<vmem>>, %arg12: memref<1x1x128xf32, #tpu.memory_space<vmem>>, %arg13: memref<1x1x128xf32, #tpu.memory_space<vmem>>, %arg14: memref<1x1x128xf32, #tpu.memory_space<vmem>>, %arg15: memref<1x128xf32, #tpu.memory_space<vmem>>, %arg16: memref<1x128xf32, #tpu.memory_space<vmem>>, %arg17: memref<128x256xbf16, #tpu.memory_space<vmem>>, %arg18: memref<2x16x256xf32, #tpu.memory_space<vmem>>, %arg19: memref<32x128xf32, #tpu.memory_space<vmem>>) attributes {dimension_semantics = [#tpu.dimension_semantics<parallel>, #tpu.dimension_semantics<arbitrary>], iteration_bounds = array<i64: 1, 2>, scalar_prefetch = 0 : i64, scratch_operands = 1 : i64, tpu.core_type = #tpu.core_type<tc>, window_params = [{transform_indices = @transform_0, window_bounds = array<i64: 2, 16, 128>}, {pipeline_mode = #tpu.pipeline_mode<synchronous>, transform_indices = @transform_1, window_bounds = array<i64: 16, 16>}, {transform_indices = @transform_2, window_bounds = array<i64: 1, 128, 384>}, {transform_indices = @transform_3, window_bounds = array<i64: 1, 128, 128>}, {transform_indices = @transform_4, window_bounds = array<i64: 1, 1, 128>}, {transform_indices = @transform_5, window_bounds = array<i64: 1, 128, 512>}, {transform_indices = @transform_6, window_bounds = array<i64: 1, 1, 512>}, {transform_indices = @transform_7, window_bounds = array<i64: 1, 512, 128>}, {transform_indices = @transform_8, window_bounds = array<i64: 1, 1, 128>}, {transform_indices = @transform_9, window_bounds = array<i64: 1, 1, 128>}, {transform_indices = @transform_10, window_bounds = array<i64: 1, 1, 128>}, {transform_indices = @transform_11, window_bounds = array<i64: 1, 1, 128>}, {transform_indices = @transform_12, window_bounds = array<i64: 1, 1, 128>}, {pipeline_mode = #tpu.pipeline_mode<synchronous>, transform_indices = @transform_13, window_bounds = array<i64: 1, 128>}, {pipeline_mode = #tpu.pipeline_mode<synchronous>, transform_indices = @transform_14, window_bounds = array<i64: 1, 128>}, {pipeline_mode = #tpu.pipeline_mode<synchronous>, transform_indices = @transform_15, window_bounds = array<i64: 128, 256>}, {transform_indices = @transform_16, window_bounds = array<i64: 2, 16, 256>}]} {
    %c0_i32 = arith.constant 0 : i32
    %0 = arith.cmpi eq, %arg1, %c0_i32 : i32
    %1 = arith.extui %0 : i1 to i32
    %c0_i32_0 = arith.constant 0 : i32
    %2 = arith.cmpi ne, %1, %c0_i32_0 : i32
    scf.if %2 {
      %c0_64 = arith.constant 0 : index
      %c0_65 = arith.constant 0 : index
      %c0_66 = arith.constant 0 : index
      %153 = vector.load %arg2[%c0_64, %c0_65, %c0_66] : memref<2x16x128xf32, #tpu.memory_space<vmem>>, vector<2x16x128xf32>
      %154 = vector.shape_cast %153 : vector<2x16x128xf32> to vector<32x128xf32>
      %c0_67 = arith.constant 0 : index
      %c0_68 = arith.constant 0 : index
      %155 = vector.load %arg19[%c0_67, %c0_68] : memref<32x128xf32, #tpu.memory_space<vmem>>, vector<32x128xf32>
      tpu.vector_store %arg19[%c0_67, %c0_68], %154 {strides = array<i32>} : memref<32x128xf32, #tpu.memory_space<vmem>>, vector<32x128xf32>,
    } else {
    }
    %c0 = arith.constant 0 : index
    %c0_1 = arith.constant 0 : index
    %3 = vector.load %arg19[%c0, %c0_1] : memref<32x128xf32, #tpu.memory_space<vmem>>, vector<32x128xf32>
    %c0_2 = arith.constant 0 : index
    %c0_3 = arith.constant 0 : index
    %c0_4 = arith.constant 0 : index
    %4 = vector.load %arg11[%c0_2, %c0_3, %c0_4] : memref<1x1x128xf32, #tpu.memory_space<vmem>>, vector<1x1x128xf32>
    %5 = vector.shape_cast %4 : vector<1x1x128xf32> to vector<1x128xf32>
    %c0_5 = arith.constant 0 : index
    %c0_6 = arith.constant 0 : index
    %c0_7 = arith.constant 0 : index
    %6 = vector.load %arg12[%c0_5, %c0_6, %c0_7] : memref<1x1x128xf32, #tpu.memory_space<vmem>>, vector<1x1x128xf32>
    %7 = vector.shape_cast %6 : vector<1x1x128xf32> to vector<1x128xf32>
    %cst = arith.constant dense<0.000000e+00> : vector<32xf32>
    %8 = vector.multi_reduction <add>, %3, %cst [1] : vector<32x128xf32> to vector<32xf32>
    %9 = vector.shape_cast %8 : vector<32xf32> to vector<32x1xf32>
    %cst_8 = arith.constant 1.280000e+02 : f32
    %10 = vector.broadcast %cst_8 : f32 to vector<32x1xf32>
    %11 = arith.divf %9, %10 : vector<32x1xf32>
    %12 = vector.broadcast %11 : vector<32x1xf32> to vector<32x128xf32>
    %13 = arith.subf %3, %12 : vector<32x128xf32>
    %14 = arith.mulf %13, %13 : vector<32x128xf32>
    %cst_9 = arith.constant dense<0.000000e+00> : vector<32xf32>
    %15 = vector.multi_reduction <add>, %14, %cst_9 [1] : vector<32x128xf32> to vector<32xf32>
    %16 = vector.shape_cast %15 : vector<32xf32> to vector<32x1xf32>
    %cst_10 = arith.constant 1.280000e+02 : f32
    %17 = vector.broadcast %cst_10 : f32 to vector<32x1xf32>
    %18 = arith.divf %16, %17 : vector<32x1xf32>
    %19 = vector.broadcast %11 : vector<32x1xf32> to vector<32x128xf32>
    %20 = arith.subf %3, %19 : vector<32x128xf32>
    %cst_11 = arith.constant 9.99999974E-6 : f32
    %21 = vector.broadcast %cst_11 : f32 to vector<32x1xf32>
    %22 = arith.addf %18, %21 : vector<32x1xf32>
    %23 = math.rsqrt %22 : vector<32x1xf32>
    %24 = vector.broadcast %23 : vector<32x1xf32> to vector<32x128xf32>
    %25 = arith.mulf %20, %24 : vector<32x128xf32>
    %26 = vector.broadcast %5 : vector<1x128xf32> to vector<32x128xf32>
    %27 = arith.mulf %26, %25 : vector<32x128xf32>
    %28 = vector.broadcast %7 : vector<1x128xf32> to vector<32x128xf32>
    %29 = arith.addf %27, %28 : vector<32x128xf32>
    %30 = arith.truncf %29 : vector<32x128xf32> to vector<32x128xbf16>
    %c0_12 = arith.constant 0 : index
    %c0_13 = arith.constant 0 : index
    %c0_14 = arith.constant 0 : index
    %31 = vector.load %arg4[%c0_12, %c0_13, %c0_14] : memref<1x128x384xbf16, #tpu.memory_space<vmem>>, vector<1x128x384xbf16>
    %32 = vector.shape_cast %31 : vector<1x128x384xbf16> to vector<128x384xbf16>
    %cst_15 = arith.constant dense<0.000000e+00> : vector<32x384xf32>
    %33 = tpu.matmul %30, %32, %cst_15 {dimension_numbers = #tpu.dot_dimension_numbers<[1], [0], [0], [1], [0, 0, 1, 1], [], []>} : vector<32x128xbf16>, vector<128x384xbf16>, vector<32x384xf32> -> vector<32x384xf32>
    %34 = vector.extract_strided_slice %33 {offsets = [0, 0], sizes = [32, 128], strides = [1, 1]} : vector<32x384xf32> to vector<32x128xf32>
    %35 = vector.shape_cast %34 : vector<32x128xf32> to vector<32x4x32xf32>
    %36 = tpu.transpose %35, [1, 0, 2] : vector<32x4x32xf32> -> vector<4x32x32xf32>
    %37 = vector.shape_cast %36 : vector<4x32x32xf32> to vector<8x16x32xf32>
    %38 = arith.truncf %37 : vector<8x16x32xf32> to vector<8x16x32xbf16>
    %39 = vector.extract_strided_slice %33 {offsets = [0, 128], sizes = [32, 128], strides = [1, 1]} : vector<32x384xf32> to vector<32x128xf32>
    %40 = vector.shape_cast %39 : vector<32x128xf32> to vector<32x4x32xf32>
    %41 = tpu.transpose %40, [1, 0, 2] : vector<32x4x32xf32> -> vector<4x32x32xf32>
    %42 = vector.shape_cast %41 : vector<4x32x32xf32> to vector<8x16x32xf32>
    %43 = arith.truncf %42 : vector<8x16x32xf32> to vector<8x16x32xbf16>
    %44 = vector.extract_strided_slice %33 {offsets = [0, 256], sizes = [32, 128], strides = [1, 1]} : vector<32x384xf32> to vector<32x128xf32>
    %45 = vector.shape_cast %44 : vector<32x128xf32> to vector<32x4x32xf32>
    %46 = tpu.transpose %45, [1, 0, 2] : vector<32x4x32xf32> -> vector<4x32x32xf32>
    %47 = vector.shape_cast %46 : vector<4x32x32xf32> to vector<8x16x32xf32>
    %48 = arith.truncf %47 : vector<8x16x32xf32> to vector<8x16x32xbf16>
    "tpu.trace_start"() <{level = 10 : i32, message = "bqd,bkd->bqk"}> : () -> ()
    %cst_16 = arith.constant dense<0.000000e+00> : vector<8x16x16xf32>
    %49 = tpu.matmul %38, %43, %cst_16 {dimension_numbers = #tpu.dot_dimension_numbers<[2], [2], [1], [1], [0, 0, 0, 1, 1, 1], [0], [0]>} : vector<8x16x32xbf16>, vector<8x16x32xbf16>, vector<8x16x16xf32> -> vector<8x16x16xf32>
    "tpu.trace_stop"() : () -> ()
    %c0_17 = arith.constant 0 : index
    %c0_18 = arith.constant 0 : index
    %50 = vector.load %arg3[%c0_17, %c0_18] : memref<16x16xf32, #tpu.memory_space<vmem>>, vector<16x16xf32>
    %51 = vector.shape_cast %50 : vector<16x16xf32> to vector<1x16x16xf32>
    %52 = vector.broadcast %51 : vector<1x16x16xf32> to vector<8x16x16xf32>
    %53 = arith.addf %49, %52 : vector<8x16x16xf32>
    %cst_19 = arith.constant dense<0xFF800000> : vector<8x16xf32>
    %54 = vector.multi_reduction <maximumf>, %53, %cst_19 [2] : vector<8x16x16xf32> to vector<8x16xf32>
    %55 = vector.shape_cast %54 : vector<8x16xf32> to vector<8x16x1xf32>
    %56 = vector.broadcast %55 : vector<8x16x1xf32> to vector<8x16x16xf32>
    %57 = arith.subf %53, %56 : vector<8x16x16xf32>
    %58 = math.exp %57 : vector<8x16x16xf32>
    %cst_20 = arith.constant dense<0.000000e+00> : vector<8x16xf32>
    %59 = vector.multi_reduction <add>, %58, %cst_20 [2] : vector<8x16x16xf32> to vector<8x16xf32>
    %60 = vector.shape_cast %59 : vector<8x16xf32> to vector<8x16x1xf32>
    %61 = tpu.reciprocal %60 {approx = true} : vector<8x16x1xf32> -> vector<8x16x1xf32>
    %62 = vector.broadcast %61 : vector<8x16x1xf32> to vector<8x16x16xf32>
    %63 = arith.mulf %58, %62 : vector<8x16x16xf32>
    %64 = arith.truncf %63 : vector<8x16x16xf32> to vector<8x16x16xbf16>
    "tpu.trace_start"() <{level = 10 : i32, message = "bqk,bkd->bqd"}> : () -> ()
    %cst_21 = arith.constant dense<0.000000e+00> : vector<8x16x32xf32>
    %65 = tpu.matmul %64, %48, %cst_21 {dimension_numbers = #tpu.dot_dimension_numbers<[2], [1], [1], [2], [0, 0, 0, 1, 1, 2], [0], [0]>} : vector<8x16x16xbf16>, vector<8x16x32xbf16>, vector<8x16x32xf32> -> vector<8x16x32xf32>
    "tpu.trace_stop"() : () -> ()
    %66 = arith.truncf %65 : vector<8x16x32xf32> to vector<8x16x32xbf16>
    %c0_22 = arith.constant 0 : index
    %c0_23 = arith.constant 0 : index
    %c0_24 = arith.constant 0 : index
    %67 = vector.load %arg5[%c0_22, %c0_23, %c0_24] : memref<1x128x128xbf16, #tpu.memory_space<vmem>>, vector<1x128x128xbf16>
    %68 = vector.shape_cast %67 : vector<1x128x128xbf16> to vector<128x128xbf16>
    %69 = vector.extract_strided_slice %66 {offsets = [0, 0, 0], sizes = [2, 16, 32], strides = [1, 1, 1]} : vector<8x16x32xbf16> to vector<2x16x32xbf16>
    %70 = vector.shape_cast %69 : vector<2x16x32xbf16> to vector<32x32xbf16>
    %71 = vector.extract_strided_slice %68 {offsets = [0, 0], sizes = [32, 128], strides = [1, 1]} : vector<128x128xbf16> to vector<32x128xbf16>
    %cst_25 = arith.constant dense<0.000000e+00> : vector<32x128xf32>
    %72 = tpu.matmul %70, %71, %cst_25 {dimension_numbers = #tpu.dot_dimension_numbers<[1], [0], [0], [1], [0, 0, 1, 1], [], []>} : vector<32x32xbf16>, vector<32x128xbf16>, vector<32x128xf32> -> vector<32x128xf32>
    %73 = vector.extract_strided_slice %66 {offsets = [2, 0, 0], sizes = [2, 16, 32], strides = [1, 1, 1]} : vector<8x16x32xbf16> to vector<2x16x32xbf16>
    %74 = vector.shape_cast %73 : vector<2x16x32xbf16> to vector<32x32xbf16>
    %75 = vector.extract_strided_slice %68 {offsets = [32, 0], sizes = [32, 128], strides = [1, 1]} : vector<128x128xbf16> to vector<32x128xbf16>
    %cst_26 = arith.constant dense<0.000000e+00> : vector<32x128xf32>
    %76 = tpu.matmul %74, %75, %cst_26 {dimension_numbers = #tpu.dot_dimension_numbers<[1], [0], [0], [1], [0, 0, 1, 1], [], []>} : vector<32x32xbf16>, vector<32x128xbf16>, vector<32x128xf32> -> vector<32x128xf32>
    %77 = arith.addf %72, %76 : vector<32x128xf32>
    %78 = vector.extract_strided_slice %66 {offsets = [4, 0, 0], sizes = [2, 16, 32], strides = [1, 1, 1]} : vector<8x16x32xbf16> to vector<2x16x32xbf16>
    %79 = vector.shape_cast %78 : vector<2x16x32xbf16> to vector<32x32xbf16>
    %80 = vector.extract_strided_slice %68 {offsets = [64, 0], sizes = [32, 128], strides = [1, 1]} : vector<128x128xbf16> to vector<32x128xbf16>
    %cst_27 = arith.constant dense<0.000000e+00> : vector<32x128xf32>
    %81 = tpu.matmul %79, %80, %cst_27 {dimension_numbers = #tpu.dot_dimension_numbers<[1], [0], [0], [1], [0, 0, 1, 1], [], []>} : vector<32x32xbf16>, vector<32x128xbf16>, vector<32x128xf32> -> vector<32x128xf32>
    %82 = arith.addf %77, %81 : vector<32x128xf32>
    %83 = vector.extract_strided_slice %66 {offsets = [6, 0, 0], sizes = [2, 16, 32], strides = [1, 1, 1]} : vector<8x16x32xbf16> to vector<2x16x32xbf16>
    %84 = vector.shape_cast %83 : vector<2x16x32xbf16> to vector<32x32xbf16>
    %85 = vector.extract_strided_slice %68 {offsets = [96, 0], sizes = [32, 128], strides = [1, 1]} : vector<128x128xbf16> to vector<32x128xbf16>
    %cst_28 = arith.constant dense<0.000000e+00> : vector<32x128xf32>
    %86 = tpu.matmul %84, %85, %cst_28 {dimension_numbers = #tpu.dot_dimension_numbers<[1], [0], [0], [1], [0, 0, 1, 1], [], []>} : vector<32x32xbf16>, vector<32x128xbf16>, vector<32x128xf32> -> vector<32x128xf32>
    %87 = arith.addf %82, %86 : vector<32x128xf32>
    %c0_29 = arith.constant 0 : index
    %c0_30 = arith.constant 0 : index
    %c0_31 = arith.constant 0 : index
    %88 = vector.load %arg6[%c0_29, %c0_30, %c0_31] : memref<1x1x128xf32, #tpu.memory_space<vmem>>, vector<1x1x128xf32>
    %89 = vector.shape_cast %88 : vector<1x1x128xf32> to vector<1x128xf32>
    %90 = vector.broadcast %89 : vector<1x128xf32> to vector<32x128xf32>
    %91 = arith.addf %87, %90 : vector<32x128xf32>
    %92 = arith.addf %91, %3 : vector<32x128xf32>
    %c0_32 = arith.constant 0 : index
    %c0_33 = arith.constant 0 : index
    %c0_34 = arith.constant 0 : index
    %93 = vector.load %arg13[%c0_32, %c0_33, %c0_34] : memref<1x1x128xf32, #tpu.memory_space<vmem>>, vector<1x1x128xf32>
    %94 = vector.shape_cast %93 : vector<1x1x128xf32> to vector<1x128xf32>
    %c0_35 = arith.constant 0 : index
    %c0_36 = arith.constant 0 : index
    %c0_37 = arith.constant 0 : index
    %95 = vector.load %arg14[%c0_35, %c0_36, %c0_37] : memref<1x1x128xf32, #tpu.memory_space<vmem>>, vector<1x1x128xf32>
    %96 = vector.shape_cast %95 : vector<1x1x128xf32> to vector<1x128xf32>
    %cst_38 = arith.constant dense<0.000000e+00> : vector<32xf32>
    %97 = vector.multi_reduction <add>, %92, %cst_38 [1] : vector<32x128xf32> to vector<32xf32>
    %98 = vector.shape_cast %97 : vector<32xf32> to vector<32x1xf32>
    %cst_39 = arith.constant 1.280000e+02 : f32
    %99 = vector.broadcast %cst_39 : f32 to vector<32x1xf32>
    %100 = arith.divf %98, %99 : vector<32x1xf32>
    %101 = vector.broadcast %100 : vector<32x1xf32> to vector<32x128xf32>
    %102 = arith.subf %92, %101 : vector<32x128xf32>
    %103 = arith.mulf %102, %102 : vector<32x128xf32>
    %cst_40 = arith.constant dense<0.000000e+00> : vector<32xf32>
    %104 = vector.multi_reduction <add>, %103, %cst_40 [1] : vector<32x128xf32> to vector<32xf32>
    %105 = vector.shape_cast %104 : vector<32xf32> to vector<32x1xf32>
    %cst_41 = arith.constant 1.280000e+02 : f32
    %106 = vector.broadcast %cst_41 : f32 to vector<32x1xf32>
    %107 = arith.divf %105, %106 : vector<32x1xf32>
    %108 = vector.broadcast %100 : vector<32x1xf32> to vector<32x128xf32>
    %109 = arith.subf %92, %108 : vector<32x128xf32>
    %cst_42 = arith.constant 9.99999974E-6 : f32
    %110 = vector.broadcast %cst_42 : f32 to vector<32x1xf32>
    %111 = arith.addf %107, %110 : vector<32x1xf32>
    %112 = math.rsqrt %111 : vector<32x1xf32>
    %113 = vector.broadcast %112 : vector<32x1xf32> to vector<32x128xf32>
    %114 = arith.mulf %109, %113 : vector<32x128xf32>
    %115 = vector.broadcast %94 : vector<1x128xf32> to vector<32x128xf32>
    %116 = arith.mulf %115, %114 : vector<32x128xf32>
    %117 = vector.broadcast %96 : vector<1x128xf32> to vector<32x128xf32>
    %118 = arith.addf %116, %117 : vector<32x128xf32>
    %119 = arith.truncf %118 : vector<32x128xf32> to vector<32x128xbf16>
    %c0_43 = arith.constant 0 : index
    %c0_44 = arith.constant 0 : index
    %c0_45 = arith.constant 0 : index
    %120 = vector.load %arg7[%c0_43, %c0_44, %c0_45] : memref<1x128x512xbf16, #tpu.memory_space<vmem>>, vector<1x128x512xbf16>
    %121 = vector.shape_cast %120 : vector<1x128x512xbf16> to vector<128x512xbf16>
    %cst_46 = arith.constant dense<0.000000e+00> : vector<32x512xf32>
    %122 = tpu.matmul %119, %121, %cst_46 {dimension_numbers = #tpu.dot_dimension_numbers<[1], [0], [0], [1], [0, 0, 1, 1], [], []>} : vector<32x128xbf16>, vector<128x512xbf16>, vector<32x512xf32> -> vector<32x512xf32>
    %c0_47 = arith.constant 0 : index
    %c0_48 = arith.constant 0 : index
    %c0_49 = arith.constant 0 : index
    %123 = vector.load %arg8[%c0_47, %c0_48, %c0_49] : memref<1x1x512xf32, #tpu.memory_space<vmem>>, vector<1x1x512xf32>
    %124 = vector.shape_cast %123 : vector<1x1x512xf32> to vector<1x512xf32>
    %125 = vector.broadcast %124 : vector<1x512xf32> to vector<32x512xf32>
    %126 = arith.addf %122, %125 : vector<32x512xf32>
    %cst_50 = arith.constant 5.000000e-01 : f32
    %127 = vector.broadcast %cst_50 : f32 to vector<32x512xf32>
    %128 = arith.mulf %127, %126 : vector<32x512xf32>
    %129 = arith.mulf %126, %126 : vector<32x512xf32>
    %130 = arith.mulf %129, %126 : vector<32x512xf32>
    %cst_51 = arith.constant 4.471500e-02 : f32
    %131 = vector.broadcast %cst_51 : f32 to vector<32x512xf32>
    %132 = arith.mulf %131, %130 : vector<32x512xf32>
    %133 = arith.addf %126, %132 : vector<32x512xf32>
    %cst_52 = arith.constant 0.797884583 : f32
    %134 = vector.broadcast %cst_52 : f32 to vector<32x512xf32>
    %135 = arith.mulf %134, %133 : vector<32x512xf32>
    %136 = math.tanh %135 : vector<32x512xf32>
    %cst_53 = arith.constant 1.000000e+00 : f32
    %137 = vector.broadcast %cst_53 : f32 to vector<32x512xf32>
    %138 = arith.addf %137, %136 : vector<32x512xf32>
    %139 = arith.mulf %128, %138 : vector<32x512xf32>
    %140 = arith.truncf %139 : vector<32x512xf32> to vector<32x512xbf16>
    %c0_54 = arith.constant 0 : index
    %c0_55 = arith.constant 0 : index
    %c0_56 = arith.constant 0 : index
    %141 = vector.load %arg9[%c0_54, %c0_55, %c0_56] : memref<1x512x128xbf16, #tpu.memory_space<vmem>>, vector<1x512x128xbf16>
    %142 = vector.shape_cast %141 : vector<1x512x128xbf16> to vector<512x128xbf16>
    %cst_57 = arith.constant dense<0.000000e+00> : vector<32x128xf32>
    %143 = tpu.matmul %140, %142, %cst_57 {dimension_numbers = #tpu.dot_dimension_numbers<[1], [0], [0], [1], [0, 0, 1, 1], [], []>} : vector<32x512xbf16>, vector<512x128xbf16>, vector<32x128xf32> -> vector<32x128xf32>
    %c0_58 = arith.constant 0 : index
    %c0_59 = arith.constant 0 : index
    %c0_60 = arith.constant 0 : index
    %144 = vector.load %arg10[%c0_58, %c0_59, %c0_60] : memref<1x1x128xf32, #tpu.memory_space<vmem>>, vector<1x1x128xf32>
    %145 = vector.shape_cast %144 : vector<1x1x128xf32> to vector<1x128xf32>
    %146 = vector.broadcast %145 : vector<1x128xf32> to vector<32x128xf32>
    %147 = arith.addf %143, %146 : vector<32x128xf32>
    %148 = arith.addf %147, %92 : vector<32x128xf32>
    %c0_61 = arith.constant 0 : index
    %c0_62 = arith.constant 0 : index
    %149 = vector.load %arg19[%c0_61, %c0_62] : memref<32x128xf32, #tpu.memory_space<vmem>>, vector<32x128xf32>
    tpu.vector_store %arg19[%c0_61, %c0_62], %148 {strides = array<i32>} : memref<32x128xf32, #tpu.memory_space<vmem>>, vector<32x128xf32>,
    %c1_i32 = arith.constant 1 : i32
    %150 = arith.cmpi eq, %arg1, %c1_i32 : i32
    %151 = arith.extui %150 : i1 to i32
    %c0_i32_63 = arith.constant 0 : i32
    %152 = arith.cmpi ne, %151, %c0_i32_63 : i32
    scf.if %152 {
      %c0_64 = arith.constant 0 : index
      %c0_65 = arith.constant 0 : index
      %153 = vector.load %arg15[%c0_64, %c0_65] : memref<1x128xf32, #tpu.memory_space<vmem>>, vector<1x128xf32>
      %c0_66 = arith.constant 0 : index
      %c0_67 = arith.constant 0 : index
      %154 = vector.load %arg16[%c0_66, %c0_67] : memref<1x128xf32, #tpu.memory_space<vmem>>, vector<1x128xf32>
      %cst_68 = arith.constant dense<0.000000e+00> : vector<32xf32>
      %155 = vector.multi_reduction <add>, %148, %cst_68 [1] : vector<32x128xf32> to vector<32xf32>
      %156 = vector.shape_cast %155 : vector<32xf32> to vector<32x1xf32>
      %cst_69 = arith.constant 1.280000e+02 : f32
      %157 = vector.broadcast %cst_69 : f32 to vector<32x1xf32>
      %158 = arith.divf %156, %157 : vector<32x1xf32>
      %159 = vector.broadcast %158 : vector<32x1xf32> to vector<32x128xf32>
      %160 = arith.subf %148, %159 : vector<32x128xf32>
      %161 = arith.mulf %160, %160 : vector<32x128xf32>
      %cst_70 = arith.constant dense<0.000000e+00> : vector<32xf32>
      %162 = vector.multi_reduction <add>, %161, %cst_70 [1] : vector<32x128xf32> to vector<32xf32>
      %163 = vector.shape_cast %162 : vector<32xf32> to vector<32x1xf32>
      %cst_71 = arith.constant 1.280000e+02 : f32
      %164 = vector.broadcast %cst_71 : f32 to vector<32x1xf32>
      %165 = arith.divf %163, %164 : vector<32x1xf32>
      %166 = vector.broadcast %158 : vector<32x1xf32> to vector<32x128xf32>
      %167 = arith.subf %148, %166 : vector<32x128xf32>
      %cst_72 = arith.constant 9.99999974E-6 : f32
      %168 = vector.broadcast %cst_72 : f32 to vector<32x1xf32>
      %169 = arith.addf %165, %168 : vector<32x1xf32>
      %170 = math.rsqrt %169 : vector<32x1xf32>
      %171 = vector.broadcast %170 : vector<32x1xf32> to vector<32x128xf32>
      %172 = arith.mulf %167, %171 : vector<32x128xf32>
      %173 = vector.broadcast %153 : vector<1x128xf32> to vector<32x128xf32>
      %174 = arith.mulf %173, %172 : vector<32x128xf32>
      %175 = vector.broadcast %154 : vector<1x128xf32> to vector<32x128xf32>
      %176 = arith.addf %174, %175 : vector<32x128xf32>
      %177 = arith.truncf %176 : vector<32x128xf32> to vector<32x128xbf16>
      %c0_73 = arith.constant 0 : index
      %c0_74 = arith.constant 0 : index
      %178 = vector.load %arg17[%c0_73, %c0_74] : memref<128x256xbf16, #tpu.memory_space<vmem>>, vector<128x256xbf16>
      %cst_75 = arith.constant dense<0.000000e+00> : vector<32x256xf32>
      %179 = tpu.matmul %177, %178, %cst_75 {dimension_numbers = #tpu.dot_dimension_numbers<[1], [0], [0], [1], [0, 0, 1, 1], [], []>} : vector<32x128xbf16>, vector<128x256xbf16>, vector<32x256xf32> -> vector<32x256xf32>
      %180 = vector.shape_cast %179 : vector<32x256xf32> to vector<2x16x256xf32>
      %c0_76 = arith.constant 0 : index
      %c0_77 = arith.constant 0 : index
      %c0_78 = arith.constant 0 : index
      %181 = vector.load %arg18[%c0_76, %c0_77, %c0_78] : memref<2x16x256xf32, #tpu.memory_space<vmem>>, vector<2x16x256xf32>
      tpu.vector_store %arg18[%c0_76, %c0_77, %c0_78], %180 {strides = array<i32>} : memref<2x16x256xf32, #tpu.memory_space<vmem>>, vector<2x16x256xf32>,
    } else {
    }
    return
  }
  func.func @transform_0(%arg0: i32, %arg1: i32) -> (i32, i32, i32) {
    %c0_i32 = arith.constant 0 : i32
    %c0_i32_0 = arith.constant 0 : i32
    %c0_i32_1 = arith.constant 0 : i32
    return %arg0, %c0_i32, %c0_i32_0 : i32, i32, i32
  }
  func.func @transform_1(%arg0: i32, %arg1: i32) -> (i32, i32) {
    %c0_i32 = arith.constant 0 : i32
    %c0_i32_0 = arith.constant 0 : i32
    %c0_i32_1 = arith.constant 0 : i32
    return %c0_i32, %c0_i32_0 : i32, i32
  }
  func.func @transform_2(%arg0: i32, %arg1: i32) -> (i32, i32, i32) {
    %c0_i32 = arith.constant 0 : i32
    %c0_i32_0 = arith.constant 0 : i32
    %c0_i32_1 = arith.constant 0 : i32
    return %arg1, %c0_i32, %c0_i32_0 : i32, i32, i32
  }
  func.func @transform_3(%arg0: i32, %arg1: i32) -> (i32, i32, i32) {
    %c0_i32 = arith.constant 0 : i32
    %c0_i32_0 = arith.constant 0 : i32
    %c0_i32_1 = arith.constant 0 : i32
    return %arg1, %c0_i32, %c0_i32_0 : i32, i32, i32
  }
  func.func @transform_4(%arg0: i32, %arg1: i32) -> (i32, i32, i32) {
    %c0_i32 = arith.constant 0 : i32
    %c0_i32_0 = arith.constant 0 : i32
    %c0_i32_1 = arith.constant 0 : i32
    return %arg1, %c0_i32, %c0_i32_0 : i32, i32, i32
  }
  func.func @transform_5(%arg0: i32, %arg1: i32) -> (i32, i32, i32) {
    %c0_i32 = arith.constant 0 : i32
    %c0_i32_0 = arith.constant 0 : i32
    %c0_i32_1 = arith.constant 0 : i32
    return %arg1, %c0_i32, %c0_i32_0 : i32, i32, i32
  }
  func.func @transform_6(%arg0: i32, %arg1: i32) -> (i32, i32, i32) {
    %c0_i32 = arith.constant 0 : i32
    %c0_i32_0 = arith.constant 0 : i32
    %c0_i32_1 = arith.constant 0 : i32
    return %arg1, %c0_i32, %c0_i32_0 : i32, i32, i32
  }
  func.func @transform_7(%arg0: i32, %arg1: i32) -> (i32, i32, i32) {
    %c0_i32 = arith.constant 0 : i32
    %c0_i32_0 = arith.constant 0 : i32
    %c0_i32_1 = arith.constant 0 : i32
    return %arg1, %c0_i32, %c0_i32_0 : i32, i32, i32
  }
  func.func @transform_8(%arg0: i32, %arg1: i32) -> (i32, i32, i32) {
    %c0_i32 = arith.constant 0 : i32
    %c0_i32_0 = arith.constant 0 : i32
    %c0_i32_1 = arith.constant 0 : i32
    return %arg1, %c0_i32, %c0_i32_0 : i32, i32, i32
  }
  func.func @transform_9(%arg0: i32, %arg1: i32) -> (i32, i32, i32) {
    %c0_i32 = arith.constant 0 : i32
    %c0_i32_0 = arith.constant 0 : i32
    %c0_i32_1 = arith.constant 0 : i32
    return %arg1, %c0_i32, %c0_i32_0 : i32, i32, i32
  }
  func.func @transform_10(%arg0: i32, %arg1: i32) -> (i32, i32, i32) {
    %c0_i32 = arith.constant 0 : i32
    %c0_i32_0 = arith.constant 0 : i32
    %c0_i32_1 = arith.constant 0 : i32
    return %arg1, %c0_i32, %c0_i32_0 : i32, i32, i32
  }
  func.func @transform_11(%arg0: i32, %arg1: i32) -> (i32, i32, i32) {
    %c0_i32 = arith.constant 0 : i32
    %c0_i32_0 = arith.constant 0 : i32
    %c0_i32_1 = arith.constant 0 : i32
    return %arg1, %c0_i32, %c0_i32_0 : i32, i32, i32
  }
  func.func @transform_12(%arg0: i32, %arg1: i32) -> (i32, i32, i32) {
    %c0_i32 = arith.constant 0 : i32
    %c0_i32_0 = arith.constant 0 : i32
    %c0_i32_1 = arith.constant 0 : i32
    return %arg1, %c0_i32, %c0_i32_0 : i32, i32, i32
  }
  func.func @transform_13(%arg0: i32, %arg1: i32) -> (i32, i32) {
    %c0_i32 = arith.constant 0 : i32
    %c0_i32_0 = arith.constant 0 : i32
    %c0_i32_1 = arith.constant 0 : i32
    return %c0_i32, %c0_i32_0 : i32, i32
  }
  func.func @transform_14(%arg0: i32, %arg1: i32) -> (i32, i32) {
    %c0_i32 = arith.constant 0 : i32
    %c0_i32_0 = arith.constant 0 : i32
    %c0_i32_1 = arith.constant 0 : i32
    return %c0_i32, %c0_i32_0 : i32, i32
  }
  func.func @transform_15(%arg0: i32, %arg1: i32) -> (i32, i32) {
    %c0_i32 = arith.constant 0 : i32
    %c0_i32_0 = arith.constant 0 : i32
    %c0_i32_1 = arith.constant 0 : i32
    return %c0_i32, %c0_i32_0 : i32, i32
  }
  func.func @transform_16(%arg0: i32, %arg1: i32) -> (i32, i32, i32) {
    %c0_i32 = arith.constant 0 : i32
    %c0_i32_0 = arith.constant 0 : i32
    %c0_i32_1 = arith.constant 0 : i32
    return %arg0, %c0_i32, %c0_i32_0 : i32, i32, i32
  }
}

module attributes {stable_mosaic.version = 11 : i64} {
  func.func @_gpt_fused_kernel(%arg0: i32, %arg1: i32, %arg2: memref<2x16x128xf32, #tpu.memory_space<vmem>>, %arg3: memref<16x16xf32, #tpu.memory_space<vmem>>, %arg4: memref<1x128x384xbf16, #tpu.memory_space<vmem>>, %arg5: memref<1x128x128xbf16, #tpu.memory_space<vmem>>, %arg6: memref<1x1x128xf32, #tpu.memory_space<vmem>>, %arg7: memref<1x128x512xbf16, #tpu.memory_space<vmem>>, %arg8: memref<1x1x512xf32, #tpu.memory_space<vmem>>, %arg9: memref<1x512x128xbf16, #tpu.memory_space<vmem>>, %arg10: memref<1x1x128xf32, #tpu.memory_space<vmem>>, %arg11: memref<1x1x128xf32, #tpu.memory_space<vmem>>, %arg12: memref<1x1x128xf32, #tpu.memory_space<vmem>>, %arg13: memref<1x1x128xf32, #tpu.memory_space<vmem>>, %arg14: memref<1x1x128xf32, #tpu.memory_space<vmem>>, %arg15: memref<1x128xf32, #tpu.memory_space<vmem>>, %arg16: memref<1x128xf32, #tpu.memory_space<vmem>>, %arg17: memref<128x256xbf16, #tpu.memory_space<vmem>>, %arg18: memref<2x16x256xf32, #tpu.memory_space<vmem>>, %arg19: memref<32x128xf32, #tpu.memory_space<vmem>>) attributes {dimension_semantics = [#tpu.dimension_semantics<parallel>, #tpu.dimension_semantics<arbitrary>], iteration_bounds = array<i64: 1, 2>, scalar_prefetch = 0 : i64, scratch_operands = 1 : i64, tpu.core_type = #tpu.core_type<tc>, window_params = [{transform_indices = @transform_0, window_bounds = array<i64: 2, 16, 128>}, {pipeline_mode = #tpu.pipeline_mode<synchronous>, transform_indices = @transform_1, window_bounds = array<i64: 16, 16>}, {transform_indices = @transform_2, window_bounds = array<i64: 1, 128, 384>}, {transform_indices = @transform_3, window_bounds = array<i64: 1, 128, 128>}, {transform_indices = @transform_4, window_bounds = array<i64: 1, 1, 128>}, {transform_indices = @transform_5, window_bounds = array<i64: 1, 128, 512>}, {transform_indices = @transform_6, window_bounds = array<i64: 1, 1, 512>}, {transform_indices = @transform_7, window_bounds = array<i64: 1, 512, 128>}, {transform_indices = @transform_8, window_bounds = array<i64: 1, 1, 128>}, {transform_indices = @transform_9, window_bounds = array<i64: 1, 1, 128>}, {transform_indices = @transform_10, window_bounds = array<i64: 1, 1, 128>}, {transform_indices = @transform_11, window_bounds = array<i64: 1, 1, 128>}, {transform_indices = @transform_12, window_bounds = array<i64: 1, 1, 128>}, {pipeline_mode = #tpu.pipeline_mode<synchronous>, transform_indices = @transform_13, window_bounds = array<i64: 1, 128>}, {pipeline_mode = #tpu.pipeline_mode<synchronous>, transform_indices = @transform_14, window_bounds = array<i64: 1, 128>}, {pipeline_mode = #tpu.pipeline_mode<synchronous>, transform_indices = @transform_15, window_bounds = array<i64: 128, 256>}, {transform_indices = @transform_16, window_bounds = array<i64: 2, 16, 256>}]} {
    %c0_i32 = arith.constant 0 : i32
    %0 = arith.cmpi eq, %arg1, %c0_i32 : i32
    %1 = arith.extui %0 : i1 to i32
    %c0_i32_0 = arith.constant 0 : i32
    %2 = arith.cmpi ne, %1, %c0_i32_0 : i32
    scf.if %2 {
      %c0_64 = arith.constant 0 : index
      %c0_65 = arith.constant 0 : index
      %c0_66 = arith.constant 0 : index
      %153 = vector.load %arg2[%c0_64, %c0_65, %c0_66] : memref<2x16x128xf32, #tpu.memory_space<vmem>>, vector<2x16x128xf32>
      %154 = vector.shape_cast %153 : vector<2x16x128xf32> to vector<32x128xf32>
      %c0_67 = arith.constant 0 : index
      %c0_68 = arith.constant 0 : index
      %155 = vector.load %arg19[%c0_67, %c0_68] : memref<32x128xf32, #tpu.memory_space<vmem>>, vector<32x128xf32>
      tpu.vector_store %arg19[%c0_67, %c0_68], %154 {strides = array<i32>} : memref<32x128xf32, #tpu.memory_space<vmem>>, vector<32x128xf32>,
    } else {
    }
    %c0 = arith.constant 0 : index
    %c0_1 = arith.constant 0 : index
    %3 = vector.load %arg19[%c0, %c0_1] : memref<32x128xf32, #tpu.memory_space<vmem>>, vector<32x128xf32>
    %c0_2 = arith.constant 0 : index
    %c0_3 = arith.constant 0 : index
    %c0_4 = arith.constant 0 : index
    %4 = vector.load %arg11[%c0_2, %c0_3, %c0_4] : memref<1x1x128xf32, #tpu.memory_space<vmem>>, vector<1x1x128xf32>
    %5 = vector.shape_cast %4 : vector<1x1x128xf32> to vector<1x128xf32>
    %c0_5 = arith.constant 0 : index
    %c0_6 = arith.constant 0 : index
    %c0_7 = arith.constant 0 : index
    %6 = vector.load %arg12[%c0_5, %c0_6, %c0_7] : memref<1x1x128xf32, #tpu.memory_space<vmem>>, vector<1x1x128xf32>
    %7 = vector.shape_cast %6 : vector<1x1x128xf32> to vector<1x128xf32>
    %cst = arith.constant dense<0.000000e+00> : vector<32xf32>
    %8 = vector.multi_reduction <add>, %3, %cst [1] : vector<32x128xf32> to vector<32xf32>
    %9 = vector.shape_cast %8 : vector<32xf32> to vector<32x1xf32>
    %cst_8 = arith.constant 1.280000e+02 : f32
    %10 = vector.broadcast %cst_8 : f32 to vector<32x1xf32>
    %11 = arith.divf %9, %10 : vector<32x1xf32>
    %12 = vector.broadcast %11 : vector<32x1xf32> to vector<32x128xf32>
    %13 = arith.subf %3, %12 : vector<32x128xf32>
    %14 = arith.mulf %13, %13 : vector<32x128xf32>
    %cst_9 = arith.constant dense<0.000000e+00> : vector<32xf32>
    %15 = vector.multi_reduction <add>, %14, %cst_9 [1] : vector<32x128xf32> to vector<32xf32>
    %16 = vector.shape_cast %15 : vector<32xf32> to vector<32x1xf32>
    %cst_10 = arith.constant 1.280000e+02 : f32
    %17 = vector.broadcast %cst_10 : f32 to vector<32x1xf32>
    %18 = arith.divf %16, %17 : vector<32x1xf32>
    %19 = vector.broadcast %11 : vector<32x1xf32> to vector<32x128xf32>
    %20 = arith.subf %3, %19 : vector<32x128xf32>
    %cst_11 = arith.constant 9.99999974E-6 : f32
    %21 = vector.broadcast %cst_11 : f32 to vector<32x1xf32>
    %22 = arith.addf %18, %21 : vector<32x1xf32>
    %23 = math.rsqrt %22 : vector<32x1xf32>
    %24 = vector.broadcast %23 : vector<32x1xf32> to vector<32x128xf32>
    %25 = arith.mulf %20, %24 : vector<32x128xf32>
    %26 = vector.broadcast %5 : vector<1x128xf32> to vector<32x128xf32>
    %27 = arith.mulf %26, %25 : vector<32x128xf32>
    %28 = vector.broadcast %7 : vector<1x128xf32> to vector<32x128xf32>
    %29 = arith.addf %27, %28 : vector<32x128xf32>
    %30 = arith.truncf %29 : vector<32x128xf32> to vector<32x128xbf16>
    %c0_12 = arith.constant 0 : index
    %c0_13 = arith.constant 0 : index
    %c0_14 = arith.constant 0 : index
    %31 = vector.load %arg4[%c0_12, %c0_13, %c0_14] : memref<1x128x384xbf16, #tpu.memory_space<vmem>>, vector<1x128x384xbf16>
    %32 = vector.shape_cast %31 : vector<1x128x384xbf16> to vector<128x384xbf16>
    %cst_15 = arith.constant dense<0.000000e+00> : vector<32x384xf32>
    %33 = tpu.matmul %30, %32, %cst_15 {dimension_numbers = #tpu.dot_dimension_numbers<[1], [0], [0], [1], [0, 0, 1, 1], [], []>} : vector<32x128xbf16>, vector<128x384xbf16>, vector<32x384xf32> -> vector<32x384xf32>
    %34 = vector.extract_strided_slice %33 {offsets = [0, 0], sizes = [32, 128], strides = [1, 1]} : vector<32x384xf32> to vector<32x128xf32>
    %35 = vector.shape_cast %34 : vector<32x128xf32> to vector<32x4x32xf32>
    %36 = tpu.transpose %35, [1, 0, 2] : vector<32x4x32xf32> -> vector<4x32x32xf32>
    %37 = vector.shape_cast %36 : vector<4x32x32xf32> to vector<8x16x32xf32>
    %38 = arith.truncf %37 : vector<8x16x32xf32> to vector<8x16x32xbf16>
    %39 = vector.extract_strided_slice %33 {offsets = [0, 128], sizes = [32, 128], strides = [1, 1]} : vector<32x384xf32> to vector<32x128xf32>
    %40 = vector.shape_cast %39 : vector<32x128xf32> to vector<32x4x32xf32>
    %41 = tpu.transpose %40, [1, 0, 2] : vector<32x4x32xf32> -> vector<4x32x32xf32>
    %42 = vector.shape_cast %41 : vector<4x32x32xf32> to vector<8x16x32xf32>
    %43 = arith.truncf %42 : vector<8x16x32xf32> to vector<8x16x32xbf16>
    %44 = vector.extract_strided_slice %33 {offsets = [0, 256], sizes = [32, 128], strides = [1, 1]} : vector<32x384xf32> to vector<32x128xf32>
    %45 = vector.shape_cast %44 : vector<32x128xf32> to vector<32x4x32xf32>
    %46 = tpu.transpose %45, [1, 0, 2] : vector<32x4x32xf32> -> vector<4x32x32xf32>
    %47 = vector.shape_cast %46 : vector<4x32x32xf32> to vector<8x16x32xf32>
    %48 = arith.truncf %47 : vector<8x16x32xf32> to vector<8x16x32xbf16>
    "tpu.trace_start"() <{level = 10 : i32, message = "bqd,bkd->bqk"}> : () -> ()
    %cst_16 = arith.constant dense<0.000000e+00> : vector<8x16x16xf32>
    %49 = tpu.matmul %38, %43, %cst_16 {dimension_numbers = #tpu.dot_dimension_numbers<[2], [2], [1], [1], [0, 0, 0, 1, 1, 1], [0], [0]>} : vector<8x16x32xbf16>, vector<8x16x32xbf16>, vector<8x16x16xf32> -> vector<8x16x16xf32>
    "tpu.trace_stop"() : () -> ()
    %c0_17 = arith.constant 0 : index
    %c0_18 = arith.constant 0 : index
    %50 = vector.load %arg3[%c0_17, %c0_18] : memref<16x16xf32, #tpu.memory_space<vmem>>, vector<16x16xf32>
    %51 = vector.shape_cast %50 : vector<16x16xf32> to vector<1x16x16xf32>
    %52 = vector.broadcast %51 : vector<1x16x16xf32> to vector<8x16x16xf32>
    %53 = arith.addf %49, %52 : vector<8x16x16xf32>
    %cst_19 = arith.constant dense<0xFF800000> : vector<8x16xf32>
    %54 = vector.multi_reduction <maximumf>, %53, %cst_19 [2] : vector<8x16x16xf32> to vector<8x16xf32>
    %55 = vector.shape_cast %54 : vector<8x16xf32> to vector<8x16x1xf32>
    %56 = vector.broadcast %55 : vector<8x16x1xf32> to vector<8x16x16xf32>
    %57 = arith.subf %53, %56 : vector<8x16x16xf32>
    %58 = math.exp %57 : vector<8x16x16xf32>
    %cst_20 = arith.constant dense<0.000000e+00> : vector<8x16xf32>
    %59 = vector.multi_reduction <add>, %58, %cst_20 [2] : vector<8x16x16xf32> to vector<8x16xf32>
    %60 = vector.shape_cast %59 : vector<8x16xf32> to vector<8x16x1xf32>
    %61 = tpu.reciprocal %60 {approx = true} : vector<8x16x1xf32> -> vector<8x16x1xf32>
    %62 = vector.broadcast %61 : vector<8x16x1xf32> to vector<8x16x16xf32>
    %63 = arith.mulf %58, %62 : vector<8x16x16xf32>
    %64 = arith.truncf %63 : vector<8x16x16xf32> to vector<8x16x16xbf16>
    "tpu.trace_start"() <{level = 10 : i32, message = "bqk,bkd->bqd"}> : () -> ()
    %cst_21 = arith.constant dense<0.000000e+00> : vector<8x16x32xf32>
    %65 = tpu.matmul %64, %48, %cst_21 {dimension_numbers = #tpu.dot_dimension_numbers<[2], [1], [1], [2], [0, 0, 0, 1, 1, 2], [0], [0]>} : vector<8x16x16xbf16>, vector<8x16x32xbf16>, vector<8x16x32xf32> -> vector<8x16x32xf32>
    "tpu.trace_stop"() : () -> ()
    %66 = arith.truncf %65 : vector<8x16x32xf32> to vector<8x16x32xbf16>
    %c0_22 = arith.constant 0 : index
    %c0_23 = arith.constant 0 : index
    %c0_24 = arith.constant 0 : index
    %67 = vector.load %arg5[%c0_22, %c0_23, %c0_24] : memref<1x128x128xbf16, #tpu.memory_space<vmem>>, vector<1x128x128xbf16>
    %68 = vector.shape_cast %67 : vector<1x128x128xbf16> to vector<128x128xbf16>
    %69 = vector.extract_strided_slice %66 {offsets = [0, 0, 0], sizes = [2, 16, 32], strides = [1, 1, 1]} : vector<8x16x32xbf16> to vector<2x16x32xbf16>
    %70 = vector.shape_cast %69 : vector<2x16x32xbf16> to vector<32x32xbf16>
    %71 = vector.extract_strided_slice %68 {offsets = [0, 0], sizes = [32, 128], strides = [1, 1]} : vector<128x128xbf16> to vector<32x128xbf16>
    %cst_25 = arith.constant dense<0.000000e+00> : vector<32x128xf32>
    %72 = tpu.matmul %70, %71, %cst_25 {dimension_numbers = #tpu.dot_dimension_numbers<[1], [0], [0], [1], [0, 0, 1, 1], [], []>} : vector<32x32xbf16>, vector<32x128xbf16>, vector<32x128xf32> -> vector<32x128xf32>
    %73 = vector.extract_strided_slice %66 {offsets = [2, 0, 0], sizes = [2, 16, 32], strides = [1, 1, 1]} : vector<8x16x32xbf16> to vector<2x16x32xbf16>
    %74 = vector.shape_cast %73 : vector<2x16x32xbf16> to vector<32x32xbf16>
    %75 = vector.extract_strided_slice %68 {offsets = [32, 0], sizes = [32, 128], strides = [1, 1]} : vector<128x128xbf16> to vector<32x128xbf16>
    %cst_26 = arith.constant dense<0.000000e+00> : vector<32x128xf32>
    %76 = tpu.matmul %74, %75, %cst_26 {dimension_numbers = #tpu.dot_dimension_numbers<[1], [0], [0], [1], [0, 0, 1, 1], [], []>} : vector<32x32xbf16>, vector<32x128xbf16>, vector<32x128xf32> -> vector<32x128xf32>
    %77 = arith.addf %72, %76 : vector<32x128xf32>
    %78 = vector.extract_strided_slice %66 {offsets = [4, 0, 0], sizes = [2, 16, 32], strides = [1, 1, 1]} : vector<8x16x32xbf16> to vector<2x16x32xbf16>
    %79 = vector.shape_cast %78 : vector<2x16x32xbf16> to vector<32x32xbf16>
    %80 = vector.extract_strided_slice %68 {offsets = [64, 0], sizes = [32, 128], strides = [1, 1]} : vector<128x128xbf16> to vector<32x128xbf16>
    %cst_27 = arith.constant dense<0.000000e+00> : vector<32x128xf32>
    %81 = tpu.matmul %79, %80, %cst_27 {dimension_numbers = #tpu.dot_dimension_numbers<[1], [0], [0], [1], [0, 0, 1, 1], [], []>} : vector<32x32xbf16>, vector<32x128xbf16>, vector<32x128xf32> -> vector<32x128xf32>
    %82 = arith.addf %77, %81 : vector<32x128xf32>
    %83 = vector.extract_strided_slice %66 {offsets = [6, 0, 0], sizes = [2, 16, 32], strides = [1, 1, 1]} : vector<8x16x32xbf16> to vector<2x16x32xbf16>
    %84 = vector.shape_cast %83 : vector<2x16x32xbf16> to vector<32x32xbf16>
    %85 = vector.extract_strided_slice %68 {offsets = [96, 0], sizes = [32, 128], strides = [1, 1]} : vector<128x128xbf16> to vector<32x128xbf16>
    %cst_28 = arith.constant dense<0.000000e+00> : vector<32x128xf32>
    %86 = tpu.matmul %84, %85, %cst_28 {dimension_numbers = #tpu.dot_dimension_numbers<[1], [0], [0], [1], [0, 0, 1, 1], [], []>} : vector<32x32xbf16>, vector<32x128xbf16>, vector<32x128xf32> -> vector<32x128xf32>
    %87 = arith.addf %82, %86 : vector<32x128xf32>
    %c0_29 = arith.constant 0 : index
    %c0_30 = arith.constant 0 : index
    %c0_31 = arith.constant 0 : index
    %88 = vector.load %arg6[%c0_29, %c0_30, %c0_31] : memref<1x1x128xf32, #tpu.memory_space<vmem>>, vector<1x1x128xf32>
    %89 = vector.shape_cast %88 : vector<1x1x128xf32> to vector<1x128xf32>
    %90 = vector.broadcast %89 : vector<1x128xf32> to vector<32x128xf32>
    %91 = arith.addf %87, %90 : vector<32x128xf32>
    %92 = arith.addf %91, %3 : vector<32x128xf32>
    %c0_32 = arith.constant 0 : index
    %c0_33 = arith.constant 0 : index
    %c0_34 = arith.constant 0 : index
    %93 = vector.load %arg13[%c0_32, %c0_33, %c0_34] : memref<1x1x128xf32, #tpu.memory_space<vmem>>, vector<1x1x128xf32>
    %94 = vector.shape_cast %93 : vector<1x1x128xf32> to vector<1x128xf32>
    %c0_35 = arith.constant 0 : index
    %c0_36 = arith.constant 0 : index
    %c0_37 = arith.constant 0 : index
    %95 = vector.load %arg14[%c0_35, %c0_36, %c0_37] : memref<1x1x128xf32, #tpu.memory_space<vmem>>, vector<1x1x128xf32>
    %96 = vector.shape_cast %95 : vector<1x1x128xf32> to vector<1x128xf32>
    %cst_38 = arith.constant dense<0.000000e+00> : vector<32xf32>
    %97 = vector.multi_reduction <add>, %92, %cst_38 [1] : vector<32x128xf32> to vector<32xf32>
    %98 = vector.shape_cast %97 : vector<32xf32> to vector<32x1xf32>
    %cst_39 = arith.constant 1.280000e+02 : f32
    %99 = vector.broadcast %cst_39 : f32 to vector<32x1xf32>
    %100 = arith.divf %98, %99 : vector<32x1xf32>
    %101 = vector.broadcast %100 : vector<32x1xf32> to vector<32x128xf32>
    %102 = arith.subf %92, %101 : vector<32x128xf32>
    %103 = arith.mulf %102, %102 : vector<32x128xf32>
    %cst_40 = arith.constant dense<0.000000e+00> : vector<32xf32>
    %104 = vector.multi_reduction <add>, %103, %cst_40 [1] : vector<32x128xf32> to vector<32xf32>
    %105 = vector.shape_cast %104 : vector<32xf32> to vector<32x1xf32>
    %cst_41 = arith.constant 1.280000e+02 : f32
    %106 = vector.broadcast %cst_41 : f32 to vector<32x1xf32>
    %107 = arith.divf %105, %106 : vector<32x1xf32>
    %108 = vector.broadcast %100 : vector<32x1xf32> to vector<32x128xf32>
    %109 = arith.subf %92, %108 : vector<32x128xf32>
    %cst_42 = arith.constant 9.99999974E-6 : f32
    %110 = vector.broadcast %cst_42 : f32 to vector<32x1xf32>
    %111 = arith.addf %107, %110 : vector<32x1xf32>
    %112 = math.rsqrt %111 : vector<32x1xf32>
    %113 = vector.broadcast %112 : vector<32x1xf32> to vector<32x128xf32>
    %114 = arith.mulf %109, %113 : vector<32x128xf32>
    %115 = vector.broadcast %94 : vector<1x128xf32> to vector<32x128xf32>
    %116 = arith.mulf %115, %114 : vector<32x128xf32>
    %117 = vector.broadcast %96 : vector<1x128xf32> to vector<32x128xf32>
    %118 = arith.addf %116, %117 : vector<32x128xf32>
    %119 = arith.truncf %118 : vector<32x128xf32> to vector<32x128xbf16>
    %c0_43 = arith.constant 0 : index
    %c0_44 = arith.constant 0 : index
    %c0_45 = arith.constant 0 : index
    %120 = vector.load %arg7[%c0_43, %c0_44, %c0_45] : memref<1x128x512xbf16, #tpu.memory_space<vmem>>, vector<1x128x512xbf16>
    %121 = vector.shape_cast %120 : vector<1x128x512xbf16> to vector<128x512xbf16>
    %cst_46 = arith.constant dense<0.000000e+00> : vector<32x512xf32>
    %122 = tpu.matmul %119, %121, %cst_46 {dimension_numbers = #tpu.dot_dimension_numbers<[1], [0], [0], [1], [0, 0, 1, 1], [], []>} : vector<32x128xbf16>, vector<128x512xbf16>, vector<32x512xf32> -> vector<32x512xf32>
    %c0_47 = arith.constant 0 : index
    %c0_48 = arith.constant 0 : index
    %c0_49 = arith.constant 0 : index
    %123 = vector.load %arg8[%c0_47, %c0_48, %c0_49] : memref<1x1x512xf32, #tpu.memory_space<vmem>>, vector<1x1x512xf32>
    %124 = vector.shape_cast %123 : vector<1x1x512xf32> to vector<1x512xf32>
    %125 = vector.broadcast %124 : vector<1x512xf32> to vector<32x512xf32>
    %126 = arith.addf %122, %125 : vector<32x512xf32>
    %cst_50 = arith.constant 5.000000e-01 : f32
    %127 = vector.broadcast %cst_50 : f32 to vector<32x512xf32>
    %128 = arith.mulf %127, %126 : vector<32x512xf32>
    %129 = arith.mulf %126, %126 : vector<32x512xf32>
    %130 = arith.mulf %129, %126 : vector<32x512xf32>
    %cst_51 = arith.constant 4.471500e-02 : f32
    %131 = vector.broadcast %cst_51 : f32 to vector<32x512xf32>
    %132 = arith.mulf %131, %130 : vector<32x512xf32>
    %133 = arith.addf %126, %132 : vector<32x512xf32>
    %cst_52 = arith.constant 0.797884583 : f32
    %134 = vector.broadcast %cst_52 : f32 to vector<32x512xf32>
    %135 = arith.mulf %134, %133 : vector<32x512xf32>
    %136 = math.tanh %135 : vector<32x512xf32>
    %cst_53 = arith.constant 1.000000e+00 : f32
    %137 = vector.broadcast %cst_53 : f32 to vector<32x512xf32>
    %138 = arith.addf %137, %136 : vector<32x512xf32>
    %139 = arith.mulf %128, %138 : vector<32x512xf32>
    %140 = arith.truncf %139 : vector<32x512xf32> to vector<32x512xbf16>
    %c0_54 = arith.constant 0 : index
    %c0_55 = arith.constant 0 : index
    %c0_56 = arith.constant 0 : index
    %141 = vector.load %arg9[%c0_54, %c0_55, %c0_56] : memref<1x512x128xbf16, #tpu.memory_space<vmem>>, vector<1x512x128xbf16>
    %142 = vector.shape_cast %141 : vector<1x512x128xbf16> to vector<512x128xbf16>
    %cst_57 = arith.constant dense<0.000000e+00> : vector<32x128xf32>
    %143 = tpu.matmul %140, %142, %cst_57 {dimension_numbers = #tpu.dot_dimension_numbers<[1], [0], [0], [1], [0, 0, 1, 1], [], []>} : vector<32x512xbf16>, vector<512x128xbf16>, vector<32x128xf32> -> vector<32x128xf32>
    %c0_58 = arith.constant 0 : index
    %c0_59 = arith.constant 0 : index
    %c0_60 = arith.constant 0 : index
    %144 = vector.load %arg10[%c0_58, %c0_59, %c0_60] : memref<1x1x128xf32, #tpu.memory_space<vmem>>, vector<1x1x128xf32>
    %145 = vector.shape_cast %144 : vector<1x1x128xf32> to vector<1x128xf32>
    %146 = vector.broadcast %145 : vector<1x128xf32> to vector<32x128xf32>
    %147 = arith.addf %143, %146 : vector<32x128xf32>
    %148 = arith.addf %147, %92 : vector<32x128xf32>
    %c0_61 = arith.constant 0 : index
    %c0_62 = arith.constant 0 : index
    %149 = vector.load %arg19[%c0_61, %c0_62] : memref<32x128xf32, #tpu.memory_space<vmem>>, vector<32x128xf32>
    tpu.vector_store %arg19[%c0_61, %c0_62], %148 {strides = array<i32>} : memref<32x128xf32, #tpu.memory_space<vmem>>, vector<32x128xf32>,
    %c1_i32 = arith.constant 1 : i32
    %150 = arith.cmpi eq, %arg1, %c1_i32 : i32
    %151 = arith.extui %150 : i1 to i32
    %c0_i32_63 = arith.constant 0 : i32
    %152 = arith.cmpi ne, %151, %c0_i32_63 : i32
    scf.if %152 {
      %c0_64 = arith.constant 0 : index
      %c0_65 = arith.constant 0 : index
      %153 = vector.load %arg15[%c0_64, %c0_65] : memref<1x128xf32, #tpu.memory_space<vmem>>, vector<1x128xf32>
      %c0_66 = arith.constant 0 : index
      %c0_67 = arith.constant 0 : index
      %154 = vector.load %arg16[%c0_66, %c0_67] : memref<1x128xf32, #tpu.memory_space<vmem>>, vector<1x128xf32>
      %cst_68 = arith.constant dense<0.000000e+00> : vector<32xf32>
      %155 = vector.multi_reduction <add>, %148, %cst_68 [1] : vector<32x128xf32> to vector<32xf32>
      %156 = vector.shape_cast %155 : vector<32xf32> to vector<32x1xf32>
      %cst_69 = arith.constant 1.280000e+02 : f32
      %157 = vector.broadcast %cst_69 : f32 to vector<32x1xf32>
      %158 = arith.divf %156, %157 : vector<32x1xf32>
      %159 = vector.broadcast %158 : vector<32x1xf32> to vector<32x128xf32>
      %160 = arith.subf %148, %159 : vector<32x128xf32>
      %161 = arith.mulf %160, %160 : vector<32x128xf32>
      %cst_70 = arith.constant dense<0.000000e+00> : vector<32xf32>
      %162 = vector.multi_reduction <add>, %161, %cst_70 [1] : vector<32x128xf32> to vector<32xf32>
      %163 = vector.shape_cast %162 : vector<32xf32> to vector<32x1xf32>
      %cst_71 = arith.constant 1.280000e+02 : f32
      %164 = vector.broadcast %cst_71 : f32 to vector<32x1xf32>
      %165 = arith.divf %163, %164 : vector<32x1xf32>
      %166 = vector.broadcast %158 : vector<32x1xf32> to vector<32x128xf32>
      %167 = arith.subf %148, %166 : vector<32x128xf32>
      %cst_72 = arith.constant 9.99999974E-6 : f32
      %168 = vector.broadcast %cst_72 : f32 to vector<32x1xf32>
      %169 = arith.addf %165, %168 : vector<32x1xf32>
      %170 = math.rsqrt %169 : vector<32x1xf32>
      %171 = vector.broadcast %170 : vector<32x1xf32> to vector<32x128xf32>
      %172 = arith.mulf %167, %171 : vector<32x128xf32>
      %173 = vector.broadcast %153 : vector<1x128xf32> to vector<32x128xf32>
      %174 = arith.mulf %173, %172 : vector<32x128xf32>
      %175 = vector.broadcast %154 : vector<1x128xf32> to vector<32x128xf32>
      %176 = arith.addf %174, %175 : vector<32x128xf32>
      %177 = arith.truncf %176 : vector<32x128xf32> to vector<32x128xbf16>
      %c0_73 = arith.constant 0 : index
      %c0_74 = arith.constant 0 : index
      %178 = vector.load %arg17[%c0_73, %c0_74] : memref<128x256xbf16, #tpu.memory_space<vmem>>, vector<128x256xbf16>
      %cst_75 = arith.constant dense<0.000000e+00> : vector<32x256xf32>
      %179 = tpu.matmul %177, %178, %cst_75 {dimension_numbers = #tpu.dot_dimension_numbers<[1], [0], [0], [1], [0, 0, 1, 1], [], []>} : vector<32x128xbf16>, vector<128x256xbf16>, vector<32x256xf32> -> vector<32x256xf32>
      %180 = vector.shape_cast %179 : vector<32x256xf32> to vector<2x16x256xf32>
      %c0_76 = arith.constant 0 : index
      %c0_77 = arith.constant 0 : index
      %c0_78 = arith.constant 0 : index
      %181 = vector.load %arg18[%c0_76, %c0_77, %c0_78] : memref<2x16x256xf32, #tpu.memory_space<vmem>>, vector<2x16x256xf32>
      tpu.vector_store %arg18[%c0_76, %c0_77, %c0_78], %180 {strides = array<i32>} : memref<2x16x256xf32, #tpu.memory_space<vmem>>, vector<2x16x256xf32>,
    } else {
    }
    return
  }
  func.func @transform_0(%arg0: i32, %arg1: i32) -> (i32, i32, i32) {
    %c0_i32 = arith.constant 0 : i32
    %c0_i32_0 = arith.constant 0 : i32
    %c0_i32_1 = arith.constant 0 : i32
    return %arg0, %c0_i32, %c0_i32_0 : i32, i32, i32
  }
  func.func @transform_1(%arg0: i32, %arg1: i32) -> (i32, i32) {
    %c0_i32 = arith.constant 0 : i32
    %c0_i32_0 = arith.constant 0 : i32
    %c0_i32_1 = arith.constant 0 : i32
    return %c0_i32, %c0_i32_0 : i32, i32
  }
  func.func @transform_2(%arg0: i32, %arg1: i32) -> (i32, i32, i32) {
    %c0_i32 = arith.constant 0 : i32
    %c0_i32_0 = arith.constant 0 : i32
    %c0_i32_1 = arith.constant 0 : i32
    return %arg1, %c0_i32, %c0_i32_0 : i32, i32, i32
  }
  func.func @transform_3(%arg0: i32, %arg1: i32) -> (i32, i32, i32) {
    %c0_i32 = arith.constant 0 : i32
    %c0_i32_0 = arith.constant 0 : i32
    %c0_i32_1 = arith.constant 0 : i32
    return %arg1, %c0_i32, %c0_i32_0 : i32, i32, i32
  }
  func.func @transform_4(%arg0: i32, %arg1: i32) -> (i32, i32, i32) {
    %c0_i32 = arith.constant 0 : i32
    %c0_i32_0 = arith.constant 0 : i32
    %c0_i32_1 = arith.constant 0 : i32
    return %arg1, %c0_i32, %c0_i32_0 : i32, i32, i32
  }
  func.func @transform_5(%arg0: i32, %arg1: i32) -> (i32, i32, i32) {
    %c0_i32 = arith.constant 0 : i32
    %c0_i32_0 = arith.constant 0 : i32
    %c0_i32_1 = arith.constant 0 : i32
    return %arg1, %c0_i32, %c0_i32_0 : i32, i32, i32
  }
  func.func @transform_6(%arg0: i32, %arg1: i32) -> (i32, i32, i32) {
    %c0_i32 = arith.constant 0 : i32
    %c0_i32_0 = arith.constant 0 : i32
    %c0_i32_1 = arith.constant 0 : i32
    return %arg1, %c0_i32, %c0_i32_0 : i32, i32, i32
  }
  func.func @transform_7(%arg0: i32, %arg1: i32) -> (i32, i32, i32) {
    %c0_i32 = arith.constant 0 : i32
    %c0_i32_0 = arith.constant 0 : i32
    %c0_i32_1 = arith.constant 0 : i32
    return %arg1, %c0_i32, %c0_i32_0 : i32, i32, i32
  }
  func.func @transform_8(%arg0: i32, %arg1: i32) -> (i32, i32, i32) {
    %c0_i32 = arith.constant 0 : i32
    %c0_i32_0 = arith.constant 0 : i32
    %c0_i32_1 = arith.constant 0 : i32
    return %arg1, %c0_i32, %c0_i32_0 : i32, i32, i32
  }
  func.func @transform_9(%arg0: i32, %arg1: i32) -> (i32, i32, i32) {
    %c0_i32 = arith.constant 0 : i32
    %c0_i32_0 = arith.constant 0 : i32
    %c0_i32_1 = arith.constant 0 : i32
    return %arg1, %c0_i32, %c0_i32_0 : i32, i32, i32
  }
  func.func @transform_10(%arg0: i32, %arg1: i32) -> (i32, i32, i32) {
    %c0_i32 = arith.constant 0 : i32
    %c0_i32_0 = arith.constant 0 : i32
    %c0_i32_1 = arith.constant 0 : i32
    return %arg1, %c0_i32, %c0_i32_0 : i32, i32, i32
  }
  func.func @transform_11(%arg0: i32, %arg1: i32) -> (i32, i32, i32) {
    %c0_i32 = arith.constant 0 : i32
    %c0_i32_0 = arith.constant 0 : i32
    %c0_i32_1 = arith.constant 0 : i32
    return %arg1, %c0_i32, %c0_i32_0 : i32, i32, i32
  }
  func.func @transform_12(%arg0: i32, %arg1: i32) -> (i32, i32, i32) {
    %c0_i32 = arith.constant 0 : i32
    %c0_i32_0 = arith.constant 0 : i32
    %c0_i32_1 = arith.constant 0 : i32
    return %arg1, %c0_i32, %c0_i32_0 : i32, i32, i32
  }
  func.func @transform_13(%arg0: i32, %arg1: i32) -> (i32, i32) {
    %c0_i32 = arith.constant 0 : i32
    %c0_i32_0 = arith.constant 0 : i32
    %c0_i32_1 = arith.constant 0 : i32
    return %c0_i32, %c0_i32_0 : i32, i32
  }
  func.func @transform_14(%arg0: i32, %arg1: i32) -> (i32, i32) {
    %c0_i32 = arith.constant 0 : i32
    %c0_i32_0 = arith.constant 0 : i32
    %c0_i32_1 = arith.constant 0 : i32
    return %c0_i32, %c0_i32_0 : i32, i32
  }
  func.func @transform_15(%arg0: i32, %arg1: i32) -> (i32, i32) {
    %c0_i32 = arith.constant 0 : i32
    %c0_i32_0 = arith.constant 0 : i32
    %c0_i32_1 = arith.constant 0 : i32
    return %c0_i32, %c0_i32_0 : i32, i32
  }
  func.func @transform_16(%arg0: i32, %arg1: i32) -> (i32, i32, i32) {
    %c0_i32 = arith.constant 0 : i32
    %c0_i32_0 = arith.constant 0 : i32
    %c0_i32_1 = arith.constant 0 : i32
    return %arg0, %c0_i32, %c0_i32_0 : i32, i32, i32
  }
}

</mosaic_0001>

<bundles_post_ra>
// kernel: gpt_forward.1
= control target key start
LH: loop header
LB: loop body
LE: loop exit
PB: predicated region body
PF: predicated region fallthrough
CT: control target
= control target key end

     0   :  { %s8195_s0 = inlined_call_operand.vmem [shape: f32[2,16,128], index: 0, kind: input, shape index: {}]   ;;  %s8196_s1 = inlined_call_operand.vmem [shape: f32[16,16], index: 1, kind: input, shape index: {}]   ;;  %s8197_s2 = inlined_call_operand.vmem [shape: bf16[2,128,384], index: 2, kind: input, shape index: {}]   ;;  %s8198_s3 = inlined_call_operand.hbm [shape: bf16[2,128,128], index: 3, kind: input, shape index: {}]   ;;  %s8199_s4 = inlined_call_operand.vmem [shape: f32[2,1,128], index: 4, kind: input, shape index: {}]   ;;  %s8200_s5 = inlined_call_operand.hbm [shape: bf16[2,128,512], index: 5, kind: input, shape index: {}]   ;;  %s8201_s6 = inlined_call_operand.vmem [shape: f32[2,1,512], index: 6, kind: input, shape index: {}]   ;;  %s8202_s7 = inlined_call_operand.hbm [shape: bf16[2,512,128], index: 7, kind: input, shape index: {}]   ;;  %s8203_s8 = inlined_call_operand.vmem [shape: f32[2,1,128], index: 8, kind: input, shape index: {}]   ;;  %s8204_s9 = inlined_call_operand.vmem [shape: f32[2,1,128], index: 9, kind: input, shape index: {}]   ;;  %s8205_s10 = inlined_call_operand.vmem [shape: f32[2,1,128], index: 10, kind: input, shape index: {}]   ;;  %s8206_s11 = inlined_call_operand.vmem [shape: f32[2,1,128], index: 11, kind: input, shape index: {}]   ;;  %s8207_s12 = inlined_call_operand.vmem [shape: f32[2,1,128], index: 12, kind: input, shape index: {}]   ;;  %s8208_s13 = inlined_call_operand.vmem [shape: f32[1,128], index: 13, kind: input, shape index: {}]   ;;  %s8209_s14 = inlined_call_operand.vmem [shape: f32[1,128], index: 14, kind: input, shape index: {}]   ;;  %s8210_s15 = inlined_call_operand.hbm [shape: bf16[128,256], index: 15, kind: input, shape index: {}]   ;;  %s8211_s16 = inlined_call_operand.hbm [shape: f32[2,16,256], index: 16, kind: output, shape index: {}]  }
   0x1   :  { %8228 = sst [smem:[#allocation21_spill]] %s8195_s0 }
   0x2   :  { %8229 = sst [smem:[#allocation22_spill]] %s8196_s1 }
   0x3   :  { %8230 = sst [smem:[#allocation23_spill]] %s8197_s2 }
   0x4   :  { %8231 = sst [smem:[#allocation24_spill]] %s8198_s3 }
   0x5   :  { %8232 = sst [smem:[#allocation25_spill]] %s8200_s5 }
   0x6   :  { %8233 = sst [smem:[#allocation26_spill]] %s8201_s6 }
   0x7   :  { %8234 = sst [smem:[#allocation27_spill]] %s8202_s7 }
   0x8   :  { %8235 = sst [smem:[#allocation28_spill]] %s8203_s8 }
   0x9   :  { %8236 = sst [smem:[#allocation29_spill]] %s8204_s9 }
   0xa   :  { %8237 = sst [smem:[#allocation30_spill]] %s8205_s10 }
   0xb   :  { %8238 = sst [smem:[#allocation31_spill]] %s8206_s11 }
   0xc   :  { %8239 = sst [smem:[#allocation32_spill]] %s8207_s12 }
   0xd   :  { %8240 = sst [smem:[#allocation33_spill]] %s8208_s13 }
   0xe   :  { %8241 = sst [smem:[#allocation34_spill]] %s8209_s14 }
   0xf   :  { %8242 = sst [smem:[#allocation35_spill]] %s8211_s16 }
  0x10   :  { %21 = vsyncpa [#allocation4], 0 }
  0x11   :  { %23 = vsyncpa [#allocation4 + $0x1], 0 }
  0x12   :  { %24 = vsyncpa [#allocation7], 0 }
  0x13   :  { %26 = vsyncpa [#allocation7 + $0x1], 0 }
  0x14   :  { %27 = vsyncpa [#allocation10], 0 }
  0x15   :  { %28 = vsyncpa [#allocation5], 0  ;;  %s6669_s21 = smov 0   ;;  %s6671_s22 = smov 0  }
  0x16   :  { %s6673_s23 = smov 0   ;;  %s6675_s24 = smov 0  }
  0x17   :  { %s6677_s25 = smov 0   ;;  %s6679_s26 = smov 0  }
  0x18 LB: > { %8243 = sst [smem:[#allocation16_spill]] %s6548_s23  ;;  %s43_s27 = sadd.s32 1, %s6556_s25  ;;  %s6560_s26 = sphi %s6679_s26, %s34_s26   ;;  %s6556_s25 = sphi %s6677_s25, %s8287_s25   ;;  %s6552_s24 = sphi %s6675_s24, %s8286_s24   ;;  %s6548_s23 = sphi %s6673_s23, %s8285_s23   ;;  %s6544_s22 = sphi %s6671_s22, %s8289_s22   ;;  %s6540_s21 = sphi %s6669_s21, %s8288_s21  }
  0x19   : > { %8244 = sst [smem:[#allocation17_spill]] %s6556_s25  ;;  %s126_s28 = sadd.s32 1, %s6548_s23 }
  0x1a   : > { %8245 = sst [smem:[#allocation18_spill]] %s6560_s26  ;;  %p44_p0 = scmp.ge.s32.totalorder %s43_s27, 2 }
  0x1b   : > { %p133_p1 = scmp.ne.s32.totalorder %s6548_s23, %s6544_s22  ;;  %p134_p2 = scmp.eq.s32.totalorder %s6560_s26, 0 }
  0x1c   : > { %s8291_s27 = smov (%p44_p0, %s43_s27), 0  ;;  %p6015_p4 = scmp.lt.s32.totalorder %s6560_s26, 2 }
  0x1d   : > { %8246 = sst [smem:[#allocation19_spill]] %s8291_s27  ;;  %p135_p3 = por %p134_p2, %p133_p1 }
  0x1e   : > { %s123_s29 = ssub.s32 %s6556_s25, %s8291_s27  ;;  %s6710_s30 = sand.u32 1, %s6548_s23  }
  0x1f   : > { %p124_p5 = scmp.eq.s32.totalorder %s123_s29, 0  ;;  %p6712_p6 = pnand %p6015_p4, %p135_p3 }
  0x20   : > { %s553_s17 = sand.u32 1, %s6560_s26   ;;  %s8216_s18 = sshll.u32 %s6710_s30, 8 }
  0x21   : > { %s8247_s0 = scalar_select %p6712_p6, 1, 0 }
  0x22   : > { %s6719_s19 = scalar_select %p124_p5, %s6548_s23, %s126_s28  }
  0x23   : > { %s8217_s20 = sshll.u32 %s6556_s25, 12  ;;  %s8249_s5 = sld [smem:[#allocation25_spill]] }
  0x24   : > { %8248 = sst [smem:[#allocation20_spill]] %s6719_s19  ;;  %s557_s29 = scalar_lea.vmem [#allocation6], %s8216_s18 }
  0x25   : > { %s564_s13 = sshll.u32 %s557_s29, 4  ;;  %s6733_s1 = scalar_lea.sflag [#allocation7], %s553_s17  ;;  %s6731_s13 = int_to_ptr.vmem [resolvable:$true] %s564_s13 }
  0x26   : > { %p6739_p8 = pneg %p6712_p6 }
  0x28   : > { %s8250_s19 = scalar_select %p6739_p8, 1, 0 }
  0x29   : > { %s6727_s27 = scalar_lea.hbm %s8249_s5, %s8217_s20  ;;  %s6359_s18 = scalar_lea.hbm %s8249_s5, 8192 }
  0x2a   : > { %s6354_s28 = scalar_lea.hbm %s6727_s27, 4096  ;;  %p6360_p11 = scmp.lt.u32.totalorder %s6727_s27, %s8249_s5 }
  0x2b   : > { %p6355_p7 = scmp.ne.s32.totalorder %s6727_s27, %s6354_s28  ;;  %p6361_p12 = scmp.lt.u32.totalorder %s6359_s18, %s6354_s28 }
  0x2c   : > { %p6363_p0 = scmp.lt.u32.totalorder %s6354_s28, %s6727_s27 }
  0x2d   : > { %p6357_p9 = pnand %p6739_p8, %p6355_p7  ;;  %p6362_p13 = por %p6361_p12, %p6360_p11 }
  0x2f   : > { %p6358_p10 = pneg %p6357_p9  ;;  %p6364_p1 = por %p6363_p0, %p6362_p13 }
  0x31   : > { %p6365_p2 = pnand %p6364_p1, %p6358_p10 }
  0x33   : > { %6368 = shalt.err (!%p6365_p2)
}
  0x34   : > { %s6369_s17 = scalar_lea.vmem %s6731_s13, 4096  ;;  %s6562_s14 = smov [#allocation6]  }
  0x35   : > { %p6370_p3 = scmp.ne.s32.totalorder %s6731_s13, %s6369_s17  ;;  %s6374_s16 = sshll.u32 %s6562_s14, 4  ;;  %s6375_s16 = int_to_ptr.vmem [resolvable:$false] %s6374_s16 }
  0x36   : > { %s6376_s20 = scalar_lea.vmem %s6375_s16, 8192  ;;  %p6377_p7 = scmp.lt.s32.totalorder %s6731_s13, %s6375_s16 }
  0x37   : > { %p6372_p4 = pnand %p6370_p3, %p6739_p8  ;;  %p6378_p9 = scmp.lt.s32.totalorder %s6376_s20, %s6369_s17 }
  0x39   : > { %p6373_p5 = pneg %p6372_p4  ;;  %p6379_p11 = por %p6378_p9, %p6377_p7 }
  0x3b   : > { %p6380_p12 = pnand %p6379_p11, %p6373_p5 }
  0x3d   : > { %6383 = shalt.err (!%p6380_p12)
}
  0x3e   : > { %s6563_s18 = smov 256   ;;  %s6564_s28 = smov 16  }
  0x3f   : > { %6010 = dma.hbm_to_vmem [thread:$0]  (!%p6712_p6), %s6727_s27, 4096, %s6731_s13, %s6733_s1, %s6563_s18, %s6563_s18, %s6564_s28  }
  0x40   : > { %s8251_s29 = sshll.u32 %s6556_s25, 12  ;;  %s8252_s7 = sld [smem:[#allocation27_spill]] }
  0x41   : > { %s8253_s20 = sshll.u32 %s6710_s30, 8  ;;  %s6775_s12 = sadd.s32 4294967295, %s6560_s26  }
  0x42   : > { %s585_s5 = scalar_lea.vmem [#allocation8], %s8253_s20  ;;  %p139_p10 = scmp.ne.s32.totalorder %s6544_s22, %s6540_s21 }
  0x43   : > { %s592_s23 = sshll.u32 %s585_s5, 4  ;;  %p8220_p13 = scmp.eq.s32.totalorder %s6775_s12, 0  ;;  %s6772_s23 = int_to_ptr.vmem [resolvable:$true] %s592_s23 }
  0x44   : > { %p5498_p0 = scmp.ge.s32.totalorder %s6560_s26, 1  ;;  %p473_p1 = scmp.lt.s32.totalorder %s6560_s26, 3 }
  0x45   : > { %p6784_p2 = por %p8220_p13, %p139_p10  ;;  %s6565_s5 = smov [#allocation9]  }
  0x46   : > { %s6768_s16 = scalar_lea.hbm %s8252_s7, %s8251_s29  ;;  %p6788_p3 = pnand %p5498_p0, %p473_p1 }
  0x47   : > { %s8254_s13 = scalar_select %p6784_p2, 1, 0 }
  0x48   : > { %s8255_s27 = scalar_select %p6788_p3, 1, 0 }
  0x49   : > { %s504_s18 = sshll.u32 %s6565_s5, 4  ;;  %p6000_p4 = pneg %p6788_p3  ;;  %s505_s18 = int_to_ptr.vmem [resolvable:$true] %s504_s18 }
  0x4a   : > { %s5502_s28 = sshll.u32 %s6710_s30, 6  ;;  %s5692_s29 = sshll.u32 %s6556_s25, 10 }
  0x4b   : > { %p6796_p5 = pnand %p6000_p4, %p8220_p13  ;;  %s8257_s3 = sld [smem:[#allocation24_spill]] }
  0x4c   : > { %s6384_s5 = scalar_lea.hbm %s8210_s15, 2048 }
  0x4d   : > { %p6385_p7 = scmp.ne.s32.totalorder %s8210_s15, %s6384_s5  ;;  %p6386_p9 = pneg %p6796_p5 }
  0x4e   : > { %p6391_p10 = scmp.lt.u32.totalorder %s6384_s5, %s8210_s15 }
  0x4f   : > { %p6387_p11 = pnand %p6386_p9, %p6385_p7 }
  0x51   : > { %s6805_s20 = scalar_lea.hbm %s8257_s3, %s5692_s29  ;;  %p6388_p12 = pneg %p6387_p11 }
  0x53   : > { %p6393_p0 = pnand %p6391_p10, %p6388_p12 }
  0x55   : > { %6396 = shalt.err (!%p6393_p0)
}
  0x56   : > { %s6397_s29 = scalar_lea.vmem %s505_s18, 2048  ;;  %p6405_p2 = scmp.lt.s32.totalorder %s505_s18, %s505_s18 }
  0x57   : > { %p6398_p1 = scmp.ne.s32.totalorder %s505_s18, %s6397_s29  ;;  %p6406_p3 = scmp.lt.s32.totalorder %s6397_s29, %s6397_s29 }
  0x59   : > { %p6400_p4 = pnand %p6398_p1, %p6386_p9  ;;  %p6407_p6 = por %p6406_p3, %p6405_p2 }
  0x5b   : > { %p6401_p13 = pneg %p6400_p4 }
  0x5d   : > { %p6408_p8 = pnand %p6407_p6, %p6401_p13 }
  0x5f   : > { %6411 = shalt.err (!%p6408_p8)
}
  0x60   : > { %s6566_s9 = smov 128   ;;  %s6567_s2 = smov 8  }
  0x61   : > { %6003 = dma.hbm_to_vmem [thread:$0]  (!%p6796_p5), %s8210_s15, 2048, %s505_s18, [#allocation10], %s6566_s9, %s6566_s9, %s6567_s2  }
  0x62   : > { %s530_s11 = scalar_lea.vmem [#allocation3], %s5502_s28  ;;  %s527_s17 = scalar_lea.sflag [#allocation4], %s6710_s30 }
  0x63   : > { %s537_s26 = sshll.u32 %s530_s11, 4  ;;  %s6412_s14 = scalar_lea.hbm %s6805_s20, 1024  ;;  %s6823_s26 = int_to_ptr.vmem [resolvable:$true] %s537_s26 }
  0x64   : > { %p6413_p6 = scmp.ne.s32.totalorder %s6805_s20, %s6412_s14  ;;  %p8258_p8 = scmp.ne.s32.totalorder %s8250_s19, 0 }
  0x65   : > { %s6417_s25 = scalar_lea.hbm %s8257_s3, 2048  ;;  %p6418_p3 = scmp.lt.u32.totalorder %s6805_s20, %s8257_s3 }
  0x66   : > { %p6415_p13 = pnand %p6413_p6, %p8258_p8  ;;  %p6419_p7 = scmp.lt.u32.totalorder %s6417_s25, %s6412_s14 }
  0x67   : > { %p6421_p9 = scmp.lt.u32.totalorder %s6412_s14, %s6805_s20 }
  0x68   : > { %p6416_p2 = pneg %p6415_p13  ;;  %p6420_p5 = por %p6419_p7, %p6418_p3 }
  0x6a   : > { %p6422_p11 = por %p6421_p9, %p6420_p5 }
  0x6c   : > { %p6423_p12 = pnand %p6422_p11, %p6416_p2 }
  0x6e   : > { %6426 = shalt.err (!%p6423_p12)
}
  0x6f   : > { %s6427_s18 = scalar_lea.vmem %s6823_s26, 1024  ;;  %s6568_s28 = smov [#allocation3]  }
  0x70   : > { %p6428_p10 = scmp.ne.s32.totalorder %s6823_s26, %s6427_s18  ;;  %s6432_s9 = sshll.u32 %s6568_s28, 4  ;;  %s6433_s9 = int_to_ptr.vmem [resolvable:$false] %s6432_s9 }
  0x71   : > { %s6434_s8 = scalar_lea.vmem %s6433_s9, 2048  ;;  %p6435_p4 = scmp.lt.s32.totalorder %s6823_s26, %s6433_s9 }
  0x72   : > { %p6430_p0 = pnand %p6428_p10, %p8258_p8  ;;  %p6436_p6 = scmp.lt.s32.totalorder %s6434_s8, %s6427_s18 }
  0x74   : > { %p6431_p1 = pneg %p6430_p0  ;;  %p6437_p13 = por %p6436_p6, %p6435_p4 }
  0x76   : > { %p6438_p3 = pnand %p6437_p13, %p6431_p1 }
  0x78   : > { %6441 = shalt.err (!%p6438_p3)
}
  0x79   : > { %s6569_s25 = smov 64   ;;  %s6570_s2 = smov 4  }
  0x7a   : > { %p8259_p2 = scmp.ne.s32.totalorder %s8247_s0, 0  ;;  %s6442_s6 = scalar_lea.hbm %s6768_s16, 4096 }
  0x7b   : > { %p6443_p7 = scmp.ne.s32.totalorder %s6768_s16, %s6442_s6  ;;  %s6447_s14 = scalar_lea.hbm %s8252_s7, 8192 }
  0x7c   : > { %6007 = dma.hbm_to_vmem [thread:$0]  (!%p8259_p2), %s6805_s20, 1024, %s6823_s26, %s527_s17, %s6569_s25, %s6569_s25, %s6570_s2  }
  0x7d   : > { %p6445_p5 = pnand %p6443_p7, %p8258_p8  ;;  %p6448_p11 = scmp.lt.u32.totalorder %s6768_s16, %s8252_s7 }
  0x7e   : > { %p6449_p12 = scmp.lt.u32.totalorder %s6447_s14, %s6442_s6  ;;  %p6451_p0 = scmp.lt.u32.totalorder %s6442_s6, %s6768_s16 }
  0x7f   : > { %p6446_p9 = pneg %p6445_p5 }
  0x80   : > { %p6450_p10 = por %p6449_p12, %p6448_p11 }
  0x82   : > { %p6452_p1 = por %p6451_p0, %p6450_p10 }
  0x84   : > { %p6453_p4 = pnand %p6452_p1, %p6446_p9 }
  0x86   : > { %6456 = shalt.err (!%p6453_p4)
}
  0x87   : > { %s6457_s30 = scalar_lea.vmem %s6772_s23, 4096  ;;  %s6571_s20 = smov [#allocation8]  }
  0x88   : > { %p6458_p6 = scmp.ne.s32.totalorder %s6772_s23, %s6457_s30  ;;  %s6462_s26 = sshll.u32 %s6571_s20, 4  ;;  %s6463_s26 = int_to_ptr.vmem [resolvable:$false] %s6462_s26 }
  0x89   : > { %s6464_s17 = scalar_lea.vmem %s6463_s26, 8192  ;;  %p6465_p7 = scmp.lt.s32.totalorder %s6772_s23, %s6463_s26 }
  0x8a   : > { %p6460_p13 = pnand %p6458_p6, %p8258_p8  ;;  %p6466_p5 = scmp.lt.s32.totalorder %s6464_s17, %s6457_s30 }
  0x8c   : > { %p6461_p3 = pneg %p6460_p13  ;;  %p6467_p11 = por %p6466_p5, %p6465_p7 }
  0x8e   : > { %p6468_p12 = pnand %p6467_p11, %p6461_p3 }
  0x90   : > { %6471 = shalt.err (!%p6468_p12)
}
  0x91   : > { %6013 = dma.hbm_to_vmem [thread:$0]  (!%p8259_p2), %s6768_s16, 4096, %s6772_s23, %s6733_s1, %s6569_s25, %s6569_s25, %s6570_s2  }
  0x92   : > { %p8260_p8 = scmp.ne.s32.totalorder %s8255_s27, 0 }
  0x93   : > { %s636_s19 = sand.u32 (!%p8260_p8), 1, %s6544_s22   ;;  %p8261_p9 = scmp.ne.s32.totalorder (!%p8260_p8), %s8254_s13, 0 }
  0x94   : > { %634 = sbr.rel (%p8260_p8) target bundleno = 3353 (0xd19), region = 84  ;;  %s5512_s21 = sshll.u32 (!%p8260_p8), %s636_s19, 6 }
  0x95   : > { %s637_s18 = scalar_lea.sflag (!%p8260_p8), [#allocation4], %s636_s19  ;;  %s6880_s28 = scalar_lea.vmem (!%p8260_p8), [#allocation3], %s5512_s21 }
  0x9b   : > { %6523 = dma.done.wait (%p8261_p9), %s637_s18, 1024  }
  0x9c   : > { %6525 = vsyncadd (%p8261_p9), %s637_s18, 4294966272  ;;  %s645_s0 = sand.u32 1, %s6775_s12   ;;  %s5513_s9 = sshll.u32 %s636_s19, 8 }
  0x9d   : > { %s646_s1 = scalar_lea.sflag [#allocation7], %s645_s0  ;;  %s6887_s23 = scalar_lea.vmem [#allocation6], %s5513_s9 }
  0x9e   : > { %6527 = dma.done.wait (%p8261_p9), %s646_s1, 8192  }
  0x9f   : > { %6529 = vsyncadd (%p8261_p9), %s646_s1, 4294959104  ;;  %s6893_s16 = scalar_lea.vmem [#allocation8], %s5513_s9  ;;  %p8262_p2 = scmp.eq.s32.totalorder %s6775_s12, 0 }
  0xa1   : > { %6531 = dma.done.wait (%p8262_p2), [#allocation10], 2048   ;;  %p8263_p10 = pmov %p8262_p2 }
  0xa2   : > { %p756_p0 = scmp.lt.s32.totalorder %s6552_s24, 1  ;;  %s8265_s20 = sld [smem:[#allocation23_spill]] }
  0xa3   : > { %6533 = vsyncadd (%p8263_p10), [#allocation10], 4294965248  ;;  %s8266_s21 = sld [smem:[#allocation26_spill]]  ;;  %s8267_s1 = sld [smem:[#allocation29_spill]] }
  0xa4   : > { %s6901_s27 = scalar_select %p756_p0, %s6552_s24, 1 }
  0xa5   : > { %s8268_s3 = sld [smem:[#allocation30_spill]]  ;;  %s8269_s14 = sld [smem:[#allocation31_spill]] }
  0xa6   : > { %s5985_s13 = smul.u32 192, %s6901_s27  ;;  %s5517_s6 = sshll.u32 %s6901_s27, 2 }
  0xa7   : > { %s8270_s30 = sld [smem:[#allocation32_spill]]  ;;  %p5518_p1 = scmp.ne.s32.totalorder %s6552_s24, 0 }
  0xa8   : > { %s6916_s26 = scalar_lea.vmem %s8265_s20, %s5985_s13  ;;  %s8271_s19 = sld [smem:[#allocation21_spill]] (!%p5518_p1) }
  0xa9   : > { %s6921_s18 = scalar_lea.vmem %s8266_s21, %s5517_s6  ;;  %s773_s8 = scalar_lea.vmem %s8267_s1, %s6901_s27 }
  0xaa   : > { %788 = sbr.rel (%p5518_p1) target bundleno = 177 (0xb1), region = 104 }
  0xab   : > { %s776_s7 = scalar_lea.vmem %s8268_s3, %s6901_s27  ;;  %s779_s5 = scalar_lea.vmem %s8269_s14, %s6901_s27 }
  0xad   : > { %s782_s20 = scalar_lea.vmem %s8270_s30, %s6901_s27 }
  0xae   : > { %v789_v0 = vld [vmem:[%s8271_s19] sm:$0xff] (!%p5518_p1)  ;;  %v790_v1 = vld [vmem:[%s8271_s19 + $0x8] sm:$0xff] (!%p5518_p1)  ;;  %v791_v2 = vld [vmem:[%s8271_s19 + $0x10] sm:$0xff] (!%p5518_p1) }
  0xaf   : > { %793 = vst [vmem:[#allocation2] sm:$0xff] (!%p5518_p1), %v789_v0  ;;  %794 = vst [vmem:[#allocation2 + $0x8] sm:$0xff] (!%p5518_p1), %v790_v1  ;;  %v792_v3 = vld [vmem:[%s8271_s19 + $0x18] sm:$0xff] (!%p5518_p1) }
  0xb0   : > { %795 = vst [vmem:[#allocation2 + $0x10] sm:$0xff] (!%p5518_p1), %v791_v2  ;;  %796 = vst [vmem:[#allocation2 + $0x18] sm:$0xff] (!%p5518_p1), %v792_v3 }
  0xb1 PF: > { %v6086_v8 = vld [vmem:[%s6916_s26 + $0x4] ss:$12 sps:$4 sm:$0xff]   ;;  %v6088_v9 = vld [vmem:[%s6916_s26] ss:$12 sps:$4 sm:$0xff]   ;;  %v6089_v10 = vld [vmem:[%s6916_s26 + $0x1c] ss:$12 sps:$4 sm:$0xff]   ;;  %s8275_s9 = scalar_lea.vmem %s8199_s4, %s6901_s27 }
  0xb2   : > { %v6091_v11 = vld [vmem:[%s6916_s26 + $0x8] ss:$12 sps:$4 sm:$0xff]   ;;  %1030 = vmatprep.subr.bf16.mxu0 %v6086_v8  ;;  %v6092_v28 = vld [vmem:[%s6916_s26 + $0x18] ss:$12 sps:$4 sm:$0xff]   ;;  %v6095_v30 = vld [vmem:[%s6916_s26 + $0x20] ss:$12 sps:$4 sm:$0xff]  }
  0xb3   : > { %1031 = vmatpush1.bf16.msra.mxu0 %v6088_v9  ;;  %5809 = vmatprep.subr.bf16.mxu1 %v6091_v11  ;;  %v6093_v29 = vld [vmem:[%s6916_s26 + $0x34] ss:$12 sps:$4 sm:$0xff]   ;;  %v6096_v31 = vld [vmem:[%s6916_s26 + $0x30] ss:$12 sps:$4 sm:$0xff]   ;;  %v6097_v32 = vld [vmem:[%s6916_s26 + $0x4c] ss:$12 sps:$4 sm:$0xff]  }
  0xb4   : > { %1032 = vmatprep.subr.bf16.mxu0 %v6089_v10  ;;  %5810 = vmatpush3.bf16.msra.mxu1 %v6091_v11  ;;  %v6099_v33 = vld [vmem:[%s6916_s26 + $0x38] ss:$12 sps:$4 sm:$0xff]   ;;  %v6100_v34 = vld [vmem:[%s6916_s26 + $0x48] ss:$12 sps:$4 sm:$0xff]   ;;  %v6103_v36 = vld [vmem:[%s6916_s26 + $0x50] ss:$12 sps:$4 sm:$0xff]  }
  0xb5   : > { %5811 = vmatprep.subr.bf16.mxu1 %v6095_v30  ;;  %v6101_v35 = vld [vmem:[%s6916_s26 + $0x64] ss:$12 sps:$4 sm:$0xff]   ;;  %v6104_v37 = vld [vmem:[%s6916_s26 + $0x60] ss:$12 sps:$4 sm:$0xff]   ;;  %v6105_v38 = vld [vmem:[%s6916_s26 + $0x7c] ss:$12 sps:$4 sm:$0xff]  }
  0xb6   : > { %v797_v4 = vld [vmem:[#allocation2] sm:$0xff]  ;;  %v798_v6 = vld [vmem:[#allocation2 + $0x8] sm:$0xff]  ;;  %v6572_v43 = vmov 0   ;;  %v6112_v44 = vld [vmem:[%s6916_s26 + $0x90] ss:$12 sps:$4 sm:$0xff]   ;;  %s6575_s13 = smov 32  }
  0xb7   : > { %v799_v5 = vld [vmem:[#allocation2 + $0x10] sm:$0xff]  ;;  %803 = vadd.xlane.f32.xlu0 %v797_v4  ;;  %v800_v7 = vld [vmem:[#allocation2 + $0x18] sm:$0xff]  ;;  %1033 = vmatpush1.bf16.msra.mxu0 %v6092_v28  ;;  %v6111_v42 = vld [vmem:[%s6916_s26 + $0x80] ss:$12 sps:$4 sm:$0xff]   ;;  %vm6577_vm0 = vmmov 0   ;;  %vm2910_vm1 = vcmask 261120  }
  0xb8   : > { %807 = vadd.xlane.f32.xlu1 %v799_v5  ;;  %1034 = vmatprep.subr.bf16.mxu0 %v6093_v29  ;;  %v6107_v39 = vld [vmem:[%s6916_s26 + $0x68] ss:$12 sps:$4 sm:$0xff]   ;;  %v6108_v40 = vld [vmem:[%s6916_s26 + $0x78] ss:$12 sps:$4 sm:$0xff]   ;;  %v6117_v48 = vld [vmem:[%s6916_s26 + $0xb0] ss:$12 sps:$4 sm:$0xff]  }
  0xb9   : > { %5812 = vmatpush3.bf16.msra.mxu1 %v6095_v30  ;;  %v6109_v41 = vld [vmem:[%s6916_s26 + $0x94] ss:$12 sps:$4 sm:$0xff]   ;;  %1062 = vmatprep.mubr.bf16.mxu0 %v6572_v43  ;;  %v6113_v45 = vld [vmem:[%s6916_s26 + $0xac] ss:$12 sps:$4 sm:$0xff]   ;;  %v6576_v29 = vmov 0.0   ;;  %s8274_s17 = sld [smem:[#allocation22_spill]] }
  0xba   : > { %5813 = vmatprep.subr.bf16.mxu1 %v6099_v33  ;;  %v6115_v46 = vld [vmem:[%s6916_s26 + $0x98] ss:$12 sps:$4 sm:$0xff]   ;;  %v6116_v47 = vld [vmem:[%s6916_s26 + $0xa8] ss:$12 sps:$4 sm:$0xff]   ;;  %v5519_v63 = vld [vmem:[%s773_s8] ss:$0 sm:$0xff] }
  0xbb   : > { %805 = vadd.xlane.f32.xlu0 %v798_v6  ;;  %1035 = vmatpush1.bf16.msra.mxu0 %v6096_v31  ;;  %s6574_s8 = smov 64   ;;  %v6578_v31 = vmov 1983009808   ;;  %vm3287_vm2 = vcmask 130048   ;;  %p5669_p4 = scmp.ne.s32.totalorder %s6552_s24, 1 }
  0xbc   : > { %809 = vadd.xlane.f32.xlu1 %v800_v7  ;;  %1036 = vmatprep.subr.bf16.mxu0 %v6097_v32  ;;  %v1175_v32 = vunpack.c.l.s4 %v6578_v31  ;;  %s8280_s11 = sld [smem:[#allocation33_spill]] (!%p5669_p4) }
  0xbd   : > { %5814 = vmatpush3.bf16.msra.mxu1 %v6099_v33  ;;  %v1177_v33 = vlaneseq }
  0xbe   : > { %5815 = vmatprep.subr.bf16.mxu1 %v6103_v36 }
  0xbf   : > { %1037 = vmatpush1.bf16.msra.mxu0 %v6100_v34 }
  0xc0   : > { %1038 = vmatprep.subr.bf16.mxu0 %v6101_v35  ;;  %v6579_v35 = vmov 1934713408  }
  0xc1   : > { %5816 = vmatpush3.bf16.msra.mxu1 %v6103_v36  ;;  %v1207_v36 = vunpack.c.l.s4 %v6579_v35 }
  0xc2   : > { %5817 = vmatprep.subr.bf16.mxu1 %v6107_v39 }
  0xc3   : > { %1039 = vmatpush1.bf16.msra.mxu0 %v6104_v37 }
  0xc4   : > { %1040 = vmatprep.subr.bf16.mxu0 %v6105_v38  ;;  %v1176_v38 = vunpack.c.0.s8 %v1175_v32 }
  0xc5   : > { %5818 = vmatpush3.bf16.msra.mxu1 %v6107_v39  ;;  %v7102_v39 = vshrl.u32 %v1177_v33, 7 }
  0xc6   : > { %5819 = vmatprep.subr.bf16.mxu1 %v6111_v42 }
  0xc7   : > { %1041 = vmatpush1.bf16.msra.mxu0 %v6108_v40 }
  0xc8   : > { %1042 = vmatprep.subr.bf16.mxu0 %v6109_v41  ;;  %v1208_v41 = vunpack.c.0.s8 %v1207_v36 }
  0xc9   : > { %5820 = vmatpush3.bf16.msra.mxu1 %v6111_v42 }
  0xca   : > { %5821 = vmatprep.subr.bf16.mxu1 %v6115_v46 }
  0xcb   : > { %1043 = vmatpush1.bf16.msra.mxu0 %v6112_v44 }
  0xcc   : > { %1044 = vmatprep.subr.bf16.mxu0 %v6113_v45 }
  0xcd   : > { %5822 = vmatpush3.bf16.msra.mxu1 %v6115_v46  ;;  %v7107_v46 = vsub.s32 %v1176_v38, %v7102_v39 }
  0xce   : > { %5823 = vmatprep.subr.bf16.mxu1 %v6117_v48 }
  0xcf   : > { %1045 = vmatpush1.bf16.msra.mxu0 %v6116_v47 }
  0xd0   : > { %5829 = vmatprep.subr.bf16.mxu0 %v6576_v29 }
  0xd1   : > { %5824 = vmatpush3.bf16.msra.mxu1 %v6117_v48 }
  0xd2   : > { %5841 = vmatprep.subr.bf16.mxu1 %v6576_v29 }
 0x144   : > { %v804_v12 = vpop.xlane.xlu0 %803 }
 0x145   : > { %v808_v13 = vpop.xlane.xlu1 %807  ;;  %v812_v14 = vmul.f32 0.0078125, %v804_v12 }
 0x146   : > { %v814_v15 = vmul.f32 0.0078125, %v808_v13 }
 0x147   : > { %v6956_v16 = vsub.f32 %v797_v4, %v812_v14  ;;  %v5520_v4 = vld [vmem:[%s776_s7] ss:$0 sm:$0xff]  ;;  %s6573_s7 = smov 96  }
 0x148   : > { %v6958_v17 = vsub.f32 %v799_v5, %v814_v15  ;;  %v806_v18 = vpop.xlane.xlu0 %805 }
 0x149   : > { %v810_v19 = vpop.xlane.xlu1 %809  ;;  %v813_v20 = vmul.f32 0.0078125, %v806_v18  ;;  %v820_v21 = vmul.f32 %v6956_v16, %v6956_v16 }
 0x14a   : > { %v815_v22 = vmul.f32 0.0078125, %v810_v19  ;;  %v822_v25 = vmul.f32 %v6958_v17, %v6958_v17 }
 0x14b   : > { %v6962_v23 = vsub.f32 %v798_v6, %v813_v20  ;;  %824 = vadd.xlane.f32.xlu0 %v820_v21 }
 0x14c   : > { %v6964_v24 = vsub.f32 %v800_v7, %v815_v22 }
 0x14d   : > { %v821_v26 = vmul.f32 %v6962_v23, %v6962_v23 }
 0x14e   : > { %v823_v27 = vmul.f32 %v6964_v24, %v6964_v24 }
 0x14f   : > { %828 = vadd.xlane.f32.xlu0 %v822_v25  ;;  %826 = vadd.xlane.f32.xlu1 %v821_v26 }
 0x153   : > { %830 = vadd.xlane.f32.xlu1 %v823_v27 }
 0x1d8   : > { %v825_v49 = vpop.xlane.xlu0 %824 }
 0x1d9   : > { %v832_v50 = vmul.f32 0.0078125, %v825_v49 }
 0x1db   : > { %v836_v51 = vadd.f32 1e-05, %v832_v50 }
 0x1dc   : > { %v827_v52 = vpop.xlane.xlu1 %826  ;;  %v829_v53 = vpop.xlane.xlu0 %828 }
 0x1dd   : > { %6206 = vrsqrt.f32 %v836_v51  ;;  %v833_v54 = vmul.f32 0.0078125, %v827_v52  ;;  %v834_v55 = vmul.f32 0.0078125, %v829_v53  ;;  %v7112_v52 = vsub.s32 %v1208_v41, %v7102_v39 }
 0x1df   : > { %v837_v56 = vadd.f32 1e-05, %v833_v54  ;;  %v838_v57 = vadd.f32 1e-05, %v834_v55 }
 0x1e0   : > { %v831_v58 = vpop.xlane.xlu1 %830 }
 0x1e1   : > { %6208 = vrsqrt.f32 %v837_v56  ;;  %v835_v59 = vmul.f32 0.0078125, %v831_v58 }
 0x1e2   : > { %6210 = vrsqrt.f32 %v838_v57 }
 0x1e3   : > { %v839_v60 = vadd.f32 1e-05, %v835_v59 }
 0x1e5   : > { %6212 = vrsqrt.f32 %v839_v60 }
 0x1e7   : > { %v6207_v61 = vpop.eup %6206 }
 0x1e8   : > { %v844_v62 = vmul.f32 %v6207_v61, %v6956_v16 }
 0x1ea   : > { %v854_v3 = vmul.f32 %v5519_v63, %v844_v62 }
 0x1eb   : > { %v6209_v0 = vpop.eup %6208 }
 0x1ec   : > { %v6211_v1 = vpop.eup %6210  ;;  %v845_v2 = vmul.f32 %v6209_v0, %v6962_v23  ;;  %v864_v8 = vadd.f32 %v5520_v4, %v854_v3 }
 0x1ed   : > { %v846_v5 = vmul.f32 %v6211_v1, %v6958_v17 }
 0x1ee   : > { %v855_v6 = vmul.f32 %v5519_v63, %v845_v2 }
 0x1ef   : > { %v6213_v7 = vpop.eup %6212  ;;  %v856_v11 = vmul.f32 %v5519_v63, %v846_v5 }
 0x1f0   : > { %v865_v9 = vadd.f32 %v5520_v4, %v855_v6  ;;  %v847_v10 = vmul.f32 %v6213_v7, %v6964_v24 }
 0x1f1   : > { %v866_v14 = vadd.f32 %v5520_v4, %v856_v11 }
 0x1f2   : > { %v868_v12 = vpack.c.bf16 %v865_v9, %v864_v8  ;;  %v857_v13 = vmul.f32 %v5519_v63, %v847_v10 }
 0x1f4   : > { %1063 = vmatmul.mubr.bf16.vlgmr.msra.gmra.mrb[0].mxu0 %v868_v12  ;;  %5825 = vmatprep.mubr.bf16.mxu1 %v868_v12  ;;  %v867_v15 = vadd.f32 %v5520_v4, %v857_v13 }
 0x1f5   : > { %1072 = vmatprep.mubr.bf16.mxu0 %v6572_v43 }
 0x1f6   : > { %v869_v16 = vpack.c.bf16 %v867_v15, %v866_v14 }
 0x1f8   : > { %5826 = vmatmul.mubr.bf16.vlgmr.msra.gmra.mrb[0].mxu1 %v869_v16 }
 0x1f9   : > { %5843 = vmatprep.mubr.msk.bf16.mxu1 %vm6577_vm0, %v6576_v29 }
 0x1fc   : > { %1073 = vmatmul.mubr.bf16.gmra.mrb[4].mxu0 %v869_v16 }
 0x1fd   : > { %5831 = vmatprep.mubr.msk.bf16.mxu0 %vm6577_vm0, %v6576_v29 }
 0x2c7   : > { %v7008_v18 = vpop.f32.mrb[0].mxu0 }
 0x2c8   : > { %1136 = vrot.lane.b32.xlu0 %v7008_v18, %s6573_s7  ;;  %v7012_v17 = vpop.f32.mrb[1].mxu0 }
 0x2c9   : > { %1740 = vrot.lane.b32.xlu1 %v7012_v17, %s6574_s8  ;;  %v7016_v19 = vpop.f32.mrb[2].mxu0 }
 0x2ca   : > { %v7018_v20 = vpop.f32.mrb[3].mxu0 }
 0x2cb   : > { %v7020_v21 = vpop.f32.mrb[0].mxu1 }
 0x2cc   : > { %1148 = vrot.lane.b32.xlu0 %v7008_v18, %s6574_s8  ;;  %v7024_v22 = vpop.f32.mrb[1].mxu1 }
 0x2cd   : > { %1138 = vrot.lane.b32.xlu1 %v7016_v19, %s6573_s7  ;;  %v7028_v23 = vpop.f32.mrb[2].mxu1 }
 0x2ce   : > { %v7030_v24 = vpop.f32.mrb[3].mxu1 }
 0x2cf   : > { %v7032_v25 = vpop.f32.mrb[4].mxu0 }
 0x2d0   : > { %1160 = vrot.lane.b32.xlu0 %v7008_v18, %s6575_s13  ;;  %v7036_v26 = vpop.f32.mrb[5].mxu0 }
 0x2d1   : > { %1150 = vrot.lane.b32.xlu1 %v7016_v19, %s6574_s8  ;;  %v7040_v27 = vpop.f32.mrb[6].mxu0 }
 0x2d2   : > { %v7042_v28 = vpop.f32.mrb[7].mxu0 }
 0x2d4   : > { %1728 = vrot.lane.b32.xlu0 %v7012_v17, %s6573_s7 }
 0x2d5   : > { %1162 = vrot.lane.b32.xlu1 %v7016_v19, %s6575_s13 }
 0x2d8   : > { %1752 = vrot.lane.b32.xlu0 %v7012_v17, %s6575_s13 }
 0x2d9   : > { %1730 = vrot.lane.b32.xlu1 %v7018_v20, %s6573_s7 }
 0x2dc   : > { %1140 = vrot.lane.b32.xlu0 %v7032_v25, %s6573_s7 }
 0x2dd   : > { %1742 = vrot.lane.b32.xlu1 %v7018_v20, %s6574_s8 }
 0x2e0   : > { %1732 = vrot.lane.b32.xlu0 %v7036_v26, %s6573_s7 }
 0x2e1   : > { %1754 = vrot.lane.b32.xlu1 %v7018_v20, %s6575_s13 }
 0x2e4   : > { %1744 = vrot.lane.b32.xlu0 %v7036_v26, %s6574_s8 }
 0x2e5   : > { %1142 = vrot.lane.b32.xlu1 %v7040_v27, %s6573_s7 }
 0x2e8   : > { %1756 = vrot.lane.b32.xlu0 %v7036_v26, %s6575_s13 }
 0x2e9   : > { %1734 = vrot.lane.b32.xlu1 %v7042_v28, %s6573_s7 }
 0x2ec   : > { %1152 = vrot.lane.b32.xlu0 %v7032_v25, %s6574_s8 }
 0x2ed   : > { %1746 = vrot.lane.b32.xlu1 %v7042_v28, %s6574_s8 }
 0x2f0   : > { %1164 = vrot.lane.b32.xlu0 %v7032_v25, %s6575_s13 }
 0x2f1   : > { %1758 = vrot.lane.b32.xlu1 %v7042_v28, %s6575_s13 }
 0x2f4   : > { %2320 = vrot.lane.b32.xlu0 %v7024_v22, %s6573_s7 }
 0x2f5   : > { %1154 = vrot.lane.b32.xlu1 %v7040_v27, %s6574_s8 }
 0x2f8   : > { %2344 = vrot.lane.b32.xlu0 %v7024_v22, %s6575_s13 }
 0x2f9   : > { %1166 = vrot.lane.b32.xlu1 %v7040_v27, %s6575_s13 }
 0x2fc   : > { %2324 = vrot.lane.b32.xlu0 %v7020_v21, %s6573_s7 }
 0x2fd   : > { %2322 = vrot.lane.b32.xlu1 %v7030_v24, %s6573_s7 }
 0x301   : > { %2332 = vrot.lane.b32.xlu1 %v7024_v22, %s6574_s8 }
 0x305   : > { %2334 = vrot.lane.b32.xlu1 %v7030_v24, %s6574_s8 }
 0x309   : > { %2346 = vrot.lane.b32.xlu1 %v7030_v24, %s6575_s13 }
 0x30d   : > { %2326 = vrot.lane.b32.xlu1 %v7028_v23, %s6573_s7  ;;  %s8281_s7 = sld [smem:[#allocation34_spill]] (!%p5669_p4) }
 0x33a   : > { %v1137_v30 = vpop.permute.xlu0 %1136 }
 0x33b   : > { %v1741_v34 = vpop.permute.xlu1 %1740 }
 0x33c   : > { %v1764_v50 = vcombine.low %v7012_v17, %v1741_v34  ;;  %v1765_v51 = vcombine.high %v7012_v17, %v1741_v34 }
 0x33e   : > { %v1149_v37 = vpop.permute.xlu0 %1148  ;;  %v7123_v1 = vrot.slane %v1764_v50, %v7107_v46  ;;  %v7126_v2 = vrot.slane %v1765_v51, %v7107_v46 }
 0x33f   : > { %v1139_v40 = vpop.permute.xlu1 %1138  ;;  %v1172_v42 = vcombine.low %v7008_v18, %v1149_v37  ;;  %v1173_v44 = vcombine.high %v7008_v18, %v1149_v37 }
 0x341   : > { %v1180_v53 = vrot.slane %v1172_v42, %v7107_v46  ;;  %v1187_v54 = vrot.slane %v1173_v44, %v7107_v46 }
 0x342   : > { %v1161_v45 = vpop.permute.xlu0 %1160 }
 0x343   : > { %v1188_v47 = vcombine.low %v1137_v30, %v1161_v45  ;;  %v1189_v48 = vcombine.high %v1137_v30, %v1161_v45  ;;  %v1151_v49 = vpop.permute.xlu1 %1150 }
 0x344   : > { %v1240_v57 = vcombine.low %v7016_v19, %v1151_v49  ;;  %v1241_v58 = vcombine.high %v7016_v19, %v1151_v49 }
 0x345   : > { %v1196_v55 = vrot.slane %v1188_v47, %v7107_v46  ;;  %v1203_v56 = vrot.slane %v1189_v48, %v7107_v46 }
 0x346   : > { %v7120_v59 = vpop.permute.xlu0 %1728  ;;  %v1248_v9 = vrot.slane %v1240_v57, %v7107_v46  ;;  %v1255_v10 = vrot.slane %v1241_v58, %v7107_v46 }
 0x347   : > { %v1204_v60 = vcombine.low %v1180_v53, %v1196_v55  ;;  %v1205_v61 = vcombine.high %v1180_v53, %v1196_v55  ;;  %v1220_v62 = vcombine.low %v1187_v54, %v1203_v56  ;;  %v1221_v63 = vcombine.high %v1187_v54, %v1203_v56  ;;  %v1163_v0 = vpop.permute.xlu1 %1162 }
 0x348   : > { %v1256_v3 = vcombine.low %v1139_v40, %v1163_v0  ;;  %v1257_v4 = vcombine.high %v1139_v40, %v1163_v0 }
 0x349   : > { %v1212_v5 = vrot.slane %v1204_v60, %v7112_v52  ;;  %v1219_v6 = vrot.slane %v1205_v61, %v7112_v52  ;;  %v1228_v7 = vrot.slane %v1220_v62, %v7112_v52  ;;  %v1235_v8 = vrot.slane %v1221_v63, %v7112_v52 }
 0x34a   : > { %v1264_v11 = vrot.slane %v1256_v3, %v7107_v46  ;;  %v1271_v12 = vrot.slane %v1257_v4, %v7107_v46  ;;  %v1753_v13 = vpop.permute.xlu0 %1752 }
 0x34b   : > { %v1444_v14 = vcombine.low %v1212_v5, %v1219_v6  ;;  %v5545_v15 = vcombine.high %v1212_v5, %v1219_v6  ;;  %v1460_v16 = vcombine.low %v1228_v7, %v1235_v8  ;;  %v5546_v18 = vcombine.high %v1228_v7, %v1235_v8  ;;  %v7136_v17 = vpop.permute.xlu1 %1730 }
 0x34c   : > { %v1272_v19 = vcombine.low %v1248_v9, %v1264_v11  ;;  %v1273_v30 = vcombine.high %v1248_v9, %v1264_v11  ;;  %v1288_v31 = vcombine.low %v1255_v10, %v1271_v12  ;;  %v1289_v32 = vcombine.high %v1255_v10, %v1271_v12 }
 0x34d   : > { %v1451_v33 = vrot.slane %v1444_v14, %v7107_v46  ;;  %v1459_v34 = vrot.slane %v5545_v15, %v7107_v46  ;;  %v1467_v35 = vrot.slane %v1460_v16, %v7107_v46  ;;  %v1475_v36 = vrot.slane %v5546_v18, %v7107_v46 }
 0x34e   : > { %v1280_v37 = vrot.slane %v1272_v19, %v7112_v52  ;;  %v1287_v38 = vrot.slane %v1273_v30, %v7112_v52  ;;  %v1296_v40 = vrot.slane %v1288_v31, %v7112_v52  ;;  %v1303_v41 = vrot.slane %v1289_v32, %v7112_v52  ;;  %v7146_v42 = vpop.permute.xlu0 %1140 }
 0x34f   : > { %v1476_v44 = vcombine.low %v1451_v33, %v1459_v34  ;;  %v1477_v45 = vcombine.high %v1451_v33, %v1459_v34  ;;  %v1492_v47 = vcombine.low %v1467_v35, %v1475_v36  ;;  %v1493_v48 = vcombine.high %v1467_v35, %v1475_v36  ;;  %v1743_v49 = vpop.permute.xlu1 %1742 }
 0x350   : > { %v1512_v50 = vcombine.low %v1280_v37, %v1287_v38  ;;  %v5547_v51 = vcombine.high %v1280_v37, %v1287_v38  ;;  %v1528_v53 = vcombine.low %v1296_v40, %v1303_v41  ;;  %v5548_v54 = vcombine.high %v1296_v40, %v1303_v41 }
 0x351   : > { %v7149_v55 = vrot.slane %v1476_v44, %v7112_v52  ;;  %v7152_v56 = vrot.slane %v1477_v45, %v7112_v52  ;;  %v7155_v57 = vrot.slane %v1492_v47, %v7112_v52  ;;  %v7158_v58 = vrot.slane %v1493_v48, %v7112_v52 }
 0x352   : > { %v1519_v60 = vrot.slane %v1512_v50, %v7107_v46  ;;  %v1527_v61 = vrot.slane %v5547_v51, %v7107_v46  ;;  %v1535_v62 = vrot.slane %v1528_v53, %v7107_v46  ;;  %v1543_v63 = vrot.slane %v5548_v54, %v7107_v46  ;;  %v7164_v0 = vpop.permute.xlu0 %1732 }
 0x353   : > { %v1508_v3 = vcombine.low %v7149_v55, %v7155_v57  ;;  %v1780_v4 = vcombine.low %v7120_v59, %v1753_v13  ;;  %v1781_v5 = vcombine.high %v7120_v59, %v1753_v13  ;;  %v1832_v6 = vcombine.low %v7018_v20, %v1743_v49  ;;  %v1755_v7 = vpop.permute.xlu1 %1754 }
 0x354   : > { %v1544_v8 = vcombine.low %v1519_v60, %v1527_v61  ;;  %v1545_v9 = vcombine.high %v1519_v60, %v1527_v61  ;;  %v1560_v10 = vcombine.low %v1535_v62, %v1543_v63  ;;  %v1561_v11 = vcombine.high %v1535_v62, %v1543_v63 }
 0x355   : > { %v1788_v12 = vrot.slane %v1780_v4, %v7107_v46  ;;  %v1795_v14 = vrot.slane %v1781_v5, %v7107_v46  ;;  %v1833_v15 = vcombine.high %v7018_v20, %v1743_v49  ;;  %v1840_v16 = vrot.slane %v1832_v6, %v7107_v46 }
 0x356   : > { %v7176_v18 = vrot.slane %v1544_v8, %v7112_v52  ;;  %v7179_v59 = vrot.slane %v1545_v9, %v7112_v52  ;;  %v7182_v13 = vrot.slane %v1560_v10, %v7112_v52  ;;  %v7185_v19 = vrot.slane %v1561_v11, %v7112_v52  ;;  %v1745_v30 = vpop.permute.xlu0 %1744 }
 0x357   : > { %v1796_v31 = vcombine.low %v7123_v1, %v1788_v12  ;;  %v1797_v32 = vcombine.high %v7123_v1, %v1788_v12  ;;  %v1812_v20 = vcombine.low %v7126_v2, %v1795_v14  ;;  %v1813_v33 = vcombine.high %v7126_v2, %v1795_v14  ;;  %v7191_v34 = vpop.permute.xlu1 %1142 }
 0x358   : > { %v1576_v35 = vcombine.low %v7176_v18, %v7182_v13  ;;  %v1847_v36 = vrot.slane %v1833_v15, %v7107_v46  ;;  %v1848_v37 = vcombine.low %v7136_v17, %v1755_v7  ;;  %v1849_v38 = vcombine.high %v7136_v17, %v1755_v7 }
 0x359   : > { %v1804_v40 = vrot.slane %v1796_v31, %v7112_v52  ;;  %v1811_v41 = vrot.slane %v1797_v32, %v7112_v52  ;;  %v1820_v1 = vrot.slane %v1812_v20, %v7112_v52  ;;  %v1827_v44 = vrot.slane %v1813_v33, %v7112_v52 }
 0x35a   : > { %v1856_v2 = vrot.slane %v1848_v37, %v7107_v46  ;;  %v1863_v45 = vrot.slane %v1849_v38, %v7107_v46  ;;  %v1900_v47 = vcombine.low %v7036_v26, %v1745_v30  ;;  %v1901_v48 = vcombine.high %v7036_v26, %v1745_v30  ;;  %v1757_v49 = vpop.permute.xlu0 %1756 }
 0x35b   : > { %v2036_v50 = vcombine.low %v1804_v40, %v1811_v41  ;;  %v5553_v51 = vcombine.high %v1804_v40, %v1811_v41  ;;  %v2052_v17 = vcombine.low %v1820_v1, %v1827_v44  ;;  %v5554_v53 = vcombine.high %v1820_v1, %v1827_v44  ;;  %v7206_v54 = vpop.permute.xlu1 %1734 }
 0x35c   : > { %v1864_v60 = vcombine.low %v1840_v16, %v1856_v2  ;;  %v1865_v61 = vcombine.high %v1840_v16, %v1856_v2  ;;  %v1880_v62 = vcombine.low %v1847_v36, %v1863_v45  ;;  %v1881_v63 = vcombine.high %v1847_v36, %v1863_v45 }
 0x35d   : > { %v7209_v4 = vrot.slane %v2036_v50, %v7107_v46  ;;  %v7212_v5 = vrot.slane %v5553_v51, %v7107_v46  ;;  %v7215_v6 = vrot.slane %v2052_v17, %v7107_v46  ;;  %v7218_v26 = vrot.slane %v5554_v53, %v7107_v46 }
 0x35e   : > { %v1872_v7 = vrot.slane %v1864_v60, %v7112_v52  ;;  %v1879_v8 = vrot.slane %v1865_v61, %v7112_v52  ;;  %v1888_v9 = vrot.slane %v1880_v62, %v7112_v52  ;;  %v1895_v10 = vrot.slane %v1881_v63, %v7112_v52  ;;  %v1153_v11 = vpop.permute.xlu0 %1152 }
 0x35f   : > { %v1908_v12 = vrot.slane %v1900_v47, %v7107_v46  ;;  %v1915_v14 = vrot.slane %v1901_v48, %v7107_v46  ;;  %v1916_v15 = vcombine.low %v7164_v0, %v1757_v49  ;;  %v1917_v16 = vcombine.high %v7164_v0, %v1757_v49  ;;  %v1747_v30 = vpop.permute.xlu1 %1746 }
 0x360   : > { %v2104_v31 = vcombine.low %v1872_v7, %v1879_v8  ;;  %v5555_v32 = vcombine.high %v1872_v7, %v1879_v8  ;;  %v2120_v20 = vcombine.low %v1888_v9, %v1895_v10  ;;  %v5556_v33 = vcombine.high %v1888_v9, %v1895_v10 }
 0x361   : > { %v1924_v36 = vrot.slane %v1916_v15, %v7107_v46  ;;  %v1931_v37 = vrot.slane %v1917_v16, %v7107_v46  ;;  %v1308_v38 = vcombine.low %v7032_v25, %v1153_v11  ;;  %v1309_v40 = vcombine.high %v7032_v25, %v1153_v11 }
 0x362   : > { %v7233_v41 = vrot.slane %v2104_v31, %v7107_v46  ;;  %v7236_v1 = vrot.slane %v5555_v32, %v7107_v46  ;;  %v7239_v0 = vrot.slane %v2120_v20, %v7107_v46  ;;  %v7242_v44 = vrot.slane %v5556_v33, %v7107_v46  ;;  %v1165_v49 = vpop.permute.xlu0 %1164 }
 0x363   : > { %v1932_v2 = vcombine.low %v1908_v12, %v1924_v36  ;;  %v1933_v45 = vcombine.high %v1908_v12, %v1924_v36  ;;  %v1948_v47 = vcombine.low %v1915_v14, %v1931_v37  ;;  %v1949_v48 = vcombine.high %v1915_v14, %v1931_v37  ;;  %v1759_v50 = vpop.permute.xlu1 %1758 }
 0x364   : > { %v1316_v25 = vrot.slane %v1308_v38, %v7107_v46  ;;  %v1323_v51 = vrot.slane %v1309_v40, %v7107_v46  ;;  %v1968_v17 = vcombine.low %v7042_v28, %v1747_v30  ;;  %v1969_v53 = vcombine.high %v7042_v28, %v1747_v30 }
 0x365   : > { %v1940_v60 = vrot.slane %v1932_v2, %v7112_v52  ;;  %v1947_v61 = vrot.slane %v1933_v45, %v7112_v52  ;;  %v1956_v62 = vrot.slane %v1948_v47, %v7112_v52  ;;  %v1963_v63 = vrot.slane %v1949_v48, %v7112_v52 }
 0x366   : > { %v1976_v7 = vrot.slane %v1968_v17, %v7107_v46  ;;  %v1983_v8 = vrot.slane %v1969_v53, %v7107_v46  ;;  %v1324_v9 = vcombine.low %v7146_v42, %v1165_v49  ;;  %v1325_v10 = vcombine.high %v7146_v42, %v1165_v49 }
 0x367   : > { %v2172_v11 = vcombine.low %v1940_v60, %v1947_v61  ;;  %v5557_v12 = vcombine.high %v1940_v60, %v1947_v61  ;;  %v2188_v14 = vcombine.low %v1956_v62, %v1963_v63  ;;  %v5558_v28 = vcombine.high %v1956_v62, %v1963_v63  ;;  %v1155_v32 = vpop.permute.xlu1 %1154  ;;  %v2321_v62 = vpop.permute.xlu0 %2320 }
 0x368   : > { %v1332_v15 = vrot.slane %v1324_v9, %v7107_v46  ;;  %v1339_v16 = vrot.slane %v1325_v10, %v7107_v46  ;;  %v1984_v30 = vcombine.low %v7206_v54, %v1759_v50  ;;  %v1985_v31 = vcombine.high %v7206_v54, %v1759_v50 }
 0x369   : > { %v7261_v20 = vrot.slane %v2172_v11, %v7107_v46  ;;  %v7264_v33 = vrot.slane %v5557_v12, %v7107_v46  ;;  %v7267_v42 = vrot.slane %v2188_v14, %v7107_v46  ;;  %v7270_v36 = vrot.slane %v5558_v28, %v7107_v46 }
 0x36a   : > { %v1340_v37 = vcombine.low %v1316_v25, %v1332_v15  ;;  %v1341_v38 = vcombine.high %v1316_v25, %v1332_v15  ;;  %v1356_v40 = vcombine.low %v1323_v51, %v1339_v16  ;;  %v1357_v2 = vcombine.high %v1323_v51, %v1339_v16 }
 0x36b   : > { %v1992_v45 = vrot.slane %v1984_v30, %v7107_v46  ;;  %v1999_v54 = vrot.slane %v1985_v31, %v7107_v46  ;;  %v1376_v47 = vcombine.low %v7040_v27, %v1155_v32  ;;  %v1377_v48 = vcombine.high %v7040_v27, %v1155_v32 }
 0x36c   : > { %v1348_v49 = vrot.slane %v1340_v37, %v7112_v52  ;;  %v1355_v50 = vrot.slane %v1341_v38, %v7112_v52  ;;  %v1364_v17 = vrot.slane %v1356_v40, %v7112_v52  ;;  %v1371_v53 = vrot.slane %v1357_v2, %v7112_v52 }
 0x36d   : > { %v2000_v60 = vcombine.low %v1976_v7, %v1992_v45  ;;  %v2001_v25 = vcombine.high %v1976_v7, %v1992_v45  ;;  %v2016_v61 = vcombine.low %v1983_v8, %v1999_v54  ;;  %v2017_v51 = vcombine.high %v1983_v8, %v1999_v54  ;;  %v1167_v54 = vpop.permute.xlu1 %1166 }
 0x36e   : > { %v1580_v63 = vcombine.low %v1348_v49, %v1355_v50  ;;  %v5549_v9 = vcombine.high %v1348_v49, %v1355_v50  ;;  %v1596_v10 = vcombine.low %v1364_v17, %v1371_v53  ;;  %v5550_v11 = vcombine.high %v1364_v17, %v1371_v53 }
 0x36f   : > { %v2008_v12 = vrot.slane %v2000_v60, %v7112_v52  ;;  %v2015_v27 = vrot.slane %v2001_v25, %v7112_v52  ;;  %v2024_v14 = vrot.slane %v2016_v61, %v7112_v52  ;;  %v2031_v28 = vrot.slane %v2017_v51, %v7112_v52  ;;  %v2345_v60 = vpop.permute.xlu0 %2344 }
 0x370   : > { %v1587_v15 = vrot.slane %v1580_v63, %v7107_v46  ;;  %v1595_v16 = vrot.slane %v5549_v9, %v7107_v46  ;;  %v1603_v7 = vrot.slane %v1596_v10, %v7107_v46  ;;  %v1611_v8 = vrot.slane %v5550_v11, %v7107_v46 }
 0x371   : > { %v2240_v30 = vcombine.low %v2008_v12, %v2015_v27  ;;  %v5559_v31 = vcombine.high %v2008_v12, %v2015_v27  ;;  %v2256_v32 = vcombine.low %v2024_v14, %v2031_v28  ;;  %v5560_v37 = vcombine.high %v2024_v14, %v2031_v28 }
 0x372   : > { %v1612_v38 = vcombine.low %v1587_v15, %v1595_v16  ;;  %v1613_v40 = vcombine.high %v1587_v15, %v1595_v16  ;;  %v1628_v2 = vcombine.low %v1603_v7, %v1611_v8  ;;  %v1629_v45 = vcombine.high %v1603_v7, %v1611_v8 }
 0x373   : > { %v7289_v49 = vrot.slane %v2240_v30, %v7107_v46  ;;  %v7292_v50 = vrot.slane %v5559_v31, %v7107_v46  ;;  %v7295_v17 = vrot.slane %v2256_v32, %v7107_v46  ;;  %v7298_v53 = vrot.slane %v5560_v37, %v7107_v46  ;;  %v7334_v37 = vpop.permute.xlu1 %2322 }
 0x374   : > { %v7301_v25 = vrot.slane %v1612_v38, %v7112_v52  ;;  %v7304_v61 = vrot.slane %v1613_v40, %v7112_v52  ;;  %v7307_v51 = vrot.slane %v1628_v2, %v7112_v52  ;;  %v7310_v63 = vrot.slane %v1629_v45, %v7112_v52 }
 0x375   : > { %v1384_v9 = vrot.slane %v1376_v47, %v7107_v46  ;;  %v1391_v10 = vrot.slane %v1377_v48, %v7107_v46  ;;  %v2068_v11 = vcombine.low %v7209_v4, %v7212_v5  ;;  %v2084_v12 = vcombine.low %v7215_v6, %v7218_v26 }
 0x376   : > { %v2136_v27 = vcombine.low %v7233_v41, %v7236_v1  ;;  %v2152_v14 = vcombine.low %v7239_v0, %v7242_v44  ;;  %v2372_v28 = vcombine.low %v2321_v62, %v2345_v60  ;;  %v2373_v15 = vcombine.high %v2321_v62, %v2345_v60 }
 0x377   : > { %v2076_v16 = vrot.slane %v2068_v11, %v7112_v52  ;;  %v2092_v47 = vrot.slane %v2084_v12, %v7112_v52  ;;  %v1392_v48 = vcombine.low %v7191_v34, %v1167_v54  ;;  %v1393_v7 = vcombine.high %v7191_v34, %v1167_v54 }
 0x378   : > { %v2144_v8 = vrot.slane %v2136_v27, %v7112_v52  ;;  %v2160_v30 = vrot.slane %v2152_v14, %v7112_v52  ;;  %v7329_v31 = vrot.slane %v2372_v28, %v7107_v46  ;;  %v7332_v32 = vrot.slane %v2373_v15, %v7107_v46 }
 0x379   : > { %v2100_v62 = vcombine.low %v2076_v16, %v2092_v47  ;;  %v2101_v38 = vcombine.high %v2076_v16, %v2092_v47  ;;  %v1400_v40 = vrot.slane %v1392_v48, %v7107_v46  ;;  %v1407_v2 = vrot.slane %v1393_v7, %v7107_v46 }
 0x37a   : > { %v2168_v45 = vcombine.low %v2144_v8, %v2160_v30  ;;  %v2169_v34 = vcombine.high %v2144_v8, %v2160_v30  ;;  %v1716_v54 = vpack.c.bf16 %v1576_v35, %v1508_v3  ;;  %v1509_v60 = vcombine.high %v7149_v55, %v7155_v57 }
 0x37b   : > { %v1408_v11 = vcombine.low %v1384_v9, %v1400_v40  ;;  %v1409_v12 = vcombine.high %v1384_v9, %v1400_v40  ;;  %v1424_v27 = vcombine.low %v1391_v10, %v1407_v2  ;;  %v1425_v14 = vcombine.high %v1391_v10, %v1407_v2 }
 0x37c   : > { %v2308_v28 = vpack.c.bf16 %v2168_v45, %v2100_v62  ;;  %v2310_v15 = vpack.c.bf16 %v2169_v34, %v2101_v38  ;;  %v1577_v16 = vcombine.high %v7176_v18, %v7182_v13  ;;  %v2069_v47 = vcombine.high %v7209_v4, %v7212_v5  ;;  %v2333_v18 = vpop.permute.xlu1 %2332 }
 0x37d   : > { %v1416_v48 = vrot.slane %v1408_v11, %v7112_v52  ;;  %v1423_v7 = vrot.slane %v1409_v12, %v7112_v52  ;;  %v1432_v3 = vrot.slane %v1424_v27, %v7112_v52  ;;  %v1439_v55 = vrot.slane %v1425_v14, %v7112_v52 }
 0x37e   : > { %v2915_v57 = vsel %vm2910_vm1, %v2308_v28, 0  ;;  %v3009_v35 = vsel %vm2910_vm1, %v2310_v15, 0  ;;  %v1718_v9 = vpack.c.bf16 %v1577_v16, %v1509_v60  ;;  %v7357_v10 = vrot.slane %v2069_v47, %v7112_v52 }
 0x37f   : > { %5830 = vmatpush3.bf16.xpose.msra.mxu0 %v2915_v57  ;;  %5842 = vmatpush3.bf16.xpose.msra.mxu1 %v3009_v35  ;;  %v1648_v13 = vcombine.low %v1416_v48, %v1423_v7  ;;  %v5551_v4 = vcombine.high %v1416_v48, %v1423_v7  ;;  %v1664_v5 = vcombine.low %v1432_v3, %v1439_v55 }
 0x380   : > { %v5552_v8 = vcombine.high %v1432_v3, %v1439_v55  ;;  %5853 = vmatprep.subr.bf16.mxu1 %v6576_v29  ;;  %v2085_v30 = vcombine.high %v7215_v6, %v7218_v26  ;;  %v2137_v62 = vcombine.high %v7233_v41, %v7236_v1  ;;  %v2153_v38 = vcombine.high %v7239_v0, %v7242_v44  ;;  %v2335_v48 = vpop.permute.xlu1 %2334 }
 0x381   : > { %v1655_v40 = vrot.slane %v1648_v13, %v7107_v46  ;;  %v1663_v2 = vrot.slane %v5551_v4, %v7107_v46  ;;  %v1671_v45 = vrot.slane %v1664_v5, %v7107_v46  ;;  %v2356_v34 = vcombine.low %v7024_v22, %v2333_v18  ;;  %5835 = vmatprep.subr.bf16.mxu0 %v6576_v29 }
 0x382   : > { %v1679_v60 = vrot.slane %v5552_v8, %v7107_v46  ;;  %v7373_v6 = vrot.slane %v2085_v30, %v7112_v52  ;;  %v7376_v26 = vrot.slane %v2137_v62, %v7112_v52  ;;  %v7379_v41 = vrot.slane %v2153_v38, %v7112_v52 }
 0x383   : > { %v1680_v1 = vcombine.low %v1655_v40, %v1663_v2  ;;  %v1681_v0 = vcombine.high %v1655_v40, %v1663_v2  ;;  %v2357_v44 = vcombine.high %v7024_v22, %v2333_v18  ;;  %v2364_v11 = vrot.slane %v2356_v34, %v7107_v46 }
 0x384   : > { %v1696_v12 = vcombine.low %v1671_v45, %v1679_v60  ;;  %v1697_v27 = vcombine.high %v1671_v45, %v1679_v60  ;;  %v2102_v14 = vcombine.low %v7357_v10, %v7373_v6  ;;  %v2170_v28 = vcombine.low %v7376_v26, %v7379_v41 }
 0x385   : > { %v7388_v15 = vrot.slane %v1680_v1, %v7112_v52  ;;  %v7391_v16 = vrot.slane %v1681_v0, %v7112_v52  ;;  %v2371_v47 = vrot.slane %v2357_v44, %v7107_v46  ;;  %v2388_v22 = vcombine.low %v2364_v11, %v7329_v31 }
 0x386   : > { %v7396_v7 = vrot.slane %v1696_v12, %v7112_v52  ;;  %v7399_v3 = vrot.slane %v1697_v27, %v7112_v52  ;;  %5832 = vmatmul.mubr.msk.bf16.vlgmr.msra.gmra.mrb[8].mxu0 %vm2910_vm1, %v1716_v54  ;;  %5844 = vmatmul.mubr.msk.bf16.vlgmr.msra.gmra.mrb[4].mxu1 %vm2910_vm1, %v1718_v9  ;;  %v2312_v55 = vpack.c.bf16 %v2170_v28, %v2102_v14  ;;  %v2347_v12 = vpop.permute.xlu1 %2346 }
 0x387   : > { %v2389_v57 = vcombine.high %v2364_v11, %v7329_v31  ;;  %v2396_v35 = vrot.slane %v2388_v22, %v7112_v52  ;;  %v2404_v18 = vcombine.low %v2371_v47, %v7332_v32  ;;  %v2405_v13 = vcombine.high %v2371_v47, %v7332_v32  ;;  %5855 = vmatprep.mubr.msk.bf16.mxu1 %vm6577_vm0, %v6576_v29 }
 0x388   : > { %v3103_v4 = vsel %vm2910_vm1, %v2312_v55, 0  ;;  %v2424_v5 = vcombine.low %v7030_v24, %v2335_v48  ;;  %v2425_v54 = vcombine.high %v7030_v24, %v2335_v48  ;;  %v1510_v9 = vcombine.low %v7152_v56, %v7158_v58  ;;  %5837 = vmatprep.mubr.msk.bf16.mxu0 %vm6577_vm0, %v6576_v29 }
 0x389   : > { %5854 = vmatpush3.bf16.xpose.msra.mxu1 %v3103_v4  ;;  %v2403_v31 = vrot.slane %v2389_v57, %v7112_v52  ;;  %v2412_v32 = vrot.slane %v2404_v18, %v7112_v52  ;;  %v2419_v8 = vrot.slane %v2405_v13, %v7112_v52  ;;  %v1578_v30 = vcombine.low %v7179_v59, %v7185_v19 }
 0x38a   : > { %v2432_v62 = vrot.slane %v2424_v5, %v7107_v46  ;;  %v2439_v24 = vrot.slane %v2425_v54, %v7107_v46  ;;  %5865 = vmatprep.subr.bf16.mxu1 %v6576_v29  ;;  %v2204_v38 = vcombine.low %v7261_v20, %v7264_v33  ;;  %v2220_v40 = vcombine.low %v7267_v42, %v7270_v36 }
 0x38b   : > { %v2628_v2 = vcombine.low %v2396_v35, %v2403_v31  ;;  %v5561_v45 = vcombine.high %v2396_v35, %v2403_v31  ;;  %v2644_v34 = vcombine.low %v2412_v32, %v2419_v8  ;;  %v5562_v60 = vcombine.high %v2412_v32, %v2419_v8 }
 0x38c   : > { %v1720_v1 = vpack.c.bf16 %v1578_v30, %v1510_v9  ;;  %v2212_v0 = vrot.slane %v2204_v38, %v7112_v52  ;;  %v2228_v44 = vrot.slane %v2220_v40, %v7112_v52  ;;  %v2272_v11 = vcombine.low %v7289_v49, %v7292_v50 }
 0x38d   : > { %v7433_v27 = vrot.slane %v2628_v2, %v7107_v46  ;;  %v7436_v14 = vrot.slane %v5561_v45, %v7107_v46  ;;  %v7439_v28 = vrot.slane %v2644_v34, %v7107_v46  ;;  %v7442_v47 = vrot.slane %v5562_v60, %v7107_v46 }
 0x38e   : > { %v2236_v22 = vcombine.low %v2212_v0, %v2228_v44  ;;  %v2280_v48 = vrot.slane %v2272_v11, %v7112_v52  ;;  %v2288_v55 = vcombine.low %v7295_v17, %v7298_v53  ;;  %v2103_v57 = vcombine.high %v7357_v10, %v7373_v6 }
 0x38f   : > { %v2171_v35 = vcombine.high %v7376_v26, %v7379_v41  ;;  %v2440_v18 = vcombine.low %v7334_v37, %v2347_v12  ;;  %v2441_v13 = vcombine.high %v7334_v37, %v2347_v12  ;;  %v1644_v4 = vcombine.low %v7301_v25, %v7307_v51 }
 0x390   : > { %5856 = vmatmul.mubr.msk.bf16.vlgmr.msra.gmra.mrb[8].mxu1 %vm2910_vm1, %v1720_v1  ;;  %v2296_v5 = vrot.slane %v2288_v55, %v7112_v52  ;;  %v1712_v54 = vcombine.low %v7388_v15, %v7396_v7  ;;  %v1511_v10 = vcombine.high %v7152_v56, %v7158_v58  ;;  %v1579_v6 = vcombine.high %v7179_v59, %v7185_v19 }
 0x391   : > { %v2314_v26 = vpack.c.bf16 %v2171_v35, %v2103_v57  ;;  %v2448_v41 = vrot.slane %v2440_v18, %v7107_v46  ;;  %v2455_v37 = vrot.slane %v2441_v13, %v7107_v46  ;;  %5867 = vmatprep.mubr.msk.bf16.mxu1 %vm6577_vm0, %v6576_v29  ;;  %v2237_v9 = vcombine.high %v2212_v0, %v2228_v44 }
 0x392   : > { %v2304_v31 = vcombine.low %v2280_v48, %v2296_v5  ;;  %v1717_v32 = vpack.c.bf16 %v1712_v54, %v1644_v4  ;;  %v1722_v8 = vpack.c.bf16 %v1579_v6, %v1511_v10  ;;  %v2305_v30 = vcombine.high %v2280_v48, %v2296_v5 }
 0x393   : > { %v3197_v38 = vsel %vm2910_vm1, %v2314_v26, 0  ;;  %v2456_v40 = vcombine.low %v2432_v62, %v2448_v41  ;;  %v2457_v56 = vcombine.high %v2432_v62, %v2448_v41  ;;  %v2472_v58 = vcombine.low %v2439_v24, %v2455_v37 }
 0x394   : > { %v2309_v2 = vpack.c.bf16 %v2304_v31, %v2236_v22  ;;  %5866 = vmatpush3.bf16.xpose.msra.mxu1 %v3197_v38  ;;  %v2473_v59 = vcombine.high %v2439_v24, %v2455_v37  ;;  %v2311_v19 = vpack.c.bf16 %v2305_v30, %v2237_v9  ;;  %v1645_v45 = vcombine.high %v7301_v25, %v7307_v51 }
 0x395   : > { %v2464_v34 = vrot.slane %v2456_v40, %v7112_v52  ;;  %v2471_v60 = vrot.slane %v2457_v56, %v7112_v52  ;;  %v2480_v1 = vrot.slane %v2472_v58, %v7112_v52  ;;  %v1713_v0 = vcombine.high %v7388_v15, %v7396_v7  ;;  %5877 = vmatprep.subr.bf16.mxu1 %v6576_v29 }
 0x396   : > { %v2962_v62 = vsel %vm2910_vm1, %v2309_v2, 0  ;;  %v2487_v44 = vrot.slane %v2473_v59, %v7112_v52  ;;  %v3056_v24 = vsel %vm2910_vm1, %v2311_v19, 0  ;;  %v2205_v25 = vcombine.high %v7261_v20, %v7264_v33 }
 0x397   : > { %5836 = vmatpush3.bf16.xpose.msra.mxu0 %v2962_v62  ;;  %v2696_v51 = vcombine.low %v2464_v34, %v2471_v60  ;;  %v5563_v11 = vcombine.high %v2464_v34, %v2471_v60  ;;  %v1719_v12 = vpack.c.bf16 %v1713_v0, %v1645_v45  ;;  %v2221_v22 = vcombine.high %v7267_v42, %v7270_v36 }
 0x398   : > { %v2712_v48 = vcombine.low %v2480_v1, %v2487_v44  ;;  %v5564_v15 = vcombine.high %v2480_v1, %v2487_v44  ;;  %5847 = vmatprep.subr.bf16.mxu0 %v6576_v29  ;;  %v2219_v7 = vrot.slane %v2205_v25, %v7112_v52  ;;  %v2273_v55 = vcombine.high %v7289_v49, %v7292_v50 }
 0x399   : > { %v2703_v57 = vrot.slane %v2696_v51, %v7107_v46  ;;  %v2711_v20 = vrot.slane %v5563_v11, %v7107_v46  ;;  %v2235_v33 = vrot.slane %v2221_v22, %v7112_v52  ;;  %v2289_v35 = vcombine.high %v7295_v17, %v7298_v53  ;;  %v7550_v11 = vld [vmem:[%s8274_s17] sm:$0xff] }
 0x39a   : > { %v2719_v42 = vrot.slane %v2712_v48, %v7107_v46  ;;  %v2727_v36 = vrot.slane %v5564_v15, %v7107_v46  ;;  %v2287_v18 = vrot.slane %v2273_v55, %v7112_v52  ;;  %v1646_v13 = vcombine.low %v7304_v61, %v7310_v63  ;;  %v7555_v48 = vld [vmem:[%s8274_s17 + $0x8] sm:$0xff] }
 0x39b   : > { %5868 = vmatmul.mubr.msk.bf16.vlgmr.msra.gmra.mrb[12].mxu1 %vm2910_vm1, %v1722_v8  ;;  %v2238_v49 = vcombine.low %v2219_v7, %v2235_v33  ;;  %v2303_v50 = vrot.slane %v2289_v35, %v7112_v52  ;;  %v1714_v4 = vcombine.low %v7391_v16, %v7399_v3  ;;  %v2660_v17 = vcombine.low %v7433_v27, %v7436_v14 }
 0x39c   : > { %v2676_v53 = vcombine.low %v7439_v28, %v7442_v47  ;;  %v2728_v5 = vcombine.low %v2703_v57, %v2711_v20  ;;  %v2744_v54 = vcombine.low %v2719_v42, %v2727_v36  ;;  %v2239_v10 = vcombine.high %v2219_v7, %v2235_v33  ;;  %5879 = vmatprep.mubr.msk.bf16.mxu1 %vm6577_vm0, %v6576_v29 }
 0x39d   : > { %v2306_v6 = vcombine.low %v2287_v18, %v2303_v50  ;;  %v1721_v26 = vpack.c.bf16 %v1714_v4, %v1646_v13  ;;  %v2668_v41 = vrot.slane %v2660_v17, %v7112_v52  ;;  %v2307_v37 = vcombine.high %v2287_v18, %v2303_v50 }
 0x39e   : > { %5838 = vmatmul.mubr.msk.bf16.vlgmr.msra.gmra.mrb[12].mxu0 %vm2910_vm1, %v1717_v32  ;;  %v2684_v9 = vrot.slane %v2676_v53, %v7112_v52  ;;  %v2736_v31 = vrot.slane %v2728_v5, %v7112_v52  ;;  %v2752_v8 = vrot.slane %v2744_v54, %v7112_v52  ;;  %v1647_v30 = vcombine.high %v7304_v61, %v7310_v63 }
 0x39f   : > { %5848 = vmatpush3.bf16.xpose.msra.mxu0 %v3056_v24  ;;  %5849 = vmatprep.mubr.msk.bf16.mxu0 %vm6577_vm0, %v6576_v29  ;;  %v2313_v38 = vpack.c.bf16 %v2306_v6, %v2238_v49  ;;  %v2315_v40 = vpack.c.bf16 %v2307_v37, %v2239_v10  ;;  %v1715_v56 = vcombine.high %v7391_v16, %v7399_v3 }
 0x3a0   : > { %5859 = vmatprep.subr.bf16.mxu0 %v6576_v29  ;;  %v2692_v32 = vcombine.low %v2668_v41, %v2684_v9  ;;  %v2760_v58 = vcombine.low %v2736_v31, %v2752_v8  ;;  %v2693_v2 = vcombine.high %v2668_v41, %v2684_v9  ;;  %v2761_v59 = vcombine.high %v2736_v31, %v2752_v8 }
 0x3a1   : > { %v1723_v19 = vpack.c.bf16 %v1715_v56, %v1647_v30  ;;  %v2661_v45 = vcombine.high %v7433_v27, %v7436_v14  ;;  %v2677_v34 = vcombine.high %v7439_v28, %v7442_v47  ;;  %v2729_v60 = vcombine.high %v2703_v57, %v2711_v20 }
 0x3a2   : > { %v2900_v61 = vpack.c.bf16 %v2760_v58, %v2692_v32  ;;  %v7521_v63 = vpack.c.bf16 %v2761_v59, %v2693_v2  ;;  %v2745_v16 = vcombine.high %v2719_v42, %v2727_v36  ;;  %v3150_v27 = vsel %vm2910_vm1, %v2313_v38, 0 }
 0x3a3   : > { %v2675_v1 = vrot.slane %v2661_v45, %v7112_v52  ;;  %v2691_v3 = vrot.slane %v2677_v34, %v7112_v52  ;;  %v2743_v0 = vrot.slane %v2729_v60, %v7112_v52  ;;  %v3244_v51 = vsel %vm2910_vm1, %v2315_v40, 0 }
 0x3a4   : > { %5878 = vmatpush3.bf16.msra.mxu1 %v2900_v61  ;;  %v2759_v62 = vrot.slane %v2745_v16, %v7112_v52 }
 0x3a5   : > { %5889 = vmatprep.subr.bf16.mxu1 %v6576_v29  ;;  %v2694_v14 = vcombine.low %v2675_v1, %v2691_v3  ;;  %v2695_v44 = vcombine.high %v2675_v1, %v2691_v3 }
 0x3a6   : > { %5850 = vmatmul.mubr.msk.bf16.vlgmr.msra.gmra.mrb[16].mxu0 %vm2910_vm1, %v1719_v12  ;;  %v2762_v28 = vcombine.low %v2743_v0, %v2759_v62  ;;  %v2763_v47 = vcombine.high %v2743_v0, %v2759_v62 }
 0x3a7   : > { %5860 = vmatpush3.bf16.xpose.msra.mxu0 %v3150_v27  ;;  %5861 = vmatprep.mubr.msk.bf16.mxu0 %vm6577_vm0, %v6576_v29 }
 0x3a8   : > { %5871 = vmatprep.subr.bf16.mxu0 %v6576_v29  ;;  %v7535_v24 = vpack.c.bf16 %v2762_v28, %v2694_v14  ;;  %v7537_v25 = vpack.c.bf16 %v2763_v47, %v2695_v44 }
 0x3ae   : > { %5862 = vmatmul.mubr.msk.bf16.vlgmr.msra.gmra.mrb[20].mxu0 %vm2910_vm1, %v1721_v26 }
 0x3af   : > { %5872 = vmatpush3.bf16.xpose.msra.mxu0 %v3244_v51  ;;  %5873 = vmatprep.mubr.msk.bf16.mxu0 %vm6577_vm0, %v6576_v29 }
 0x3b0   : > { %5883 = vmatprep.subr.bf16.mxu0 %v6576_v29 }
 0x3b6   : > { %5874 = vmatmul.mubr.msk.bf16.vlgmr.msra.gmra.mrb[24].mxu0 %vm2910_vm1, %v1723_v19 }
 0x3b7   : > { %5885 = vmatprep.mubr.msk.bf16.mxu0 %vm6577_vm0, %v6576_v29 }
 0x459   : > { %v2951_v12 = vpop.f32.mrb[8].mxu0  ;;  %v3045_v22 = vpop.f32.mrb[4].mxu1 }
 0x45a   : > { %v7558_v15 = vadd.f32 %v2951_v12, %v7550_v11  ;;  %v5833_v7 = vpop.f32.mrb[9].mxu0  ;;  %v5845_v55 = vpop.f32.mrb[5].mxu1  ;;  %v7561_v33 = vadd.f32 %v3045_v22, %v7550_v11 }
 0x45b   : > { %v2954_v57 = vpop.f32.mrb[10].mxu0  ;;  %v3048_v20 = vpop.f32.mrb[6].mxu1 }
 0x45c   : > { %v7564_v35 = vadd.f32 %v2954_v57, %v7555_v48  ;;  %v5834_v42 = vpop.f32.mrb[11].mxu0  ;;  %v5846_v36 = vpop.f32.mrb[7].mxu1  ;;  %v3288_v18 = vsel %vm3287_vm2, %v7558_v15, -inf  ;;  %v7569_v13 = vadd.f32 %v3048_v20, %v7555_v48  ;;  %v3300_v50 = vsel %vm3287_vm2, %v7561_v33, -inf }
 0x45d   : > { %3289 = vmax.xlane.f32.xlu0 %v3288_v18 }
 0x45e   : > { %v3291_v49 = vsel %vm3287_vm2, %v7564_v35, -inf  ;;  %v3303_v4 = vsel %vm3287_vm2, %v7569_v13, -inf }
 0x45f   : > { %3292 = vmax.xlane.f32.xlu1 %v3291_v49 }
 0x461   : > { %3301 = vmax.xlane.f32.xlu0 %v3300_v50  ;;  %v7643_v50 = vpop.permute.xlu0 %2324 }
 0x463   : > { %v3139_v17 = vpop.f32.mrb[8].mxu1  ;;  %3304 = vmax.xlane.f32.xlu1 %v3303_v4  ;;  %v7645_v4 = vpop.permute.xlu1 %2326 }
 0x464   : > { %v5857_v53 = vpop.f32.mrb[9].mxu1  ;;  %v7592_v32 = vadd.f32 %v3139_v17, %v7550_v11 }
 0x465   : > { %v3142_v5 = vpop.f32.mrb[10].mxu1 }
 0x466   : > { %v7578_v54 = vadd.f32 %v3142_v5, %v7555_v48  ;;  %v5858_v10 = vpop.f32.mrb[11].mxu1  ;;  %v3312_v19 = vsel %vm3287_vm2, %v7592_v32, -inf }
 0x468   : > { %v3315_v6 = vsel %vm3287_vm2, %v7578_v54, -inf }
 0x469   : > { %3316 = vmax.xlane.f32.xlu1 %v3315_v6 }
 0x46e   : > { %v3233_v26 = vpop.f32.mrb[12].mxu1 }
 0x46f   : > { %v7583_v41 = vadd.f32 %v3233_v26, %v7550_v11  ;;  %v5869_v37 = vpop.f32.mrb[13].mxu1 }
 0x470   : > { %v3236_v9 = vpop.f32.mrb[14].mxu1 }
 0x471   : > { %v2998_v31 = vpop.f32.mrb[12].mxu0  ;;  %v7586_v8 = vadd.f32 %v3236_v9, %v7555_v48  ;;  %v5870_v30 = vpop.f32.mrb[15].mxu1 }
 0x472   : > { %v7589_v38 = vadd.f32 %v2998_v31, %v7550_v11  ;;  %v5839_v40 = vpop.f32.mrb[13].mxu0 }
 0x473   : > { %v3001_v56 = vpop.f32.mrb[14].mxu0  ;;  %v3327_v42 = vsel %vm3287_vm2, %v7586_v8, -inf }
 0x474   : > { %v5840_v58 = vpop.f32.mrb[15].mxu0  ;;  %v3294_v2 = vsel %vm3287_vm2, %v7589_v38, -inf  ;;  %v7597_v59 = vadd.f32 %v3001_v56, %v7555_v48 }
 0x475   : > { %3295 = vmax.xlane.f32.xlu0 %v3294_v2 }
 0x476   : > { %v3297_v3 = vsel %vm3287_vm2, %v7597_v59, -inf }
 0x479   : > { %3313 = vmax.xlane.f32.xlu0 %v3312_v19  ;;  %v3092_v45 = vpop.f32.mrb[16].mxu0 }
 0x47a   : > { %v5851_v61 = vpop.f32.mrb[17].mxu0  ;;  %v7602_v60 = vadd.f32 %v3092_v45, %v7550_v11 }
 0x47b   : > { %v3095_v34 = vpop.f32.mrb[18].mxu0 }
 0x47c   : > { %v7605_v1 = vadd.f32 %v3095_v34, %v7555_v48  ;;  %v5852_v16 = vpop.f32.mrb[19].mxu0  ;;  %v3306_v62 = vsel %vm3287_vm2, %v7602_v60, -inf }
 0x47d   : > { %3298 = vmax.xlane.f32.xlu0 %v3297_v3 }
 0x47e   : > { %v3309_v0 = vsel %vm3287_vm2, %v7605_v1, -inf }
 0x47f   : > { %3310 = vmax.xlane.f32.xlu1 %v3309_v0 }
 0x481   : > { %3307 = vmax.xlane.f32.xlu0 %v3306_v62  ;;  %v3186_v27 = vpop.f32.mrb[20].mxu0 }
 0x482   : > { %v7614_v14 = vadd.f32 %v3186_v27, %v7550_v11  ;;  %v5863_v44 = vpop.f32.mrb[21].mxu0 }
 0x483   : > { %v3189_v28 = vpop.f32.mrb[22].mxu0 }
 0x484   : > { %v7617_v47 = vadd.f32 %v3189_v28, %v7555_v48  ;;  %v5864_v51 = vpop.f32.mrb[23].mxu0 }
 0x486   : > { %v3321_v36 = vsel %vm3287_vm2, %v7617_v47, -inf }
 0x489   : > { %v3280_v12 = vpop.f32.mrb[24].mxu0 }
 0x48a   : > { %v7620_v22 = vadd.f32 %v3280_v12, %v7550_v11  ;;  %v5875_v7 = vpop.f32.mrb[25].mxu0  ;;  %v3324_v11 = vsel %vm3287_vm2, %v7583_v41, -inf }
 0x48b   : > { %v3283_v55 = vpop.f32.mrb[26].mxu0 }
 0x48c   : > { %v7623_v57 = vadd.f32 %v3283_v55, %v7555_v48  ;;  %v5876_v20 = vpop.f32.mrb[27].mxu0  ;;  %v3318_v48 = vsel %vm3287_vm2, %v7614_v14, -inf  ;;  %v3330_v49 = vsel %vm3287_vm2, %v7620_v22, -inf }
 0x48e   : > { %v3333_v18 = vsel %vm3287_vm2, %v7623_v57, -inf }
 0x490   : > { %2338 = vrot.lane.b32.xlu1 %v7028_v23, %s6574_s8 }
 0x497   : > { %2336 = vrot.lane.b32.xlu0 %v7020_v21, %s6574_s8 }
 0x4b4   : > { %3328 = vmax.xlane.f32.xlu1 %v3327_v42 }
 0x4b6   : > { %3325 = vmax.xlane.f32.xlu0 %v3324_v11 }
 0x4b8   : > { %3322 = vmax.xlane.f32.xlu1 %v3321_v36 }
 0x4ba   : > { %3319 = vmax.xlane.f32.xlu0 %v3318_v48 }
 0x4bc   : > { %3334 = vmax.xlane.f32.xlu1 %v3333_v18 }
 0x4be   : > { %3331 = vmax.xlane.f32.xlu0 %v3330_v49 }
 0x4d4   : > { %2348 = vrot.lane.b32.xlu0 %v7020_v21, %s6575_s13 }
 0x4ea   : > { %v3290_v17 = vpop.xlane.xlu0 %3289 }
 0x4eb   : > { %v3336_v53 = vsub.f32 %v7558_v15, %v3290_v17 }
 0x4ec   : > { %v3293_v5 = vpop.xlane.xlu1 %3292 }
 0x4ed   : > { %v3352_v10 = vmul.f32 1.442695, %v3336_v53  ;;  %v3337_v6 = vsub.f32 %v7564_v35, %v3293_v5 }
 0x4ee   : > { %v3302_v15 = vpop.xlane.xlu0 %3301 }
 0x4ef   : > { %6214 = vpow2.f32 %v3352_v10  ;;  %v3354_v26 = vmul.f32 1.442695, %v3337_v6  ;;  %v3340_v40 = vsub.f32 %v7561_v33, %v3302_v15 }
 0x4f0   : > { %v3305_v56 = vpop.xlane.xlu1 %3304 }
 0x4f1   : > { %6216 = vpow2.f32 %v3354_v26  ;;  %v3360_v2 = vmul.f32 1.442695, %v3340_v40  ;;  %v3341_v10 = vsub.f32 %v7569_v13, %v3305_v56 }
 0x4f3   : > { %v3362_v6 = vmul.f32 1.442695, %v3341_v10 }
 0x4f6   : > { %v3317_v61 = vpop.xlane.xlu1 %3316 }
 0x4f7   : > { %v3345_v26 = vsub.f32 %v7578_v54, %v3317_v61 }
 0x4f9   : > { %v7649_v37 = vpop.eup %6214 }
 0x4fa   : > { %v3384_v9 = vsel %vm3287_vm2, %v7649_v37, 0.0 }
 0x4fb   : > { %v7653_v31 = vpop.eup %6216  ;;  %3385 = vadd.xlane.f32.xlu0 %v3384_v9 }
 0x4fc   : > { %v3387_v30 = vsel %vm3287_vm2, %v7653_v31, 0.0 }
 0x4fd   : > { %3388 = vadd.xlane.f32.xlu1 %v3387_v30  ;;  %v3370_v30 = vmul.f32 1.442695, %v3345_v26 }
 0x502   : > { %v3296_v35 = vpop.xlane.xlu0 %3295 }
 0x503   : > { %v3338_v58 = vsub.f32 %v7589_v38, %v3296_v35 }
 0x505   : > { %v3356_v19 = vmul.f32 1.442695, %v3338_v58 }
 0x506   : > { %v3314_v45 = vpop.xlane.xlu0 %3313 }
 0x507   : > { %6218 = vpow2.f32 %v3356_v19  ;;  %v3344_v44 = vsub.f32 %v7592_v32, %v3314_v45 }
 0x508   : > { %6220 = vpow2.f32 %v3360_v2 }
 0x509   : > { %v3368_v42 = vmul.f32 1.442695, %v3344_v44 }
 0x50a   : > { %v3299_v34 = vpop.xlane.xlu0 %3298 }
 0x50b   : > { %v3339_v16 = vsub.f32 %v7597_v59, %v3299_v34 }
 0x50c   : > { %v3311_v3 = vpop.xlane.xlu1 %3310 }
 0x50d   : > { %v3358_v0 = vmul.f32 1.442695, %v3339_v16  ;;  %v3343_v62 = vsub.f32 %v7605_v1, %v3311_v3 }
 0x50e   : > { %v3308_v27 = vpop.xlane.xlu0 %3307 }
 0x50f   : > { %6222 = vpow2.f32 %v3358_v0  ;;  %v3342_v33 = vsub.f32 %v7602_v60, %v3308_v27  ;;  %v3366_v51 = vmul.f32 1.442695, %v3343_v62 }
 0x510   : > { %v7663_v38 = vpop.permute.xlu1 %2338 }
 0x511   : > { %v7665_v28 = vpop.eup %6218  ;;  %v3364_v12 = vmul.f32 1.442695, %v3342_v33  ;;  %v2560_v7 = vcombine.low %v7028_v23, %v7663_v38  ;;  %v2561_v59 = vcombine.high %v7028_v23, %v7663_v38 }
 0x512   : > { %v7671_v55 = vpop.permute.xlu0 %2336  ;;  %v3390_v1 = vsel %vm3287_vm2, %v7665_v28, 0.0  ;;  %v7675_v60 = vpop.eup %6220 }
 0x513   : > { %6224 = vpow2.f32 %v3364_v12  ;;  %v2492_v32 = vcombine.low %v7020_v21, %v7671_v55  ;;  %3391 = vadd.xlane.f32.xlu0 %v3390_v1  ;;  %v2493_v20 = vcombine.high %v7020_v21, %v7671_v55  ;;  %v3396_v11 = vsel %vm3287_vm2, %v7675_v60, 0.0 }
 0x514   : > { %6226 = vpow2.f32 %v3366_v51 }
 0x515   : > { %6228 = vpow2.f32 %v3368_v42  ;;  %v2500_v44 = vrot.slane %v2492_v32, %v7107_v46 }
 0x516   : > { %6230 = vpow2.f32 %v3362_v6 }
 0x517   : > { %3397 = vadd.xlane.f32.xlu0 %v3396_v11  ;;  %6232 = vpow2.f32 %v3370_v30 }
 0x519   : > { %v7683_v36 = vpop.eup %6222 }
 0x51a   : > { %v3393_v48 = vsel %vm3287_vm2, %v7683_v36, 0.0 }
 0x51b   : > { %3394 = vadd.xlane.f32.xlu1 %v3393_v48 }
 0x51d   : > { %v7687_v18 = vpop.eup %6224 }
 0x51e   : > { %v3402_v49 = vsel %vm3287_vm2, %v7687_v18, 0.0  ;;  %v7691_v17 = vpop.eup %6226 }
 0x51f   : > { %3403 = vadd.xlane.f32.xlu0 %v3402_v49  ;;  %v3405_v21 = vsel %vm3287_vm2, %v7691_v17, 0.0  ;;  %v7695_v53 = vpop.eup %6228 }
 0x520   : > { %v3408_v5 = vsel %vm3287_vm2, %v7695_v53, 0.0  ;;  %v7708_v0 = vpop.eup %6230 }
 0x521   : > { %v7713_v27 = vpop.eup %6232 }
 0x522   : > { %v3411_v55 = vsel %vm3287_vm2, %v7713_v27, 0.0 }
 0x523   : > { %3406 = vadd.xlane.f32.xlu0 %v3405_v21 }
 0x527   : > { %3409 = vadd.xlane.f32.xlu0 %v3408_v5 }
 0x52c   : > { %2350 = vrot.lane.b32.xlu1 %v7028_v23, %s6575_s13 }
 0x541   : > { %v3329_v9 = vpop.xlane.xlu1 %3328 }
 0x542   : > { %v3349_v40 = vsub.f32 %v7586_v8, %v3329_v9 }
 0x543   : > { %v3326_v15 = vpop.xlane.xlu0 %3325 }
 0x544   : > { %v3348_v58 = vsub.f32 %v7583_v41, %v3326_v15  ;;  %v3378_v13 = vmul.f32 1.442695, %v3349_v40 }
 0x545   : > { %v3323_v35 = vpop.xlane.xlu1 %3322 }
 0x546   : > { %v3347_v2 = vsub.f32 %v7617_v47, %v3323_v35  ;;  %v3376_v16 = vmul.f32 1.442695, %v3348_v58 }
 0x547   : > { %v3320_v19 = vpop.xlane.xlu0 %3319 }
 0x548   : > { %v3374_v45 = vmul.f32 1.442695, %v3347_v2  ;;  %v3346_v34 = vsub.f32 %v7614_v14, %v3320_v19  ;;  %v3399_v14 = vsel %vm3287_vm2, %v7708_v0, 0.0 }
 0x549   : > { %v3335_v56 = vpop.xlane.xlu1 %3334 }
 0x54a   : > { %6234 = vpow2.f32 %v3374_v45  ;;  %v3372_v54 = vmul.f32 1.442695, %v3346_v34  ;;  %v3351_v61 = vsub.f32 %v7623_v57, %v3335_v56 }
 0x54b   : > { %v3332_v3 = vpop.xlane.xlu0 %3331 }
 0x54c   : > { %6236 = vpow2.f32 %v3372_v54  ;;  %v3350_v8 = vsub.f32 %v7620_v22, %v3332_v3  ;;  %v3382_v41 = vmul.f32 1.442695, %v3351_v61  ;;  %v2507_v22 = vrot.slane %v2493_v20, %v7107_v46 }
 0x54d   : > { %6238 = vpow2.f32 %v3378_v13 }
 0x54e   : > { %6240 = vpow2.f32 %v3376_v16  ;;  %v3380_v47 = vmul.f32 1.442695, %v3350_v8 }
 0x54f   : > { %v2349_v62 = vpop.permute.xlu0 %2348  ;;  %6242 = vpow2.f32 %v3382_v41 }
 0x550   : > { %v2508_v33 = vcombine.low %v7643_v50, %v2349_v62  ;;  %v2509_v57 = vcombine.high %v7643_v50, %v2349_v62  ;;  %3400 = vadd.xlane.f32.xlu1 %v3399_v14  ;;  %6244 = vpow2.f32 %v3380_v47 }
 0x552   : > { %v2516_v51 = vrot.slane %v2508_v33, %v7107_v46  ;;  %v2523_v12 = vrot.slane %v2509_v57, %v7107_v46 }
 0x554   : > { %v7723_v1 = vpop.eup %6234  ;;  %v2524_v42 = vcombine.low %v2500_v44, %v2516_v51  ;;  %v2525_v11 = vcombine.high %v2500_v44, %v2516_v51  ;;  %v2540_v48 = vcombine.low %v2507_v22, %v2523_v12  ;;  %v2541_v50 = vcombine.high %v2507_v22, %v2523_v12  ;;  %3412 = vadd.xlane.f32.xlu1 %v3411_v55 }
 0x555   : > { %v3417_v6 = vsel %vm3287_vm2, %v7723_v1, 0.0 }
 0x556   : > { %v7725_v49 = vpop.eup %6236  ;;  %v2532_v32 = vrot.slane %v2524_v42, %v7112_v52  ;;  %v2539_v20 = vrot.slane %v2525_v11, %v7112_v52  ;;  %v2548_v21 = vrot.slane %v2540_v48, %v7112_v52  ;;  %v2555_v5 = vrot.slane %v2541_v50, %v7112_v52 }
 0x557   : > { %v7731_v10 = vpop.eup %6238  ;;  %v3414_v26 = vsel %vm3287_vm2, %v7725_v49, 0.0 }
 0x558   : > { %v7737_v9 = vpop.eup %6240  ;;  %v2764_v30 = vcombine.low %v2532_v32, %v2539_v20  ;;  %v5565_v15 = vcombine.high %v2532_v32, %v2539_v20  ;;  %v2780_v40 = vcombine.low %v2548_v21, %v2555_v5  ;;  %v5566_v35 = vcombine.high %v2548_v21, %v2555_v5  ;;  %3418 = vadd.xlane.f32.xlu1 %v3417_v6 }
 0x559   : > { %3415 = vadd.xlane.f32.xlu0 %v3414_v26  ;;  %v7743_v34 = vpop.eup %6242  ;;  %v3423_v13 = vsel %vm3287_vm2, %v7731_v10, 0.0  ;;  %v3420_v56 = vsel %vm3287_vm2, %v7737_v9, 0.0 }
 0x55a   : > { %v2771_v58 = vrot.slane %v2764_v30, %v7107_v46  ;;  %v2779_v2 = vrot.slane %v5565_v15, %v7107_v46  ;;  %v2787_v19 = vrot.slane %v2780_v40, %v7107_v46  ;;  %v2795_v45 = vrot.slane %v5566_v35, %v7107_v46  ;;  %v7749_v16 = vpop.eup %6244 }
 0x55b   : > { %v3429_v33 = vsel %vm3287_vm2, %v7743_v34, 0.0  ;;  %v3426_v57 = vsel %vm3287_vm2, %v7749_v16, 0.0 }
 0x55c   : > { %3424 = vadd.xlane.f32.xlu1 %v3423_v13  ;;  %v2796_v54 = vcombine.low %v2771_v58, %v2779_v2  ;;  %v2812_v61 = vcombine.low %v2787_v19, %v2795_v45  ;;  %v2797_v3 = vcombine.high %v2771_v58, %v2779_v2  ;;  %v2813_v8 = vcombine.high %v2787_v19, %v2795_v45 }
 0x55d   : > { %3421 = vadd.xlane.f32.xlu0 %v3420_v56 }
 0x55e   : > { %v7752_v41 = vrot.slane %v2796_v54, %v7112_v52  ;;  %v7755_v47 = vrot.slane %v2812_v61, %v7112_v52  ;;  %v7758_v62 = vrot.slane %v2797_v3, %v7112_v52  ;;  %v7761_v14 = vrot.slane %v2813_v8, %v7112_v52 }
 0x560   : > { %3430 = vadd.xlane.f32.xlu1 %v3429_v33  ;;  %v2828_v44 = vcombine.low %v7752_v41, %v7755_v47  ;;  %v2829_v22 = vcombine.high %v7752_v41, %v7755_v47  ;;  %v2830_v51 = vcombine.low %v7758_v62, %v7761_v14  ;;  %v2831_v12 = vcombine.high %v7758_v62, %v7761_v14 }
 0x561   : > { %3427 = vadd.xlane.f32.xlu0 %v3426_v57 }
 0x588   : > { %v3386_v55 = vpop.xlane.xlu0 %3385 }
 0x589   : > { %6246 = vrcp.f32 %v3386_v55 }
 0x58a   : > { %v3389_v42 = vpop.xlane.xlu1 %3388 }
 0x58b   : > { %6248 = vrcp.f32 %v3389_v42 }
 0x593   : > { %v6247_v11 = vpop.eup %6246 }
 0x594   : > { %v3448_v50 = vmul.f32 %v6247_v11, %v7649_v37 }
 0x595   : > { %v6249_v48 = vpop.eup %6248 }
 0x596   : > { %v3449_v32 = vmul.f32 %v6249_v48, %v7653_v31  ;;  %v2568_v31 = vrot.slane %v2560_v7, %v7107_v46 }
 0x598   : > { %v3464_v20 = vpack.c.bf16 %v3449_v32, %v3448_v50 }
 0x59a   : > { %5880 = vmatmul.mubr.msk.bf16.vlgmr.msra.gmra.mrb[16].mxu1 %vm3287_vm2, %v3464_v20 }
 0x59b   : > { %5890 = vmatpush3.bf16.msra.mxu1 %v7521_v63  ;;  %5891 = vmatprep.mubr.msk.bf16.mxu1 %vm6577_vm0, %v6576_v29  ;;  %v2575_v63 = vrot.slane %v2561_v59, %v7107_v46 }
 0x59c   : > { %5901 = vmatprep.subr.bf16.mxu1 %v6576_v29 }
 0x5a0   : > { %v3392_v21 = vpop.xlane.xlu0 %3391 }
 0x5a4   : > { %v7782_v6 = vpop.xlane.xlu0 %3397 }
 0x5a8   : > { %v3395_v5 = vpop.xlane.xlu1 %3394 }
 0x5a9   : > { %6250 = vrcp.f32 %v3395_v5 }
 0x5aa   : > { %6252 = vrcp.f32 %v3392_v21 }
 0x5ac   : > { %v2351_v26 = vpop.permute.xlu1 %2350  ;;  %v3404_v35 = vpop.xlane.xlu0 %3403 }
 0x5ad   : > { %v2576_v30 = vcombine.low %v7645_v4, %v2351_v26  ;;  %v2577_v37 = vcombine.high %v7645_v4, %v2351_v26 }
 0x5af   : > { %v2584_v15 = vrot.slane %v2576_v30, %v7107_v46  ;;  %v2591_v40 = vrot.slane %v2577_v37, %v7107_v46 }
 0x5b0   : > { %v3407_v61 = vpop.xlane.xlu0 %3406 }
 0x5b1   : > { %v2592_v58 = vcombine.low %v2568_v31, %v2584_v15  ;;  %v2593_v2 = vcombine.high %v2568_v31, %v2584_v15  ;;  %v2608_v19 = vcombine.low %v2575_v63, %v2591_v40  ;;  %v2609_v4 = vcombine.high %v2575_v63, %v2591_v40 }
 0x5b2   : > { %6254 = vrcp.f32 %v3407_v61 }
 0x5b3   : > { %v2600_v45 = vrot.slane %v2592_v58, %v7112_v52  ;;  %v2607_v7 = vrot.slane %v2593_v2, %v7112_v52  ;;  %v2616_v13 = vrot.slane %v2608_v19, %v7112_v52  ;;  %v2623_v23 = vrot.slane %v2609_v4, %v7112_v52  ;;  %v6251_v50 = vpop.eup %6250 }
 0x5b4   : > { %6256 = vrcp.f32 %v3404_v35  ;;  %v6253_v26 = vpop.eup %6252  ;;  %v3410_v14 = vpop.xlane.xlu0 %3409 }
 0x5b5   : > { %v2832_v38 = vcombine.low %v2600_v45, %v2607_v7  ;;  %v5567_v59 = vcombine.high %v2600_v45, %v2607_v7  ;;  %v2848_v56 = vcombine.low %v2616_v13, %v2623_v23  ;;  %v5568_v54 = vcombine.high %v2616_v13, %v2623_v23 }
 0x5b6   : > { %6258 = vrcp.f32 %v7782_v6 }
 0x5b7   : > { %v2839_v3 = vrot.slane %v2832_v38, %v7107_v46  ;;  %v2847_v8 = vrot.slane %v5567_v59, %v7107_v46  ;;  %v2855_v33 = vrot.slane %v2848_v56, %v7107_v46  ;;  %v2863_v57 = vrot.slane %v5568_v54, %v7107_v46 }
 0x5b8   : > { %v3451_v46 = vmul.f32 %v6251_v50, %v7683_v36 }
 0x5b9   : > { %v2864_v55 = vcombine.low %v2839_v3, %v2847_v8  ;;  %v2880_v42 = vcombine.low %v2855_v33, %v2863_v57  ;;  %v2865_v11 = vcombine.high %v2839_v3, %v2847_v8  ;;  %v2881_v48 = vcombine.high %v2855_v33, %v2863_v57 }
 0x5bb   : > { %v2872_v32 = vrot.slane %v2864_v55, %v7112_v52  ;;  %v2888_v20 = vrot.slane %v2880_v42, %v7112_v52  ;;  %v2879_v21 = vrot.slane %v2865_v11, %v7112_v52  ;;  %v2895_v5 = vrot.slane %v2881_v48, %v7112_v52 }
 0x5bc   : > { %v3450_v52 = vmul.f32 %v6253_v26, %v7665_v28  ;;  %v6255_v36 = vpop.eup %6254 }
 0x5bd   : > { %v2896_v30 = vcombine.low %v2872_v32, %v2888_v20  ;;  %v2897_v37 = vcombine.high %v2872_v32, %v2888_v20  ;;  %v2898_v31 = vcombine.low %v2879_v21, %v2895_v5  ;;  %v2899_v63 = vcombine.high %v2879_v21, %v2895_v5 }
 0x5be   : > { %v3465_v2 = vpack.c.bf16 %v3451_v46, %v3450_v52  ;;  %v3455_v41 = vmul.f32 %v6255_v36, %v7691_v17 }
 0x5bf   : > { %v2901_v15 = vpack.c.bf16 %v2896_v30, %v2828_v44  ;;  %v2903_v40 = vpack.c.bf16 %v2897_v37, %v2829_v22  ;;  %v2905_v35 = vpack.c.bf16 %v2898_v31, %v2830_v51  ;;  %v2907_v58 = vpack.c.bf16 %v2899_v63, %v2831_v12  ;;  %v6257_v44 = vpop.eup %6256 }
 0x5c0   : > { %v3454_v28 = vmul.f32 %v6257_v44, %v7687_v18  ;;  %v6259_v51 = vpop.eup %6258 }
 0x5c1   : > { %5884 = vmatpush3.bf16.msra.mxu0 %v2901_v15  ;;  %v3452_v19 = vmul.f32 %v6259_v51, %v7675_v60 }
 0x5c2   : > { %5895 = vmatprep.subr.bf16.mxu0 %v6576_v29  ;;  %v3467_v47 = vpack.c.bf16 %v3455_v41, %v3454_v28  ;;  %v6122_v41 = vld [vmem:[%s6880_s28 + $0x20] sm:$0xff]  }
 0x5c4   : > { %5886 = vmatmul.mubr.msk.bf16.vlgmr.msra.gmra.mrb[28].mxu0 %vm3287_vm2, %v3465_v2  ;;  %v6121_v2 = vld [vmem:[%s6880_s28 + $0x8] sm:$0xff]  }
 0x5c5   : > { %5896 = vmatpush3.bf16.msra.mxu0 %v2903_v40  ;;  %5897 = vmatprep.mubr.msk.bf16.mxu0 %vm6577_vm0, %v6576_v29 }
 0x5c6   : > { %5907 = vmatprep.subr.bf16.mxu0 %v6576_v29 }
 0x5cc   : > { %5898 = vmatmul.mubr.msk.bf16.vlgmr.msra.gmra.mrb[32].mxu0 %vm3287_vm2, %v3467_v47 }
 0x5cd   : > { %5908 = vmatpush3.bf16.msra.mxu0 %v2905_v35  ;;  %5909 = vmatprep.mubr.msk.bf16.mxu0 %vm6577_vm0, %v6576_v29 }
 0x5ce   : > { %5919 = vmatprep.subr.bf16.mxu0 %v6576_v29 }
 0x5dd   : > { %v3401_v62 = vpop.xlane.xlu1 %3400 }
 0x5de   : > { %6260 = vrcp.f32 %v3401_v62 }
 0x5e1   : > { %v3413_v22 = vpop.xlane.xlu1 %3412 }
 0x5e2   : > { %6262 = vrcp.f32 %v3413_v22 }
 0x5e3   : > { %6264 = vrcp.f32 %v3410_v14 }
 0x5e5   : > { %v3419_v17 = vpop.xlane.xlu1 %3418 }
 0x5e6   : > { %6266 = vrcp.f32 %v3419_v17  ;;  %v3416_v18 = vpop.xlane.xlu0 %3415 }
 0x5e7   : > { %6268 = vrcp.f32 %v3416_v18 }
 0x5e8   : > { %v6261_v12 = vpop.eup %6260 }
 0x5e9   : > { %v3453_v4 = vmul.f32 %v6261_v12, %v7708_v0  ;;  %v3425_v45 = vpop.xlane.xlu1 %3424 }
 0x5ea   : > { %6270 = vrcp.f32 %v3425_v45  ;;  %v3422_v7 = vpop.xlane.xlu0 %3421 }
 0x5eb   : > { %6272 = vrcp.f32 %v3422_v7  ;;  %v3466_v6 = vpack.c.bf16 %v3453_v4, %v3452_v19  ;;  %v6123_v4 = vld [vmem:[%s6880_s28 + $0x28] sm:$0xff]  }
 0x5ec   : > { %v6263_v13 = vpop.eup %6262 }
 0x5ed   : > { %v3431_v23 = vpop.xlane.xlu1 %3430  ;;  %5892 = vmatmul.mubr.msk.bf16.vlgmr.msra.gmra.mrb[20].mxu1 %vm3287_vm2, %v3466_v6  ;;  %v6265_v38 = vpop.eup %6264  ;;  %v3457_v60 = vmul.f32 %v6263_v13, %v7713_v27 }
 0x5ee   : > { %6274 = vrcp.f32 %v3431_v23  ;;  %5902 = vmatpush3.bf16.msra.mxu1 %v7535_v24  ;;  %v3428_v59 = vpop.xlane.xlu0 %3427  ;;  %5903 = vmatprep.mubr.msk.bf16.mxu1 %vm6577_vm0, %v6576_v29  ;;  %v3456_v54 = vmul.f32 %v6265_v38, %v7695_v53 }
 0x5ef   : > { %6276 = vrcp.f32 %v3428_v59  ;;  %5913 = vmatprep.subr.bf16.mxu1 %v6576_v29 }
 0x5f0   : > { %v6267_v0 = vpop.eup %6266  ;;  %v3468_v8 = vpack.c.bf16 %v3457_v60, %v3456_v54  ;;  %v6125_v54 = vld [vmem:[%s6880_s28 + $0x38] sm:$0xff]  }
 0x5f1   : > { %v6269_v56 = vpop.eup %6268  ;;  %v3459_v61 = vmul.f32 %v6267_v0, %v7723_v1 }
 0x5f2   : > { %v3458_v3 = vmul.f32 %v6269_v56, %v7725_v49  ;;  %v6124_v56 = vld [vmem:[%s6880_s28 + $0x30] sm:$0xff]  }
 0x5f4   : > { %v6271_v33 = vpop.eup %6270  ;;  %v3469_v24 = vpack.c.bf16 %v3459_v61, %v3458_v3  ;;  %v5601_v61 = vld [vmem:[%s8275_s9] ss:$0 sm:$0xff] }
 0x5f5   : > { %v6273_v57 = vpop.eup %6272  ;;  %5904 = vmatmul.mubr.msk.bf16.vlgmr.msra.gmra.mrb[24].mxu1 %vm3287_vm2, %v3468_v8  ;;  %v3461_v27 = vmul.f32 %v6271_v33, %v7731_v10  ;;  %v6118_v10 = vld [vmem:[%s6880_s28 + $0x10] sm:$0xff]  }
 0x5f6   : > { %5910 = vmatmul.mubr.msk.bf16.vlgmr.msra.gmra.mrb[36].mxu0 %vm3287_vm2, %v3469_v24  ;;  %5914 = vmatpush3.bf16.msra.mxu1 %v7537_v25  ;;  %v3460_v55 = vmul.f32 %v6273_v57, %v7737_v9  ;;  %v6119_v9 = vld [vmem:[%s6880_s28 + $0x18] sm:$0xff]  }
 0x5f7   : > { %5920 = vmatpush3.bf16.msra.mxu0 %v2907_v58  ;;  %5915 = vmatprep.mubr.msk.bf16.mxu1 %vm6577_vm0, %v6576_v29 }
 0x5f8   : > { %v6275_v53 = vpop.eup %6274  ;;  %5921 = vmatprep.mubr.msk.bf16.mxu0 %vm6577_vm0, %v6576_v29  ;;  %v3470_v25 = vpack.c.bf16 %v3461_v27, %v3460_v55  ;;  %5925 = vmatprep.subr.bf16.mxu1 %v6118_v10  ;;  %v6120_v29 = vld [vmem:[%s6880_s28] sm:$0xff]  }
 0x5f9   : > { %v6277_v1 = vpop.eup %6276  ;;  %v3463_v49 = vmul.f32 %v6275_v53, %v7743_v34  ;;  %v6318_v55 = vld [vmem:[#allocation2] sm:$0xff] }
 0x5fa   : > { %v3462_v42 = vmul.f32 %v6277_v1, %v7749_v16 }
 0x5fc   : > { %v3471_v11 = vpack.c.bf16 %v3463_v49, %v3462_v42  ;;  %v6319_v42 = vld [vmem:[#allocation2 + $0x8] sm:$0xff] }
 0x5fd   : > { %5916 = vmatmul.mubr.msk.bf16.vlgmr.msra.gmra.mrb[28].mxu1 %vm3287_vm2, %v3470_v25 }
 0x5fe   : > { %5922 = vmatmul.mubr.msk.bf16.vlgmr.msra.gmra.mrb[40].mxu0 %vm3287_vm2, %v3471_v11  ;;  %5926 = vmatpush3.bf16.msra.mxu1 %v6118_v10  ;;  %v6320_v11 = vld [vmem:[#allocation2 + $0x10] sm:$0xff] }
 0x5ff   : > { %4453 = vmatprep.mubr.bf16.mxu0 %v6572_v43  ;;  %5927 = vmatprep.subr.bf16.mxu1 %v6119_v9 }
 0x602   : > { %5928 = vmatpush3.bf16.msra.mxu1 %v6119_v9  ;;  %v6321_v9 = vld [vmem:[#allocation2 + $0x18] sm:$0xff] }
 0x603   : > { %5933 = vmatprep.subr.bf16.mxu1 %v6120_v29 }
 0x66d   : > { %v3509_v48 = vpop.f32.mrb[16].mxu1 }
 0x66e   : > { %v5881_v34 = vpop.f32.mrb[17].mxu1 }
 0x66f   : > { %v3512_v50 = vpop.f32.mrb[18].mxu1  ;;  %v6128_v34 = vld [vmem:[%s6887_s23 + $0x4] ss:$16 sps:$4 sm:$0xff]  }
 0x670   : > { %v3824_v16 = vpack.c.bf16 %v3512_v50, %v3509_v48  ;;  %v5882_v32 = vpop.f32.mrb[19].mxu1  ;;  %v6126_v48 = vld [vmem:[%s6887_s23] ss:$16 sps:$4 sm:$0xff]   ;;  %v6129_v50 = vld [vmem:[%s6887_s23 + $0x8] ss:$16 sps:$4 sm:$0xff]   ;;  %4421 = vmatprep.subr.bf16.mxu0 %v6128_v34 }
 0x671   : > { %v6134_v32 = vld [vmem:[%s6887_s23 + $0x24] ss:$16 sps:$4 sm:$0xff]   ;;  %4422 = vmatpush1.bf16.msra.mxu0 %v6126_v48 }
 0x672   : > { %4423 = vmatprep.subr.bf16.mxu0 %v6134_v32 }
 0x697   : > { %v3553_v20 = vpop.f32.mrb[28].mxu0 }
 0x698   : > { %v5887_v21 = vpop.f32.mrb[29].mxu0 }
 0x699   : > { %v3556_v5 = vpop.f32.mrb[30].mxu0  ;;  %v6132_v21 = vld [vmem:[%s6887_s23 + $0x20] ss:$16 sps:$4 sm:$0xff]  }
 0x69a   : > { %v3825_v26 = vpack.c.bf16 %v3556_v5, %v3553_v20  ;;  %v5888_v30 = vpop.f32.mrb[31].mxu0  ;;  %v6137_v20 = vld [vmem:[%s6887_s23 + $0x2c] ss:$16 sps:$4 sm:$0xff]   ;;  %v6135_v5 = vld [vmem:[%s6887_s23 + $0x28] ss:$16 sps:$4 sm:$0xff]   ;;  %4424 = vmatpush1.bf16.msra.mxu0 %v6132_v21 }
 0x69f   : > { %v3641_v37 = vpop.f32.mrb[32].mxu0 }
 0x6a0   : > { %v5899_v31 = vpop.f32.mrb[33].mxu0 }
 0x6a1   : > { %v3644_v46 = vpop.f32.mrb[34].mxu0 }
 0x6a2   : > { %v3827_v63 = vpack.c.bf16 %v3644_v46, %v3641_v37  ;;  %v5900_v15 = vpop.f32.mrb[35].mxu0 }
 0x6c0   : > { %v3597_v40 = vpop.f32.mrb[20].mxu1 }
 0x6c1   : > { %v5893_v35 = vpop.f32.mrb[21].mxu1 }
 0x6c2   : > { %v3600_v52 = vpop.f32.mrb[22].mxu1 }
 0x6c3   : > { %v3826_v58 = vpack.c.bf16 %v3600_v52, %v3597_v40  ;;  %v5894_v36 = vpop.f32.mrb[23].mxu1 }
 0x6c5   : > { %5929 = vmatprep.mubr.msk.bf16.mxu1 %vm2910_vm1, %v3826_v58 }
 0x6c6   : > { %5930 = vmatmul.mubr.msk.bf16.vlgmr.msra.gmra.mrb[32].mxu1 %vm2910_vm1, %v3827_v63 }
 0x6c7   : > { %5934 = vmatpush3.bf16.msra.mxu1 %v6120_v29  ;;  %5937 = vmatprep.mubr.msk.bf16.mxu1 %vm2910_vm1, %v3824_v16  ;;  %v6131_v16 = vld [vmem:[%s6887_s23 + $0xc] ss:$16 sps:$4 sm:$0xff]  }
 0x6c8   : > { %v3685_v44 = vpop.f32.mrb[24].mxu1  ;;  %5935 = vmatprep.subr.bf16.mxu1 %v6121_v2 }
 0x6c9   : > { %v3729_v28 = vpop.f32.mrb[36].mxu0  ;;  %v5905_v47 = vpop.f32.mrb[25].mxu1 }
 0x6ca   : > { %v5911_v62 = vpop.f32.mrb[37].mxu0  ;;  %v3688_v14 = vpop.f32.mrb[26].mxu1  ;;  %v6138_v47 = vld [vmem:[%s6887_s23 + $0x40] ss:$16 sps:$4 sm:$0xff]  }
 0x6cb   : > { %v3828_v22 = vpack.c.bf16 %v3688_v14, %v3685_v44  ;;  %v3732_v17 = vpop.f32.mrb[38].mxu0  ;;  %v5906_v51 = vpop.f32.mrb[27].mxu1  ;;  %5936 = vmatpush3.bf16.msra.mxu1 %v6121_v2  ;;  %v6140_v62 = vld [vmem:[%s6887_s23 + $0x44] ss:$16 sps:$4 sm:$0xff]   ;;  %v6141_v14 = vld [vmem:[%s6887_s23 + $0x48] ss:$16 sps:$4 sm:$0xff]  }
 0x6cc   : > { %v3829_v18 = vpack.c.bf16 %v3732_v17, %v3729_v28  ;;  %v5912_v12 = vpop.f32.mrb[39].mxu0  ;;  %5941 = vmatprep.subr.bf16.mxu1 %v6122_v41  ;;  %4425 = vmatprep.subr.bf16.mxu0 %v6140_v62  ;;  %v6146_v17 = vld [vmem:[%s6887_s23 + $0x64] ss:$16 sps:$4 sm:$0xff]   ;;  %v6144_v51 = vld [vmem:[%s6887_s23 + $0x60] ss:$16 sps:$4 sm:$0xff]  }
 0x6cd   : > { %4426 = vmatpush1.bf16.msra.mxu0 %v6138_v47  ;;  %v6147_v12 = vld [vmem:[%s6887_s23 + $0x68] ss:$16 sps:$4 sm:$0xff]   ;;  %v6176_v47 = vld [vmem:[%s6893_s16] sm:$0xff]  }
 0x6ce   : > { %4427 = vmatprep.subr.bf16.mxu0 %v6146_v17  ;;  %v6177_v62 = vld [vmem:[%s6893_s16 + $0x80] sm:$0xff]   ;;  %v6181_v17 = vld [vmem:[%s6893_s16 + $0x88] sm:$0xff]  }
 0x6d0   : > { %v3773_v19 = vpop.f32.mrb[28].mxu1 }
 0x6d1   : > { %v3817_v45 = vpop.f32.mrb[40].mxu0  ;;  %v5917_v7 = vpop.f32.mrb[29].mxu1  ;;  %4428 = vmatpush1.bf16.msra.mxu0 %v6144_v51  ;;  %v6182_v51 = vld [vmem:[%s6893_s16 + $0x50] sm:$0xff]  }
 0x6d2   : > { %v5923_v6 = vpop.f32.mrb[41].mxu0  ;;  %v3776_v13 = vpop.f32.mrb[30].mxu1  ;;  %5938 = vmatmul.mubr.msk.bf16.vlgmr.msra.gmra.mrb[32].mxu1 %vm2910_vm1, %v3825_v26  ;;  %v6153_v7 = vld [vmem:[%s6887_s23 + $0x88] ss:$16 sps:$4 sm:$0xff]  }
 0x6d3   : > { %v3830_v23 = vpack.c.bf16 %v3776_v13, %v3773_v19  ;;  %v3820_v38 = vpop.f32.mrb[42].mxu0  ;;  %v5918_v59 = vpop.f32.mrb[31].mxu1  ;;  %5942 = vmatpush3.bf16.msra.mxu1 %v6122_v41  ;;  %5945 = vmatprep.mubr.msk.bf16.mxu1 %vm2910_vm1, %v3828_v22  ;;  %v6143_v22 = vld [vmem:[%s6887_s23 + $0x4c] ss:$16 sps:$4 sm:$0xff]   ;;  %v6152_v19 = vld [vmem:[%s6887_s23 + $0x84] ss:$16 sps:$4 sm:$0xff]  }
 0x6d4   : > { %v3831_v60 = vpack.c.bf16 %v3820_v38, %v3817_v45  ;;  %v5924_v0 = vpop.f32.mrb[43].mxu0  ;;  %5943 = vmatprep.subr.bf16.mxu1 %v6123_v4  ;;  %v6150_v45 = vld [vmem:[%s6887_s23 + $0x80] ss:$16 sps:$4 sm:$0xff]   ;;  %4429 = vmatprep.subr.bf16.mxu0 %v6152_v19  ;;  %v6158_v6 = vld [vmem:[%s6887_s23 + $0xa4] ss:$16 sps:$4 sm:$0xff]  }
 0x6d5   : > { %v6161_v13 = vld [vmem:[%s6887_s23 + $0xac] ss:$16 sps:$4 sm:$0xff]   ;;  %4430 = vmatpush1.bf16.msra.mxu0 %v6150_v45  ;;  %v6159_v38 = vld [vmem:[%s6887_s23 + $0xa8] ss:$16 sps:$4 sm:$0xff]   ;;  %v6164_v59 = vld [vmem:[%s6887_s23 + $0xc4] ss:$16 sps:$4 sm:$0xff]  }
 0x6d6   : > { %4431 = vmatprep.subr.bf16.mxu0 %v6158_v6  ;;  %v6162_v0 = vld [vmem:[%s6887_s23 + $0xc0] ss:$16 sps:$4 sm:$0xff]   ;;  %v6187_v45 = vld [vmem:[%s6893_s16 + $0xd8] sm:$0xff]  }
 0x6d7   : > { %5944 = vmatpush3.bf16.msra.mxu1 %v6123_v4  ;;  %v6155_v4 = vld [vmem:[%s6887_s23 + $0x8c] ss:$16 sps:$4 sm:$0xff]   ;;  %v6185_v19 = vld [vmem:[%s6893_s16 + $0x90] sm:$0xff]  }
 0x6d8   : > { %5949 = vmatprep.subr.bf16.mxu1 %v6124_v56  ;;  %v6189_v6 = vld [vmem:[%s6893_s16 + $0x98] sm:$0xff]  }
 0x6de   : > { %5946 = vmatmul.mubr.msk.bf16.vlgmr.msra.gmra.mrb[32].mxu1 %vm2910_vm1, %v3829_v18  ;;  %v6149_v18 = vld [vmem:[%s6887_s23 + $0x6c] ss:$16 sps:$4 sm:$0xff]  }
 0x6df   : > { %5950 = vmatpush3.bf16.msra.mxu1 %v6124_v56  ;;  %5953 = vmatprep.mubr.msk.bf16.mxu1 %vm2910_vm1, %v3830_v23  ;;  %v6156_v23 = vld [vmem:[%s6887_s23 + $0xa0] ss:$16 sps:$4 sm:$0xff]   ;;  %v6165_v56 = vld [vmem:[%s6887_s23 + $0xc8] ss:$16 sps:$4 sm:$0xff]  }
 0x6e0   : > { %5951 = vmatprep.subr.bf16.mxu1 %v6125_v54  ;;  %4432 = vmatpush1.bf16.msra.mxu0 %v6156_v23  ;;  %v6191_v23 = vld [vmem:[%s6893_s16 + $0xe0] sm:$0xff]  }
 0x6e1   : > { %4433 = vmatprep.subr.bf16.mxu0 %v6164_v59  ;;  %v6193_v59 = vld [vmem:[%s6893_s16 + $0xa0] sm:$0xff]  }
 0x6e3   : > { %5952 = vmatpush3.bf16.msra.mxu1 %v6125_v54  ;;  %v6170_v54 = vld [vmem:[%s6887_s23 + $0xe4] ss:$16 sps:$4 sm:$0xff]  }
 0x6e4   : > { %4474 = vmatprep.subr.bf16.mxu1 %v6131_v16  ;;  %4434 = vmatpush1.bf16.msra.mxu0 %v6162_v0  ;;  %v5602_v16 = vld [vmem:[%s779_s5] ss:$0 sm:$0xff]  ;;  %v6195_v0 = vld [vmem:[%s6893_s16 + $0xe8] sm:$0xff]  }
 0x6e5   : > { %4435 = vmatprep.subr.bf16.mxu0 %v6170_v54  ;;  %v6197_v54 = vld [vmem:[%s6893_s16 + $0xa8] sm:$0xff]  }
 0x6ea   : > { %5954 = vmatmul.mubr.msk.bf16.vlgmr.msra.gmra.mrb[32].mxu1 %vm2910_vm1, %v3831_v60  ;;  %v6167_v60 = vld [vmem:[%s6887_s23 + $0xcc] ss:$16 sps:$4 sm:$0xff]  }
 0x6eb   : > { %4506 = vmatprep.mubr.bf16.mxu1 %v6572_v43  ;;  %4475 = vmatpush1.bf16.msra.mxu1 %v6129_v50 }
 0x6ec   : > { %4476 = vmatprep.subr.bf16.mxu1 %v6137_v20 }
 0x6ef   : > { %4477 = vmatpush1.bf16.msra.mxu1 %v6135_v5 }
 0x6f0   : > { %4478 = vmatprep.subr.bf16.mxu1 %v6143_v22  ;;  %v6179_v22 = vld [vmem:[%s6893_s16 + $0xc8] sm:$0xff]  }
 0x6f3   : > { %4479 = vmatpush1.bf16.msra.mxu1 %v6141_v14  ;;  %v6178_v14 = vld [vmem:[%s6893_s16 + $0x48] sm:$0xff]  }
 0x6f4   : > { %4480 = vmatprep.subr.bf16.mxu1 %v6149_v18  ;;  %v6183_v18 = vld [vmem:[%s6893_s16 + $0xd0] sm:$0xff]  }
 0x6f7   : > { %4481 = vmatpush1.bf16.msra.mxu1 %v6147_v12  ;;  %v6184_v12 = vld [vmem:[%s6893_s16 + $0x10] sm:$0xff]  }
 0x6f8   : > { %4482 = vmatprep.subr.bf16.mxu1 %v6155_v4  ;;  %v6186_v4 = vld [vmem:[%s6893_s16 + $0x58] sm:$0xff]  }
 0x6fb   : > { %4483 = vmatpush1.bf16.msra.mxu1 %v6153_v7  ;;  %v6188_v7 = vld [vmem:[%s6893_s16 + $0x18] sm:$0xff]  }
 0x6fc   : > { %4484 = vmatprep.subr.bf16.mxu1 %v6161_v13  ;;  %v6190_v13 = vld [vmem:[%s6893_s16 + $0x60] sm:$0xff]  }
 0x6ff   : > { %4485 = vmatpush1.bf16.msra.mxu1 %v6159_v38  ;;  %v6192_v38 = vld [vmem:[%s6893_s16 + $0x20] sm:$0xff]  }
 0x700   : > { %4486 = vmatprep.subr.bf16.mxu1 %v6167_v60  ;;  %v6194_v60 = vld [vmem:[%s6893_s16 + $0x68] sm:$0xff]  }
 0x703   : > { %4487 = vmatpush1.bf16.msra.mxu1 %v6165_v56  ;;  %v6196_v56 = vld [vmem:[%s6893_s16 + $0x28] sm:$0xff]  }
 0x7bd   : > { %v5955_v3 = vpop.f32.mrb[32].mxu1 }
 0x7be   : > { %v4105_v8 = vpop.f32.mrb[33].mxu1  ;;  %v4133_v27 = vadd.f32 %v5955_v3, %v5601_v61  ;;  %v6168_v3 = vld [vmem:[%s6887_s23 + $0xe0] ss:$16 sps:$4 sm:$0xff]  }
 0x7bf   : > { %v4131_v33 = vadd.f32 %v5601_v61, %v4105_v8  ;;  %v5956_v24 = vpop.f32.mrb[34].mxu1  ;;  %v6171_v8 = vld [vmem:[%s6887_s23 + $0xe8] ss:$16 sps:$4 sm:$0xff]   ;;  %4436 = vmatpush1.bf16.msra.mxu0 %v6168_v3  ;;  %v6199_v3 = vld [vmem:[%s6893_s16 + $0xf0] sm:$0xff]  }
 0x7c0   : > { %v4108_v57 = vpop.f32.mrb[35].mxu1  ;;  %v4134_v49 = vadd.f32 %v5956_v24, %v5601_v61  ;;  %v7886_v10 = vadd.f32 %v6320_v11, %v4133_v27 }
 0x7c1   : > { %v7881_v53 = vadd.f32 %v6318_v55, %v4131_v33  ;;  %v4132_v1 = vadd.f32 %v5601_v61, %v4108_v57  ;;  %v6173_v61 = vld [vmem:[%s6887_s23 + $0xec] ss:$16 sps:$4 sm:$0xff]  }
 0x7c2   : > { %v7889_v29 = vadd.f32 %v6321_v9, %v4134_v49  ;;  %4488 = vmatprep.subr.bf16.mxu1 %v6173_v61  ;;  %v6198_v61 = vld [vmem:[%s6893_s16 + $0x70] sm:$0xff]  }
 0x7c3   : > { %v7883_v25 = vadd.f32 %v6319_v42, %v4132_v1  ;;  %4141 = vadd.xlane.f32.xlu0 %v7881_v53  ;;  %4489 = vmatpush1.bf16.msra.mxu1 %v6171_v8  ;;  %v6200_v8 = vld [vmem:[%s6893_s16 + $0x30] sm:$0xff]  }
 0x7c5   : > { %4143 = vadd.xlane.f32.xlu1 %v7883_v25 }
 0x7c7   : > { %4145 = vadd.xlane.f32.xlu0 %v7886_v10 }
 0x7c9   : > { %4147 = vadd.xlane.f32.xlu1 %v7889_v29 }
 0x850   : > { %v4142_v26 = vpop.xlane.xlu0 %4141 }
 0x851   : > { %v4149_v30 = vmul.f32 0.0078125, %v4142_v26 }
 0x852   : > { %v4144_v37 = vpop.xlane.xlu1 %4143 }
 0x853   : > { %v7902_v31 = vsub.f32 %v7881_v53, %v4149_v30  ;;  %v4150_v46 = vmul.f32 0.0078125, %v4144_v37  ;;  %v5603_v30 = vld [vmem:[%s782_s20] ss:$0 sm:$0xff] }
 0x854   : > { %v4146_v63 = vpop.xlane.xlu0 %4145 }
 0x855   : > { %v7905_v15 = vsub.f32 %v7883_v25, %v4150_v46  ;;  %v4151_v40 = vmul.f32 0.0078125, %v4146_v63  ;;  %v4157_v35 = vmul.f32 %v7902_v31, %v7902_v31 }
 0x856   : > { %v4148_v52 = vpop.xlane.xlu1 %4147 }
 0x857   : > { %v7910_v58 = vsub.f32 %v7886_v10, %v4151_v40  ;;  %v4152_v36 = vmul.f32 0.0078125, %v4148_v52  ;;  %4161 = vadd.xlane.f32.xlu0 %v4157_v35  ;;  %v4158_v2 = vmul.f32 %v7905_v15, %v7905_v15 }
 0x859   : > { %v7915_v44 = vsub.f32 %v7889_v29, %v4152_v36  ;;  %4163 = vadd.xlane.f32.xlu1 %v4158_v2  ;;  %v4159_v41 = vmul.f32 %v7910_v58, %v7910_v58 }
 0x85b   : > { %4165 = vadd.xlane.f32.xlu0 %v4159_v41  ;;  %v4160_v28 = vmul.f32 %v7915_v44, %v7915_v44 }
 0x85d   : > { %4167 = vadd.xlane.f32.xlu1 %v4160_v28  ;;  %v6175_v28 = vld [vmem:[%s6893_s16 + $0xc0] sm:$0xff]  }
 0x85e   : > { %5781 = vmatprep.subr.bf16.mxu1 %v6175_v28 }
 0x8e4   : > { %v4162_v33 = vpop.xlane.xlu0 %4161 }
 0x8e5   : > { %v4169_v24 = vmul.f32 0.0078125, %v4162_v33  ;;  %v6201_v33 = vld [vmem:[%s6893_s16 + $0xb0] sm:$0xff]  }
 0x8e6   : > { %v4164_v57 = vpop.xlane.xlu1 %4163 }
 0x8e7   : > { %v4173_v27 = vadd.f32 1e-05, %v4169_v24  ;;  %v4170_v55 = vmul.f32 0.0078125, %v4164_v57  ;;  %v6202_v24 = vld [vmem:[%s6893_s16 + $0x78] sm:$0xff]  }
 0x8e8   : > { %v4166_v1 = vpop.xlane.xlu0 %4165  ;;  %v6203_v57 = vld [vmem:[%s6893_s16 + $0xf8] sm:$0xff]  }
 0x8e9   : > { %6278 = vrsqrt.f32 %v4173_v27  ;;  %v4174_v49 = vadd.f32 1e-05, %v4170_v55  ;;  %v4171_v42 = vmul.f32 0.0078125, %v4166_v1  ;;  %v6204_v27 = vld [vmem:[%s6893_s16 + $0x38] sm:$0xff]   ;;  %v4243_v1 = vsub.s32 0, %v7102_v39 }
 0x8ea   : > { %v4168_v11 = vpop.xlane.xlu1 %4167  ;;  %v6205_v55 = vld [vmem:[%s6893_s16 + $0xb8] sm:$0xff]  }
 0x8eb   : > { %6280 = vrsqrt.f32 %v4174_v49  ;;  %v4175_v9 = vadd.f32 1e-05, %v4171_v42  ;;  %v4172_v48 = vmul.f32 0.0078125, %v4168_v11  ;;  %v4251_v49 = vsub.s32 2, %v7102_v39  ;;  %v4239_v42 = vld [vmem:[%s6921_s18] sm:$0xf] }
 0x8ec   : > { %v4247_v11 = vsub.s32 1, %v7102_v39  ;;  %s8278_s18 = sld [smem:[#allocation28_spill]] }
 0x8ed   : > { %6282 = vrsqrt.f32 %v4175_v9  ;;  %v4176_v34 = vadd.f32 1e-05, %v4172_v48  ;;  %v4255_v9 = vsub.s32 3, %v7102_v39  ;;  %v7998_v48 = vrot.slane %v4239_v42, %v4243_v1 }
 0x8ef   : > { %6284 = vrsqrt.f32 %v4176_v34  ;;  %v8000_v34 = vrot.slane %v4239_v42, %v4251_v49 }
 0x8f2   : > { %s8279_s20 = scalar_lea.vmem %s8278_s18, %s6901_s27 }
 0x8f3   : > { %v6279_v50 = vpop.eup %6278 }
 0x8f4   : > { %v4181_v32 = vmul.f32 %v6279_v50, %v7902_v31  ;;  %v8002_v50 = vrot.slane %v4239_v42, %v4247_v11 }
 0x8f5   : > { %v6281_v20 = vpop.eup %6280 }
 0x8f6   : > { %v4182_v21 = vmul.f32 %v6281_v20, %v7905_v15  ;;  %v4191_v5 = vmul.f32 %v5602_v16, %v4181_v32 }
 0x8f7   : > { %v6283_v26 = vpop.eup %6282 }
 0x8f8   : > { %v4192_v37 = vmul.f32 %v5602_v16, %v4182_v21  ;;  %v4201_v63 = vadd.f32 %v5603_v30, %v4191_v5  ;;  %v4183_v35 = vmul.f32 %v6283_v26, %v7910_v58 }
 0x8f9   : > { %v6285_v46 = vpop.eup %6284 }
 0x8fa   : > { %v4202_v40 = vadd.f32 %v5603_v30, %v4192_v37  ;;  %v4184_v31 = vmul.f32 %v6285_v46, %v7915_v44  ;;  %v4193_v36 = vmul.f32 %v5602_v16, %v4183_v35  ;;  %v6174_v44 = vld [vmem:[%s6893_s16 + $0x40] sm:$0xff]  }
 0x8fb   : > { %5753 = vmatprep.subr.bf16.mxu0 %v6174_v44 }
 0x8fc   : > { %v4205_v15 = vpack.c.bf16 %v4202_v40, %v4201_v63  ;;  %v4194_v52 = vmul.f32 %v5602_v16, %v4184_v31  ;;  %v4203_v41 = vadd.f32 %v5603_v30, %v4193_v36  ;;  %v8004_v16 = vrot.slane %v4239_v42, %v4255_v9 }
 0x8fe   : > { %4454 = vmatmul.mubr.bf16.vlgmr.msra.gmra.mrb[44].mxu0 %v4205_v15  ;;  %4507 = vmatmul.mubr.bf16.vlgmr.msra.gmra.mrb[36].mxu1 %v4205_v15  ;;  %v4204_v2 = vadd.f32 %v5603_v30, %v4194_v52 }
 0x8ff   : > { %4463 = vmatprep.mubr.bf16.mxu0 %v6572_v43  ;;  %4516 = vmatprep.mubr.bf16.mxu1 %v6572_v43  ;;  %v6180_v43 = vld [vmem:[%s6893_s16 + $0x8] sm:$0xff]  }
 0x900   : > { %v4206_v58 = vpack.c.bf16 %v4204_v2, %v4203_v41  ;;  %5754 = vmatpush3.bf16.msra.mxu0 %v6176_v47  ;;  %5782 = vmatpush3.bf16.msra.mxu1 %v6177_v62 }
 0x901   : > { %5755 = vmatprep.subr.bf16.mxu0 %v6178_v14  ;;  %5783 = vmatprep.subr.bf16.mxu1 %v6179_v22 }
 0x904   : > { %5756 = vmatpush3.bf16.msra.mxu0 %v6180_v43  ;;  %5784 = vmatpush3.bf16.msra.mxu1 %v6181_v17 }
 0x905   : > { %5757 = vmatprep.subr.bf16.mxu0 %v6182_v51  ;;  %5785 = vmatprep.subr.bf16.mxu1 %v6183_v18 }
 0x906   : > { %4464 = vmatmul.mubr.bf16.gmra.mrb[48].mxu0 %v4206_v58  ;;  %4517 = vmatmul.mubr.bf16.gmra.mrb[40].mxu1 %v4206_v58 }
 0x908   : > { %5758 = vmatpush3.bf16.msra.mxu0 %v6184_v12  ;;  %5786 = vmatpush3.bf16.msra.mxu1 %v6185_v19 }
 0x909   : > { %5759 = vmatprep.subr.bf16.mxu0 %v6186_v4  ;;  %5787 = vmatprep.subr.bf16.mxu1 %v6187_v45 }
 0x90c   : > { %5760 = vmatpush3.bf16.msra.mxu0 %v6188_v7  ;;  %5788 = vmatpush3.bf16.msra.mxu1 %v6189_v6 }
 0x90d   : > { %5761 = vmatprep.subr.bf16.mxu0 %v6190_v13  ;;  %5789 = vmatprep.subr.bf16.mxu1 %v6191_v23 }
 0x910   : > { %5762 = vmatpush3.bf16.msra.mxu0 %v6192_v38  ;;  %5790 = vmatpush3.bf16.msra.mxu1 %v6193_v59 }
 0x911   : > { %5763 = vmatprep.subr.bf16.mxu0 %v6194_v60  ;;  %5791 = vmatprep.subr.bf16.mxu1 %v6195_v0 }
 0x914   : > { %5764 = vmatpush3.bf16.msra.mxu0 %v6196_v56  ;;  %5792 = vmatpush3.bf16.msra.mxu1 %v6197_v54 }
 0x915   : > { %5765 = vmatprep.subr.bf16.mxu0 %v6198_v61  ;;  %5793 = vmatprep.subr.bf16.mxu1 %v6199_v3 }
 0x918   : > { %5766 = vmatpush3.bf16.msra.mxu0 %v6200_v8  ;;  %5794 = vmatpush3.bf16.msra.mxu1 %v6201_v33 }
 0x919   : > { %5767 = vmatprep.subr.bf16.mxu0 %v6202_v24  ;;  %5795 = vmatprep.subr.bf16.mxu1 %v6203_v57 }
 0x91c   : > { %5768 = vmatpush3.bf16.msra.mxu0 %v6204_v27  ;;  %5796 = vmatpush3.bf16.msra.mxu1 %v6205_v55 }
 0x9d1   : > { %v4455_v32 = vpop.f32.mrb[44].mxu0  ;;  %v4508_v20 = vpop.f32.mrb[36].mxu1 }
 0x9d2   : > { %v4456_v21 = vadd.f32 %v4455_v32, %v7998_v48  ;;  %v4509_v5 = vadd.f32 %v4508_v20, %v8000_v34  ;;  %v4457_v26 = vpop.f32.mrb[45].mxu0  ;;  %v4510_v30 = vpop.f32.mrb[37].mxu1 }
 0x9d3   : > { %v8009_v37 = vadd.f32 %v4457_v26, %v8002_v50  ;;  %v8012_v39 = vadd.f32 %v4510_v30, %v8004_v16  ;;  %v4459_v46 = vpop.f32.mrb[46].mxu0  ;;  %v4512_v63 = vpop.f32.mrb[38].mxu1 }
 0x9d4   : > { %v8014_v40 = vmul.f32 0.5, %v4456_v21  ;;  %v4543_v35 = vmul.f32 %v4456_v21, %v4456_v21  ;;  %v8016_v31 = vmul.f32 0.5, %v4509_v5  ;;  %v4545_v15 = vmul.f32 %v4509_v5, %v4509_v5  ;;  %v4461_v52 = vpop.f32.mrb[47].mxu0  ;;  %v4514_v36 = vpop.f32.mrb[39].mxu1 }
 0x9d5   : > { %v4544_v2 = vmul.f32 %v8009_v37, %v8009_v37  ;;  %v4546_v41 = vmul.f32 %v8012_v39, %v8012_v39  ;;  %v4460_v58 = vadd.f32 %v4459_v46, %v7998_v48  ;;  %v4513_v44 = vadd.f32 %v4512_v63, %v8000_v34 }
 0x9d6   : > { %v4559_v28 = vmul.f32 %v4543_v35, %v4456_v21  ;;  %v4561_v47 = vmul.f32 %v4545_v15, %v4509_v5  ;;  %v8025_v62 = vadd.f32 %v4461_v52, %v8002_v50  ;;  %v8028_v14 = vadd.f32 %v4514_v36, %v8004_v16 }
 0x9d7   : > { %v4560_v22 = vmul.f32 %v4544_v2, %v8009_v37  ;;  %v4562_v43 = vmul.f32 %v4546_v41, %v8012_v39  ;;  %v8032_v17 = vmul.f32 0.5, %v4460_v58  ;;  %v4547_v51 = vmul.f32 %v4460_v58, %v4460_v58 }
 0x9d8   : > { %v4575_v18 = vmul.f32 0.044715, %v4559_v28  ;;  %v4577_v12 = vmul.f32 0.044715, %v4561_v47  ;;  %v8034_v19 = vmul.f32 0.5, %v4513_v44  ;;  %v4549_v4 = vmul.f32 %v4513_v44, %v4513_v44 }
 0x9d9   : > { %v4576_v45 = vmul.f32 0.044715, %v4560_v22  ;;  %v4578_v7 = vmul.f32 0.044715, %v4562_v43  ;;  %v4563_v6 = vmul.f32 %v4547_v51, %v4460_v58  ;;  %v4548_v13 = vmul.f32 %v8025_v62, %v8025_v62  ;;  %v4465_v23 = vpop.f32.mrb[48].mxu0  ;;  %v4518_v38 = vpop.f32.mrb[40].mxu1 }
 0x9da   : > { %v4591_v59 = vadd.f32 %v4575_v18, %v4456_v21  ;;  %v4593_v60 = vadd.f32 %v4577_v12, %v4509_v5  ;;  %v4565_v0 = vmul.f32 %v4549_v4, %v4513_v44  ;;  %v4550_v56 = vmul.f32 %v8028_v14, %v8028_v14  ;;  %v4467_v54 = vpop.f32.mrb[49].mxu0  ;;  %v4520_v61 = vpop.f32.mrb[41].mxu1 }
 0x9db   : > { %v4592_v3 = vadd.f32 %v4576_v45, %v8009_v37  ;;  %v4594_v8 = vadd.f32 %v4578_v7, %v8012_v39  ;;  %v4579_v33 = vmul.f32 0.044715, %v4563_v6  ;;  %v4564_v24 = vmul.f32 %v4548_v13, %v8025_v62  ;;  %v4469_v57 = vpop.f32.mrb[50].mxu0  ;;  %v4522_v27 = vpop.f32.mrb[42].mxu1 }
 0x9dc   : > { %v4607_v55 = vmul.f32 0.7978846, %v4591_v59  ;;  %v4609_v1 = vmul.f32 0.7978846, %v4593_v60  ;;  %v4581_v49 = vmul.f32 0.044715, %v4565_v0  ;;  %v4566_v42 = vmul.f32 %v4550_v56, %v8028_v14 }
 0x9dd   : > { %v4608_v11 = vmul.f32 0.7978846, %v4592_v3  ;;  %v4610_v9 = vmul.f32 0.7978846, %v4594_v8  ;;  %v4595_v32 = vadd.f32 %v4579_v33, %v4460_v58  ;;  %v4580_v20 = vmul.f32 0.044715, %v4564_v24 }
 0x9de   : > { %6286 = vtanh.f32 %v4607_v55  ;;  %v4597_v21 = vadd.f32 %v4581_v49, %v4513_v44  ;;  %v4582_v5 = vmul.f32 0.044715, %v4566_v42  ;;  %v8045_v26 = vadd.f32 %v4465_v23, %v7998_v48  ;;  %v4471_v30 = vpop.f32.mrb[51].mxu0  ;;  %v4524_v46 = vpop.f32.mrb[43].mxu1 }
 0x9df   : > { %6288 = vtanh.f32 %v4609_v1  ;;  %v4611_v63 = vmul.f32 0.7978846, %v4595_v32  ;;  %v4596_v35 = vadd.f32 %v4580_v20, %v8025_v62  ;;  %v8049_v15 = vadd.f32 %v4518_v38, %v8000_v34 }
 0x9e0   : > { %6290 = vtanh.f32 %v4608_v11  ;;  %v4613_v52 = vmul.f32 0.7978846, %v4597_v21  ;;  %v4598_v36 = vadd.f32 %v4582_v5, %v8028_v14  ;;  %v4551_v2 = vmul.f32 %v8045_v26, %v8045_v26 }
 0x9e1   : > { %6292 = vtanh.f32 %v4610_v9  ;;  %v4612_v41 = vmul.f32 0.7978846, %v4596_v35  ;;  %v4553_v58 = vmul.f32 %v8049_v15, %v8049_v15  ;;  %v8057_v44 = vadd.f32 %v4467_v54, %v8002_v50 }
 0x9e2   : > { %6294 = vtanh.f32 %v4611_v63  ;;  %v4614_v28 = vmul.f32 0.7978846, %v4598_v36  ;;  %v4567_v47 = vmul.f32 %v4551_v2, %v8045_v26  ;;  %v8061_v22 = vadd.f32 %v4520_v61, %v8004_v16 }
 0x9e3   : > { %6296 = vtanh.f32 %v4613_v52  ;;  %v4569_v43 = vmul.f32 %v4553_v58, %v8049_v15  ;;  %v4552_v51 = vmul.f32 %v8057_v44, %v8057_v44  ;;  %v8067_v18 = vadd.f32 %v4469_v57, %v7998_v48 }
 0x9e4   : > { %6298 = vtanh.f32 %v4612_v41  ;;  %v4583_v12 = vmul.f32 0.044715, %v4567_v47  ;;  %v4554_v4 = vmul.f32 %v8061_v22, %v8061_v22  ;;  %v8072_v45 = vadd.f32 %v4522_v27, %v8000_v34 }
 0x9e5   : > { %6300 = vtanh.f32 %v4614_v28  ;;  %v4585_v7 = vmul.f32 0.044715, %v4569_v43  ;;  %v4568_v6 = vmul.f32 %v4552_v51, %v8057_v44  ;;  %v4555_v13 = vmul.f32 %v8067_v18, %v8067_v18 }
 0x9e6   : > { %v4599_v23 = vadd.f32 %v4583_v12, %v8045_v26  ;;  %v4570_v48 = vmul.f32 %v4554_v4, %v8061_v22  ;;  %v4557_v38 = vmul.f32 %v8072_v45, %v8072_v45  ;;  %v8082_v59 = vadd.f32 %v4471_v30, %v8002_v50 }
 0x9e7   : > { %v4601_v34 = vadd.f32 %v4585_v7, %v8049_v15  ;;  %v4584_v60 = vmul.f32 0.044715, %v4568_v6  ;;  %v4571_v0 = vmul.f32 %v4555_v13, %v8067_v18  ;;  %v8087_v56 = vadd.f32 %v4524_v46, %v8004_v16 }
 0x9e8   : > { %v6287_v54 = vpop.eup %6286  ;;  %v4615_v61 = vmul.f32 0.7978846, %v4599_v23  ;;  %v4586_v3 = vmul.f32 0.044715, %v4570_v48  ;;  %v4573_v8 = vmul.f32 %v4557_v38, %v8072_v45  ;;  %v4556_v33 = vmul.f32 %v8082_v59, %v8082_v59 }
 0x9e9   : > { %v6289_v24 = vpop.eup %6288  ;;  %v4639_v57 = vadd.f32 1.0, %v6287_v54  ;;  %v4617_v50 = vmul.f32 0.7978846, %v4601_v34  ;;  %v4600_v27 = vadd.f32 %v4584_v60, %v8057_v44  ;;  %v4587_v55 = vmul.f32 0.044715, %v4571_v0 }
 0x9ea   : > { %v6291_v1 = vpop.eup %6290  ;;  %v4641_v49 = vadd.f32 1.0, %v6289_v24  ;;  %6302 = vtanh.f32 %v4615_v61  ;;  %v4602_v16 = vadd.f32 %v4586_v3, %v8061_v22  ;;  %v4589_v42 = vmul.f32 0.044715, %v4573_v8 }
 0x9eb   : > { %v6293_v11 = vpop.eup %6292  ;;  %v4655_v9 = vmul.f32 %v4639_v57, %v8014_v40  ;;  %6304 = vtanh.f32 %v4617_v50  ;;  %v4616_v32 = vmul.f32 0.7978846, %v4600_v27  ;;  %v4603_v20 = vadd.f32 %v4587_v55, %v8067_v18 }
 0x9ec   : > { %v6295_v21 = vpop.eup %6294  ;;  %v4657_v5 = vmul.f32 %v4641_v49, %v8016_v31  ;;  %v4618_v30 = vmul.f32 0.7978846, %v4602_v16  ;;  %v4605_v46 = vadd.f32 %v4589_v42, %v8072_v45  ;;  %v4572_v63 = vmul.f32 %v4556_v33, %v8082_v59 }
 0x9ed   : > { %v6297_v35 = vpop.eup %6296  ;;  %v4643_v52 = vadd.f32 1.0, %v6295_v21  ;;  %6306 = vtanh.f32 %v4616_v32  ;;  %v4619_v36 = vmul.f32 0.7978846, %v4603_v20  ;;  %v4558_v2 = vmul.f32 %v8087_v56, %v8087_v56 }
 0x9ee   : > { %v6299_v40 = vpop.eup %6298  ;;  %v4645_v41 = vadd.f32 1.0, %v6297_v35  ;;  %6308 = vtanh.f32 %v4618_v30  ;;  %v4621_v58 = vmul.f32 0.7978846, %v4605_v46  ;;  %v4588_v28 = vmul.f32 0.044715, %v4572_v63 }
 0x9ef   : > { %v6301_v47 = vpop.eup %6300  ;;  %v4659_v31 = vmul.f32 %v4643_v52, %v8032_v17  ;;  %6310 = vtanh.f32 %v4619_v36  ;;  %v4574_v43 = vmul.f32 %v4558_v2, %v8087_v56  ;;  %v4528_v51 = vmul.f32 0.5, %v8009_v37 }
 0x9f0   : > { %v4661_v12 = vmul.f32 %v4645_v41, %v8034_v19  ;;  %6312 = vtanh.f32 %v4621_v58  ;;  %v4604_v4 = vadd.f32 %v4588_v28, %v8082_v59  ;;  %v4532_v7 = vmul.f32 0.5, %v8025_v62 }
 0x9f1   : > { %v4590_v6 = vmul.f32 0.044715, %v4574_v43  ;;  %v4640_v13 = vadd.f32 1.0, %v6291_v1  ;;  %v4644_v23 = vadd.f32 1.0, %v6299_v40  ;;  %v4530_v48 = vmul.f32 0.5, %v8012_v39 }
 0x9f2   : > { %v4620_v38 = vmul.f32 0.7978846, %v4604_v4  ;;  %v4534_v17 = vmul.f32 0.5, %v8028_v14  ;;  %v4642_v34 = vadd.f32 1.0, %v6293_v11  ;;  %v4646_v60 = vadd.f32 1.0, %v6301_v47 }
 0x9f3   : > { %v4606_v0 = vadd.f32 %v4590_v6, %v8087_v56  ;;  %v4656_v37 = vmul.f32 %v4640_v13, %v4528_v51  ;;  %v4660_v54 = vmul.f32 %v4644_v23, %v4532_v7  ;;  %v4671_v19 = vpack.c.bf16 %v4659_v31, %v4655_v9  ;;  %v5636_v4 = vld [vmem:[%s8279_s20] ss:$0 sm:$0xff] }
 0x9f4   : > { %v6303_v61 = vpop.eup %6302  ;;  %6314 = vtanh.f32 %v4620_v38  ;;  %v4658_v3 = vmul.f32 %v4642_v34, %v4530_v48  ;;  %v4662_v8 = vmul.f32 %v4646_v60, %v4534_v17  ;;  %v4673_v62 = vpack.c.bf16 %v4661_v12, %v4657_v5 }
 0x9f5   : > { %v6305_v33 = vpop.eup %6304  ;;  %v4622_v24 = vmul.f32 0.7978846, %v4606_v0  ;;  %v4672_v57 = vpack.c.bf16 %v4660_v54, %v4656_v37  ;;  %v4647_v27 = vadd.f32 1.0, %v6303_v61  ;;  %v4535_v16 = vmul.f32 0.5, %v8045_v26 }
 0x9f6   : > { %v4674_v50 = vpack.c.bf16 %v4662_v8, %v4658_v3  ;;  %v4649_v1 = vadd.f32 1.0, %v6305_v33  ;;  %v4539_v42 = vmul.f32 0.5, %v8067_v18  ;;  %v4537_v9 = vmul.f32 0.5, %v8049_v15 }
 0x9f7   : > { %v6307_v39 = vpop.eup %6306  ;;  %6316 = vtanh.f32 %v4622_v24  ;;  %4974 = vmatprep.mubr.bf16.mxu0 %v4672_v57  ;;  %v4541_v32 = vmul.f32 0.5, %v8072_v45  ;;  %v4663_v21 = vmul.f32 %v4647_v27, %v4535_v16  ;;  %v4536_v36 = vmul.f32 0.5, %v8057_v44 }
 0x9f8   : > { %v6309_v14 = vpop.eup %6308  ;;  %5023 = vmatprep.mubr.bf16.mxu1 %v4674_v50  ;;  %4975 = vmatmul.mubr.bf16.vlgmr.msra.gmra.mrb[52].mxu0 %v4671_v19  ;;  %v4648_v30 = vadd.f32 1.0, %v6307_v39  ;;  %v4665_v46 = vmul.f32 %v4649_v1, %v4537_v9  ;;  %v4540_v2 = vmul.f32 0.5, %v8082_v59  ;;  %v4538_v45 = vmul.f32 0.5, %v8061_v22  ;;  %v6322_v9 = vld [vmem:[#allocation9 + $0x4] ss:$8 sps:$4 sm:$0xff] (!%p5669_p4)  }
 0x9f9   : > { %v6311_v55 = vpop.eup %6310  ;;  %5024 = vmatmul.mubr.bf16.vlgmr.msra.gmra.mrb[44].mxu1 %v4673_v62  ;;  %v4650_v18 = vadd.f32 1.0, %v6309_v14  ;;  %v4542_v28 = vmul.f32 0.5, %v8087_v56  ;;  %5216 = vmatprep.subr.bf16.mxu0 (!%p5669_p4), %v6322_v9 }
 0x9fa   : > { %v6313_v49 = vpop.eup %6312  ;;  %v4651_v11 = vadd.f32 1.0, %v6311_v55  ;;  %v4664_v15 = vmul.f32 %v4648_v30, %v4536_v36  ;;  %5969 = vmatprep.subr.bf16.mxu1 (!%p5669_p4), %v6322_v9 }
 0x9fb   : > { %v4653_v20 = vadd.f32 1.0, %v6313_v49  ;;  %v4666_v43 = vmul.f32 %v4650_v18, %v4538_v45  ;;  %v6328_v45 = vld [vmem:[#allocation9 + $0x24] ss:$8 sps:$4 sm:$0xff] (!%p5669_p4)  }
 0x9fc   : > { %v4667_v5 = vmul.f32 %v4651_v11, %v4539_v42 }
 0x9fd   : > { %v4669_v63 = vmul.f32 %v4653_v20, %v4541_v32  ;;  %v6324_v32 = vld [vmem:[#allocation9] ss:$8 sps:$4 sm:$0xff] (!%p5669_p4)  }
 0x9fe   : > { %v6315_v35 = vpop.eup %6314  ;;  %v4675_v52 = vpack.c.bf16 %v4667_v5, %v4663_v21  ;;  %5217 = vmatpush1.bf16.msra.mxu0 (!%p5669_p4), %v6324_v32  ;;  %5977 = vmatpush1.bf16.msra.mxu1 (!%p5669_p4), %v6324_v32 }
 0x9ff   : > { %v4652_v26 = vadd.f32 1.0, %v6315_v35  ;;  %v4677_v40 = vpack.c.bf16 %v4669_v63, %v4665_v46 }
 0xa01   : > { %v6317_v41 = vpop.eup %6316  ;;  %v4668_v58 = vmul.f32 %v4652_v26, %v4540_v2 }
 0xa02   : > { %v4654_v47 = vadd.f32 1.0, %v6317_v41 }
 0xa03   : > { %v4676_v31 = vpack.c.bf16 %v4668_v58, %v4664_v15  ;;  %v6325_v15 = vld [vmem:[#allocation9 + $0x14] ss:$8 sps:$4 sm:$0xff] (!%p5669_p4)   ;;  %v6327_v58 = vld [vmem:[#allocation9 + $0x10] ss:$8 sps:$4 sm:$0xff] (!%p5669_p4)  }
 0xa04   : > { %v4670_v51 = vmul.f32 %v4654_v47, %v4542_v28  ;;  %5218 = vmatprep.subr.bf16.mxu0 (!%p5669_p4), %v6325_v15  ;;  %5970 = vmatprep.subr.bf16.mxu1 (!%p5669_p4), %v6325_v15  ;;  %v6330_v28 = vld [vmem:[#allocation9 + $0x20] ss:$8 sps:$4 sm:$0xff] (!%p5669_p4)   ;;  %v6331_v47 = vld [vmem:[#allocation9 + $0x34] ss:$8 sps:$4 sm:$0xff] (!%p5669_p4)  }
 0xa05   : > { %4982 = vmatprep.mubr.bf16.mxu0 %v4676_v31  ;;  %5219 = vmatpush1.bf16.msra.mxu0 (!%p5669_p4), %v6327_v58  ;;  %v6333_v31 = vld [vmem:[#allocation9 + $0x30] ss:$8 sps:$4 sm:$0xff] (!%p5669_p4)  }
 0xa06   : > { %v4678_v12 = vpack.c.bf16 %v4670_v51, %v4666_v43  ;;  %4983 = vmatmul.mubr.bf16.gmra.mrb[56].mxu0 %v4675_v52  ;;  %5978 = vmatpush1.bf16.msra.mxu1 (!%p5669_p4), %v6327_v58  ;;  %v6334_v43 = vld [vmem:[#allocation9 + $0x44] ss:$8 sps:$4 sm:$0xff] (!%p5669_p4)   ;;  %v6336_v51 = vld [vmem:[#allocation9 + $0x40] ss:$8 sps:$4 sm:$0xff] (!%p5669_p4)  }
 0xa07   : > { %5220 = vmatprep.subr.bf16.mxu0 (!%p5669_p4), %v6328_v45  ;;  %5971 = vmatprep.subr.bf16.mxu1 (!%p5669_p4), %v6328_v45 }
 0xa08   : > { %5031 = vmatprep.mubr.bf16.mxu1 %v4678_v12  ;;  %v6337_v12 = vld [vmem:[#allocation9 + $0x54] ss:$8 sps:$4 sm:$0xff] (!%p5669_p4)  }
 0xa09   : > { %5032 = vmatmul.mubr.bf16.gmra.mrb[48].mxu1 %v4677_v40  ;;  %5221 = vmatpush1.bf16.msra.mxu0 (!%p5669_p4), %v6330_v28 }
 0xa0a   : > { %5979 = vmatpush1.bf16.msra.mxu1 (!%p5669_p4), %v6330_v28  ;;  %5222 = vmatprep.subr.bf16.mxu0 (!%p5669_p4), %v6331_v47 }
 0xa0b   : > { %5972 = vmatprep.subr.bf16.mxu1 (!%p5669_p4), %v6331_v47 }
 0xa0d   : > { %5223 = vmatpush1.bf16.msra.mxu0 (!%p5669_p4), %v6333_v31 }
 0xa0e   : > { %5980 = vmatpush1.bf16.msra.mxu1 (!%p5669_p4), %v6333_v31  ;;  %5224 = vmatprep.subr.bf16.mxu0 (!%p5669_p4), %v6334_v43 }
 0xa0f   : > { %5973 = vmatprep.subr.bf16.mxu1 (!%p5669_p4), %v6334_v43 }
 0xa11   : > { %5225 = vmatpush1.bf16.msra.mxu0 (!%p5669_p4), %v6336_v51 }
 0xa12   : > { %5981 = vmatpush1.bf16.msra.mxu1 (!%p5669_p4), %v6336_v51  ;;  %5226 = vmatprep.subr.bf16.mxu0 (!%p5669_p4), %v6337_v12 }
 0xa13   : > { %5974 = vmatprep.subr.bf16.mxu1 (!%p5669_p4), %v6337_v12 }
 0xacb   : > { %v5769_v44 = vpop.f32.mrb[52].mxu0 }
 0xacc   : > { %v5797_v59 = vpop.f32.mrb[44].mxu1  ;;  %v5770_v7 = vpop.f32.mrb[53].mxu0 }
 0xacd   : > { %v5771_v22 = vadd.f32 %v5770_v7, %v5769_v44  ;;  %v5798_v6 = vpop.f32.mrb[45].mxu1  ;;  %v5772_v56 = vpop.f32.mrb[54].mxu0  ;;  %v6339_v44 = vld [vmem:[#allocation9 + $0x50] ss:$8 sps:$4 sm:$0xff] (!%p5669_p4)   ;;  %v6342_v7 = vld [vmem:[#allocation9 + $0x60] ss:$8 sps:$4 sm:$0xff] (!%p5669_p4)  }
 0xace   : > { %v5799_v13 = vadd.f32 %v5798_v6, %v5797_v59  ;;  %v5800_v23 = vpop.f32.mrb[46].mxu1  ;;  %v5773_v48 = vpop.f32.mrb[55].mxu0  ;;  %v6340_v59 = vld [vmem:[#allocation9 + $0x64] ss:$8 sps:$4 sm:$0xff] (!%p5669_p4)   ;;  %5227 = vmatpush1.bf16.msra.mxu0 (!%p5669_p4), %v6339_v44  ;;  %5982 = vmatpush1.bf16.msra.mxu1 (!%p5669_p4), %v6339_v44  ;;  %v6345_v6 = vld [vmem:[#allocation9 + $0x70] ss:$8 sps:$4 sm:$0xff] (!%p5669_p4)  }
 0xacf   : > { %v4977_v38 = vadd.f32 %v5771_v22, %v5636_v4  ;;  %v5774_v17 = vadd.f32 %v5773_v48, %v5772_v56  ;;  %v5801_v34 = vpop.f32.mrb[47].mxu1  ;;  %5228 = vmatprep.subr.bf16.mxu0 (!%p5669_p4), %v6340_v59  ;;  %5975 = vmatprep.subr.bf16.mxu1 (!%p5669_p4), %v6340_v59  ;;  %v6343_v22 = vld [vmem:[#allocation9 + $0x74] ss:$8 sps:$4 sm:$0xff] (!%p5669_p4)  }
 0xad0   : > { %v5802_v60 = vadd.f32 %v5801_v34, %v5800_v23 }
 0xad1   : > { %v5026_v0 = vadd.f32 %v5799_v13, %v4977_v38  ;;  %v4980_v37 = vadd.f32 %v5774_v17, %v5636_v4 }
 0xad2   : > { %5229 = vmatpush1.bf16.msra.mxu0 (!%p5669_p4), %v6342_v7  ;;  %5983 = vmatpush1.bf16.msra.mxu1 (!%p5669_p4), %v6342_v7 }
 0xad3   : > { %v5040_v54 = vadd.f32 %v5026_v0, %v7881_v53  ;;  %v5029_v19 = vadd.f32 %v5802_v60, %v4980_v37  ;;  %5230 = vmatprep.subr.bf16.mxu0 (!%p5669_p4), %v6343_v22  ;;  %5976 = vmatprep.subr.bf16.mxu1 (!%p5669_p4), %v6343_v22 }
 0xad5   : > { %5044 = vst [vmem:[#allocation2] sm:$0xff] %v5040_v54  ;;  %v5041_v61 = vadd.f32 %v5029_v19, %v7883_v25  ;;  %5054 = vadd.xlane.f32.xlu0 (!%p5669_p4), %v5040_v54 }
 0xad6   : > { %5231 = vmatpush1.bf16.msra.mxu0 (!%p5669_p4), %v6345_v6  ;;  %5984 = vmatpush1.bf16.msra.mxu1 (!%p5669_p4), %v6345_v6 }
 0xad7   : > { %5045 = vst [vmem:[#allocation2 + $0x8] sm:$0xff] %v5041_v61 }
 0xad9   : > { %v5775_v3 = vpop.f32.mrb[56].mxu0  ;;  %5056 = vadd.xlane.f32.xlu0 (!%p5669_p4), %v5041_v61 }
 0xada   : > { %v5776_v8 = vpop.f32.mrb[57].mxu0 }
 0xadb   : > { %v5777_v62 = vadd.f32 %v5776_v8, %v5775_v3  ;;  %v5778_v33 = vpop.f32.mrb[58].mxu0  ;;  %v5670_v8 = vld [vmem:[%s8280_s11] ss:$0 sm:$0xff] (!%p5669_p4) }
 0xadc   : > { %v5803_v24 = vpop.f32.mrb[48].mxu1  ;;  %v5779_v57 = vpop.f32.mrb[59].mxu0 }
 0xadd   : > { %v4985_v50 = vadd.f32 %v5777_v62, %v5636_v4  ;;  %v5804_v39 = vpop.f32.mrb[49].mxu1  ;;  %v5780_v14 = vadd.f32 %v5779_v57, %v5778_v33 }
 0xade   : > { %v5805_v27 = vadd.f32 %v5804_v39, %v5803_v24  ;;  %v5806_v55 = vpop.f32.mrb[50].mxu1 }
 0xadf   : > { %v4988_v1 = vadd.f32 %v5780_v14, %v5636_v4  ;;  %v5807_v49 = vpop.f32.mrb[51].mxu1  ;;  %v6580_v4 = vmov (!%p5669_p4), 0  }
 0xae0   : > { %v5034_v16 = vadd.f32 %v5805_v27, %v4985_v50  ;;  %v5808_v53 = vadd.f32 %v5807_v49, %v5806_v55  ;;  %5051 = sbr.rel (%p5669_p4) target bundleno = 3321 (0xcf9), region = 108  ;;  %5248 = vmatprep.mubr.bf16.mxu0 (!%p5669_p4), %v6580_v4  ;;  %5258 = vmatprep.mubr.bf16.mxu1 (!%p5669_p4), %v6580_v4  ;;  %v5671_v50 = vld [vmem:[%s8281_s7] ss:$0 sm:$0xff] (!%p5669_p4) }
 0xae2   : > { %v5042_v42 = vadd.f32 %v5034_v16, %v7886_v10  ;;  %v5037_v11 = vadd.f32 %v5808_v53, %v4988_v1 }
 0xae4   : > { %5046 = vst [vmem:[#allocation2 + $0x10] sm:$0xff] %v5042_v42  ;;  %v5043_v25 = vadd.f32 %v5037_v11, %v7889_v29  ;;  %5058 = vadd.xlane.f32.xlu1 (!%p5669_p4), %v5042_v42 }
 0xae6   : > { %5047 = vst [vmem:[#allocation2 + $0x18] sm:$0xff] %v5043_v25 }
 0xae8   : > { %5060 = vadd.xlane.f32.xlu1 %v5043_v25 }
 0xb62   : > { %v5055_v20 = vpop.xlane.xlu0 %5054 }
 0xb63   : > { %v5062_v21 = vmul.f32 0.0078125, %v5055_v20 }
 0xb65   : > { %v8128_v30 = vsub.f32 %v5040_v54, %v5062_v21 }
 0xb66   : > { %v5057_v46 = vpop.xlane.xlu0 %5056 }
 0xb67   : > { %v5063_v35 = vmul.f32 0.0078125, %v5057_v46  ;;  %v5070_v52 = vmul.f32 %v8128_v30, %v8128_v30 }
 0xb69   : > { %v8134_v2 = vsub.f32 %v5041_v61, %v5063_v35  ;;  %5074 = vadd.xlane.f32.xlu0 %v5070_v52 }
 0xb6b   : > { %v5071_v18 = vmul.f32 %v8134_v2, %v8134_v2 }
 0xb6d   : > { %5076 = vadd.xlane.f32.xlu1 %v5071_v18 }
 0xb71   : > { %v5059_v10 = vpop.xlane.xlu1 %5058 }
 0xb72   : > { %v5064_v5 = vmul.f32 0.0078125, %v5059_v10 }
 0xb74   : > { %v8130_v29 = vsub.f32 %v5042_v42, %v5064_v5 }
 0xb75   : > { %v5061_v63 = vpop.xlane.xlu1 %5060 }
 0xb76   : > { %v5065_v36 = vmul.f32 0.0078125, %v5061_v63  ;;  %v5072_v40 = vmul.f32 %v8130_v29, %v8130_v29 }
 0xb78   : > { %v8136_v26 = vsub.f32 %v5043_v25, %v5065_v36  ;;  %5078 = vadd.xlane.f32.xlu0 %v5072_v40 }
 0xb7a   : > { %v5073_v41 = vmul.f32 %v8136_v26, %v8136_v26 }
 0xb7c   : > { %5080 = vadd.xlane.f32.xlu1 %v5073_v41 }
 0xbf6   : > { %v5075_v56 = vpop.xlane.xlu0 %5074 }
 0xbf7   : > { %v5082_v13 = vmul.f32 0.0078125, %v5075_v56 }
 0xbf9   : > { %v5086_v23 = vadd.f32 1e-05, %v5082_v13 }
 0xbfa   : > { %v5077_v48 = vpop.xlane.xlu1 %5076 }
 0xbfb   : > { %6346 = vrsqrt.f32 %v5086_v23  ;;  %v5083_v17 = vmul.f32 0.0078125, %v5077_v48 }
 0xbfd   : > { %v5087_v60 = vadd.f32 1e-05, %v5083_v17 }
 0xbff   : > { %6348 = vrsqrt.f32 %v5087_v60 }
 0xc05   : > { %v5079_v38 = vpop.xlane.xlu0 %5078  ;;  %v6347_v61 = vpop.eup %6346 }
 0xc06   : > { %v5084_v34 = vmul.f32 0.0078125, %v5079_v38  ;;  %v5094_v3 = vmul.f32 %v6347_v61, %v8128_v30 }
 0xc08   : > { %v5088_v0 = vadd.f32 1e-05, %v5084_v34  ;;  %v5104_v57 = vmul.f32 %v5670_v8, %v5094_v3 }
 0xc09   : > { %v5081_v37 = vpop.xlane.xlu1 %5080  ;;  %v6349_v62 = vpop.eup %6348 }
 0xc0a   : > { %v5085_v54 = vmul.f32 0.0078125, %v5081_v37  ;;  %6350 = vrsqrt.f32 %v5088_v0  ;;  %v5095_v24 = vmul.f32 %v6349_v62, %v8134_v2  ;;  %v5114_v55 = vadd.f32 %v5671_v50, %v5104_v57 }
 0xc0c   : > { %v5089_v19 = vadd.f32 1e-05, %v5085_v54  ;;  %v5105_v14 = vmul.f32 %v5670_v8, %v5095_v24 }
 0xc0e   : > { %6352 = vrsqrt.f32 %v5089_v19  ;;  %v5115_v1 = vadd.f32 %v5671_v50, %v5105_v14 }
 0xc10   : > { %v5118_v53 = vpack.c.bf16 %v5115_v1, %v5114_v55 }
 0xc12   : > { %5249 = vmatmul.mubr.bf16.vlgmr.msra.gmra.mrb[0].mxu0 %v5118_v53 }
 0xc14   : > { %v6351_v33 = vpop.eup %6350 }
 0xc15   : > { %v5096_v39 = vmul.f32 %v6351_v33, %v8130_v29 }
 0xc17   : > { %v5106_v16 = vmul.f32 %v5670_v8, %v5096_v39 }
 0xc18   : > { %v6353_v27 = vpop.eup %6352 }
 0xc19   : > { %v5097_v49 = vmul.f32 %v6353_v27, %v8136_v26  ;;  %v5116_v11 = vadd.f32 %v5671_v50, %v5106_v16 }
 0xc1b   : > { %v5107_v42 = vmul.f32 %v5670_v8, %v5097_v49 }
 0xc1d   : > { %v5117_v25 = vadd.f32 %v5671_v50, %v5107_v42 }
 0xc1f   : > { %v5119_v9 = vpack.c.bf16 %v5117_v25, %v5116_v11 }
 0xc21   : > { %5259 = vmatmul.mubr.bf16.vlgmr.msra.gmra.mrb[0].mxu1 %v5119_v9 }
 0xce5   : > { %v5250_v32 = vpop.f32.mrb[0].mxu0 }
 0xce6   : > { %5269 = vst [vmem:[#allocation11] sm:$0xff] %v5250_v32  ;;  %v5252_v20 = vpop.f32.mrb[1].mxu0 }
 0xce7   : > { %5270 = vst [vmem:[#allocation11 + $0x8] sm:$0xff] %v5252_v20  ;;  %v5254_v10 = vpop.f32.mrb[2].mxu0 }
 0xce8   : > { %5271 = vst [vmem:[#allocation11 + $0x10] sm:$0xff] %v5254_v10  ;;  %v5256_v21 = vpop.f32.mrb[3].mxu0 }
 0xce9   : > { %5272 = vst [vmem:[#allocation11 + $0x18] sm:$0xff] %v5256_v21 }
 0xcf4   : > { %v5260_v5 = vpop.f32.mrb[0].mxu1 }
 0xcf5   : > { %5273 = vst [vmem:[#allocation11 + $0x20] sm:$0xff] %v5260_v5  ;;  %v5262_v30 = vpop.f32.mrb[1].mxu1 }
 0xcf6   : > { %5274 = vst [vmem:[#allocation11 + $0x28] sm:$0xff] %v5262_v30  ;;  %v5264_v29 = vpop.f32.mrb[2].mxu1 }
 0xcf7   : > { %5275 = vst [vmem:[#allocation11 + $0x30] sm:$0xff] %v5264_v29  ;;  %v5266_v46 = vpop.f32.mrb[3].mxu1 }
 0xcf8   : > { %5276 = vst [vmem:[#allocation11 + $0x38] sm:$0xff] %v5266_v46 }
 0xcf9 PF: > { %p6017_p6 = scmp.eq.s32.totalorder %s6775_s12, 1  ;;  %s6581_s8 = smov [#allocation11]  }
 0xcfa   : > { %s5287_s13 = sshll.u32 %s6581_s8, 4  ;;  %s5288_s13 = int_to_ptr.vmem [resolvable:$true] %s5287_s13 }
 0xcfb   : > { %s6472_s30 = scalar_lea.vmem %s5288_s13, 1024  ;;  %p6479_p5 = scmp.lt.s32.totalorder %s5288_s13, %s5288_s13 }
 0xcfc   : > { %p6473_p13 = scmp.ne.s32.totalorder %s5288_s13, %s6472_s30  ;;  %p6480_p11 = scmp.lt.s32.totalorder %s6472_s30, %s6472_s30 }
 0xcfe   : > { %p6474_p3 = pnand %p6473_p13, %p6017_p6  ;;  %p6481_p12 = por %p6480_p11, %p6479_p5 }
 0xd00   : > { %p6475_p7 = pneg %p6474_p3 }
 0xd02   : > { %p6482_p8 = pnand %p6481_p12, %p6475_p7 }
 0xd04   : > { %6485 = shalt.err (!%p6482_p8)
}
 0xd05   : > { %s8282_s0 = sld [smem:[#allocation35_spill]] }
 0xd0b   : > { %s6486_s3 = scalar_lea.hbm %s8282_s0, 1024 }
 0xd0c   : > { %p6487_p9 = scmp.ne.s32.totalorder %s8282_s0, %s6486_s3  ;;  %p6492_p0 = scmp.lt.u32.totalorder %s6486_s3, %s8282_s0 }
 0xd0e   : > { %p6488_p2 = pnand %p6487_p9, %p6017_p6 }
 0xd10   : > { %p6489_p10 = pneg %p6488_p2 }
 0xd12   : > { %p6494_p1 = pnand %p6492_p0, %p6489_p10 }
 0xd14   : > { %6497 = shalt.err (!%p6494_p1)
}
 0xd15   : > { %s6582_s1 = smov 256   ;;  %s6583_s26 = smov 16  }
 0xd16   : > { %5997 = dma.vmem_to_hbm [thread:$0]  (%p6017_p6), %s5288_s13, 1024, %s8282_s0, [#allocation5], %s6582_s1, %s6582_s1, %s6583_s26  }
 0xd17   : > { %6535 = dma.done.wait (%p6017_p6), [#allocation5], 1024  }
 0xd18   : > { %6537 = vsyncadd (%p6017_p6), [#allocation5], 4294966272 }
 0xd19 PF: > { %s8283_s16 = sld [smem:[#allocation18_spill]]  ;;  %s8284_s5 = sld [smem:[#allocation16_spill]] }
 0xd1a   : > { %s8285_s23 = sld [smem:[#allocation20_spill]]  ;;  %s8286_s24 = sld [smem:[#allocation17_spill]] }
 0xd1b   : > { %s8287_s25 = sld [smem:[#allocation19_spill]]  ;;  %s8288_s21 = smov %s6544_s22 }
 0xd1f   : > { %s34_s26 = sadd.s32 1, %s8283_s16   ;;  %s8289_s22 = smov %s8284_s5 }
 0xd20   : > { %p31_p4 = scmp.ge.s32.totalorder %s34_s26, 4  }
 0xd22   :  { %33 = sbr.rel (!%p31_p4) target bundleno = 24 (0x18), region = 185 }
 0xd29   :  { %5303 = vsyncpa [#allocation4], 1 }
 0xd2a   :  { %5305 = vsyncpa [#allocation4 + $0x1], 1 }
 0xd2b   :  { %5306 = vsyncpa [#allocation7], 1 }
 0xd2c   :  { %5308 = vsyncpa [#allocation7 + $0x1], 1 }
 0xd2d   :  { %5309 = vsyncpa [#allocation10], 1 }
 0xd2e   :  { %5310 = vsyncpa [#allocation5], 1 }
 0xd2f   :  { %5312 = vsyncpa [#allocation5 + $0x1], 1 }

// kernel: gpt_forward.1
= control target key start
LH: loop header
LB: loop body
LE: loop exit
PB: predicated region body
PF: predicated region fallthrough
CT: control target
= control target key end

     0   :  { %s8195_s0 = inlined_call_operand.vmem [shape: f32[2,16,128], index: 0, kind: input, shape index: {}]   ;;  %s8196_s1 = inlined_call_operand.vmem [shape: f32[16,16], index: 1, kind: input, shape index: {}]   ;;  %s8197_s2 = inlined_call_operand.vmem [shape: bf16[2,128,384], index: 2, kind: input, shape index: {}]   ;;  %s8198_s3 = inlined_call_operand.hbm [shape: bf16[2,128,128], index: 3, kind: input, shape index: {}]   ;;  %s8199_s4 = inlined_call_operand.vmem [shape: f32[2,1,128], index: 4, kind: input, shape index: {}]   ;;  %s8200_s5 = inlined_call_operand.hbm [shape: bf16[2,128,512], index: 5, kind: input, shape index: {}]   ;;  %s8201_s6 = inlined_call_operand.vmem [shape: f32[2,1,512], index: 6, kind: input, shape index: {}]   ;;  %s8202_s7 = inlined_call_operand.hbm [shape: bf16[2,512,128], index: 7, kind: input, shape index: {}]   ;;  %s8203_s8 = inlined_call_operand.vmem [shape: f32[2,1,128], index: 8, kind: input, shape index: {}]   ;;  %s8204_s9 = inlined_call_operand.vmem [shape: f32[2,1,128], index: 9, kind: input, shape index: {}]   ;;  %s8205_s10 = inlined_call_operand.vmem [shape: f32[2,1,128], index: 10, kind: input, shape index: {}]   ;;  %s8206_s11 = inlined_call_operand.vmem [shape: f32[2,1,128], index: 11, kind: input, shape index: {}]   ;;  %s8207_s12 = inlined_call_operand.vmem [shape: f32[2,1,128], index: 12, kind: input, shape index: {}]   ;;  %s8208_s13 = inlined_call_operand.vmem [shape: f32[1,128], index: 13, kind: input, shape index: {}]   ;;  %s8209_s14 = inlined_call_operand.vmem [shape: f32[1,128], index: 14, kind: input, shape index: {}]   ;;  %s8210_s15 = inlined_call_operand.hbm [shape: bf16[128,256], index: 15, kind: input, shape index: {}]   ;;  %s8211_s16 = inlined_call_operand.hbm [shape: f32[2,16,256], index: 16, kind: output, shape index: {}]  }
   0x1   :  { %8228 = sst [smem:[#allocation21_spill]] %s8195_s0 }
   0x2   :  { %8229 = sst [smem:[#allocation22_spill]] %s8196_s1 }
   0x3   :  { %8230 = sst [smem:[#allocation23_spill]] %s8197_s2 }
   0x4   :  { %8231 = sst [smem:[#allocation24_spill]] %s8198_s3 }
   0x5   :  { %8232 = sst [smem:[#allocation25_spill]] %s8200_s5 }
   0x6   :  { %8233 = sst [smem:[#allocation26_spill]] %s8201_s6 }
   0x7   :  { %8234 = sst [smem:[#allocation27_spill]] %s8202_s7 }
   0x8   :  { %8235 = sst [smem:[#allocation28_spill]] %s8203_s8 }
   0x9   :  { %8236 = sst [smem:[#allocation29_spill]] %s8204_s9 }
   0xa   :  { %8237 = sst [smem:[#allocation30_spill]] %s8205_s10 }
   0xb   :  { %8238 = sst [smem:[#allocation31_spill]] %s8206_s11 }
   0xc   :  { %8239 = sst [smem:[#allocation32_spill]] %s8207_s12 }
   0xd   :  { %8240 = sst [smem:[#allocation33_spill]] %s8208_s13 }
   0xe   :  { %8241 = sst [smem:[#allocation34_spill]] %s8209_s14 }
   0xf   :  { %8242 = sst [smem:[#allocation35_spill]] %s8211_s16 }
  0x10   :  { %21 = vsyncpa [#allocation4], 0 }
  0x11   :  { %23 = vsyncpa [#allocation4 + $0x1], 0 }
  0x12   :  { %24 = vsyncpa [#allocation7], 0 }
  0x13   :  { %26 = vsyncpa [#allocation7 + $0x1], 0 }
  0x14   :  { %27 = vsyncpa [#allocation10], 0 }
  0x15   :  { %28 = vsyncpa [#allocation5], 0  ;;  %s6669_s21 = smov 0   ;;  %s6671_s22 = smov 0  }
  0x16   :  { %s6673_s23 = smov 0   ;;  %s6675_s24 = smov 0  }
  0x17   :  { %s6677_s25 = smov 0   ;;  %s6679_s26 = smov 0  }
  0x18 LB: > { %8243 = sst [smem:[#allocation16_spill]] %s6548_s23  ;;  %s43_s27 = sadd.s32 1, %s6556_s25  ;;  %s6560_s26 = sphi %s6679_s26, %s34_s26   ;;  %s6556_s25 = sphi %s6677_s25, %s8287_s25   ;;  %s6552_s24 = sphi %s6675_s24, %s8286_s24   ;;  %s6548_s23 = sphi %s6673_s23, %s8285_s23   ;;  %s6544_s22 = sphi %s6671_s22, %s8289_s22   ;;  %s6540_s21 = sphi %s6669_s21, %s8288_s21  }
  0x19   : > { %8244 = sst [smem:[#allocation17_spill]] %s6556_s25  ;;  %s126_s28 = sadd.s32 1, %s6548_s23 }
  0x1a   : > { %8245 = sst [smem:[#allocation18_spill]] %s6560_s26  ;;  %p44_p0 = scmp.ge.s32.totalorder %s43_s27, 2 }
  0x1b   : > { %p133_p1 = scmp.ne.s32.totalorder %s6548_s23, %s6544_s22  ;;  %p134_p2 = scmp.eq.s32.totalorder %s6560_s26, 0 }
  0x1c   : > { %s8291_s27 = smov (%p44_p0, %s43_s27), 0  ;;  %p6015_p4 = scmp.lt.s32.totalorder %s6560_s26, 2 }
  0x1d   : > { %8246 = sst [smem:[#allocation19_spill]] %s8291_s27  ;;  %p135_p3 = por %p134_p2, %p133_p1 }
  0x1e   : > { %s123_s29 = ssub.s32 %s6556_s25, %s8291_s27  ;;  %s6710_s30 = sand.u32 1, %s6548_s23  }
  0x1f   : > { %p124_p5 = scmp.eq.s32.totalorder %s123_s29, 0  ;;  %p6712_p6 = pnand %p6015_p4, %p135_p3 }
  0x20   : > { %s553_s17 = sand.u32 1, %s6560_s26   ;;  %s8216_s18 = sshll.u32 %s6710_s30, 8 }
  0x21   : > { %s8247_s0 = scalar_select %p6712_p6, 1, 0 }
  0x22   : > { %s6719_s19 = scalar_select %p124_p5, %s6548_s23, %s126_s28  }
  0x23   : > { %s8217_s20 = sshll.u32 %s6556_s25, 12  ;;  %s8249_s5 = sld [smem:[#allocation25_spill]] }
  0x24   : > { %8248 = sst [smem:[#allocation20_spill]] %s6719_s19  ;;  %s557_s29 = scalar_lea.vmem [#allocation6], %s8216_s18 }
  0x25   : > { %s564_s13 = sshll.u32 %s557_s29, 4  ;;  %s6733_s1 = scalar_lea.sflag [#allocation7], %s553_s17  ;;  %s6731_s13 = int_to_ptr.vmem [resolvable:$true] %s564_s13 }
  0x26   : > { %p6739_p8 = pneg %p6712_p6 }
  0x28   : > { %s8250_s19 = scalar_select %p6739_p8, 1, 0 }
  0x29   : > { %s6727_s27 = scalar_lea.hbm %s8249_s5, %s8217_s20  ;;  %s6359_s18 = scalar_lea.hbm %s8249_s5, 8192 }
  0x2a   : > { %s6354_s28 = scalar_lea.hbm %s6727_s27, 4096  ;;  %p6360_p11 = scmp.lt.u32.totalorder %s6727_s27, %s8249_s5 }
  0x2b   : > { %p6355_p7 = scmp.ne.s32.totalorder %s6727_s27, %s6354_s28  ;;  %p6361_p12 = scmp.lt.u32.totalorder %s6359_s18, %s6354_s28 }
  0x2c   : > { %p6363_p0 = scmp.lt.u32.totalorder %s6354_s28, %s6727_s27 }
  0x2d   : > { %p6357_p9 = pnand %p6739_p8, %p6355_p7  ;;  %p6362_p13 = por %p6361_p12, %p6360_p11 }
  0x2f   : > { %p6358_p10 = pneg %p6357_p9  ;;  %p6364_p1 = por %p6363_p0, %p6362_p13 }
  0x31   : > { %p6365_p2 = pnand %p6364_p1, %p6358_p10 }
  0x33   : > { %6368 = shalt.err (!%p6365_p2)
}
  0x34   : > { %s6369_s17 = scalar_lea.vmem %s6731_s13, 4096  ;;  %s6562_s14 = smov [#allocation6]  }
  0x35   : > { %p6370_p3 = scmp.ne.s32.totalorder %s6731_s13, %s6369_s17  ;;  %s6374_s16 = sshll.u32 %s6562_s14, 4  ;;  %s6375_s16 = int_to_ptr.vmem [resolvable:$false] %s6374_s16 }
  0x36   : > { %s6376_s20 = scalar_lea.vmem %s6375_s16, 8192  ;;  %p6377_p7 = scmp.lt.s32.totalorder %s6731_s13, %s6375_s16 }
  0x37   : > { %p6372_p4 = pnand %p6370_p3, %p6739_p8  ;;  %p6378_p9 = scmp.lt.s32.totalorder %s6376_s20, %s6369_s17 }
  0x39   : > { %p6373_p5 = pneg %p6372_p4  ;;  %p6379_p11 = por %p6378_p9, %p6377_p7 }
  0x3b   : > { %p6380_p12 = pnand %p6379_p11, %p6373_p5 }
  0x3d   : > { %6383 = shalt.err (!%p6380_p12)
}
  0x3e   : > { %s6563_s18 = smov 256   ;;  %s6564_s28 = smov 16  }
  0x3f   : > { %6010 = dma.hbm_to_vmem [thread:$0]  (!%p6712_p6), %s6727_s27, 4096, %s6731_s13, %s6733_s1, %s6563_s18, %s6563_s18, %s6564_s28  }
  0x40   : > { %s8251_s29 = sshll.u32 %s6556_s25, 12  ;;  %s8252_s7 = sld [smem:[#allocation27_spill]] }
  0x41   : > { %s8253_s20 = sshll.u32 %s6710_s30, 8  ;;  %s6775_s12 = sadd.s32 4294967295, %s6560_s26  }
  0x42   : > { %s585_s5 = scalar_lea.vmem [#allocation8], %s8253_s20  ;;  %p139_p10 = scmp.ne.s32.totalorder %s6544_s22, %s6540_s21 }
  0x43   : > { %s592_s23 = sshll.u32 %s585_s5, 4  ;;  %p8220_p13 = scmp.eq.s32.totalorder %s6775_s12, 0  ;;  %s6772_s23 = int_to_ptr.vmem [resolvable:$true] %s592_s23 }
  0x44   : > { %p5498_p0 = scmp.ge.s32.totalorder %s6560_s26, 1  ;;  %p473_p1 = scmp.lt.s32.totalorder %s6560_s26, 3 }
  0x45   : > { %p6784_p2 = por %p8220_p13, %p139_p10  ;;  %s6565_s5 = smov [#allocation9]  }
  0x46   : > { %s6768_s16 = scalar_lea.hbm %s8252_s7, %s8251_s29  ;;  %p6788_p3 = pnand %p5498_p0, %p473_p1 }
  0x47   : > { %s8254_s13 = scalar_select %p6784_p2, 1, 0 }
  0x48   : > { %s8255_s27 = scalar_select %p6788_p3, 1, 0 }
  0x49   : > { %s504_s18 = sshll.u32 %s6565_s5, 4  ;;  %p6000_p4 = pneg %p6788_p3  ;;  %s505_s18 = int_to_ptr.vmem [resolvable:$true] %s504_s18 }
  0x4a   : > { %s5502_s28 = sshll.u32 %s6710_s30, 6  ;;  %s5692_s29 = sshll.u32 %s6556_s25, 10 }
  0x4b   : > { %p6796_p5 = pnand %p6000_p4, %p8220_p13  ;;  %s8257_s3 = sld [smem:[#allocation24_spill]] }
  0x4c   : > { %s6384_s5 = scalar_lea.hbm %s8210_s15, 2048 }
  0x4d   : > { %p6385_p7 = scmp.ne.s32.totalorder %s8210_s15, %s6384_s5  ;;  %p6386_p9 = pneg %p6796_p5 }
  0x4e   : > { %p6391_p10 = scmp.lt.u32.totalorder %s6384_s5, %s8210_s15 }
  0x4f   : > { %p6387_p11 = pnand %p6386_p9, %p6385_p7 }
  0x51   : > { %s6805_s20 = scalar_lea.hbm %s8257_s3, %s5692_s29  ;;  %p6388_p12 = pneg %p6387_p11 }
  0x53   : > { %p6393_p0 = pnand %p6391_p10, %p6388_p12 }
  0x55   : > { %6396 = shalt.err (!%p6393_p0)
}
  0x56   : > { %s6397_s29 = scalar_lea.vmem %s505_s18, 2048  ;;  %p6405_p2 = scmp.lt.s32.totalorder %s505_s18, %s505_s18 }
  0x57   : > { %p6398_p1 = scmp.ne.s32.totalorder %s505_s18, %s6397_s29  ;;  %p6406_p3 = scmp.lt.s32.totalorder %s6397_s29, %s6397_s29 }
  0x59   : > { %p6400_p4 = pnand %p6398_p1, %p6386_p9  ;;  %p6407_p6 = por %p6406_p3, %p6405_p2 }
  0x5b   : > { %p6401_p13 = pneg %p6400_p4 }
  0x5d   : > { %p6408_p8 = pnand %p6407_p6, %p6401_p13 }
  0x5f   : > { %6411 = shalt.err (!%p6408_p8)
}
  0x60   : > { %s6566_s9 = smov 128   ;;  %s6567_s2 = smov 8  }
  0x61   : > { %6003 = dma.hbm_to_vmem [thread:$0]  (!%p6796_p5), %s8210_s15, 2048, %s505_s18, [#allocation10], %s6566_s9, %s6566_s9, %s6567_s2  }
  0x62   : > { %s530_s11 = scalar_lea.vmem [#allocation3], %s5502_s28  ;;  %s527_s17 = scalar_lea.sflag [#allocation4], %s6710_s30 }
  0x63   : > { %s537_s26 = sshll.u32 %s530_s11, 4  ;;  %s6412_s14 = scalar_lea.hbm %s6805_s20, 1024  ;;  %s6823_s26 = int_to_ptr.vmem [resolvable:$true] %s537_s26 }
  0x64   : > { %p6413_p6 = scmp.ne.s32.totalorder %s6805_s20, %s6412_s14  ;;  %p8258_p8 = scmp.ne.s32.totalorder %s8250_s19, 0 }
  0x65   : > { %s6417_s25 = scalar_lea.hbm %s8257_s3, 2048  ;;  %p6418_p3 = scmp.lt.u32.totalorder %s6805_s20, %s8257_s3 }
  0x66   : > { %p6415_p13 = pnand %p6413_p6, %p8258_p8  ;;  %p6419_p7 = scmp.lt.u32.totalorder %s6417_s25, %s6412_s14 }
  0x67   : > { %p6421_p9 = scmp.lt.u32.totalorder %s6412_s14, %s6805_s20 }
  0x68   : > { %p6416_p2 = pneg %p6415_p13  ;;  %p6420_p5 = por %p6419_p7, %p6418_p3 }
  0x6a   : > { %p6422_p11 = por %p6421_p9, %p6420_p5 }
  0x6c   : > { %p6423_p12 = pnand %p6422_p11, %p6416_p2 }
  0x6e   : > { %6426 = shalt.err (!%p6423_p12)
}
  0x6f   : > { %s6427_s18 = scalar_lea.vmem %s6823_s26, 1024  ;;  %s6568_s28 = smov [#allocation3]  }
  0x70   : > { %p6428_p10 = scmp.ne.s32.totalorder %s6823_s26, %s6427_s18  ;;  %s6432_s9 = sshll.u32 %s6568_s28, 4  ;;  %s6433_s9 = int_to_ptr.vmem [resolvable:$false] %s6432_s9 }
  0x71   : > { %s6434_s8 = scalar_lea.vmem %s6433_s9, 2048  ;;  %p6435_p4 = scmp.lt.s32.totalorder %s6823_s26, %s6433_s9 }
  0x72   : > { %p6430_p0 = pnand %p6428_p10, %p8258_p8  ;;  %p6436_p6 = scmp.lt.s32.totalorder %s6434_s8, %s6427_s18 }
  0x74   : > { %p6431_p1 = pneg %p6430_p0  ;;  %p6437_p13 = por %p6436_p6, %p6435_p4 }
  0x76   : > { %p6438_p3 = pnand %p6437_p13, %p6431_p1 }
  0x78   : > { %6441 = shalt.err (!%p6438_p3)
}
  0x79   : > { %s6569_s25 = smov 64   ;;  %s6570_s2 = smov 4  }
  0x7a   : > { %p8259_p2 = scmp.ne.s32.totalorder %s8247_s0, 0  ;;  %s6442_s6 = scalar_lea.hbm %s6768_s16, 4096 }
  0x7b   : > { %p6443_p7 = scmp.ne.s32.totalorder %s6768_s16, %s6442_s6  ;;  %s6447_s14 = scalar_lea.hbm %s8252_s7, 8192 }
  0x7c   : > { %6007 = dma.hbm_to_vmem [thread:$0]  (!%p8259_p2), %s6805_s20, 1024, %s6823_s26, %s527_s17, %s6569_s25, %s6569_s25, %s6570_s2  }
  0x7d   : > { %p6445_p5 = pnand %p6443_p7, %p8258_p8  ;;  %p6448_p11 = scmp.lt.u32.totalorder %s6768_s16, %s8252_s7 }
  0x7e   : > { %p6449_p12 = scmp.lt.u32.totalorder %s6447_s14, %s6442_s6  ;;  %p6451_p0 = scmp.lt.u32.totalorder %s6442_s6, %s6768_s16 }
  0x7f   : > { %p6446_p9 = pneg %p6445_p5 }
  0x80   : > { %p6450_p10 = por %p6449_p12, %p6448_p11 }
  0x82   : > { %p6452_p1 = por %p6451_p0, %p6450_p10 }
  0x84   : > { %p6453_p4 = pnand %p6452_p1, %p6446_p9 }
  0x86   : > { %6456 = shalt.err (!%p6453_p4)
}
  0x87   : > { %s6457_s30 = scalar_lea.vmem %s6772_s23, 4096  ;;  %s6571_s20 = smov [#allocation8]  }
  0x88   : > { %p6458_p6 = scmp.ne.s32.totalorder %s6772_s23, %s6457_s30  ;;  %s6462_s26 = sshll.u32 %s6571_s20, 4  ;;  %s6463_s26 = int_to_ptr.vmem [resolvable:$false] %s6462_s26 }
  0x89   : > { %s6464_s17 = scalar_lea.vmem %s6463_s26, 8192  ;;  %p6465_p7 = scmp.lt.s32.totalorder %s6772_s23, %s6463_s26 }
  0x8a   : > { %p6460_p13 = pnand %p6458_p6, %p8258_p8  ;;  %p6466_p5 = scmp.lt.s32.totalorder %s6464_s17, %s6457_s30 }
  0x8c   : > { %p6461_p3 = pneg %p6460_p13  ;;  %p6467_p11 = por %p6466_p5, %p6465_p7 }
  0x8e   : > { %p6468_p12 = pnand %p6467_p11, %p6461_p3 }
  0x90   : > { %6471 = shalt.err (!%p6468_p12)
}
  0x91   : > { %6013 = dma.hbm_to_vmem [thread:$0]  (!%p8259_p2), %s6768_s16, 4096, %s6772_s23, %s6733_s1, %s6569_s25, %s6569_s25, %s6570_s2  }
  0x92   : > { %p8260_p8 = scmp.ne.s32.totalorder %s8255_s27, 0 }
  0x93   : > { %s636_s19 = sand.u32 (!%p8260_p8), 1, %s6544_s22   ;;  %p8261_p9 = scmp.ne.s32.totalorder (!%p8260_p8), %s8254_s13, 0 }
  0x94   : > { %634 = sbr.rel (%p8260_p8) target bundleno = 3353 (0xd19), region = 84  ;;  %s5512_s21 = sshll.u32 (!%p8260_p8), %s636_s19, 6 }
  0x95   : > { %s637_s18 = scalar_lea.sflag (!%p8260_p8), [#allocation4], %s636_s19  ;;  %s6880_s28 = scalar_lea.vmem (!%p8260_p8), [#allocation3], %s5512_s21 }
  0x9b   : > { %6523 = dma.done.wait (%p8261_p9), %s637_s18, 1024  }
  0x9c   : > { %6525 = vsyncadd (%p8261_p9), %s637_s18, 4294966272  ;;  %s645_s0 = sand.u32 1, %s6775_s12   ;;  %s5513_s9 = sshll.u32 %s636_s19, 8 }
  0x9d   : > { %s646_s1 = scalar_lea.sflag [#allocation7], %s645_s0  ;;  %s6887_s23 = scalar_lea.vmem [#allocation6], %s5513_s9 }
  0x9e   : > { %6527 = dma.done.wait (%p8261_p9), %s646_s1, 8192  }
  0x9f   : > { %6529 = vsyncadd (%p8261_p9), %s646_s1, 4294959104  ;;  %s6893_s16 = scalar_lea.vmem [#allocation8], %s5513_s9  ;;  %p8262_p2 = scmp.eq.s32.totalorder %s6775_s12, 0 }
  0xa1   : > { %6531 = dma.done.wait (%p8262_p2), [#allocation10], 2048   ;;  %p8263_p10 = pmov %p8262_p2 }
  0xa2   : > { %p756_p0 = scmp.lt.s32.totalorder %s6552_s24, 1  ;;  %s8265_s20 = sld [smem:[#allocation23_spill]] }
  0xa3   : > { %6533 = vsyncadd (%p8263_p10), [#allocation10], 4294965248  ;;  %s8266_s21 = sld [smem:[#allocation26_spill]]  ;;  %s8267_s1 = sld [smem:[#allocation29_spill]] }
  0xa4   : > { %s6901_s27 = scalar_select %p756_p0, %s6552_s24, 1 }
  0xa5   : > { %s8268_s3 = sld [smem:[#allocation30_spill]]  ;;  %s8269_s14 = sld [smem:[#allocation31_spill]] }
  0xa6   : > { %s5985_s13 = smul.u32 192, %s6901_s27  ;;  %s5517_s6 = sshll.u32 %s6901_s27, 2 }
  0xa7   : > { %s8270_s30 = sld [smem:[#allocation32_spill]]  ;;  %p5518_p1 = scmp.ne.s32.totalorder %s6552_s24, 0 }
  0xa8   : > { %s6916_s26 = scalar_lea.vmem %s8265_s20, %s5985_s13  ;;  %s8271_s19 = sld [smem:[#allocation21_spill]] (!%p5518_p1) }
  0xa9   : > { %s6921_s18 = scalar_lea.vmem %s8266_s21, %s5517_s6  ;;  %s773_s8 = scalar_lea.vmem %s8267_s1, %s6901_s27 }
  0xaa   : > { %788 = sbr.rel (%p5518_p1) target bundleno = 177 (0xb1), region = 104 }
  0xab   : > { %s776_s7 = scalar_lea.vmem %s8268_s3, %s6901_s27  ;;  %s779_s5 = scalar_lea.vmem %s8269_s14, %s6901_s27 }
  0xad   : > { %s782_s20 = scalar_lea.vmem %s8270_s30, %s6901_s27 }
  0xae   : > { %v789_v0 = vld [vmem:[%s8271_s19] sm:$0xff] (!%p5518_p1)  ;;  %v790_v1 = vld [vmem:[%s8271_s19 + $0x8] sm:$0xff] (!%p5518_p1)  ;;  %v791_v2 = vld [vmem:[%s8271_s19 + $0x10] sm:$0xff] (!%p5518_p1) }
  0xaf   : > { %793 = vst [vmem:[#allocation2] sm:$0xff] (!%p5518_p1), %v789_v0  ;;  %794 = vst [vmem:[#allocation2 + $0x8] sm:$0xff] (!%p5518_p1), %v790_v1  ;;  %v792_v3 = vld [vmem:[%s8271_s19 + $0x18] sm:$0xff] (!%p5518_p1) }
  0xb0   : > { %795 = vst [vmem:[#allocation2 + $0x10] sm:$0xff] (!%p5518_p1), %v791_v2  ;;  %796 = vst [vmem:[#allocation2 + $0x18] sm:$0xff] (!%p5518_p1), %v792_v3 }
  0xb1 PF: > { %v6086_v8 = vld [vmem:[%s6916_s26 + $0x4] ss:$12 sps:$4 sm:$0xff]   ;;  %v6088_v9 = vld [vmem:[%s6916_s26] ss:$12 sps:$4 sm:$0xff]   ;;  %v6089_v10 = vld [vmem:[%s6916_s26 + $0x1c] ss:$12 sps:$4 sm:$0xff]   ;;  %s8275_s9 = scalar_lea.vmem %s8199_s4, %s6901_s27 }
  0xb2   : > { %v6091_v11 = vld [vmem:[%s6916_s26 + $0x8] ss:$12 sps:$4 sm:$0xff]   ;;  %1030 = vmatprep.subr.bf16.mxu0 %v6086_v8  ;;  %v6092_v28 = vld [vmem:[%s6916_s26 + $0x18] ss:$12 sps:$4 sm:$0xff]   ;;  %v6095_v30 = vld [vmem:[%s6916_s26 + $0x20] ss:$12 sps:$4 sm:$0xff]  }
  0xb3   : > { %1031 = vmatpush1.bf16.msra.mxu0 %v6088_v9  ;;  %5809 = vmatprep.subr.bf16.mxu1 %v6091_v11  ;;  %v6093_v29 = vld [vmem:[%s6916_s26 + $0x34] ss:$12 sps:$4 sm:$0xff]   ;;  %v6096_v31 = vld [vmem:[%s6916_s26 + $0x30] ss:$12 sps:$4 sm:$0xff]   ;;  %v6097_v32 = vld [vmem:[%s6916_s26 + $0x4c] ss:$12 sps:$4 sm:$0xff]  }
  0xb4   : > { %1032 = vmatprep.subr.bf16.mxu0 %v6089_v10  ;;  %5810 = vmatpush3.bf16.msra.mxu1 %v6091_v11  ;;  %v6099_v33 = vld [vmem:[%s6916_s26 + $0x38] ss:$12 sps:$4 sm:$0xff]   ;;  %v6100_v34 = vld [vmem:[%s6916_s26 + $0x48] ss:$12 sps:$4 sm:$0xff]   ;;  %v6103_v36 = vld [vmem:[%s6916_s26 + $0x50] ss:$12 sps:$4 sm:$0xff]  }
  0xb5   : > { %5811 = vmatprep.subr.bf16.mxu1 %v6095_v30  ;;  %v6101_v35 = vld [vmem:[%s6916_s26 + $0x64] ss:$12 sps:$4 sm:$0xff]   ;;  %v6104_v37 = vld [vmem:[%s6916_s26 + $0x60] ss:$12 sps:$4 sm:$0xff]   ;;  %v6105_v38 = vld [vmem:[%s6916_s26 + $0x7c] ss:$12 sps:$4 sm:$0xff]  }
  0xb6   : > { %v797_v4 = vld [vmem:[#allocation2] sm:$0xff]  ;;  %v798_v6 = vld [vmem:[#allocation2 + $0x8] sm:$0xff]  ;;  %v6572_v43 = vmov 0   ;;  %v6112_v44 = vld [vmem:[%s6916_s26 + $0x90] ss:$12 sps:$4 sm:$0xff]   ;;  %s6575_s13 = smov 32  }
  0xb7   : > { %v799_v5 = vld [vmem:[#allocation2 + $0x10] sm:$0xff]  ;;  %803 = vadd.xlane.f32.xlu0 %v797_v4  ;;  %v800_v7 = vld [vmem:[#allocation2 + $0x18] sm:$0xff]  ;;  %1033 = vmatpush1.bf16.msra.mxu0 %v6092_v28  ;;  %v6111_v42 = vld [vmem:[%s6916_s26 + $0x80] ss:$12 sps:$4 sm:$0xff]   ;;  %vm6577_vm0 = vmmov 0   ;;  %vm2910_vm1 = vcmask 261120  }
  0xb8   : > { %807 = vadd.xlane.f32.xlu1 %v799_v5  ;;  %1034 = vmatprep.subr.bf16.mxu0 %v6093_v29  ;;  %v6107_v39 = vld [vmem:[%s6916_s26 + $0x68] ss:$12 sps:$4 sm:$0xff]   ;;  %v6108_v40 = vld [vmem:[%s6916_s26 + $0x78] ss:$12 sps:$4 sm:$0xff]   ;;  %v6117_v48 = vld [vmem:[%s6916_s26 + $0xb0] ss:$12 sps:$4 sm:$0xff]  }
  0xb9   : > { %5812 = vmatpush3.bf16.msra.mxu1 %v6095_v30  ;;  %v6109_v41 = vld [vmem:[%s6916_s26 + $0x94] ss:$12 sps:$4 sm:$0xff]   ;;  %1062 = vmatprep.mubr.bf16.mxu0 %v6572_v43  ;;  %v6113_v45 = vld [vmem:[%s6916_s26 + $0xac] ss:$12 sps:$4 sm:$0xff]   ;;  %v6576_v29 = vmov 0.0   ;;  %s8274_s17 = sld [smem:[#allocation22_spill]] }
  0xba   : > { %5813 = vmatprep.subr.bf16.mxu1 %v6099_v33  ;;  %v6115_v46 = vld [vmem:[%s6916_s26 + $0x98] ss:$12 sps:$4 sm:$0xff]   ;;  %v6116_v47 = vld [vmem:[%s6916_s26 + $0xa8] ss:$12 sps:$4 sm:$0xff]   ;;  %v5519_v63 = vld [vmem:[%s773_s8] ss:$0 sm:$0xff] }
  0xbb   : > { %805 = vadd.xlane.f32.xlu0 %v798_v6  ;;  %1035 = vmatpush1.bf16.msra.mxu0 %v6096_v31  ;;  %s6574_s8 = smov 64   ;;  %v6578_v31 = vmov 1983009808   ;;  %vm3287_vm2 = vcmask 130048   ;;  %p5669_p4 = scmp.ne.s32.totalorder %s6552_s24, 1 }
  0xbc   : > { %809 = vadd.xlane.f32.xlu1 %v800_v7  ;;  %1036 = vmatprep.subr.bf16.mxu0 %v6097_v32  ;;  %v1175_v32 = vunpack.c.l.s4 %v6578_v31  ;;  %s8280_s11 = sld [smem:[#allocation33_spill]] (!%p5669_p4) }
  0xbd   : > { %5814 = vmatpush3.bf16.msra.mxu1 %v6099_v33  ;;  %v1177_v33 = vlaneseq }
  0xbe   : > { %5815 = vmatprep.subr.bf16.mxu1 %v6103_v36 }
  0xbf   : > { %1037 = vmatpush1.bf16.msra.mxu0 %v6100_v34 }
  0xc0   : > { %1038 = vmatprep.subr.bf16.mxu0 %v6101_v35  ;;  %v6579_v35 = vmov 1934713408  }
  0xc1   : > { %5816 = vmatpush3.bf16.msra.mxu1 %v6103_v36  ;;  %v1207_v36 = vunpack.c.l.s4 %v6579_v35 }
  0xc2   : > { %5817 = vmatprep.subr.bf16.mxu1 %v6107_v39 }
  0xc3   : > { %1039 = vmatpush1.bf16.msra.mxu0 %v6104_v37 }
  0xc4   : > { %1040 = vmatprep.subr.bf16.mxu0 %v6105_v38  ;;  %v1176_v38 = vunpack.c.0.s8 %v1175_v32 }
  0xc5   : > { %5818 = vmatpush3.bf16.msra.mxu1 %v6107_v39  ;;  %v7102_v39 = vshrl.u32 %v1177_v33, 7 }
  0xc6   : > { %5819 = vmatprep.subr.bf16.mxu1 %v6111_v42 }
  0xc7   : > { %1041 = vmatpush1.bf16.msra.mxu0 %v6108_v40 }
  0xc8   : > { %1042 = vmatprep.subr.bf16.mxu0 %v6109_v41  ;;  %v1208_v41 = vunpack.c.0.s8 %v1207_v36 }
  0xc9   : > { %5820 = vmatpush3.bf16.msra.mxu1 %v6111_v42 }
  0xca   : > { %5821 = vmatprep.subr.bf16.mxu1 %v6115_v46 }
  0xcb   : > { %1043 = vmatpush1.bf16.msra.mxu0 %v6112_v44 }
  0xcc   : > { %1044 = vmatprep.subr.bf16.mxu0 %v6113_v45 }
  0xcd   : > { %5822 = vmatpush3.bf16.msra.mxu1 %v6115_v46  ;;  %v7107_v46 = vsub.s32 %v1176_v38, %v7102_v39 }
  0xce   : > { %5823 = vmatprep.subr.bf16.mxu1 %v6117_v48 }
  0xcf   : > { %1045 = vmatpush1.bf16.msra.mxu0 %v6116_v47 }
  0xd0   : > { %5829 = vmatprep.subr.bf16.mxu0 %v6576_v29 }
  0xd1   : > { %5824 = vmatpush3.bf16.msra.mxu1 %v6117_v48 }
  0xd2   : > { %5841 = vmatprep.subr.bf16.mxu1 %v6576_v29 }
 0x144   : > { %v804_v12 = vpop.xlane.xlu0 %803 }
 0x145   : > { %v808_v13 = vpop.xlane.xlu1 %807  ;;  %v812_v14 = vmul.f32 0.0078125, %v804_v12 }
 0x146   : > { %v814_v15 = vmul.f32 0.0078125, %v808_v13 }
 0x147   : > { %v6956_v16 = vsub.f32 %v797_v4, %v812_v14  ;;  %v5520_v4 = vld [vmem:[%s776_s7] ss:$0 sm:$0xff]  ;;  %s6573_s7 = smov 96  }
 0x148   : > { %v6958_v17 = vsub.f32 %v799_v5, %v814_v15  ;;  %v806_v18 = vpop.xlane.xlu0 %805 }
 0x149   : > { %v810_v19 = vpop.xlane.xlu1 %809  ;;  %v813_v20 = vmul.f32 0.0078125, %v806_v18  ;;  %v820_v21 = vmul.f32 %v6956_v16, %v6956_v16 }
 0x14a   : > { %v815_v22 = vmul.f32 0.0078125, %v810_v19  ;;  %v822_v25 = vmul.f32 %v6958_v17, %v6958_v17 }
 0x14b   : > { %v6962_v23 = vsub.f32 %v798_v6, %v813_v20  ;;  %824 = vadd.xlane.f32.xlu0 %v820_v21 }
 0x14c   : > { %v6964_v24 = vsub.f32 %v800_v7, %v815_v22 }
 0x14d   : > { %v821_v26 = vmul.f32 %v6962_v23, %v6962_v23 }
 0x14e   : > { %v823_v27 = vmul.f32 %v6964_v24, %v6964_v24 }
 0x14f   : > { %828 = vadd.xlane.f32.xlu0 %v822_v25  ;;  %826 = vadd.xlane.f32.xlu1 %v821_v26 }
 0x153   : > { %830 = vadd.xlane.f32.xlu1 %v823_v27 }
 0x1d8   : > { %v825_v49 = vpop.xlane.xlu0 %824 }
 0x1d9   : > { %v832_v50 = vmul.f32 0.0078125, %v825_v49 }
 0x1db   : > { %v836_v51 = vadd.f32 1e-05, %v832_v50 }
 0x1dc   : > { %v827_v52 = vpop.xlane.xlu1 %826  ;;  %v829_v53 = vpop.xlane.xlu0 %828 }
 0x1dd   : > { %6206 = vrsqrt.f32 %v836_v51  ;;  %v833_v54 = vmul.f32 0.0078125, %v827_v52  ;;  %v834_v55 = vmul.f32 0.0078125, %v829_v53  ;;  %v7112_v52 = vsub.s32 %v1208_v41, %v7102_v39 }
 0x1df   : > { %v837_v56 = vadd.f32 1e-05, %v833_v54  ;;  %v838_v57 = vadd.f32 1e-05, %v834_v55 }
 0x1e0   : > { %v831_v58 = vpop.xlane.xlu1 %830 }
 0x1e1   : > { %6208 = vrsqrt.f32 %v837_v56  ;;  %v835_v59 = vmul.f32 0.0078125, %v831_v58 }
 0x1e2   : > { %6210 = vrsqrt.f32 %v838_v57 }
 0x1e3   : > { %v839_v60 = vadd.f32 1e-05, %v835_v59 }
 0x1e5   : > { %6212 = vrsqrt.f32 %v839_v60 }
 0x1e7   : > { %v6207_v61 = vpop.eup %6206 }
 0x1e8   : > { %v844_v62 = vmul.f32 %v6207_v61, %v6956_v16 }
 0x1ea   : > { %v854_v3 = vmul.f32 %v5519_v63, %v844_v62 }
 0x1eb   : > { %v6209_v0 = vpop.eup %6208 }
 0x1ec   : > { %v6211_v1 = vpop.eup %6210  ;;  %v845_v2 = vmul.f32 %v6209_v0, %v6962_v23  ;;  %v864_v8 = vadd.f32 %v5520_v4, %v854_v3 }
 0x1ed   : > { %v846_v5 = vmul.f32 %v6211_v1, %v6958_v17 }
 0x1ee   : > { %v855_v6 = vmul.f32 %v5519_v63, %v845_v2 }
 0x1ef   : > { %v6213_v7 = vpop.eup %6212  ;;  %v856_v11 = vmul.f32 %v5519_v63, %v846_v5 }
 0x1f0   : > { %v865_v9 = vadd.f32 %v5520_v4, %v855_v6  ;;  %v847_v10 = vmul.f32 %v6213_v7, %v6964_v24 }
 0x1f1   : > { %v866_v14 = vadd.f32 %v5520_v4, %v856_v11 }
 0x1f2   : > { %v868_v12 = vpack.c.bf16 %v865_v9, %v864_v8  ;;  %v857_v13 = vmul.f32 %v5519_v63, %v847_v10 }
 0x1f4   : > { %1063 = vmatmul.mubr.bf16.vlgmr.msra.gmra.mrb[0].mxu0 %v868_v12  ;;  %5825 = vmatprep.mubr.bf16.mxu1 %v868_v12  ;;  %v867_v15 = vadd.f32 %v5520_v4, %v857_v13 }
 0x1f5   : > { %1072 = vmatprep.mubr.bf16.mxu0 %v6572_v43 }
 0x1f6   : > { %v869_v16 = vpack.c.bf16 %v867_v15, %v866_v14 }
 0x1f8   : > { %5826 = vmatmul.mubr.bf16.vlgmr.msra.gmra.mrb[0].mxu1 %v869_v16 }
 0x1f9   : > { %5843 = vmatprep.mubr.msk.bf16.mxu1 %vm6577_vm0, %v6576_v29 }
 0x1fc   : > { %1073 = vmatmul.mubr.bf16.gmra.mrb[4].mxu0 %v869_v16 }
 0x1fd   : > { %5831 = vmatprep.mubr.msk.bf16.mxu0 %vm6577_vm0, %v6576_v29 }
 0x2c7   : > { %v7008_v18 = vpop.f32.mrb[0].mxu0 }
 0x2c8   : > { %1136 = vrot.lane.b32.xlu0 %v7008_v18, %s6573_s7  ;;  %v7012_v17 = vpop.f32.mrb[1].mxu0 }
 0x2c9   : > { %1740 = vrot.lane.b32.xlu1 %v7012_v17, %s6574_s8  ;;  %v7016_v19 = vpop.f32.mrb[2].mxu0 }
 0x2ca   : > { %v7018_v20 = vpop.f32.mrb[3].mxu0 }
 0x2cb   : > { %v7020_v21 = vpop.f32.mrb[0].mxu1 }
 0x2cc   : > { %1148 = vrot.lane.b32.xlu0 %v7008_v18, %s6574_s8  ;;  %v7024_v22 = vpop.f32.mrb[1].mxu1 }
 0x2cd   : > { %1138 = vrot.lane.b32.xlu1 %v7016_v19, %s6573_s7  ;;  %v7028_v23 = vpop.f32.mrb[2].mxu1 }
 0x2ce   : > { %v7030_v24 = vpop.f32.mrb[3].mxu1 }
 0x2cf   : > { %v7032_v25 = vpop.f32.mrb[4].mxu0 }
 0x2d0   : > { %1160 = vrot.lane.b32.xlu0 %v7008_v18, %s6575_s13  ;;  %v7036_v26 = vpop.f32.mrb[5].mxu0 }
 0x2d1   : > { %1150 = vrot.lane.b32.xlu1 %v7016_v19, %s6574_s8  ;;  %v7040_v27 = vpop.f32.mrb[6].mxu0 }
 0x2d2   : > { %v7042_v28 = vpop.f32.mrb[7].mxu0 }
 0x2d4   : > { %1728 = vrot.lane.b32.xlu0 %v7012_v17, %s6573_s7 }
 0x2d5   : > { %1162 = vrot.lane.b32.xlu1 %v7016_v19, %s6575_s13 }
 0x2d8   : > { %1752 = vrot.lane.b32.xlu0 %v7012_v17, %s6575_s13 }
 0x2d9   : > { %1730 = vrot.lane.b32.xlu1 %v7018_v20, %s6573_s7 }
 0x2dc   : > { %1140 = vrot.lane.b32.xlu0 %v7032_v25, %s6573_s7 }
 0x2dd   : > { %1742 = vrot.lane.b32.xlu1 %v7018_v20, %s6574_s8 }
 0x2e0   : > { %1732 = vrot.lane.b32.xlu0 %v7036_v26, %s6573_s7 }
 0x2e1   : > { %1754 = vrot.lane.b32.xlu1 %v7018_v20, %s6575_s13 }
 0x2e4   : > { %1744 = vrot.lane.b32.xlu0 %v7036_v26, %s6574_s8 }
 0x2e5   : > { %1142 = vrot.lane.b32.xlu1 %v7040_v27, %s6573_s7 }
 0x2e8   : > { %1756 = vrot.lane.b32.xlu0 %v7036_v26, %s6575_s13 }
 0x2e9   : > { %1734 = vrot.lane.b32.xlu1 %v7042_v28, %s6573_s7 }
 0x2ec   : > { %1152 = vrot.lane.b32.xlu0 %v7032_v25, %s6574_s8 }
 0x2ed   : > { %1746 = vrot.lane.b32.xlu1 %v7042_v28, %s6574_s8 }
 0x2f0   : > { %1164 = vrot.lane.b32.xlu0 %v7032_v25, %s6575_s13 }
 0x2f1   : > { %1758 = vrot.lane.b32.xlu1 %v7042_v28, %s6575_s13 }
 0x2f4   : > { %2320 = vrot.lane.b32.xlu0 %v7024_v22, %s6573_s7 }
 0x2f5   : > { %1154 = vrot.lane.b32.xlu1 %v7040_v27, %s6574_s8 }
 0x2f8   : > { %2344 = vrot.lane.b32.xlu0 %v7024_v22, %s6575_s13 }
 0x2f9   : > { %1166 = vrot.lane.b32.xlu1 %v7040_v27, %s6575_s13 }
 0x2fc   : > { %2324 = vrot.lane.b32.xlu0 %v7020_v21, %s6573_s7 }
 0x2fd   : > { %2322 = vrot.lane.b32.xlu1 %v7030_v24, %s6573_s7 }
 0x301   : > { %2332 = vrot.lane.b32.xlu1 %v7024_v22, %s6574_s8 }
 0x305   : > { %2334 = vrot.lane.b32.xlu1 %v7030_v24, %s6574_s8 }
 0x309   : > { %2346 = vrot.lane.b32.xlu1 %v7030_v24, %s6575_s13 }
 0x30d   : > { %2326 = vrot.lane.b32.xlu1 %v7028_v23, %s6573_s7  ;;  %s8281_s7 = sld [smem:[#allocation34_spill]] (!%p5669_p4) }
 0x33a   : > { %v1137_v30 = vpop.permute.xlu0 %1136 }
 0x33b   : > { %v1741_v34 = vpop.permute.xlu1 %1740 }
 0x33c   : > { %v1764_v50 = vcombine.low %v7012_v17, %v1741_v34  ;;  %v1765_v51 = vcombine.high %v7012_v17, %v1741_v34 }
 0x33e   : > { %v1149_v37 = vpop.permute.xlu0 %1148  ;;  %v7123_v1 = vrot.slane %v1764_v50, %v7107_v46  ;;  %v7126_v2 = vrot.slane %v1765_v51, %v7107_v46 }
 0x33f   : > { %v1139_v40 = vpop.permute.xlu1 %1138  ;;  %v1172_v42 = vcombine.low %v7008_v18, %v1149_v37  ;;  %v1173_v44 = vcombine.high %v7008_v18, %v1149_v37 }
 0x341   : > { %v1180_v53 = vrot.slane %v1172_v42, %v7107_v46  ;;  %v1187_v54 = vrot.slane %v1173_v44, %v7107_v46 }
 0x342   : > { %v1161_v45 = vpop.permute.xlu0 %1160 }
 0x343   : > { %v1188_v47 = vcombine.low %v1137_v30, %v1161_v45  ;;  %v1189_v48 = vcombine.high %v1137_v30, %v1161_v45  ;;  %v1151_v49 = vpop.permute.xlu1 %1150 }
 0x344   : > { %v1240_v57 = vcombine.low %v7016_v19, %v1151_v49  ;;  %v1241_v58 = vcombine.high %v7016_v19, %v1151_v49 }
 0x345   : > { %v1196_v55 = vrot.slane %v1188_v47, %v7107_v46  ;;  %v1203_v56 = vrot.slane %v1189_v48, %v7107_v46 }
 0x346   : > { %v7120_v59 = vpop.permute.xlu0 %1728  ;;  %v1248_v9 = vrot.slane %v1240_v57, %v7107_v46  ;;  %v1255_v10 = vrot.slane %v1241_v58, %v7107_v46 }
 0x347   : > { %v1204_v60 = vcombine.low %v1180_v53, %v1196_v55  ;;  %v1205_v61 = vcombine.high %v1180_v53, %v1196_v55  ;;  %v1220_v62 = vcombine.low %v1187_v54, %v1203_v56  ;;  %v1221_v63 = vcombine.high %v1187_v54, %v1203_v56  ;;  %v1163_v0 = vpop.permute.xlu1 %1162 }
 0x348   : > { %v1256_v3 = vcombine.low %v1139_v40, %v1163_v0  ;;  %v1257_v4 = vcombine.high %v1139_v40, %v1163_v0 }
 0x349   : > { %v1212_v5 = vrot.slane %v1204_v60, %v7112_v52  ;;  %v1219_v6 = vrot.slane %v1205_v61, %v7112_v52  ;;  %v1228_v7 = vrot.slane %v1220_v62, %v7112_v52  ;;  %v1235_v8 = vrot.slane %v1221_v63, %v7112_v52 }
 0x34a   : > { %v1264_v11 = vrot.slane %v1256_v3, %v7107_v46  ;;  %v1271_v12 = vrot.slane %v1257_v4, %v7107_v46  ;;  %v1753_v13 = vpop.permute.xlu0 %1752 }
 0x34b   : > { %v1444_v14 = vcombine.low %v1212_v5, %v1219_v6  ;;  %v5545_v15 = vcombine.high %v1212_v5, %v1219_v6  ;;  %v1460_v16 = vcombine.low %v1228_v7, %v1235_v8  ;;  %v5546_v18 = vcombine.high %v1228_v7, %v1235_v8  ;;  %v7136_v17 = vpop.permute.xlu1 %1730 }
 0x34c   : > { %v1272_v19 = vcombine.low %v1248_v9, %v1264_v11  ;;  %v1273_v30 = vcombine.high %v1248_v9, %v1264_v11  ;;  %v1288_v31 = vcombine.low %v1255_v10, %v1271_v12  ;;  %v1289_v32 = vcombine.high %v1255_v10, %v1271_v12 }
 0x34d   : > { %v1451_v33 = vrot.slane %v1444_v14, %v7107_v46  ;;  %v1459_v34 = vrot.slane %v5545_v15, %v7107_v46  ;;  %v1467_v35 = vrot.slane %v1460_v16, %v7107_v46  ;;  %v1475_v36 = vrot.slane %v5546_v18, %v7107_v46 }
 0x34e   : > { %v1280_v37 = vrot.slane %v1272_v19, %v7112_v52  ;;  %v1287_v38 = vrot.slane %v1273_v30, %v7112_v52  ;;  %v1296_v40 = vrot.slane %v1288_v31, %v7112_v52  ;;  %v1303_v41 = vrot.slane %v1289_v32, %v7112_v52  ;;  %v7146_v42 = vpop.permute.xlu0 %1140 }
 0x34f   : > { %v1476_v44 = vcombine.low %v1451_v33, %v1459_v34  ;;  %v1477_v45 = vcombine.high %v1451_v33, %v1459_v34  ;;  %v1492_v47 = vcombine.low %v1467_v35, %v1475_v36  ;;  %v1493_v48 = vcombine.high %v1467_v35, %v1475_v36  ;;  %v1743_v49 = vpop.permute.xlu1 %1742 }
 0x350   : > { %v1512_v50 = vcombine.low %v1280_v37, %v1287_v38  ;;  %v5547_v51 = vcombine.high %v1280_v37, %v1287_v38  ;;  %v1528_v53 = vcombine.low %v1296_v40, %v1303_v41  ;;  %v5548_v54 = vcombine.high %v1296_v40, %v1303_v41 }
 0x351   : > { %v7149_v55 = vrot.slane %v1476_v44, %v7112_v52  ;;  %v7152_v56 = vrot.slane %v1477_v45, %v7112_v52  ;;  %v7155_v57 = vrot.slane %v1492_v47, %v7112_v52  ;;  %v7158_v58 = vrot.slane %v1493_v48, %v7112_v52 }
 0x352   : > { %v1519_v60 = vrot.slane %v1512_v50, %v7107_v46  ;;  %v1527_v61 = vrot.slane %v5547_v51, %v7107_v46  ;;  %v1535_v62 = vrot.slane %v1528_v53, %v7107_v46  ;;  %v1543_v63 = vrot.slane %v5548_v54, %v7107_v46  ;;  %v7164_v0 = vpop.permute.xlu0 %1732 }
 0x353   : > { %v1508_v3 = vcombine.low %v7149_v55, %v7155_v57  ;;  %v1780_v4 = vcombine.low %v7120_v59, %v1753_v13  ;;  %v1781_v5 = vcombine.high %v7120_v59, %v1753_v13  ;;  %v1832_v6 = vcombine.low %v7018_v20, %v1743_v49  ;;  %v1755_v7 = vpop.permute.xlu1 %1754 }
 0x354   : > { %v1544_v8 = vcombine.low %v1519_v60, %v1527_v61  ;;  %v1545_v9 = vcombine.high %v1519_v60, %v1527_v61  ;;  %v1560_v10 = vcombine.low %v1535_v62, %v1543_v63  ;;  %v1561_v11 = vcombine.high %v1535_v62, %v1543_v63 }
 0x355   : > { %v1788_v12 = vrot.slane %v1780_v4, %v7107_v46  ;;  %v1795_v14 = vrot.slane %v1781_v5, %v7107_v46  ;;  %v1833_v15 = vcombine.high %v7018_v20, %v1743_v49  ;;  %v1840_v16 = vrot.slane %v1832_v6, %v7107_v46 }
 0x356   : > { %v7176_v18 = vrot.slane %v1544_v8, %v7112_v52  ;;  %v7179_v59 = vrot.slane %v1545_v9, %v7112_v52  ;;  %v7182_v13 = vrot.slane %v1560_v10, %v7112_v52  ;;  %v7185_v19 = vrot.slane %v1561_v11, %v7112_v52  ;;  %v1745_v30 = vpop.permute.xlu0 %1744 }
 0x357   : > { %v1796_v31 = vcombine.low %v7123_v1, %v1788_v12  ;;  %v1797_v32 = vcombine.high %v7123_v1, %v1788_v12  ;;  %v1812_v20 = vcombine.low %v7126_v2, %v1795_v14  ;;  %v1813_v33 = vcombine.high %v7126_v2, %v1795_v14  ;;  %v7191_v34 = vpop.permute.xlu1 %1142 }
 0x358   : > { %v1576_v35 = vcombine.low %v7176_v18, %v7182_v13  ;;  %v1847_v36 = vrot.slane %v1833_v15, %v7107_v46  ;;  %v1848_v37 = vcombine.low %v7136_v17, %v1755_v7  ;;  %v1849_v38 = vcombine.high %v7136_v17, %v1755_v7 }
 0x359   : > { %v1804_v40 = vrot.slane %v1796_v31, %v7112_v52  ;;  %v1811_v41 = vrot.slane %v1797_v32, %v7112_v52  ;;  %v1820_v1 = vrot.slane %v1812_v20, %v7112_v52  ;;  %v1827_v44 = vrot.slane %v1813_v33, %v7112_v52 }
 0x35a   : > { %v1856_v2 = vrot.slane %v1848_v37, %v7107_v46  ;;  %v1863_v45 = vrot.slane %v1849_v38, %v7107_v46  ;;  %v1900_v47 = vcombine.low %v7036_v26, %v1745_v30  ;;  %v1901_v48 = vcombine.high %v7036_v26, %v1745_v30  ;;  %v1757_v49 = vpop.permute.xlu0 %1756 }
 0x35b   : > { %v2036_v50 = vcombine.low %v1804_v40, %v1811_v41  ;;  %v5553_v51 = vcombine.high %v1804_v40, %v1811_v41  ;;  %v2052_v17 = vcombine.low %v1820_v1, %v1827_v44  ;;  %v5554_v53 = vcombine.high %v1820_v1, %v1827_v44  ;;  %v7206_v54 = vpop.permute.xlu1 %1734 }
 0x35c   : > { %v1864_v60 = vcombine.low %v1840_v16, %v1856_v2  ;;  %v1865_v61 = vcombine.high %v1840_v16, %v1856_v2  ;;  %v1880_v62 = vcombine.low %v1847_v36, %v1863_v45  ;;  %v1881_v63 = vcombine.high %v1847_v36, %v1863_v45 }
 0x35d   : > { %v7209_v4 = vrot.slane %v2036_v50, %v7107_v46  ;;  %v7212_v5 = vrot.slane %v5553_v51, %v7107_v46  ;;  %v7215_v6 = vrot.slane %v2052_v17, %v7107_v46  ;;  %v7218_v26 = vrot.slane %v5554_v53, %v7107_v46 }
 0x35e   : > { %v1872_v7 = vrot.slane %v1864_v60, %v7112_v52  ;;  %v1879_v8 = vrot.slane %v1865_v61, %v7112_v52  ;;  %v1888_v9 = vrot.slane %v1880_v62, %v7112_v52  ;;  %v1895_v10 = vrot.slane %v1881_v63, %v7112_v52  ;;  %v1153_v11 = vpop.permute.xlu0 %1152 }
 0x35f   : > { %v1908_v12 = vrot.slane %v1900_v47, %v7107_v46  ;;  %v1915_v14 = vrot.slane %v1901_v48, %v7107_v46  ;;  %v1916_v15 = vcombine.low %v7164_v0, %v1757_v49  ;;  %v1917_v16 = vcombine.high %v7164_v0, %v1757_v49  ;;  %v1747_v30 = vpop.permute.xlu1 %1746 }
 0x360   : > { %v2104_v31 = vcombine.low %v1872_v7, %v1879_v8  ;;  %v5555_v32 = vcombine.high %v1872_v7, %v1879_v8  ;;  %v2120_v20 = vcombine.low %v1888_v9, %v1895_v10  ;;  %v5556_v33 = vcombine.high %v1888_v9, %v1895_v10 }
 0x361   : > { %v1924_v36 = vrot.slane %v1916_v15, %v7107_v46  ;;  %v1931_v37 = vrot.slane %v1917_v16, %v7107_v46  ;;  %v1308_v38 = vcombine.low %v7032_v25, %v1153_v11  ;;  %v1309_v40 = vcombine.high %v7032_v25, %v1153_v11 }
 0x362   : > { %v7233_v41 = vrot.slane %v2104_v31, %v7107_v46  ;;  %v7236_v1 = vrot.slane %v5555_v32, %v7107_v46  ;;  %v7239_v0 = vrot.slane %v2120_v20, %v7107_v46  ;;  %v7242_v44 = vrot.slane %v5556_v33, %v7107_v46  ;;  %v1165_v49 = vpop.permute.xlu0 %1164 }
 0x363   : > { %v1932_v2 = vcombine.low %v1908_v12, %v1924_v36  ;;  %v1933_v45 = vcombine.high %v1908_v12, %v1924_v36  ;;  %v1948_v47 = vcombine.low %v1915_v14, %v1931_v37  ;;  %v1949_v48 = vcombine.high %v1915_v14, %v1931_v37  ;;  %v1759_v50 = vpop.permute.xlu1 %1758 }
 0x364   : > { %v1316_v25 = vrot.slane %v1308_v38, %v7107_v46  ;;  %v1323_v51 = vrot.slane %v1309_v40, %v7107_v46  ;;  %v1968_v17 = vcombine.low %v7042_v28, %v1747_v30  ;;  %v1969_v53 = vcombine.high %v7042_v28, %v1747_v30 }
 0x365   : > { %v1940_v60 = vrot.slane %v1932_v2, %v7112_v52  ;;  %v1947_v61 = vrot.slane %v1933_v45, %v7112_v52  ;;  %v1956_v62 = vrot.slane %v1948_v47, %v7112_v52  ;;  %v1963_v63 = vrot.slane %v1949_v48, %v7112_v52 }
 0x366   : > { %v1976_v7 = vrot.slane %v1968_v17, %v7107_v46  ;;  %v1983_v8 = vrot.slane %v1969_v53, %v7107_v46  ;;  %v1324_v9 = vcombine.low %v7146_v42, %v1165_v49  ;;  %v1325_v10 = vcombine.high %v7146_v42, %v1165_v49 }
 0x367   : > { %v2172_v11 = vcombine.low %v1940_v60, %v1947_v61  ;;  %v5557_v12 = vcombine.high %v1940_v60, %v1947_v61  ;;  %v2188_v14 = vcombine.low %v1956_v62, %v1963_v63  ;;  %v5558_v28 = vcombine.high %v1956_v62, %v1963_v63  ;;  %v1155_v32 = vpop.permute.xlu1 %1154  ;;  %v2321_v62 = vpop.permute.xlu0 %2320 }
 0x368   : > { %v1332_v15 = vrot.slane %v1324_v9, %v7107_v46  ;;  %v1339_v16 = vrot.slane %v1325_v10, %v7107_v46  ;;  %v1984_v30 = vcombine.low %v7206_v54, %v1759_v50  ;;  %v1985_v31 = vcombine.high %v7206_v54, %v1759_v50 }
 0x369   : > { %v7261_v20 = vrot.slane %v2172_v11, %v7107_v46  ;;  %v7264_v33 = vrot.slane %v5557_v12, %v7107_v46  ;;  %v7267_v42 = vrot.slane %v2188_v14, %v7107_v46  ;;  %v7270_v36 = vrot.slane %v5558_v28, %v7107_v46 }
 0x36a   : > { %v1340_v37 = vcombine.low %v1316_v25, %v1332_v15  ;;  %v1341_v38 = vcombine.high %v1316_v25, %v1332_v15  ;;  %v1356_v40 = vcombine.low %v1323_v51, %v1339_v16  ;;  %v1357_v2 = vcombine.high %v1323_v51, %v1339_v16 }
 0x36b   : > { %v1992_v45 = vrot.slane %v1984_v30, %v7107_v46  ;;  %v1999_v54 = vrot.slane %v1985_v31, %v7107_v46  ;;  %v1376_v47 = vcombine.low %v7040_v27, %v1155_v32  ;;  %v1377_v48 = vcombine.high %v7040_v27, %v1155_v32 }
 0x36c   : > { %v1348_v49 = vrot.slane %v1340_v37, %v7112_v52  ;;  %v1355_v50 = vrot.slane %v1341_v38, %v7112_v52  ;;  %v1364_v17 = vrot.slane %v1356_v40, %v7112_v52  ;;  %v1371_v53 = vrot.slane %v1357_v2, %v7112_v52 }
 0x36d   : > { %v2000_v60 = vcombine.low %v1976_v7, %v1992_v45  ;;  %v2001_v25 = vcombine.high %v1976_v7, %v1992_v45  ;;  %v2016_v61 = vcombine.low %v1983_v8, %v1999_v54  ;;  %v2017_v51 = vcombine.high %v1983_v8, %v1999_v54  ;;  %v1167_v54 = vpop.permute.xlu1 %1166 }
 0x36e   : > { %v1580_v63 = vcombine.low %v1348_v49, %v1355_v50  ;;  %v5549_v9 = vcombine.high %v1348_v49, %v1355_v50  ;;  %v1596_v10 = vcombine.low %v1364_v17, %v1371_v53  ;;  %v5550_v11 = vcombine.high %v1364_v17, %v1371_v53 }
 0x36f   : > { %v2008_v12 = vrot.slane %v2000_v60, %v7112_v52  ;;  %v2015_v27 = vrot.slane %v2001_v25, %v7112_v52  ;;  %v2024_v14 = vrot.slane %v2016_v61, %v7112_v52  ;;  %v2031_v28 = vrot.slane %v2017_v51, %v7112_v52  ;;  %v2345_v60 = vpop.permute.xlu0 %2344 }
 0x370   : > { %v1587_v15 = vrot.slane %v1580_v63, %v7107_v46  ;;  %v1595_v16 = vrot.slane %v5549_v9, %v7107_v46  ;;  %v1603_v7 = vrot.slane %v1596_v10, %v7107_v46  ;;  %v1611_v8 = vrot.slane %v5550_v11, %v7107_v46 }
 0x371   : > { %v2240_v30 = vcombine.low %v2008_v12, %v2015_v27  ;;  %v5559_v31 = vcombine.high %v2008_v12, %v2015_v27  ;;  %v2256_v32 = vcombine.low %v2024_v14, %v2031_v28  ;;  %v5560_v37 = vcombine.high %v2024_v14, %v2031_v28 }
 0x372   : > { %v1612_v38 = vcombine.low %v1587_v15, %v1595_v16  ;;  %v1613_v40 = vcombine.high %v1587_v15, %v1595_v16  ;;  %v1628_v2 = vcombine.low %v1603_v7, %v1611_v8  ;;  %v1629_v45 = vcombine.high %v1603_v7, %v1611_v8 }
 0x373   : > { %v7289_v49 = vrot.slane %v2240_v30, %v7107_v46  ;;  %v7292_v50 = vrot.slane %v5559_v31, %v7107_v46  ;;  %v7295_v17 = vrot.slane %v2256_v32, %v7107_v46  ;;  %v7298_v53 = vrot.slane %v5560_v37, %v7107_v46  ;;  %v7334_v37 = vpop.permute.xlu1 %2322 }
 0x374   : > { %v7301_v25 = vrot.slane %v1612_v38, %v7112_v52  ;;  %v7304_v61 = vrot.slane %v1613_v40, %v7112_v52  ;;  %v7307_v51 = vrot.slane %v1628_v2, %v7112_v52  ;;  %v7310_v63 = vrot.slane %v1629_v45, %v7112_v52 }
 0x375   : > { %v1384_v9 = vrot.slane %v1376_v47, %v7107_v46  ;;  %v1391_v10 = vrot.slane %v1377_v48, %v7107_v46  ;;  %v2068_v11 = vcombine.low %v7209_v4, %v7212_v5  ;;  %v2084_v12 = vcombine.low %v7215_v6, %v7218_v26 }
 0x376   : > { %v2136_v27 = vcombine.low %v7233_v41, %v7236_v1  ;;  %v2152_v14 = vcombine.low %v7239_v0, %v7242_v44  ;;  %v2372_v28 = vcombine.low %v2321_v62, %v2345_v60  ;;  %v2373_v15 = vcombine.high %v2321_v62, %v2345_v60 }
 0x377   : > { %v2076_v16 = vrot.slane %v2068_v11, %v7112_v52  ;;  %v2092_v47 = vrot.slane %v2084_v12, %v7112_v52  ;;  %v1392_v48 = vcombine.low %v7191_v34, %v1167_v54  ;;  %v1393_v7 = vcombine.high %v7191_v34, %v1167_v54 }
 0x378   : > { %v2144_v8 = vrot.slane %v2136_v27, %v7112_v52  ;;  %v2160_v30 = vrot.slane %v2152_v14, %v7112_v52  ;;  %v7329_v31 = vrot.slane %v2372_v28, %v7107_v46  ;;  %v7332_v32 = vrot.slane %v2373_v15, %v7107_v46 }
 0x379   : > { %v2100_v62 = vcombine.low %v2076_v16, %v2092_v47  ;;  %v2101_v38 = vcombine.high %v2076_v16, %v2092_v47  ;;  %v1400_v40 = vrot.slane %v1392_v48, %v7107_v46  ;;  %v1407_v2 = vrot.slane %v1393_v7, %v7107_v46 }
 0x37a   : > { %v2168_v45 = vcombine.low %v2144_v8, %v2160_v30  ;;  %v2169_v34 = vcombine.high %v2144_v8, %v2160_v30  ;;  %v1716_v54 = vpack.c.bf16 %v1576_v35, %v1508_v3  ;;  %v1509_v60 = vcombine.high %v7149_v55, %v7155_v57 }
 0x37b   : > { %v1408_v11 = vcombine.low %v1384_v9, %v1400_v40  ;;  %v1409_v12 = vcombine.high %v1384_v9, %v1400_v40  ;;  %v1424_v27 = vcombine.low %v1391_v10, %v1407_v2  ;;  %v1425_v14 = vcombine.high %v1391_v10, %v1407_v2 }
 0x37c   : > { %v2308_v28 = vpack.c.bf16 %v2168_v45, %v2100_v62  ;;  %v2310_v15 = vpack.c.bf16 %v2169_v34, %v2101_v38  ;;  %v1577_v16 = vcombine.high %v7176_v18, %v7182_v13  ;;  %v2069_v47 = vcombine.high %v7209_v4, %v7212_v5  ;;  %v2333_v18 = vpop.permute.xlu1 %2332 }
 0x37d   : > { %v1416_v48 = vrot.slane %v1408_v11, %v7112_v52  ;;  %v1423_v7 = vrot.slane %v1409_v12, %v7112_v52  ;;  %v1432_v3 = vrot.slane %v1424_v27, %v7112_v52  ;;  %v1439_v55 = vrot.slane %v1425_v14, %v7112_v52 }
 0x37e   : > { %v2915_v57 = vsel %vm2910_vm1, %v2308_v28, 0  ;;  %v3009_v35 = vsel %vm2910_vm1, %v2310_v15, 0  ;;  %v1718_v9 = vpack.c.bf16 %v1577_v16, %v1509_v60  ;;  %v7357_v10 = vrot.slane %v2069_v47, %v7112_v52 }
 0x37f   : > { %5830 = vmatpush3.bf16.xpose.msra.mxu0 %v2915_v57  ;;  %5842 = vmatpush3.bf16.xpose.msra.mxu1 %v3009_v35  ;;  %v1648_v13 = vcombine.low %v1416_v48, %v1423_v7  ;;  %v5551_v4 = vcombine.high %v1416_v48, %v1423_v7  ;;  %v1664_v5 = vcombine.low %v1432_v3, %v1439_v55 }
 0x380   : > { %v5552_v8 = vcombine.high %v1432_v3, %v1439_v55  ;;  %5853 = vmatprep.subr.bf16.mxu1 %v6576_v29  ;;  %v2085_v30 = vcombine.high %v7215_v6, %v7218_v26  ;;  %v2137_v62 = vcombine.high %v7233_v41, %v7236_v1  ;;  %v2153_v38 = vcombine.high %v7239_v0, %v7242_v44  ;;  %v2335_v48 = vpop.permute.xlu1 %2334 }
 0x381   : > { %v1655_v40 = vrot.slane %v1648_v13, %v7107_v46  ;;  %v1663_v2 = vrot.slane %v5551_v4, %v7107_v46  ;;  %v1671_v45 = vrot.slane %v1664_v5, %v7107_v46  ;;  %v2356_v34 = vcombine.low %v7024_v22, %v2333_v18  ;;  %5835 = vmatprep.subr.bf16.mxu0 %v6576_v29 }
 0x382   : > { %v1679_v60 = vrot.slane %v5552_v8, %v7107_v46  ;;  %v7373_v6 = vrot.slane %v2085_v30, %v7112_v52  ;;  %v7376_v26 = vrot.slane %v2137_v62, %v7112_v52  ;;  %v7379_v41 = vrot.slane %v2153_v38, %v7112_v52 }
 0x383   : > { %v1680_v1 = vcombine.low %v1655_v40, %v1663_v2  ;;  %v1681_v0 = vcombine.high %v1655_v40, %v1663_v2  ;;  %v2357_v44 = vcombine.high %v7024_v22, %v2333_v18  ;;  %v2364_v11 = vrot.slane %v2356_v34, %v7107_v46 }
 0x384   : > { %v1696_v12 = vcombine.low %v1671_v45, %v1679_v60  ;;  %v1697_v27 = vcombine.high %v1671_v45, %v1679_v60  ;;  %v2102_v14 = vcombine.low %v7357_v10, %v7373_v6  ;;  %v2170_v28 = vcombine.low %v7376_v26, %v7379_v41 }
 0x385   : > { %v7388_v15 = vrot.slane %v1680_v1, %v7112_v52  ;;  %v7391_v16 = vrot.slane %v1681_v0, %v7112_v52  ;;  %v2371_v47 = vrot.slane %v2357_v44, %v7107_v46  ;;  %v2388_v22 = vcombine.low %v2364_v11, %v7329_v31 }
 0x386   : > { %v7396_v7 = vrot.slane %v1696_v12, %v7112_v52  ;;  %v7399_v3 = vrot.slane %v1697_v27, %v7112_v52  ;;  %5832 = vmatmul.mubr.msk.bf16.vlgmr.msra.gmra.mrb[8].mxu0 %vm2910_vm1, %v1716_v54  ;;  %5844 = vmatmul.mubr.msk.bf16.vlgmr.msra.gmra.mrb[4].mxu1 %vm2910_vm1, %v1718_v9  ;;  %v2312_v55 = vpack.c.bf16 %v2170_v28, %v2102_v14  ;;  %v2347_v12 = vpop.permute.xlu1 %2346 }
 0x387   : > { %v2389_v57 = vcombine.high %v2364_v11, %v7329_v31  ;;  %v2396_v35 = vrot.slane %v2388_v22, %v7112_v52  ;;  %v2404_v18 = vcombine.low %v2371_v47, %v7332_v32  ;;  %v2405_v13 = vcombine.high %v2371_v47, %v7332_v32  ;;  %5855 = vmatprep.mubr.msk.bf16.mxu1 %vm6577_vm0, %v6576_v29 }
 0x388   : > { %v3103_v4 = vsel %vm2910_vm1, %v2312_v55, 0  ;;  %v2424_v5 = vcombine.low %v7030_v24, %v2335_v48  ;;  %v2425_v54 = vcombine.high %v7030_v24, %v2335_v48  ;;  %v1510_v9 = vcombine.low %v7152_v56, %v7158_v58  ;;  %5837 = vmatprep.mubr.msk.bf16.mxu0 %vm6577_vm0, %v6576_v29 }
 0x389   : > { %5854 = vmatpush3.bf16.xpose.msra.mxu1 %v3103_v4  ;;  %v2403_v31 = vrot.slane %v2389_v57, %v7112_v52  ;;  %v2412_v32 = vrot.slane %v2404_v18, %v7112_v52  ;;  %v2419_v8 = vrot.slane %v2405_v13, %v7112_v52  ;;  %v1578_v30 = vcombine.low %v7179_v59, %v7185_v19 }
 0x38a   : > { %v2432_v62 = vrot.slane %v2424_v5, %v7107_v46  ;;  %v2439_v24 = vrot.slane %v2425_v54, %v7107_v46  ;;  %5865 = vmatprep.subr.bf16.mxu1 %v6576_v29  ;;  %v2204_v38 = vcombine.low %v7261_v20, %v7264_v33  ;;  %v2220_v40 = vcombine.low %v7267_v42, %v7270_v36 }
 0x38b   : > { %v2628_v2 = vcombine.low %v2396_v35, %v2403_v31  ;;  %v5561_v45 = vcombine.high %v2396_v35, %v2403_v31  ;;  %v2644_v34 = vcombine.low %v2412_v32, %v2419_v8  ;;  %v5562_v60 = vcombine.high %v2412_v32, %v2419_v8 }
 0x38c   : > { %v1720_v1 = vpack.c.bf16 %v1578_v30, %v1510_v9  ;;  %v2212_v0 = vrot.slane %v2204_v38, %v7112_v52  ;;  %v2228_v44 = vrot.slane %v2220_v40, %v7112_v52  ;;  %v2272_v11 = vcombine.low %v7289_v49, %v7292_v50 }
 0x38d   : > { %v7433_v27 = vrot.slane %v2628_v2, %v7107_v46  ;;  %v7436_v14 = vrot.slane %v5561_v45, %v7107_v46  ;;  %v7439_v28 = vrot.slane %v2644_v34, %v7107_v46  ;;  %v7442_v47 = vrot.slane %v5562_v60, %v7107_v46 }
 0x38e   : > { %v2236_v22 = vcombine.low %v2212_v0, %v2228_v44  ;;  %v2280_v48 = vrot.slane %v2272_v11, %v7112_v52  ;;  %v2288_v55 = vcombine.low %v7295_v17, %v7298_v53  ;;  %v2103_v57 = vcombine.high %v7357_v10, %v7373_v6 }
 0x38f   : > { %v2171_v35 = vcombine.high %v7376_v26, %v7379_v41  ;;  %v2440_v18 = vcombine.low %v7334_v37, %v2347_v12  ;;  %v2441_v13 = vcombine.high %v7334_v37, %v2347_v12  ;;  %v1644_v4 = vcombine.low %v7301_v25, %v7307_v51 }
 0x390   : > { %5856 = vmatmul.mubr.msk.bf16.vlgmr.msra.gmra.mrb[8].mxu1 %vm2910_vm1, %v1720_v1  ;;  %v2296_v5 = vrot.slane %v2288_v55, %v7112_v52  ;;  %v1712_v54 = vcombine.low %v7388_v15, %v7396_v7  ;;  %v1511_v10 = vcombine.high %v7152_v56, %v7158_v58  ;;  %v1579_v6 = vcombine.high %v7179_v59, %v7185_v19 }
 0x391   : > { %v2314_v26 = vpack.c.bf16 %v2171_v35, %v2103_v57  ;;  %v2448_v41 = vrot.slane %v2440_v18, %v7107_v46  ;;  %v2455_v37 = vrot.slane %v2441_v13, %v7107_v46  ;;  %5867 = vmatprep.mubr.msk.bf16.mxu1 %vm6577_vm0, %v6576_v29  ;;  %v2237_v9 = vcombine.high %v2212_v0, %v2228_v44 }
 0x392   : > { %v2304_v31 = vcombine.low %v2280_v48, %v2296_v5  ;;  %v1717_v32 = vpack.c.bf16 %v1712_v54, %v1644_v4  ;;  %v1722_v8 = vpack.c.bf16 %v1579_v6, %v1511_v10  ;;  %v2305_v30 = vcombine.high %v2280_v48, %v2296_v5 }
 0x393   : > { %v3197_v38 = vsel %vm2910_vm1, %v2314_v26, 0  ;;  %v2456_v40 = vcombine.low %v2432_v62, %v2448_v41  ;;  %v2457_v56 = vcombine.high %v2432_v62, %v2448_v41  ;;  %v2472_v58 = vcombine.low %v2439_v24, %v2455_v37 }
 0x394   : > { %v2309_v2 = vpack.c.bf16 %v2304_v31, %v2236_v22  ;;  %5866 = vmatpush3.bf16.xpose.msra.mxu1 %v3197_v38  ;;  %v2473_v59 = vcombine.high %v2439_v24, %v2455_v37  ;;  %v2311_v19 = vpack.c.bf16 %v2305_v30, %v2237_v9  ;;  %v1645_v45 = vcombine.high %v7301_v25, %v7307_v51 }
 0x395   : > { %v2464_v34 = vrot.slane %v2456_v40, %v7112_v52  ;;  %v2471_v60 = vrot.slane %v2457_v56, %v7112_v52  ;;  %v2480_v1 = vrot.slane %v2472_v58, %v7112_v52  ;;  %v1713_v0 = vcombine.high %v7388_v15, %v7396_v7  ;;  %5877 = vmatprep.subr.bf16.mxu1 %v6576_v29 }
 0x396   : > { %v2962_v62 = vsel %vm2910_vm1, %v2309_v2, 0  ;;  %v2487_v44 = vrot.slane %v2473_v59, %v7112_v52  ;;  %v3056_v24 = vsel %vm2910_vm1, %v2311_v19, 0  ;;  %v2205_v25 = vcombine.high %v7261_v20, %v7264_v33 }
 0x397   : > { %5836 = vmatpush3.bf16.xpose.msra.mxu0 %v2962_v62  ;;  %v2696_v51 = vcombine.low %v2464_v34, %v2471_v60  ;;  %v5563_v11 = vcombine.high %v2464_v34, %v2471_v60  ;;  %v1719_v12 = vpack.c.bf16 %v1713_v0, %v1645_v45  ;;  %v2221_v22 = vcombine.high %v7267_v42, %v7270_v36 }
 0x398   : > { %v2712_v48 = vcombine.low %v2480_v1, %v2487_v44  ;;  %v5564_v15 = vcombine.high %v2480_v1, %v2487_v44  ;;  %5847 = vmatprep.subr.bf16.mxu0 %v6576_v29  ;;  %v2219_v7 = vrot.slane %v2205_v25, %v7112_v52  ;;  %v2273_v55 = vcombine.high %v7289_v49, %v7292_v50 }
 0x399   : > { %v2703_v57 = vrot.slane %v2696_v51, %v7107_v46  ;;  %v2711_v20 = vrot.slane %v5563_v11, %v7107_v46  ;;  %v2235_v33 = vrot.slane %v2221_v22, %v7112_v52  ;;  %v2289_v35 = vcombine.high %v7295_v17, %v7298_v53  ;;  %v7550_v11 = vld [vmem:[%s8274_s17] sm:$0xff] }
 0x39a   : > { %v2719_v42 = vrot.slane %v2712_v48, %v7107_v46  ;;  %v2727_v36 = vrot.slane %v5564_v15, %v7107_v46  ;;  %v2287_v18 = vrot.slane %v2273_v55, %v7112_v52  ;;  %v1646_v13 = vcombine.low %v7304_v61, %v7310_v63  ;;  %v7555_v48 = vld [vmem:[%s8274_s17 + $0x8] sm:$0xff] }
 0x39b   : > { %5868 = vmatmul.mubr.msk.bf16.vlgmr.msra.gmra.mrb[12].mxu1 %vm2910_vm1, %v1722_v8  ;;  %v2238_v49 = vcombine.low %v2219_v7, %v2235_v33  ;;  %v2303_v50 = vrot.slane %v2289_v35, %v7112_v52  ;;  %v1714_v4 = vcombine.low %v7391_v16, %v7399_v3  ;;  %v2660_v17 = vcombine.low %v7433_v27, %v7436_v14 }
 0x39c   : > { %v2676_v53 = vcombine.low %v7439_v28, %v7442_v47  ;;  %v2728_v5 = vcombine.low %v2703_v57, %v2711_v20  ;;  %v2744_v54 = vcombine.low %v2719_v42, %v2727_v36  ;;  %v2239_v10 = vcombine.high %v2219_v7, %v2235_v33  ;;  %5879 = vmatprep.mubr.msk.bf16.mxu1 %vm6577_vm0, %v6576_v29 }
 0x39d   : > { %v2306_v6 = vcombine.low %v2287_v18, %v2303_v50  ;;  %v1721_v26 = vpack.c.bf16 %v1714_v4, %v1646_v13  ;;  %v2668_v41 = vrot.slane %v2660_v17, %v7112_v52  ;;  %v2307_v37 = vcombine.high %v2287_v18, %v2303_v50 }
 0x39e   : > { %5838 = vmatmul.mubr.msk.bf16.vlgmr.msra.gmra.mrb[12].mxu0 %vm2910_vm1, %v1717_v32  ;;  %v2684_v9 = vrot.slane %v2676_v53, %v7112_v52  ;;  %v2736_v31 = vrot.slane %v2728_v5, %v7112_v52  ;;  %v2752_v8 = vrot.slane %v2744_v54, %v7112_v52  ;;  %v1647_v30 = vcombine.high %v7304_v61, %v7310_v63 }
 0x39f   : > { %5848 = vmatpush3.bf16.xpose.msra.mxu0 %v3056_v24  ;;  %5849 = vmatprep.mubr.msk.bf16.mxu0 %vm6577_vm0, %v6576_v29  ;;  %v2313_v38 = vpack.c.bf16 %v2306_v6, %v2238_v49  ;;  %v2315_v40 = vpack.c.bf16 %v2307_v37, %v2239_v10  ;;  %v1715_v56 = vcombine.high %v7391_v16, %v7399_v3 }
 0x3a0   : > { %5859 = vmatprep.subr.bf16.mxu0 %v6576_v29  ;;  %v2692_v32 = vcombine.low %v2668_v41, %v2684_v9  ;;  %v2760_v58 = vcombine.low %v2736_v31, %v2752_v8  ;;  %v2693_v2 = vcombine.high %v2668_v41, %v2684_v9  ;;  %v2761_v59 = vcombine.high %v2736_v31, %v2752_v8 }
 0x3a1   : > { %v1723_v19 = vpack.c.bf16 %v1715_v56, %v1647_v30  ;;  %v2661_v45 = vcombine.high %v7433_v27, %v7436_v14  ;;  %v2677_v34 = vcombine.high %v7439_v28, %v7442_v47  ;;  %v2729_v60 = vcombine.high %v2703_v57, %v2711_v20 }
 0x3a2   : > { %v2900_v61 = vpack.c.bf16 %v2760_v58, %v2692_v32  ;;  %v7521_v63 = vpack.c.bf16 %v2761_v59, %v2693_v2  ;;  %v2745_v16 = vcombine.high %v2719_v42, %v2727_v36  ;;  %v3150_v27 = vsel %vm2910_vm1, %v2313_v38, 0 }
 0x3a3   : > { %v2675_v1 = vrot.slane %v2661_v45, %v7112_v52  ;;  %v2691_v3 = vrot.slane %v2677_v34, %v7112_v52  ;;  %v2743_v0 = vrot.slane %v2729_v60, %v7112_v52  ;;  %v3244_v51 = vsel %vm2910_vm1, %v2315_v40, 0 }
 0x3a4   : > { %5878 = vmatpush3.bf16.msra.mxu1 %v2900_v61  ;;  %v2759_v62 = vrot.slane %v2745_v16, %v7112_v52 }
 0x3a5   : > { %5889 = vmatprep.subr.bf16.mxu1 %v6576_v29  ;;  %v2694_v14 = vcombine.low %v2675_v1, %v2691_v3  ;;  %v2695_v44 = vcombine.high %v2675_v1, %v2691_v3 }
 0x3a6   : > { %5850 = vmatmul.mubr.msk.bf16.vlgmr.msra.gmra.mrb[16].mxu0 %vm2910_vm1, %v1719_v12  ;;  %v2762_v28 = vcombine.low %v2743_v0, %v2759_v62  ;;  %v2763_v47 = vcombine.high %v2743_v0, %v2759_v62 }
 0x3a7   : > { %5860 = vmatpush3.bf16.xpose.msra.mxu0 %v3150_v27  ;;  %5861 = vmatprep.mubr.msk.bf16.mxu0 %vm6577_vm0, %v6576_v29 }
 0x3a8   : > { %5871 = vmatprep.subr.bf16.mxu0 %v6576_v29  ;;  %v7535_v24 = vpack.c.bf16 %v2762_v28, %v2694_v14  ;;  %v7537_v25 = vpack.c.bf16 %v2763_v47, %v2695_v44 }
 0x3ae   : > { %5862 = vmatmul.mubr.msk.bf16.vlgmr.msra.gmra.mrb[20].mxu0 %vm2910_vm1, %v1721_v26 }
 0x3af   : > { %5872 = vmatpush3.bf16.xpose.msra.mxu0 %v3244_v51  ;;  %5873 = vmatprep.mubr.msk.bf16.mxu0 %vm6577_vm0, %v6576_v29 }
 0x3b0   : > { %5883 = vmatprep.subr.bf16.mxu0 %v6576_v29 }
 0x3b6   : > { %5874 = vmatmul.mubr.msk.bf16.vlgmr.msra.gmra.mrb[24].mxu0 %vm2910_vm1, %v1723_v19 }
 0x3b7   : > { %5885 = vmatprep.mubr.msk.bf16.mxu0 %vm6577_vm0, %v6576_v29 }
 0x459   : > { %v2951_v12 = vpop.f32.mrb[8].mxu0  ;;  %v3045_v22 = vpop.f32.mrb[4].mxu1 }
 0x45a   : > { %v7558_v15 = vadd.f32 %v2951_v12, %v7550_v11  ;;  %v5833_v7 = vpop.f32.mrb[9].mxu0  ;;  %v5845_v55 = vpop.f32.mrb[5].mxu1  ;;  %v7561_v33 = vadd.f32 %v3045_v22, %v7550_v11 }
 0x45b   : > { %v2954_v57 = vpop.f32.mrb[10].mxu0  ;;  %v3048_v20 = vpop.f32.mrb[6].mxu1 }
 0x45c   : > { %v7564_v35 = vadd.f32 %v2954_v57, %v7555_v48  ;;  %v5834_v42 = vpop.f32.mrb[11].mxu0  ;;  %v5846_v36 = vpop.f32.mrb[7].mxu1  ;;  %v3288_v18 = vsel %vm3287_vm2, %v7558_v15, -inf  ;;  %v7569_v13 = vadd.f32 %v3048_v20, %v7555_v48  ;;  %v3300_v50 = vsel %vm3287_vm2, %v7561_v33, -inf }
 0x45d   : > { %3289 = vmax.xlane.f32.xlu0 %v3288_v18 }
 0x45e   : > { %v3291_v49 = vsel %vm3287_vm2, %v7564_v35, -inf  ;;  %v3303_v4 = vsel %vm3287_vm2, %v7569_v13, -inf }
 0x45f   : > { %3292 = vmax.xlane.f32.xlu1 %v3291_v49 }
 0x461   : > { %3301 = vmax.xlane.f32.xlu0 %v3300_v50  ;;  %v7643_v50 = vpop.permute.xlu0 %2324 }
 0x463   : > { %v3139_v17 = vpop.f32.mrb[8].mxu1  ;;  %3304 = vmax.xlane.f32.xlu1 %v3303_v4  ;;  %v7645_v4 = vpop.permute.xlu1 %2326 }
 0x464   : > { %v5857_v53 = vpop.f32.mrb[9].mxu1  ;;  %v7592_v32 = vadd.f32 %v3139_v17, %v7550_v11 }
 0x465   : > { %v3142_v5 = vpop.f32.mrb[10].mxu1 }
 0x466   : > { %v7578_v54 = vadd.f32 %v3142_v5, %v7555_v48  ;;  %v5858_v10 = vpop.f32.mrb[11].mxu1  ;;  %v3312_v19 = vsel %vm3287_vm2, %v7592_v32, -inf }
 0x468   : > { %v3315_v6 = vsel %vm3287_vm2, %v7578_v54, -inf }
 0x469   : > { %3316 = vmax.xlane.f32.xlu1 %v3315_v6 }
 0x46e   : > { %v3233_v26 = vpop.f32.mrb[12].mxu1 }
 0x46f   : > { %v7583_v41 = vadd.f32 %v3233_v26, %v7550_v11  ;;  %v5869_v37 = vpop.f32.mrb[13].mxu1 }
 0x470   : > { %v3236_v9 = vpop.f32.mrb[14].mxu1 }
 0x471   : > { %v2998_v31 = vpop.f32.mrb[12].mxu0  ;;  %v7586_v8 = vadd.f32 %v3236_v9, %v7555_v48  ;;  %v5870_v30 = vpop.f32.mrb[15].mxu1 }
 0x472   : > { %v7589_v38 = vadd.f32 %v2998_v31, %v7550_v11  ;;  %v5839_v40 = vpop.f32.mrb[13].mxu0 }
 0x473   : > { %v3001_v56 = vpop.f32.mrb[14].mxu0  ;;  %v3327_v42 = vsel %vm3287_vm2, %v7586_v8, -inf }
 0x474   : > { %v5840_v58 = vpop.f32.mrb[15].mxu0  ;;  %v3294_v2 = vsel %vm3287_vm2, %v7589_v38, -inf  ;;  %v7597_v59 = vadd.f32 %v3001_v56, %v7555_v48 }
 0x475   : > { %3295 = vmax.xlane.f32.xlu0 %v3294_v2 }
 0x476   : > { %v3297_v3 = vsel %vm3287_vm2, %v7597_v59, -inf }
 0x479   : > { %3313 = vmax.xlane.f32.xlu0 %v3312_v19  ;;  %v3092_v45 = vpop.f32.mrb[16].mxu0 }
 0x47a   : > { %v5851_v61 = vpop.f32.mrb[17].mxu0  ;;  %v7602_v60 = vadd.f32 %v3092_v45, %v7550_v11 }
 0x47b   : > { %v3095_v34 = vpop.f32.mrb[18].mxu0 }
 0x47c   : > { %v7605_v1 = vadd.f32 %v3095_v34, %v7555_v48  ;;  %v5852_v16 = vpop.f32.mrb[19].mxu0  ;;  %v3306_v62 = vsel %vm3287_vm2, %v7602_v60, -inf }
 0x47d   : > { %3298 = vmax.xlane.f32.xlu0 %v3297_v3 }
 0x47e   : > { %v3309_v0 = vsel %vm3287_vm2, %v7605_v1, -inf }
 0x47f   : > { %3310 = vmax.xlane.f32.xlu1 %v3309_v0 }
 0x481   : > { %3307 = vmax.xlane.f32.xlu0 %v3306_v62  ;;  %v3186_v27 = vpop.f32.mrb[20].mxu0 }
 0x482   : > { %v7614_v14 = vadd.f32 %v3186_v27, %v7550_v11  ;;  %v5863_v44 = vpop.f32.mrb[21].mxu0 }
 0x483   : > { %v3189_v28 = vpop.f32.mrb[22].mxu0 }
 0x484   : > { %v7617_v47 = vadd.f32 %v3189_v28, %v7555_v48  ;;  %v5864_v51 = vpop.f32.mrb[23].mxu0 }
 0x486   : > { %v3321_v36 = vsel %vm3287_vm2, %v7617_v47, -inf }
 0x489   : > { %v3280_v12 = vpop.f32.mrb[24].mxu0 }
 0x48a   : > { %v7620_v22 = vadd.f32 %v3280_v12, %v7550_v11  ;;  %v5875_v7 = vpop.f32.mrb[25].mxu0  ;;  %v3324_v11 = vsel %vm3287_vm2, %v7583_v41, -inf }
 0x48b   : > { %v3283_v55 = vpop.f32.mrb[26].mxu0 }
 0x48c   : > { %v7623_v57 = vadd.f32 %v3283_v55, %v7555_v48  ;;  %v5876_v20 = vpop.f32.mrb[27].mxu0  ;;  %v3318_v48 = vsel %vm3287_vm2, %v7614_v14, -inf  ;;  %v3330_v49 = vsel %vm3287_vm2, %v7620_v22, -inf }
 0x48e   : > { %v3333_v18 = vsel %vm3287_vm2, %v7623_v57, -inf }
 0x490   : > { %2338 = vrot.lane.b32.xlu1 %v7028_v23, %s6574_s8 }
 0x497   : > { %2336 = vrot.lane.b32.xlu0 %v7020_v21, %s6574_s8 }
 0x4b4   : > { %3328 = vmax.xlane.f32.xlu1 %v3327_v42 }
 0x4b6   : > { %3325 = vmax.xlane.f32.xlu0 %v3324_v11 }
 0x4b8   : > { %3322 = vmax.xlane.f32.xlu1 %v3321_v36 }
 0x4ba   : > { %3319 = vmax.xlane.f32.xlu0 %v3318_v48 }
 0x4bc   : > { %3334 = vmax.xlane.f32.xlu1 %v3333_v18 }
 0x4be   : > { %3331 = vmax.xlane.f32.xlu0 %v3330_v49 }
 0x4d4   : > { %2348 = vrot.lane.b32.xlu0 %v7020_v21, %s6575_s13 }
 0x4ea   : > { %v3290_v17 = vpop.xlane.xlu0 %3289 }
 0x4eb   : > { %v3336_v53 = vsub.f32 %v7558_v15, %v3290_v17 }
 0x4ec   : > { %v3293_v5 = vpop.xlane.xlu1 %3292 }
 0x4ed   : > { %v3352_v10 = vmul.f32 1.442695, %v3336_v53  ;;  %v3337_v6 = vsub.f32 %v7564_v35, %v3293_v5 }
 0x4ee   : > { %v3302_v15 = vpop.xlane.xlu0 %3301 }
 0x4ef   : > { %6214 = vpow2.f32 %v3352_v10  ;;  %v3354_v26 = vmul.f32 1.442695, %v3337_v6  ;;  %v3340_v40 = vsub.f32 %v7561_v33, %v3302_v15 }
 0x4f0   : > { %v3305_v56 = vpop.xlane.xlu1 %3304 }
 0x4f1   : > { %6216 = vpow2.f32 %v3354_v26  ;;  %v3360_v2 = vmul.f32 1.442695, %v3340_v40  ;;  %v3341_v10 = vsub.f32 %v7569_v13, %v3305_v56 }
 0x4f3   : > { %v3362_v6 = vmul.f32 1.442695, %v3341_v10 }
 0x4f6   : > { %v3317_v61 = vpop.xlane.xlu1 %3316 }
 0x4f7   : > { %v3345_v26 = vsub.f32 %v7578_v54, %v3317_v61 }
 0x4f9   : > { %v7649_v37 = vpop.eup %6214 }
 0x4fa   : > { %v3384_v9 = vsel %vm3287_vm2, %v7649_v37, 0.0 }
 0x4fb   : > { %v7653_v31 = vpop.eup %6216  ;;  %3385 = vadd.xlane.f32.xlu0 %v3384_v9 }
 0x4fc   : > { %v3387_v30 = vsel %vm3287_vm2, %v7653_v31, 0.0 }
 0x4fd   : > { %3388 = vadd.xlane.f32.xlu1 %v3387_v30  ;;  %v3370_v30 = vmul.f32 1.442695, %v3345_v26 }
 0x502   : > { %v3296_v35 = vpop.xlane.xlu0 %3295 }
 0x503   : > { %v3338_v58 = vsub.f32 %v7589_v38, %v3296_v35 }
 0x505   : > { %v3356_v19 = vmul.f32 1.442695, %v3338_v58 }
 0x506   : > { %v3314_v45 = vpop.xlane.xlu0 %3313 }
 0x507   : > { %6218 = vpow2.f32 %v3356_v19  ;;  %v3344_v44 = vsub.f32 %v7592_v32, %v3314_v45 }
 0x508   : > { %6220 = vpow2.f32 %v3360_v2 }
 0x509   : > { %v3368_v42 = vmul.f32 1.442695, %v3344_v44 }
 0x50a   : > { %v3299_v34 = vpop.xlane.xlu0 %3298 }
 0x50b   : > { %v3339_v16 = vsub.f32 %v7597_v59, %v3299_v34 }
 0x50c   : > { %v3311_v3 = vpop.xlane.xlu1 %3310 }
 0x50d   : > { %v3358_v0 = vmul.f32 1.442695, %v3339_v16  ;;  %v3343_v62 = vsub.f32 %v7605_v1, %v3311_v3 }
 0x50e   : > { %v3308_v27 = vpop.xlane.xlu0 %3307 }
 0x50f   : > { %6222 = vpow2.f32 %v3358_v0  ;;  %v3342_v33 = vsub.f32 %v7602_v60, %v3308_v27  ;;  %v3366_v51 = vmul.f32 1.442695, %v3343_v62 }
 0x510   : > { %v7663_v38 = vpop.permute.xlu1 %2338 }
 0x511   : > { %v7665_v28 = vpop.eup %6218  ;;  %v3364_v12 = vmul.f32 1.442695, %v3342_v33  ;;  %v2560_v7 = vcombine.low %v7028_v23, %v7663_v38  ;;  %v2561_v59 = vcombine.high %v7028_v23, %v7663_v38 }
 0x512   : > { %v7671_v55 = vpop.permute.xlu0 %2336  ;;  %v3390_v1 = vsel %vm3287_vm2, %v7665_v28, 0.0  ;;  %v7675_v60 = vpop.eup %6220 }
 0x513   : > { %6224 = vpow2.f32 %v3364_v12  ;;  %v2492_v32 = vcombine.low %v7020_v21, %v7671_v55  ;;  %3391 = vadd.xlane.f32.xlu0 %v3390_v1  ;;  %v2493_v20 = vcombine.high %v7020_v21, %v7671_v55  ;;  %v3396_v11 = vsel %vm3287_vm2, %v7675_v60, 0.0 }
 0x514   : > { %6226 = vpow2.f32 %v3366_v51 }
 0x515   : > { %6228 = vpow2.f32 %v3368_v42  ;;  %v2500_v44 = vrot.slane %v2492_v32, %v7107_v46 }
 0x516   : > { %6230 = vpow2.f32 %v3362_v6 }
 0x517   : > { %3397 = vadd.xlane.f32.xlu0 %v3396_v11  ;;  %6232 = vpow2.f32 %v3370_v30 }
 0x519   : > { %v7683_v36 = vpop.eup %6222 }
 0x51a   : > { %v3393_v48 = vsel %vm3287_vm2, %v7683_v36, 0.0 }
 0x51b   : > { %3394 = vadd.xlane.f32.xlu1 %v3393_v48 }
 0x51d   : > { %v7687_v18 = vpop.eup %6224 }
 0x51e   : > { %v3402_v49 = vsel %vm3287_vm2, %v7687_v18, 0.0  ;;  %v7691_v17 = vpop.eup %6226 }
 0x51f   : > { %3403 = vadd.xlane.f32.xlu0 %v3402_v49  ;;  %v3405_v21 = vsel %vm3287_vm2, %v7691_v17, 0.0  ;;  %v7695_v53 = vpop.eup %6228 }
 0x520   : > { %v3408_v5 = vsel %vm3287_vm2, %v7695_v53, 0.0  ;;  %v7708_v0 = vpop.eup %6230 }
 0x521   : > { %v7713_v27 = vpop.eup %6232 }
 0x522   : > { %v3411_v55 = vsel %vm3287_vm2, %v7713_v27, 0.0 }
 0x523   : > { %3406 = vadd.xlane.f32.xlu0 %v3405_v21 }
 0x527   : > { %3409 = vadd.xlane.f32.xlu0 %v3408_v5 }
 0x52c   : > { %2350 = vrot.lane.b32.xlu1 %v7028_v23, %s6575_s13 }
 0x541   : > { %v3329_v9 = vpop.xlane.xlu1 %3328 }
 0x542   : > { %v3349_v40 = vsub.f32 %v7586_v8, %v3329_v9 }
 0x543   : > { %v3326_v15 = vpop.xlane.xlu0 %3325 }
 0x544   : > { %v3348_v58 = vsub.f32 %v7583_v41, %v3326_v15  ;;  %v3378_v13 = vmul.f32 1.442695, %v3349_v40 }
 0x545   : > { %v3323_v35 = vpop.xlane.xlu1 %3322 }
 0x546   : > { %v3347_v2 = vsub.f32 %v7617_v47, %v3323_v35  ;;  %v3376_v16 = vmul.f32 1.442695, %v3348_v58 }
 0x547   : > { %v3320_v19 = vpop.xlane.xlu0 %3319 }
 0x548   : > { %v3374_v45 = vmul.f32 1.442695, %v3347_v2  ;;  %v3346_v34 = vsub.f32 %v7614_v14, %v3320_v19  ;;  %v3399_v14 = vsel %vm3287_vm2, %v7708_v0, 0.0 }
 0x549   : > { %v3335_v56 = vpop.xlane.xlu1 %3334 }
 0x54a   : > { %6234 = vpow2.f32 %v3374_v45  ;;  %v3372_v54 = vmul.f32 1.442695, %v3346_v34  ;;  %v3351_v61 = vsub.f32 %v7623_v57, %v3335_v56 }
 0x54b   : > { %v3332_v3 = vpop.xlane.xlu0 %3331 }
 0x54c   : > { %6236 = vpow2.f32 %v3372_v54  ;;  %v3350_v8 = vsub.f32 %v7620_v22, %v3332_v3  ;;  %v3382_v41 = vmul.f32 1.442695, %v3351_v61  ;;  %v2507_v22 = vrot.slane %v2493_v20, %v7107_v46 }
 0x54d   : > { %6238 = vpow2.f32 %v3378_v13 }
 0x54e   : > { %6240 = vpow2.f32 %v3376_v16  ;;  %v3380_v47 = vmul.f32 1.442695, %v3350_v8 }
 0x54f   : > { %v2349_v62 = vpop.permute.xlu0 %2348  ;;  %6242 = vpow2.f32 %v3382_v41 }
 0x550   : > { %v2508_v33 = vcombine.low %v7643_v50, %v2349_v62  ;;  %v2509_v57 = vcombine.high %v7643_v50, %v2349_v62  ;;  %3400 = vadd.xlane.f32.xlu1 %v3399_v14  ;;  %6244 = vpow2.f32 %v3380_v47 }
 0x552   : > { %v2516_v51 = vrot.slane %v2508_v33, %v7107_v46  ;;  %v2523_v12 = vrot.slane %v2509_v57, %v7107_v46 }
 0x554   : > { %v7723_v1 = vpop.eup %6234  ;;  %v2524_v42 = vcombine.low %v2500_v44, %v2516_v51  ;;  %v2525_v11 = vcombine.high %v2500_v44, %v2516_v51  ;;  %v2540_v48 = vcombine.low %v2507_v22, %v2523_v12  ;;  %v2541_v50 = vcombine.high %v2507_v22, %v2523_v12  ;;  %3412 = vadd.xlane.f32.xlu1 %v3411_v55 }
 0x555   : > { %v3417_v6 = vsel %vm3287_vm2, %v7723_v1, 0.0 }
 0x556   : > { %v7725_v49 = vpop.eup %6236  ;;  %v2532_v32 = vrot.slane %v2524_v42, %v7112_v52  ;;  %v2539_v20 = vrot.slane %v2525_v11, %v7112_v52  ;;  %v2548_v21 = vrot.slane %v2540_v48, %v7112_v52  ;;  %v2555_v5 = vrot.slane %v2541_v50, %v7112_v52 }
 0x557   : > { %v7731_v10 = vpop.eup %6238  ;;  %v3414_v26 = vsel %vm3287_vm2, %v7725_v49, 0.0 }
 0x558   : > { %v7737_v9 = vpop.eup %6240  ;;  %v2764_v30 = vcombine.low %v2532_v32, %v2539_v20  ;;  %v5565_v15 = vcombine.high %v2532_v32, %v2539_v20  ;;  %v2780_v40 = vcombine.low %v2548_v21, %v2555_v5  ;;  %v5566_v35 = vcombine.high %v2548_v21, %v2555_v5  ;;  %3418 = vadd.xlane.f32.xlu1 %v3417_v6 }
 0x559   : > { %3415 = vadd.xlane.f32.xlu0 %v3414_v26  ;;  %v7743_v34 = vpop.eup %6242  ;;  %v3423_v13 = vsel %vm3287_vm2, %v7731_v10, 0.0  ;;  %v3420_v56 = vsel %vm3287_vm2, %v7737_v9, 0.0 }
 0x55a   : > { %v2771_v58 = vrot.slane %v2764_v30, %v7107_v46  ;;  %v2779_v2 = vrot.slane %v5565_v15, %v7107_v46  ;;  %v2787_v19 = vrot.slane %v2780_v40, %v7107_v46  ;;  %v2795_v45 = vrot.slane %v5566_v35, %v7107_v46  ;;  %v7749_v16 = vpop.eup %6244 }
 0x55b   : > { %v3429_v33 = vsel %vm3287_vm2, %v7743_v34, 0.0  ;;  %v3426_v57 = vsel %vm3287_vm2, %v7749_v16, 0.0 }
 0x55c   : > { %3424 = vadd.xlane.f32.xlu1 %v3423_v13  ;;  %v2796_v54 = vcombine.low %v2771_v58, %v2779_v2  ;;  %v2812_v61 = vcombine.low %v2787_v19, %v2795_v45  ;;  %v2797_v3 = vcombine.high %v2771_v58, %v2779_v2  ;;  %v2813_v8 = vcombine.high %v2787_v19, %v2795_v45 }
 0x55d   : > { %3421 = vadd.xlane.f32.xlu0 %v3420_v56 }
 0x55e   : > { %v7752_v41 = vrot.slane %v2796_v54, %v7112_v52  ;;  %v7755_v47 = vrot.slane %v2812_v61, %v7112_v52  ;;  %v7758_v62 = vrot.slane %v2797_v3, %v7112_v52  ;;  %v7761_v14 = vrot.slane %v2813_v8, %v7112_v52 }
 0x560   : > { %3430 = vadd.xlane.f32.xlu1 %v3429_v33  ;;  %v2828_v44 = vcombine.low %v7752_v41, %v7755_v47  ;;  %v2829_v22 = vcombine.high %v7752_v41, %v7755_v47  ;;  %v2830_v51 = vcombine.low %v7758_v62, %v7761_v14  ;;  %v2831_v12 = vcombine.high %v7758_v62, %v7761_v14 }
 0x561   : > { %3427 = vadd.xlane.f32.xlu0 %v3426_v57 }
 0x588   : > { %v3386_v55 = vpop.xlane.xlu0 %3385 }
 0x589   : > { %6246 = vrcp.f32 %v3386_v55 }
 0x58a   : > { %v3389_v42 = vpop.xlane.xlu1 %3388 }
 0x58b   : > { %6248 = vrcp.f32 %v3389_v42 }
 0x593   : > { %v6247_v11 = vpop.eup %6246 }
 0x594   : > { %v3448_v50 = vmul.f32 %v6247_v11, %v7649_v37 }
 0x595   : > { %v6249_v48 = vpop.eup %6248 }
 0x596   : > { %v3449_v32 = vmul.f32 %v6249_v48, %v7653_v31  ;;  %v2568_v31 = vrot.slane %v2560_v7, %v7107_v46 }
 0x598   : > { %v3464_v20 = vpack.c.bf16 %v3449_v32, %v3448_v50 }
 0x59a   : > { %5880 = vmatmul.mubr.msk.bf16.vlgmr.msra.gmra.mrb[16].mxu1 %vm3287_vm2, %v3464_v20 }
 0x59b   : > { %5890 = vmatpush3.bf16.msra.mxu1 %v7521_v63  ;;  %5891 = vmatprep.mubr.msk.bf16.mxu1 %vm6577_vm0, %v6576_v29  ;;  %v2575_v63 = vrot.slane %v2561_v59, %v7107_v46 }
 0x59c   : > { %5901 = vmatprep.subr.bf16.mxu1 %v6576_v29 }
 0x5a0   : > { %v3392_v21 = vpop.xlane.xlu0 %3391 }
 0x5a4   : > { %v7782_v6 = vpop.xlane.xlu0 %3397 }
 0x5a8   : > { %v3395_v5 = vpop.xlane.xlu1 %3394 }
 0x5a9   : > { %6250 = vrcp.f32 %v3395_v5 }
 0x5aa   : > { %6252 = vrcp.f32 %v3392_v21 }
 0x5ac   : > { %v2351_v26 = vpop.permute.xlu1 %2350  ;;  %v3404_v35 = vpop.xlane.xlu0 %3403 }
 0x5ad   : > { %v2576_v30 = vcombine.low %v7645_v4, %v2351_v26  ;;  %v2577_v37 = vcombine.high %v7645_v4, %v2351_v26 }
 0x5af   : > { %v2584_v15 = vrot.slane %v2576_v30, %v7107_v46  ;;  %v2591_v40 = vrot.slane %v2577_v37, %v7107_v46 }
 0x5b0   : > { %v3407_v61 = vpop.xlane.xlu0 %3406 }
 0x5b1   : > { %v2592_v58 = vcombine.low %v2568_v31, %v2584_v15  ;;  %v2593_v2 = vcombine.high %v2568_v31, %v2584_v15  ;;  %v2608_v19 = vcombine.low %v2575_v63, %v2591_v40  ;;  %v2609_v4 = vcombine.high %v2575_v63, %v2591_v40 }
 0x5b2   : > { %6254 = vrcp.f32 %v3407_v61 }
 0x5b3   : > { %v2600_v45 = vrot.slane %v2592_v58, %v7112_v52  ;;  %v2607_v7 = vrot.slane %v2593_v2, %v7112_v52  ;;  %v2616_v13 = vrot.slane %v2608_v19, %v7112_v52  ;;  %v2623_v23 = vrot.slane %v2609_v4, %v7112_v52  ;;  %v6251_v50 = vpop.eup %6250 }
 0x5b4   : > { %6256 = vrcp.f32 %v3404_v35  ;;  %v6253_v26 = vpop.eup %6252  ;;  %v3410_v14 = vpop.xlane.xlu0 %3409 }
 0x5b5   : > { %v2832_v38 = vcombine.low %v2600_v45, %v2607_v7  ;;  %v5567_v59 = vcombine.high %v2600_v45, %v2607_v7  ;;  %v2848_v56 = vcombine.low %v2616_v13, %v2623_v23  ;;  %v5568_v54 = vcombine.high %v2616_v13, %v2623_v23 }
 0x5b6   : > { %6258 = vrcp.f32 %v7782_v6 }
 0x5b7   : > { %v2839_v3 = vrot.slane %v2832_v38, %v7107_v46  ;;  %v2847_v8 = vrot.slane %v5567_v59, %v7107_v46  ;;  %v2855_v33 = vrot.slane %v2848_v56, %v7107_v46  ;;  %v2863_v57 = vrot.slane %v5568_v54, %v7107_v46 }
 0x5b8   : > { %v3451_v46 = vmul.f32 %v6251_v50, %v7683_v36 }
 0x5b9   : > { %v2864_v55 = vcombine.low %v2839_v3, %v2847_v8  ;;  %v2880_v42 = vcombine.low %v2855_v33, %v2863_v57  ;;  %v2865_v11 = vcombine.high %v2839_v3, %v2847_v8  ;;  %v2881_v48 = vcombine.high %v2855_v33, %v2863_v57 }
 0x5bb   : > { %v2872_v32 = vrot.slane %v2864_v55, %v7112_v52  ;;  %v2888_v20 = vrot.slane %v2880_v42, %v7112_v52  ;;  %v2879_v21 = vrot.slane %v2865_v11, %v7112_v52  ;;  %v2895_v5 = vrot.slane %v2881_v48, %v7112_v52 }
 0x5bc   : > { %v3450_v52 = vmul.f32 %v6253_v26, %v7665_v28  ;;  %v6255_v36 = vpop.eup %6254 }
 0x5bd   : > { %v2896_v30 = vcombine.low %v2872_v32, %v2888_v20  ;;  %v2897_v37 = vcombine.high %v2872_v32, %v2888_v20  ;;  %v2898_v31 = vcombine.low %v2879_v21, %v2895_v5  ;;  %v2899_v63 = vcombine.high %v2879_v21, %v2895_v5 }
 0x5be   : > { %v3465_v2 = vpack.c.bf16 %v3451_v46, %v3450_v52  ;;  %v3455_v41 = vmul.f32 %v6255_v36, %v7691_v17 }
 0x5bf   : > { %v2901_v15 = vpack.c.bf16 %v2896_v30, %v2828_v44  ;;  %v2903_v40 = vpack.c.bf16 %v2897_v37, %v2829_v22  ;;  %v2905_v35 = vpack.c.bf16 %v2898_v31, %v2830_v51  ;;  %v2907_v58 = vpack.c.bf16 %v2899_v63, %v2831_v12  ;;  %v6257_v44 = vpop.eup %6256 }
 0x5c0   : > { %v3454_v28 = vmul.f32 %v6257_v44, %v7687_v18  ;;  %v6259_v51 = vpop.eup %6258 }
 0x5c1   : > { %5884 = vmatpush3.bf16.msra.mxu0 %v2901_v15  ;;  %v3452_v19 = vmul.f32 %v6259_v51, %v7675_v60 }
 0x5c2   : > { %5895 = vmatprep.subr.bf16.mxu0 %v6576_v29  ;;  %v3467_v47 = vpack.c.bf16 %v3455_v41, %v3454_v28  ;;  %v6122_v41 = vld [vmem:[%s6880_s28 + $0x20] sm:$0xff]  }
 0x5c4   : > { %5886 = vmatmul.mubr.msk.bf16.vlgmr.msra.gmra.mrb[28].mxu0 %vm3287_vm2, %v3465_v2  ;;  %v6121_v2 = vld [vmem:[%s6880_s28 + $0x8] sm:$0xff]  }
 0x5c5   : > { %5896 = vmatpush3.bf16.msra.mxu0 %v2903_v40  ;;  %5897 = vmatprep.mubr.msk.bf16.mxu0 %vm6577_vm0, %v6576_v29 }
 0x5c6   : > { %5907 = vmatprep.subr.bf16.mxu0 %v6576_v29 }
 0x5cc   : > { %5898 = vmatmul.mubr.msk.bf16.vlgmr.msra.gmra.mrb[32].mxu0 %vm3287_vm2, %v3467_v47 }
 0x5cd   : > { %5908 = vmatpush3.bf16.msra.mxu0 %v2905_v35  ;;  %5909 = vmatprep.mubr.msk.bf16.mxu0 %vm6577_vm0, %v6576_v29 }
 0x5ce   : > { %5919 = vmatprep.subr.bf16.mxu0 %v6576_v29 }
 0x5dd   : > { %v3401_v62 = vpop.xlane.xlu1 %3400 }
 0x5de   : > { %6260 = vrcp.f32 %v3401_v62 }
 0x5e1   : > { %v3413_v22 = vpop.xlane.xlu1 %3412 }
 0x5e2   : > { %6262 = vrcp.f32 %v3413_v22 }
 0x5e3   : > { %6264 = vrcp.f32 %v3410_v14 }
 0x5e5   : > { %v3419_v17 = vpop.xlane.xlu1 %3418 }
 0x5e6   : > { %6266 = vrcp.f32 %v3419_v17  ;;  %v3416_v18 = vpop.xlane.xlu0 %3415 }
 0x5e7   : > { %6268 = vrcp.f32 %v3416_v18 }
 0x5e8   : > { %v6261_v12 = vpop.eup %6260 }
 0x5e9   : > { %v3453_v4 = vmul.f32 %v6261_v12, %v7708_v0  ;;  %v3425_v45 = vpop.xlane.xlu1 %3424 }
 0x5ea   : > { %6270 = vrcp.f32 %v3425_v45  ;;  %v3422_v7 = vpop.xlane.xlu0 %3421 }
 0x5eb   : > { %6272 = vrcp.f32 %v3422_v7  ;;  %v3466_v6 = vpack.c.bf16 %v3453_v4, %v3452_v19  ;;  %v6123_v4 = vld [vmem:[%s6880_s28 + $0x28] sm:$0xff]  }
 0x5ec   : > { %v6263_v13 = vpop.eup %6262 }
 0x5ed   : > { %v3431_v23 = vpop.xlane.xlu1 %3430  ;;  %5892 = vmatmul.mubr.msk.bf16.vlgmr.msra.gmra.mrb[20].mxu1 %vm3287_vm2, %v3466_v6  ;;  %v6265_v38 = vpop.eup %6264  ;;  %v3457_v60 = vmul.f32 %v6263_v13, %v7713_v27 }
 0x5ee   : > { %6274 = vrcp.f32 %v3431_v23  ;;  %5902 = vmatpush3.bf16.msra.mxu1 %v7535_v24  ;;  %v3428_v59 = vpop.xlane.xlu0 %3427  ;;  %5903 = vmatprep.mubr.msk.bf16.mxu1 %vm6577_vm0, %v6576_v29  ;;  %v3456_v54 = vmul.f32 %v6265_v38, %v7695_v53 }
 0x5ef   : > { %6276 = vrcp.f32 %v3428_v59  ;;  %5913 = vmatprep.subr.bf16.mxu1 %v6576_v29 }
 0x5f0   : > { %v6267_v0 = vpop.eup %6266  ;;  %v3468_v8 = vpack.c.bf16 %v3457_v60, %v3456_v54  ;;  %v6125_v54 = vld [vmem:[%s6880_s28 + $0x38] sm:$0xff]  }
 0x5f1   : > { %v6269_v56 = vpop.eup %6268  ;;  %v3459_v61 = vmul.f32 %v6267_v0, %v7723_v1 }
 0x5f2   : > { %v3458_v3 = vmul.f32 %v6269_v56, %v7725_v49  ;;  %v6124_v56 = vld [vmem:[%s6880_s28 + $0x30] sm:$0xff]  }
 0x5f4   : > { %v6271_v33 = vpop.eup %6270  ;;  %v3469_v24 = vpack.c.bf16 %v3459_v61, %v3458_v3  ;;  %v5601_v61 = vld [vmem:[%s8275_s9] ss:$0 sm:$0xff] }
 0x5f5   : > { %v6273_v57 = vpop.eup %6272  ;;  %5904 = vmatmul.mubr.msk.bf16.vlgmr.msra.gmra.mrb[24].mxu1 %vm3287_vm2, %v3468_v8  ;;  %v3461_v27 = vmul.f32 %v6271_v33, %v7731_v10  ;;  %v6118_v10 = vld [vmem:[%s6880_s28 + $0x10] sm:$0xff]  }
 0x5f6   : > { %5910 = vmatmul.mubr.msk.bf16.vlgmr.msra.gmra.mrb[36].mxu0 %vm3287_vm2, %v3469_v24  ;;  %5914 = vmatpush3.bf16.msra.mxu1 %v7537_v25  ;;  %v3460_v55 = vmul.f32 %v6273_v57, %v7737_v9  ;;  %v6119_v9 = vld [vmem:[%s6880_s28 + $0x18] sm:$0xff]  }
 0x5f7   : > { %5920 = vmatpush3.bf16.msra.mxu0 %v2907_v58  ;;  %5915 = vmatprep.mubr.msk.bf16.mxu1 %vm6577_vm0, %v6576_v29 }
 0x5f8   : > { %v6275_v53 = vpop.eup %6274  ;;  %5921 = vmatprep.mubr.msk.bf16.mxu0 %vm6577_vm0, %v6576_v29  ;;  %v3470_v25 = vpack.c.bf16 %v3461_v27, %v3460_v55  ;;  %5925 = vmatprep.subr.bf16.mxu1 %v6118_v10  ;;  %v6120_v29 = vld [vmem:[%s6880_s28] sm:$0xff]  }
 0x5f9   : > { %v6277_v1 = vpop.eup %6276  ;;  %v3463_v49 = vmul.f32 %v6275_v53, %v7743_v34  ;;  %v6318_v55 = vld [vmem:[#allocation2] sm:$0xff] }
 0x5fa   : > { %v3462_v42 = vmul.f32 %v6277_v1, %v7749_v16 }
 0x5fc   : > { %v3471_v11 = vpack.c.bf16 %v3463_v49, %v3462_v42  ;;  %v6319_v42 = vld [vmem:[#allocation2 + $0x8] sm:$0xff] }
 0x5fd   : > { %5916 = vmatmul.mubr.msk.bf16.vlgmr.msra.gmra.mrb[28].mxu1 %vm3287_vm2, %v3470_v25 }
 0x5fe   : > { %5922 = vmatmul.mubr.msk.bf16.vlgmr.msra.gmra.mrb[40].mxu0 %vm3287_vm2, %v3471_v11  ;;  %5926 = vmatpush3.bf16.msra.mxu1 %v6118_v10  ;;  %v6320_v11 = vld [vmem:[#allocation2 + $0x10] sm:$0xff] }
 0x5ff   : > { %4453 = vmatprep.mubr.bf16.mxu0 %v6572_v43  ;;  %5927 = vmatprep.subr.bf16.mxu1 %v6119_v9 }
 0x602   : > { %5928 = vmatpush3.bf16.msra.mxu1 %v6119_v9  ;;  %v6321_v9 = vld [vmem:[#allocation2 + $0x18] sm:$0xff] }
 0x603   : > { %5933 = vmatprep.subr.bf16.mxu1 %v6120_v29 }
 0x66d   : > { %v3509_v48 = vpop.f32.mrb[16].mxu1 }
 0x66e   : > { %v5881_v34 = vpop.f32.mrb[17].mxu1 }
 0x66f   : > { %v3512_v50 = vpop.f32.mrb[18].mxu1  ;;  %v6128_v34 = vld [vmem:[%s6887_s23 + $0x4] ss:$16 sps:$4 sm:$0xff]  }
 0x670   : > { %v3824_v16 = vpack.c.bf16 %v3512_v50, %v3509_v48  ;;  %v5882_v32 = vpop.f32.mrb[19].mxu1  ;;  %v6126_v48 = vld [vmem:[%s6887_s23] ss:$16 sps:$4 sm:$0xff]   ;;  %v6129_v50 = vld [vmem:[%s6887_s23 + $0x8] ss:$16 sps:$4 sm:$0xff]   ;;  %4421 = vmatprep.subr.bf16.mxu0 %v6128_v34 }
 0x671   : > { %v6134_v32 = vld [vmem:[%s6887_s23 + $0x24] ss:$16 sps:$4 sm:$0xff]   ;;  %4422 = vmatpush1.bf16.msra.mxu0 %v6126_v48 }
 0x672   : > { %4423 = vmatprep.subr.bf16.mxu0 %v6134_v32 }
 0x697   : > { %v3553_v20 = vpop.f32.mrb[28].mxu0 }
 0x698   : > { %v5887_v21 = vpop.f32.mrb[29].mxu0 }
 0x699   : > { %v3556_v5 = vpop.f32.mrb[30].mxu0  ;;  %v6132_v21 = vld [vmem:[%s6887_s23 + $0x20] ss:$16 sps:$4 sm:$0xff]  }
 0x69a   : > { %v3825_v26 = vpack.c.bf16 %v3556_v5, %v3553_v20  ;;  %v5888_v30 = vpop.f32.mrb[31].mxu0  ;;  %v6137_v20 = vld [vmem:[%s6887_s23 + $0x2c] ss:$16 sps:$4 sm:$0xff]   ;;  %v6135_v5 = vld [vmem:[%s6887_s23 + $0x28] ss:$16 sps:$4 sm:$0xff]   ;;  %4424 = vmatpush1.bf16.msra.mxu0 %v6132_v21 }
 0x69f   : > { %v3641_v37 = vpop.f32.mrb[32].mxu0 }
 0x6a0   : > { %v5899_v31 = vpop.f32.mrb[33].mxu0 }
 0x6a1   : > { %v3644_v46 = vpop.f32.mrb[34].mxu0 }
 0x6a2   : > { %v3827_v63 = vpack.c.bf16 %v3644_v46, %v3641_v37  ;;  %v5900_v15 = vpop.f32.mrb[35].mxu0 }
 0x6c0   : > { %v3597_v40 = vpop.f32.mrb[20].mxu1 }
 0x6c1   : > { %v5893_v35 = vpop.f32.mrb[21].mxu1 }
 0x6c2   : > { %v3600_v52 = vpop.f32.mrb[22].mxu1 }
 0x6c3   : > { %v3826_v58 = vpack.c.bf16 %v3600_v52, %v3597_v40  ;;  %v5894_v36 = vpop.f32.mrb[23].mxu1 }
 0x6c5   : > { %5929 = vmatprep.mubr.msk.bf16.mxu1 %vm2910_vm1, %v3826_v58 }
 0x6c6   : > { %5930 = vmatmul.mubr.msk.bf16.vlgmr.msra.gmra.mrb[32].mxu1 %vm2910_vm1, %v3827_v63 }
 0x6c7   : > { %5934 = vmatpush3.bf16.msra.mxu1 %v6120_v29  ;;  %5937 = vmatprep.mubr.msk.bf16.mxu1 %vm2910_vm1, %v3824_v16  ;;  %v6131_v16 = vld [vmem:[%s6887_s23 + $0xc] ss:$16 sps:$4 sm:$0xff]  }
 0x6c8   : > { %v3685_v44 = vpop.f32.mrb[24].mxu1  ;;  %5935 = vmatprep.subr.bf16.mxu1 %v6121_v2 }
 0x6c9   : > { %v3729_v28 = vpop.f32.mrb[36].mxu0  ;;  %v5905_v47 = vpop.f32.mrb[25].mxu1 }
 0x6ca   : > { %v5911_v62 = vpop.f32.mrb[37].mxu0  ;;  %v3688_v14 = vpop.f32.mrb[26].mxu1  ;;  %v6138_v47 = vld [vmem:[%s6887_s23 + $0x40] ss:$16 sps:$4 sm:$0xff]  }
 0x6cb   : > { %v3828_v22 = vpack.c.bf16 %v3688_v14, %v3685_v44  ;;  %v3732_v17 = vpop.f32.mrb[38].mxu0  ;;  %v5906_v51 = vpop.f32.mrb[27].mxu1  ;;  %5936 = vmatpush3.bf16.msra.mxu1 %v6121_v2  ;;  %v6140_v62 = vld [vmem:[%s6887_s23 + $0x44] ss:$16 sps:$4 sm:$0xff]   ;;  %v6141_v14 = vld [vmem:[%s6887_s23 + $0x48] ss:$16 sps:$4 sm:$0xff]  }
 0x6cc   : > { %v3829_v18 = vpack.c.bf16 %v3732_v17, %v3729_v28  ;;  %v5912_v12 = vpop.f32.mrb[39].mxu0  ;;  %5941 = vmatprep.subr.bf16.mxu1 %v6122_v41  ;;  %4425 = vmatprep.subr.bf16.mxu0 %v6140_v62  ;;  %v6146_v17 = vld [vmem:[%s6887_s23 + $0x64] ss:$16 sps:$4 sm:$0xff]   ;;  %v6144_v51 = vld [vmem:[%s6887_s23 + $0x60] ss:$16 sps:$4 sm:$0xff]  }
 0x6cd   : > { %4426 = vmatpush1.bf16.msra.mxu0 %v6138_v47  ;;  %v6147_v12 = vld [vmem:[%s6887_s23 + $0x68] ss:$16 sps:$4 sm:$0xff]   ;;  %v6176_v47 = vld [vmem:[%s6893_s16] sm:$0xff]  }
 0x6ce   : > { %4427 = vmatprep.subr.bf16.mxu0 %v6146_v17  ;;  %v6177_v62 = vld [vmem:[%s6893_s16 + $0x80] sm:$0xff]   ;;  %v6181_v17 = vld [vmem:[%s6893_s16 + $0x88] sm:$0xff]  }
 0x6d0   : > { %v3773_v19 = vpop.f32.mrb[28].mxu1 }
 0x6d1   : > { %v3817_v45 = vpop.f32.mrb[40].mxu0  ;;  %v5917_v7 = vpop.f32.mrb[29].mxu1  ;;  %4428 = vmatpush1.bf16.msra.mxu0 %v6144_v51  ;;  %v6182_v51 = vld [vmem:[%s6893_s16 + $0x50] sm:$0xff]  }
 0x6d2   : > { %v5923_v6 = vpop.f32.mrb[41].mxu0  ;;  %v3776_v13 = vpop.f32.mrb[30].mxu1  ;;  %5938 = vmatmul.mubr.msk.bf16.vlgmr.msra.gmra.mrb[32].mxu1 %vm2910_vm1, %v3825_v26  ;;  %v6153_v7 = vld [vmem:[%s6887_s23 + $0x88] ss:$16 sps:$4 sm:$0xff]  }
 0x6d3   : > { %v3830_v23 = vpack.c.bf16 %v3776_v13, %v3773_v19  ;;  %v3820_v38 = vpop.f32.mrb[42].mxu0  ;;  %v5918_v59 = vpop.f32.mrb[31].mxu1  ;;  %5942 = vmatpush3.bf16.msra.mxu1 %v6122_v41  ;;  %5945 = vmatprep.mubr.msk.bf16.mxu1 %vm2910_vm1, %v3828_v22  ;;  %v6143_v22 = vld [vmem:[%s6887_s23 + $0x4c] ss:$16 sps:$4 sm:$0xff]   ;;  %v6152_v19 = vld [vmem:[%s6887_s23 + $0x84] ss:$16 sps:$4 sm:$0xff]  }
 0x6d4   : > { %v3831_v60 = vpack.c.bf16 %v3820_v38, %v3817_v45  ;;  %v5924_v0 = vpop.f32.mrb[43].mxu0  ;;  %5943 = vmatprep.subr.bf16.mxu1 %v6123_v4  ;;  %v6150_v45 = vld [vmem:[%s6887_s23 + $0x80] ss:$16 sps:$4 sm:$0xff]   ;;  %4429 = vmatprep.subr.bf16.mxu0 %v6152_v19  ;;  %v6158_v6 = vld [vmem:[%s6887_s23 + $0xa4] ss:$16 sps:$4 sm:$0xff]  }
 0x6d5   : > { %v6161_v13 = vld [vmem:[%s6887_s23 + $0xac] ss:$16 sps:$4 sm:$0xff]   ;;  %4430 = vmatpush1.bf16.msra.mxu0 %v6150_v45  ;;  %v6159_v38 = vld [vmem:[%s6887_s23 + $0xa8] ss:$16 sps:$4 sm:$0xff]   ;;  %v6164_v59 = vld [vmem:[%s6887_s23 + $0xc4] ss:$16 sps:$4 sm:$0xff]  }
 0x6d6   : > { %4431 = vmatprep.subr.bf16.mxu0 %v6158_v6  ;;  %v6162_v0 = vld [vmem:[%s6887_s23 + $0xc0] ss:$16 sps:$4 sm:$0xff]   ;;  %v6187_v45 = vld [vmem:[%s6893_s16 + $0xd8] sm:$0xff]  }
 0x6d7   : > { %5944 = vmatpush3.bf16.msra.mxu1 %v6123_v4  ;;  %v6155_v4 = vld [vmem:[%s6887_s23 + $0x8c] ss:$16 sps:$4 sm:$0xff]   ;;  %v6185_v19 = vld [vmem:[%s6893_s16 + $0x90] sm:$0xff]  }
 0x6d8   : > { %5949 = vmatprep.subr.bf16.mxu1 %v6124_v56  ;;  %v6189_v6 = vld [vmem:[%s6893_s16 + $0x98] sm:$0xff]  }
 0x6de   : > { %5946 = vmatmul.mubr.msk.bf16.vlgmr.msra.gmra.mrb[32].mxu1 %vm2910_vm1, %v3829_v18  ;;  %v6149_v18 = vld [vmem:[%s6887_s23 + $0x6c] ss:$16 sps:$4 sm:$0xff]  }
 0x6df   : > { %5950 = vmatpush3.bf16.msra.mxu1 %v6124_v56  ;;  %5953 = vmatprep.mubr.msk.bf16.mxu1 %vm2910_vm1, %v3830_v23  ;;  %v6156_v23 = vld [vmem:[%s6887_s23 + $0xa0] ss:$16 sps:$4 sm:$0xff]   ;;  %v6165_v56 = vld [vmem:[%s6887_s23 + $0xc8] ss:$16 sps:$4 sm:$0xff]  }
 0x6e0   : > { %5951 = vmatprep.subr.bf16.mxu1 %v6125_v54  ;;  %4432 = vmatpush1.bf16.msra.mxu0 %v6156_v23  ;;  %v6191_v23 = vld [vmem:[%s6893_s16 + $0xe0] sm:$0xff]  }
 0x6e1   : > { %4433 = vmatprep.subr.bf16.mxu0 %v6164_v59  ;;  %v6193_v59 = vld [vmem:[%s6893_s16 + $0xa0] sm:$0xff]  }
 0x6e3   : > { %5952 = vmatpush3.bf16.msra.mxu1 %v6125_v54  ;;  %v6170_v54 = vld [vmem:[%s6887_s23 + $0xe4] ss:$16 sps:$4 sm:$0xff]  }
 0x6e4   : > { %4474 = vmatprep.subr.bf16.mxu1 %v6131_v16  ;;  %4434 = vmatpush1.bf16.msra.mxu0 %v6162_v0  ;;  %v5602_v16 = vld [vmem:[%s779_s5] ss:$0 sm:$0xff]  ;;  %v6195_v0 = vld [vmem:[%s6893_s16 + $0xe8] sm:$0xff]  }
 0x6e5   : > { %4435 = vmatprep.subr.bf16.mxu0 %v6170_v54  ;;  %v6197_v54 = vld [vmem:[%s6893_s16 + $0xa8] sm:$0xff]  }
 0x6ea   : > { %5954 = vmatmul.mubr.msk.bf16.vlgmr.msra.gmra.mrb[32].mxu1 %vm2910_vm1, %v3831_v60  ;;  %v6167_v60 = vld [vmem:[%s6887_s23 + $0xcc] ss:$16 sps:$4 sm:$0xff]  }
 0x6eb   : > { %4506 = vmatprep.mubr.bf16.mxu1 %v6572_v43  ;;  %4475 = vmatpush1.bf16.msra.mxu1 %v6129_v50 }
 0x6ec   : > { %4476 = vmatprep.subr.bf16.mxu1 %v6137_v20 }
 0x6ef   : > { %4477 = vmatpush1.bf16.msra.mxu1 %v6135_v5 }
 0x6f0   : > { %4478 = vmatprep.subr.bf16.mxu1 %v6143_v22  ;;  %v6179_v22 = vld [vmem:[%s6893_s16 + $0xc8] sm:$0xff]  }
 0x6f3   : > { %4479 = vmatpush1.bf16.msra.mxu1 %v6141_v14  ;;  %v6178_v14 = vld [vmem:[%s6893_s16 + $0x48] sm:$0xff]  }
 0x6f4   : > { %4480 = vmatprep.subr.bf16.mxu1 %v6149_v18  ;;  %v6183_v18 = vld [vmem:[%s6893_s16 + $0xd0] sm:$0xff]  }
 0x6f7   : > { %4481 = vmatpush1.bf16.msra.mxu1 %v6147_v12  ;;  %v6184_v12 = vld [vmem:[%s6893_s16 + $0x10] sm:$0xff]  }
 0x6f8   : > { %4482 = vmatprep.subr.bf16.mxu1 %v6155_v4  ;;  %v6186_v4 = vld [vmem:[%s6893_s16 + $0x58] sm:$0xff]  }
 0x6fb   : > { %4483 = vmatpush1.bf16.msra.mxu1 %v6153_v7  ;;  %v6188_v7 = vld [vmem:[%s6893_s16 + $0x18] sm:$0xff]  }
 0x6fc   : > { %4484 = vmatprep.subr.bf16.mxu1 %v6161_v13  ;;  %v6190_v13 = vld [vmem:[%s6893_s16 + $0x60] sm:$0xff]  }
 0x6ff   : > { %4485 = vmatpush1.bf16.msra.mxu1 %v6159_v38  ;;  %v6192_v38 = vld [vmem:[%s6893_s16 + $0x20] sm:$0xff]  }
 0x700   : > { %4486 = vmatprep.subr.bf16.mxu1 %v6167_v60  ;;  %v6194_v60 = vld [vmem:[%s6893_s16 + $0x68] sm:$0xff]  }
 0x703   : > { %4487 = vmatpush1.bf16.msra.mxu1 %v6165_v56  ;;  %v6196_v56 = vld [vmem:[%s6893_s16 + $0x28] sm:$0xff]  }
 0x7bd   : > { %v5955_v3 = vpop.f32.mrb[32].mxu1 }
 0x7be   : > { %v4105_v8 = vpop.f32.mrb[33].mxu1  ;;  %v4133_v27 = vadd.f32 %v5955_v3, %v5601_v61  ;;  %v6168_v3 = vld [vmem:[%s6887_s23 + $0xe0] ss:$16 sps:$4 sm:$0xff]  }
 0x7bf   : > { %v4131_v33 = vadd.f32 %v5601_v61, %v4105_v8  ;;  %v5956_v24 = vpop.f32.mrb[34].mxu1  ;;  %v6171_v8 = vld [vmem:[%s6887_s23 + $0xe8] ss:$16 sps:$4 sm:$0xff]   ;;  %4436 = vmatpush1.bf16.msra.mxu0 %v6168_v3  ;;  %v6199_v3 = vld [vmem:[%s6893_s16 + $0xf0] sm:$0xff]  }
 0x7c0   : > { %v4108_v57 = vpop.f32.mrb[35].mxu1  ;;  %v4134_v49 = vadd.f32 %v5956_v24, %v5601_v61  ;;  %v7886_v10 = vadd.f32 %v6320_v11, %v4133_v27 }
 0x7c1   : > { %v7881_v53 = vadd.f32 %v6318_v55, %v4131_v33  ;;  %v4132_v1 = vadd.f32 %v5601_v61, %v4108_v57  ;;  %v6173_v61 = vld [vmem:[%s6887_s23 + $0xec] ss:$16 sps:$4 sm:$0xff]  }
 0x7c2   : > { %v7889_v29 = vadd.f32 %v6321_v9, %v4134_v49  ;;  %4488 = vmatprep.subr.bf16.mxu1 %v6173_v61  ;;  %v6198_v61 = vld [vmem:[%s6893_s16 + $0x70] sm:$0xff]  }
 0x7c3   : > { %v7883_v25 = vadd.f32 %v6319_v42, %v4132_v1  ;;  %4141 = vadd.xlane.f32.xlu0 %v7881_v53  ;;  %4489 = vmatpush1.bf16.msra.mxu1 %v6171_v8  ;;  %v6200_v8 = vld [vmem:[%s6893_s16 + $0x30] sm:$0xff]  }
 0x7c5   : > { %4143 = vadd.xlane.f32.xlu1 %v7883_v25 }
 0x7c7   : > { %4145 = vadd.xlane.f32.xlu0 %v7886_v10 }
 0x7c9   : > { %4147 = vadd.xlane.f32.xlu1 %v7889_v29 }
 0x850   : > { %v4142_v26 = vpop.xlane.xlu0 %4141 }
 0x851   : > { %v4149_v30 = vmul.f32 0.0078125, %v4142_v26 }
 0x852   : > { %v4144_v37 = vpop.xlane.xlu1 %4143 }
 0x853   : > { %v7902_v31 = vsub.f32 %v7881_v53, %v4149_v30  ;;  %v4150_v46 = vmul.f32 0.0078125, %v4144_v37  ;;  %v5603_v30 = vld [vmem:[%s782_s20] ss:$0 sm:$0xff] }
 0x854   : > { %v4146_v63 = vpop.xlane.xlu0 %4145 }
 0x855   : > { %v7905_v15 = vsub.f32 %v7883_v25, %v4150_v46  ;;  %v4151_v40 = vmul.f32 0.0078125, %v4146_v63  ;;  %v4157_v35 = vmul.f32 %v7902_v31, %v7902_v31 }
 0x856   : > { %v4148_v52 = vpop.xlane.xlu1 %4147 }
 0x857   : > { %v7910_v58 = vsub.f32 %v7886_v10, %v4151_v40  ;;  %v4152_v36 = vmul.f32 0.0078125, %v4148_v52  ;;  %4161 = vadd.xlane.f32.xlu0 %v4157_v35  ;;  %v4158_v2 = vmul.f32 %v7905_v15, %v7905_v15 }
 0x859   : > { %v7915_v44 = vsub.f32 %v7889_v29, %v4152_v36  ;;  %4163 = vadd.xlane.f32.xlu1 %v4158_v2  ;;  %v4159_v41 = vmul.f32 %v7910_v58, %v7910_v58 }
 0x85b   : > { %4165 = vadd.xlane.f32.xlu0 %v4159_v41  ;;  %v4160_v28 = vmul.f32 %v7915_v44, %v7915_v44 }
 0x85d   : > { %4167 = vadd.xlane.f32.xlu1 %v4160_v28  ;;  %v6175_v28 = vld [vmem:[%s6893_s16 + $0xc0] sm:$0xff]  }
 0x85e   : > { %5781 = vmatprep.subr.bf16.mxu1 %v6175_v28 }
 0x8e4   : > { %v4162_v33 = vpop.xlane.xlu0 %4161 }
 0x8e5   : > { %v4169_v24 = vmul.f32 0.0078125, %v4162_v33  ;;  %v6201_v33 = vld [vmem:[%s6893_s16 + $0xb0] sm:$0xff]  }
 0x8e6   : > { %v4164_v57 = vpop.xlane.xlu1 %4163 }
 0x8e7   : > { %v4173_v27 = vadd.f32 1e-05, %v4169_v24  ;;  %v4170_v55 = vmul.f32 0.0078125, %v4164_v57  ;;  %v6202_v24 = vld [vmem:[%s6893_s16 + $0x78] sm:$0xff]  }
 0x8e8   : > { %v4166_v1 = vpop.xlane.xlu0 %4165  ;;  %v6203_v57 = vld [vmem:[%s6893_s16 + $0xf8] sm:$0xff]  }
 0x8e9   : > { %6278 = vrsqrt.f32 %v4173_v27  ;;  %v4174_v49 = vadd.f32 1e-05, %v4170_v55  ;;  %v4171_v42 = vmul.f32 0.0078125, %v4166_v1  ;;  %v6204_v27 = vld [vmem:[%s6893_s16 + $0x38] sm:$0xff]   ;;  %v4243_v1 = vsub.s32 0, %v7102_v39 }
 0x8ea   : > { %v4168_v11 = vpop.xlane.xlu1 %4167  ;;  %v6205_v55 = vld [vmem:[%s6893_s16 + $0xb8] sm:$0xff]  }
 0x8eb   : > { %6280 = vrsqrt.f32 %v4174_v49  ;;  %v4175_v9 = vadd.f32 1e-05, %v4171_v42  ;;  %v4172_v48 = vmul.f32 0.0078125, %v4168_v11  ;;  %v4251_v49 = vsub.s32 2, %v7102_v39  ;;  %v4239_v42 = vld [vmem:[%s6921_s18] sm:$0xf] }
 0x8ec   : > { %v4247_v11 = vsub.s32 1, %v7102_v39  ;;  %s8278_s18 = sld [smem:[#allocation28_spill]] }
 0x8ed   : > { %6282 = vrsqrt.f32 %v4175_v9  ;;  %v4176_v34 = vadd.f32 1e-05, %v4172_v48  ;;  %v4255_v9 = vsub.s32 3, %v7102_v39  ;;  %v7998_v48 = vrot.slane %v4239_v42, %v4243_v1 }
 0x8ef   : > { %6284 = vrsqrt.f32 %v4176_v34  ;;  %v8000_v34 = vrot.slane %v4239_v42, %v4251_v49 }
 0x8f2   : > { %s8279_s20 = scalar_lea.vmem %s8278_s18, %s6901_s27 }
 0x8f3   : > { %v6279_v50 = vpop.eup %6278 }
 0x8f4   : > { %v4181_v32 = vmul.f32 %v6279_v50, %v7902_v31  ;;  %v8002_v50 = vrot.slane %v4239_v42, %v4247_v11 }
 0x8f5   : > { %v6281_v20 = vpop.eup %6280 }
 0x8f6   : > { %v4182_v21 = vmul.f32 %v6281_v20, %v7905_v15  ;;  %v4191_v5 = vmul.f32 %v5602_v16, %v4181_v32 }
 0x8f7   : > { %v6283_v26 = vpop.eup %6282 }
 0x8f8   : > { %v4192_v37 = vmul.f32 %v5602_v16, %v4182_v21  ;;  %v4201_v63 = vadd.f32 %v5603_v30, %v4191_v5  ;;  %v4183_v35 = vmul.f32 %v6283_v26, %v7910_v58 }
 0x8f9   : > { %v6285_v46 = vpop.eup %6284 }
 0x8fa   : > { %v4202_v40 = vadd.f32 %v5603_v30, %v4192_v37  ;;  %v4184_v31 = vmul.f32 %v6285_v46, %v7915_v44  ;;  %v4193_v36 = vmul.f32 %v5602_v16, %v4183_v35  ;;  %v6174_v44 = vld [vmem:[%s6893_s16 + $0x40] sm:$0xff]  }
 0x8fb   : > { %5753 = vmatprep.subr.bf16.mxu0 %v6174_v44 }
 0x8fc   : > { %v4205_v15 = vpack.c.bf16 %v4202_v40, %v4201_v63  ;;  %v4194_v52 = vmul.f32 %v5602_v16, %v4184_v31  ;;  %v4203_v41 = vadd.f32 %v5603_v30, %v4193_v36  ;;  %v8004_v16 = vrot.slane %v4239_v42, %v4255_v9 }
 0x8fe   : > { %4454 = vmatmul.mubr.bf16.vlgmr.msra.gmra.mrb[44].mxu0 %v4205_v15  ;;  %4507 = vmatmul.mubr.bf16.vlgmr.msra.gmra.mrb[36].mxu1 %v4205_v15  ;;  %v4204_v2 = vadd.f32 %v5603_v30, %v4194_v52 }
 0x8ff   : > { %4463 = vmatprep.mubr.bf16.mxu0 %v6572_v43  ;;  %4516 = vmatprep.mubr.bf16.mxu1 %v6572_v43  ;;  %v6180_v43 = vld [vmem:[%s6893_s16 + $0x8] sm:$0xff]  }
 0x900   : > { %v4206_v58 = vpack.c.bf16 %v4204_v2, %v4203_v41  ;;  %5754 = vmatpush3.bf16.msra.mxu0 %v6176_v47  ;;  %5782 = vmatpush3.bf16.msra.mxu1 %v6177_v62 }
 0x901   : > { %5755 = vmatprep.subr.bf16.mxu0 %v6178_v14  ;;  %5783 = vmatprep.subr.bf16.mxu1 %v6179_v22 }
 0x904   : > { %5756 = vmatpush3.bf16.msra.mxu0 %v6180_v43  ;;  %5784 = vmatpush3.bf16.msra.mxu1 %v6181_v17 }
 0x905   : > { %5757 = vmatprep.subr.bf16.mxu0 %v6182_v51  ;;  %5785 = vmatprep.subr.bf16.mxu1 %v6183_v18 }
 0x906   : > { %4464 = vmatmul.mubr.bf16.gmra.mrb[48].mxu0 %v4206_v58  ;;  %4517 = vmatmul.mubr.bf16.gmra.mrb[40].mxu1 %v4206_v58 }
 0x908   : > { %5758 = vmatpush3.bf16.msra.mxu0 %v6184_v12  ;;  %5786 = vmatpush3.bf16.msra.mxu1 %v6185_v19 }
 0x909   : > { %5759 = vmatprep.subr.bf16.mxu0 %v6186_v4  ;;  %5787 = vmatprep.subr.bf16.mxu1 %v6187_v45 }
 0x90c   : > { %5760 = vmatpush3.bf16.msra.mxu0 %v6188_v7  ;;  %5788 = vmatpush3.bf16.msra.mxu1 %v6189_v6 }
 0x90d   : > { %5761 = vmatprep.subr.bf16.mxu0 %v6190_v13  ;;  %5789 = vmatprep.subr.bf16.mxu1 %v6191_v23 }
 0x910   : > { %5762 = vmatpush3.bf16.msra.mxu0 %v6192_v38  ;;  %5790 = vmatpush3.bf16.msra.mxu1 %v6193_v59 }
 0x911   : > { %5763 = vmatprep.subr.bf16.mxu0 %v6194_v60  ;;  %5791 = vmatprep.subr.bf16.mxu1 %v6195_v0 }
 0x914   : > { %5764 = vmatpush3.bf16.msra.mxu0 %v6196_v56  ;;  %5792 = vmatpush3.bf16.msra.mxu1 %v6197_v54 }
 0x915   : > { %5765 = vmatprep.subr.bf16.mxu0 %v6198_v61  ;;  %5793 = vmatprep.subr.bf16.mxu1 %v6199_v3 }
 0x918   : > { %5766 = vmatpush3.bf16.msra.mxu0 %v6200_v8  ;;  %5794 = vmatpush3.bf16.msra.mxu1 %v6201_v33 }
 0x919   : > { %5767 = vmatprep.subr.bf16.mxu0 %v6202_v24  ;;  %5795 = vmatprep.subr.bf16.mxu1 %v6203_v57 }
 0x91c   : > { %5768 = vmatpush3.bf16.msra.mxu0 %v6204_v27  ;;  %5796 = vmatpush3.bf16.msra.mxu1 %v6205_v55 }
 0x9d1   : > { %v4455_v32 = vpop.f32.mrb[44].mxu0  ;;  %v4508_v20 = vpop.f32.mrb[36].mxu1 }
 0x9d2   : > { %v4456_v21 = vadd.f32 %v4455_v32, %v7998_v48  ;;  %v4509_v5 = vadd.f32 %v4508_v20, %v8000_v34  ;;  %v4457_v26 = vpop.f32.mrb[45].mxu0  ;;  %v4510_v30 = vpop.f32.mrb[37].mxu1 }
 0x9d3   : > { %v8009_v37 = vadd.f32 %v4457_v26, %v8002_v50  ;;  %v8012_v39 = vadd.f32 %v4510_v30, %v8004_v16  ;;  %v4459_v46 = vpop.f32.mrb[46].mxu0  ;;  %v4512_v63 = vpop.f32.mrb[38].mxu1 }
 0x9d4   : > { %v8014_v40 = vmul.f32 0.5, %v4456_v21  ;;  %v4543_v35 = vmul.f32 %v4456_v21, %v4456_v21  ;;  %v8016_v31 = vmul.f32 0.5, %v4509_v5  ;;  %v4545_v15 = vmul.f32 %v4509_v5, %v4509_v5  ;;  %v4461_v52 = vpop.f32.mrb[47].mxu0  ;;  %v4514_v36 = vpop.f32.mrb[39].mxu1 }
 0x9d5   : > { %v4544_v2 = vmul.f32 %v8009_v37, %v8009_v37  ;;  %v4546_v41 = vmul.f32 %v8012_v39, %v8012_v39  ;;  %v4460_v58 = vadd.f32 %v4459_v46, %v7998_v48  ;;  %v4513_v44 = vadd.f32 %v4512_v63, %v8000_v34 }
 0x9d6   : > { %v4559_v28 = vmul.f32 %v4543_v35, %v4456_v21  ;;  %v4561_v47 = vmul.f32 %v4545_v15, %v4509_v5  ;;  %v8025_v62 = vadd.f32 %v4461_v52, %v8002_v50  ;;  %v8028_v14 = vadd.f32 %v4514_v36, %v8004_v16 }
 0x9d7   : > { %v4560_v22 = vmul.f32 %v4544_v2, %v8009_v37  ;;  %v4562_v43 = vmul.f32 %v4546_v41, %v8012_v39  ;;  %v8032_v17 = vmul.f32 0.5, %v4460_v58  ;;  %v4547_v51 = vmul.f32 %v4460_v58, %v4460_v58 }
 0x9d8   : > { %v4575_v18 = vmul.f32 0.044715, %v4559_v28  ;;  %v4577_v12 = vmul.f32 0.044715, %v4561_v47  ;;  %v8034_v19 = vmul.f32 0.5, %v4513_v44  ;;  %v4549_v4 = vmul.f32 %v4513_v44, %v4513_v44 }
 0x9d9   : > { %v4576_v45 = vmul.f32 0.044715, %v4560_v22  ;;  %v4578_v7 = vmul.f32 0.044715, %v4562_v43  ;;  %v4563_v6 = vmul.f32 %v4547_v51, %v4460_v58  ;;  %v4548_v13 = vmul.f32 %v8025_v62, %v8025_v62  ;;  %v4465_v23 = vpop.f32.mrb[48].mxu0  ;;  %v4518_v38 = vpop.f32.mrb[40].mxu1 }
 0x9da   : > { %v4591_v59 = vadd.f32 %v4575_v18, %v4456_v21  ;;  %v4593_v60 = vadd.f32 %v4577_v12, %v4509_v5  ;;  %v4565_v0 = vmul.f32 %v4549_v4, %v4513_v44  ;;  %v4550_v56 = vmul.f32 %v8028_v14, %v8028_v14  ;;  %v4467_v54 = vpop.f32.mrb[49].mxu0  ;;  %v4520_v61 = vpop.f32.mrb[41].mxu1 }
 0x9db   : > { %v4592_v3 = vadd.f32 %v4576_v45, %v8009_v37  ;;  %v4594_v8 = vadd.f32 %v4578_v7, %v8012_v39  ;;  %v4579_v33 = vmul.f32 0.044715, %v4563_v6  ;;  %v4564_v24 = vmul.f32 %v4548_v13, %v8025_v62  ;;  %v4469_v57 = vpop.f32.mrb[50].mxu0  ;;  %v4522_v27 = vpop.f32.mrb[42].mxu1 }
 0x9dc   : > { %v4607_v55 = vmul.f32 0.7978846, %v4591_v59  ;;  %v4609_v1 = vmul.f32 0.7978846, %v4593_v60  ;;  %v4581_v49 = vmul.f32 0.044715, %v4565_v0  ;;  %v4566_v42 = vmul.f32 %v4550_v56, %v8028_v14 }
 0x9dd   : > { %v4608_v11 = vmul.f32 0.7978846, %v4592_v3  ;;  %v4610_v9 = vmul.f32 0.7978846, %v4594_v8  ;;  %v4595_v32 = vadd.f32 %v4579_v33, %v4460_v58  ;;  %v4580_v20 = vmul.f32 0.044715, %v4564_v24 }
 0x9de   : > { %6286 = vtanh.f32 %v4607_v55  ;;  %v4597_v21 = vadd.f32 %v4581_v49, %v4513_v44  ;;  %v4582_v5 = vmul.f32 0.044715, %v4566_v42  ;;  %v8045_v26 = vadd.f32 %v4465_v23, %v7998_v48  ;;  %v4471_v30 = vpop.f32.mrb[51].mxu0  ;;  %v4524_v46 = vpop.f32.mrb[43].mxu1 }
 0x9df   : > { %6288 = vtanh.f32 %v4609_v1  ;;  %v4611_v63 = vmul.f32 0.7978846, %v4595_v32  ;;  %v4596_v35 = vadd.f32 %v4580_v20, %v8025_v62  ;;  %v8049_v15 = vadd.f32 %v4518_v38, %v8000_v34 }
 0x9e0   : > { %6290 = vtanh.f32 %v4608_v11  ;;  %v4613_v52 = vmul.f32 0.7978846, %v4597_v21  ;;  %v4598_v36 = vadd.f32 %v4582_v5, %v8028_v14  ;;  %v4551_v2 = vmul.f32 %v8045_v26, %v8045_v26 }
 0x9e1   : > { %6292 = vtanh.f32 %v4610_v9  ;;  %v4612_v41 = vmul.f32 0.7978846, %v4596_v35  ;;  %v4553_v58 = vmul.f32 %v8049_v15, %v8049_v15  ;;  %v8057_v44 = vadd.f32 %v4467_v54, %v8002_v50 }
 0x9e2   : > { %6294 = vtanh.f32 %v4611_v63  ;;  %v4614_v28 = vmul.f32 0.7978846, %v4598_v36  ;;  %v4567_v47 = vmul.f32 %v4551_v2, %v8045_v26  ;;  %v8061_v22 = vadd.f32 %v4520_v61, %v8004_v16 }
 0x9e3   : > { %6296 = vtanh.f32 %v4613_v52  ;;  %v4569_v43 = vmul.f32 %v4553_v58, %v8049_v15  ;;  %v4552_v51 = vmul.f32 %v8057_v44, %v8057_v44  ;;  %v8067_v18 = vadd.f32 %v4469_v57, %v7998_v48 }
 0x9e4   : > { %6298 = vtanh.f32 %v4612_v41  ;;  %v4583_v12 = vmul.f32 0.044715, %v4567_v47  ;;  %v4554_v4 = vmul.f32 %v8061_v22, %v8061_v22  ;;  %v8072_v45 = vadd.f32 %v4522_v27, %v8000_v34 }
 0x9e5   : > { %6300 = vtanh.f32 %v4614_v28  ;;  %v4585_v7 = vmul.f32 0.044715, %v4569_v43  ;;  %v4568_v6 = vmul.f32 %v4552_v51, %v8057_v44  ;;  %v4555_v13 = vmul.f32 %v8067_v18, %v8067_v18 }
 0x9e6   : > { %v4599_v23 = vadd.f32 %v4583_v12, %v8045_v26  ;;  %v4570_v48 = vmul.f32 %v4554_v4, %v8061_v22  ;;  %v4557_v38 = vmul.f32 %v8072_v45, %v8072_v45  ;;  %v8082_v59 = vadd.f32 %v4471_v30, %v8002_v50 }
 0x9e7   : > { %v4601_v34 = vadd.f32 %v4585_v7, %v8049_v15  ;;  %v4584_v60 = vmul.f32 0.044715, %v4568_v6  ;;  %v4571_v0 = vmul.f32 %v4555_v13, %v8067_v18  ;;  %v8087_v56 = vadd.f32 %v4524_v46, %v8004_v16 }
 0x9e8   : > { %v6287_v54 = vpop.eup %6286  ;;  %v4615_v61 = vmul.f32 0.7978846, %v4599_v23  ;;  %v4586_v3 = vmul.f32 0.044715, %v4570_v48  ;;  %v4573_v8 = vmul.f32 %v4557_v38, %v8072_v45  ;;  %v4556_v33 = vmul.f32 %v8082_v59, %v8082_v59 }
 0x9e9   : > { %v6289_v24 = vpop.eup %6288  ;;  %v4639_v57 = vadd.f32 1.0, %v6287_v54  ;;  %v4617_v50 = vmul.f32 0.7978846, %v4601_v34  ;;  %v4600_v27 = vadd.f32 %v4584_v60, %v8057_v44  ;;  %v4587_v55 = vmul.f32 0.044715, %v4571_v0 }
 0x9ea   : > { %v6291_v1 = vpop.eup %6290  ;;  %v4641_v49 = vadd.f32 1.0, %v6289_v24  ;;  %6302 = vtanh.f32 %v4615_v61  ;;  %v4602_v16 = vadd.f32 %v4586_v3, %v8061_v22  ;;  %v4589_v42 = vmul.f32 0.044715, %v4573_v8 }
 0x9eb   : > { %v6293_v11 = vpop.eup %6292  ;;  %v4655_v9 = vmul.f32 %v4639_v57, %v8014_v40  ;;  %6304 = vtanh.f32 %v4617_v50  ;;  %v4616_v32 = vmul.f32 0.7978846, %v4600_v27  ;;  %v4603_v20 = vadd.f32 %v4587_v55, %v8067_v18 }
 0x9ec   : > { %v6295_v21 = vpop.eup %6294  ;;  %v4657_v5 = vmul.f32 %v4641_v49, %v8016_v31  ;;  %v4618_v30 = vmul.f32 0.7978846, %v4602_v16  ;;  %v4605_v46 = vadd.f32 %v4589_v42, %v8072_v45  ;;  %v4572_v63 = vmul.f32 %v4556_v33, %v8082_v59 }
 0x9ed   : > { %v6297_v35 = vpop.eup %6296  ;;  %v4643_v52 = vadd.f32 1.0, %v6295_v21  ;;  %6306 = vtanh.f32 %v4616_v32  ;;  %v4619_v36 = vmul.f32 0.7978846, %v4603_v20  ;;  %v4558_v2 = vmul.f32 %v8087_v56, %v8087_v56 }
 0x9ee   : > { %v6299_v40 = vpop.eup %6298  ;;  %v4645_v41 = vadd.f32 1.0, %v6297_v35  ;;  %6308 = vtanh.f32 %v4618_v30  ;;  %v4621_v58 = vmul.f32 0.7978846, %v4605_v46  ;;  %v4588_v28 = vmul.f32 0.044715, %v4572_v63 }
 0x9ef   : > { %v6301_v47 = vpop.eup %6300  ;;  %v4659_v31 = vmul.f32 %v4643_v52, %v8032_v17  ;;  %6310 = vtanh.f32 %v4619_v36  ;;  %v4574_v43 = vmul.f32 %v4558_v2, %v8087_v56  ;;  %v4528_v51 = vmul.f32 0.5, %v8009_v37 }
 0x9f0   : > { %v4661_v12 = vmul.f32 %v4645_v41, %v8034_v19  ;;  %6312 = vtanh.f32 %v4621_v58  ;;  %v4604_v4 = vadd.f32 %v4588_v28, %v8082_v59  ;;  %v4532_v7 = vmul.f32 0.5, %v8025_v62 }
 0x9f1   : > { %v4590_v6 = vmul.f32 0.044715, %v4574_v43  ;;  %v4640_v13 = vadd.f32 1.0, %v6291_v1  ;;  %v4644_v23 = vadd.f32 1.0, %v6299_v40  ;;  %v4530_v48 = vmul.f32 0.5, %v8012_v39 }
 0x9f2   : > { %v4620_v38 = vmul.f32 0.7978846, %v4604_v4  ;;  %v4534_v17 = vmul.f32 0.5, %v8028_v14  ;;  %v4642_v34 = vadd.f32 1.0, %v6293_v11  ;;  %v4646_v60 = vadd.f32 1.0, %v6301_v47 }
 0x9f3   : > { %v4606_v0 = vadd.f32 %v4590_v6, %v8087_v56  ;;  %v4656_v37 = vmul.f32 %v4640_v13, %v4528_v51  ;;  %v4660_v54 = vmul.f32 %v4644_v23, %v4532_v7  ;;  %v4671_v19 = vpack.c.bf16 %v4659_v31, %v4655_v9  ;;  %v5636_v4 = vld [vmem:[%s8279_s20] ss:$0 sm:$0xff] }
 0x9f4   : > { %v6303_v61 = vpop.eup %6302  ;;  %6314 = vtanh.f32 %v4620_v38  ;;  %v4658_v3 = vmul.f32 %v4642_v34, %v4530_v48  ;;  %v4662_v8 = vmul.f32 %v4646_v60, %v4534_v17  ;;  %v4673_v62 = vpack.c.bf16 %v4661_v12, %v4657_v5 }
 0x9f5   : > { %v6305_v33 = vpop.eup %6304  ;;  %v4622_v24 = vmul.f32 0.7978846, %v4606_v0  ;;  %v4672_v57 = vpack.c.bf16 %v4660_v54, %v4656_v37  ;;  %v4647_v27 = vadd.f32 1.0, %v6303_v61  ;;  %v4535_v16 = vmul.f32 0.5, %v8045_v26 }
 0x9f6   : > { %v4674_v50 = vpack.c.bf16 %v4662_v8, %v4658_v3  ;;  %v4649_v1 = vadd.f32 1.0, %v6305_v33  ;;  %v4539_v42 = vmul.f32 0.5, %v8067_v18  ;;  %v4537_v9 = vmul.f32 0.5, %v8049_v15 }
 0x9f7   : > { %v6307_v39 = vpop.eup %6306  ;;  %6316 = vtanh.f32 %v4622_v24  ;;  %4974 = vmatprep.mubr.bf16.mxu0 %v4672_v57  ;;  %v4541_v32 = vmul.f32 0.5, %v8072_v45  ;;  %v4663_v21 = vmul.f32 %v4647_v27, %v4535_v16  ;;  %v4536_v36 = vmul.f32 0.5, %v8057_v44 }
 0x9f8   : > { %v6309_v14 = vpop.eup %6308  ;;  %5023 = vmatprep.mubr.bf16.mxu1 %v4674_v50  ;;  %4975 = vmatmul.mubr.bf16.vlgmr.msra.gmra.mrb[52].mxu0 %v4671_v19  ;;  %v4648_v30 = vadd.f32 1.0, %v6307_v39  ;;  %v4665_v46 = vmul.f32 %v4649_v1, %v4537_v9  ;;  %v4540_v2 = vmul.f32 0.5, %v8082_v59  ;;  %v4538_v45 = vmul.f32 0.5, %v8061_v22  ;;  %v6322_v9 = vld [vmem:[#allocation9 + $0x4] ss:$8 sps:$4 sm:$0xff] (!%p5669_p4)  }
 0x9f9   : > { %v6311_v55 = vpop.eup %6310  ;;  %5024 = vmatmul.mubr.bf16.vlgmr.msra.gmra.mrb[44].mxu1 %v4673_v62  ;;  %v4650_v18 = vadd.f32 1.0, %v6309_v14  ;;  %v4542_v28 = vmul.f32 0.5, %v8087_v56  ;;  %5216 = vmatprep.subr.bf16.mxu0 (!%p5669_p4), %v6322_v9 }
 0x9fa   : > { %v6313_v49 = vpop.eup %6312  ;;  %v4651_v11 = vadd.f32 1.0, %v6311_v55  ;;  %v4664_v15 = vmul.f32 %v4648_v30, %v4536_v36  ;;  %5969 = vmatprep.subr.bf16.mxu1 (!%p5669_p4), %v6322_v9 }
 0x9fb   : > { %v4653_v20 = vadd.f32 1.0, %v6313_v49  ;;  %v4666_v43 = vmul.f32 %v4650_v18, %v4538_v45  ;;  %v6328_v45 = vld [vmem:[#allocation9 + $0x24] ss:$8 sps:$4 sm:$0xff] (!%p5669_p4)  }
 0x9fc   : > { %v4667_v5 = vmul.f32 %v4651_v11, %v4539_v42 }
 0x9fd   : > { %v4669_v63 = vmul.f32 %v4653_v20, %v4541_v32  ;;  %v6324_v32 = vld [vmem:[#allocation9] ss:$8 sps:$4 sm:$0xff] (!%p5669_p4)  }
 0x9fe   : > { %v6315_v35 = vpop.eup %6314  ;;  %v4675_v52 = vpack.c.bf16 %v4667_v5, %v4663_v21  ;;  %5217 = vmatpush1.bf16.msra.mxu0 (!%p5669_p4), %v6324_v32  ;;  %5977 = vmatpush1.bf16.msra.mxu1 (!%p5669_p4), %v6324_v32 }
 0x9ff   : > { %v4652_v26 = vadd.f32 1.0, %v6315_v35  ;;  %v4677_v40 = vpack.c.bf16 %v4669_v63, %v4665_v46 }
 0xa01   : > { %v6317_v41 = vpop.eup %6316  ;;  %v4668_v58 = vmul.f32 %v4652_v26, %v4540_v2 }
 0xa02   : > { %v4654_v47 = vadd.f32 1.0, %v6317_v41 }
 0xa03   : > { %v4676_v31 = vpack.c.bf16 %v4668_v58, %v4664_v15  ;;  %v6325_v15 = vld [vmem:[#allocation9 + $0x14] ss:$8 sps:$4 sm:$0xff] (!%p5669_p4)   ;;  %v6327_v58 = vld [vmem:[#allocation9 + $0x10] ss:$8 sps:$4 sm:$0xff] (!%p5669_p4)  }
 0xa04   : > { %v4670_v51 = vmul.f32 %v4654_v47, %v4542_v28  ;;  %5218 = vmatprep.subr.bf16.mxu0 (!%p5669_p4), %v6325_v15  ;;  %5970 = vmatprep.subr.bf16.mxu1 (!%p5669_p4), %v6325_v15  ;;  %v6330_v28 = vld [vmem:[#allocation9 + $0x20] ss:$8 sps:$4 sm:$0xff] (!%p5669_p4)   ;;  %v6331_v47 = vld [vmem:[#allocation9 + $0x34] ss:$8 sps:$4 sm:$0xff] (!%p5669_p4)  }
 0xa05   : > { %4982 = vmatprep.mubr.bf16.mxu0 %v4676_v31  ;;  %5219 = vmatpush1.bf16.msra.mxu0 (!%p5669_p4), %v6327_v58  ;;  %v6333_v31 = vld [vmem:[#allocation9 + $0x30] ss:$8 sps:$4 sm:$0xff] (!%p5669_p4)  }
 0xa06   : > { %v4678_v12 = vpack.c.bf16 %v4670_v51, %v4666_v43  ;;  %4983 = vmatmul.mubr.bf16.gmra.mrb[56].mxu0 %v4675_v52  ;;  %5978 = vmatpush1.bf16.msra.mxu1 (!%p5669_p4), %v6327_v58  ;;  %v6334_v43 = vld [vmem:[#allocation9 + $0x44] ss:$8 sps:$4 sm:$0xff] (!%p5669_p4)   ;;  %v6336_v51 = vld [vmem:[#allocation9 + $0x40] ss:$8 sps:$4 sm:$0xff] (!%p5669_p4)  }
 0xa07   : > { %5220 = vmatprep.subr.bf16.mxu0 (!%p5669_p4), %v6328_v45  ;;  %5971 = vmatprep.subr.bf16.mxu1 (!%p5669_p4), %v6328_v45 }
 0xa08   : > { %5031 = vmatprep.mubr.bf16.mxu1 %v4678_v12  ;;  %v6337_v12 = vld [vmem:[#allocation9 + $0x54] ss:$8 sps:$4 sm:$0xff] (!%p5669_p4)  }
 0xa09   : > { %5032 = vmatmul.mubr.bf16.gmra.mrb[48].mxu1 %v4677_v40  ;;  %5221 = vmatpush1.bf16.msra.mxu0 (!%p5669_p4), %v6330_v28 }
 0xa0a   : > { %5979 = vmatpush1.bf16.msra.mxu1 (!%p5669_p4), %v6330_v28  ;;  %5222 = vmatprep.subr.bf16.mxu0 (!%p5669_p4), %v6331_v47 }
 0xa0b   : > { %5972 = vmatprep.subr.bf16.mxu1 (!%p5669_p4), %v6331_v47 }
 0xa0d   : > { %5223 = vmatpush1.bf16.msra.mxu0 (!%p5669_p4), %v6333_v31 }
 0xa0e   : > { %5980 = vmatpush1.bf16.msra.mxu1 (!%p5669_p4), %v6333_v31  ;;  %5224 = vmatprep.subr.bf16.mxu0 (!%p5669_p4), %v6334_v43 }
 0xa0f   : > { %5973 = vmatprep.subr.bf16.mxu1 (!%p5669_p4), %v6334_v43 }
 0xa11   : > { %5225 = vmatpush1.bf16.msra.mxu0 (!%p5669_p4), %v6336_v51 }
 0xa12   : > { %5981 = vmatpush1.bf16.msra.mxu1 (!%p5669_p4), %v6336_v51  ;;  %5226 = vmatprep.subr.bf16.mxu0 (!%p5669_p4), %v6337_v12 }
 0xa13   : > { %5974 = vmatprep.subr.bf16.mxu1 (!%p5669_p4), %v6337_v12 }
 0xacb   : > { %v5769_v44 = vpop.f32.mrb[52].mxu0 }
 0xacc   : > { %v5797_v59 = vpop.f32.mrb[44].mxu1  ;;  %v5770_v7 = vpop.f32.mrb[53].mxu0 }
 0xacd   : > { %v5771_v22 = vadd.f32 %v5770_v7, %v5769_v44  ;;  %v5798_v6 = vpop.f32.mrb[45].mxu1  ;;  %v5772_v56 = vpop.f32.mrb[54].mxu0  ;;  %v6339_v44 = vld [vmem:[#allocation9 + $0x50] ss:$8 sps:$4 sm:$0xff] (!%p5669_p4)   ;;  %v6342_v7 = vld [vmem:[#allocation9 + $0x60] ss:$8 sps:$4 sm:$0xff] (!%p5669_p4)  }
 0xace   : > { %v5799_v13 = vadd.f32 %v5798_v6, %v5797_v59  ;;  %v5800_v23 = vpop.f32.mrb[46].mxu1  ;;  %v5773_v48 = vpop.f32.mrb[55].mxu0  ;;  %v6340_v59 = vld [vmem:[#allocation9 + $0x64] ss:$8 sps:$4 sm:$0xff] (!%p5669_p4)   ;;  %5227 = vmatpush1.bf16.msra.mxu0 (!%p5669_p4), %v6339_v44  ;;  %5982 = vmatpush1.bf16.msra.mxu1 (!%p5669_p4), %v6339_v44  ;;  %v6345_v6 = vld [vmem:[#allocation9 + $0x70] ss:$8 sps:$4 sm:$0xff] (!%p5669_p4)  }
 0xacf   : > { %v4977_v38 = vadd.f32 %v5771_v22, %v5636_v4  ;;  %v5774_v17 = vadd.f32 %v5773_v48, %v5772_v56  ;;  %v5801_v34 = vpop.f32.mrb[47].mxu1  ;;  %5228 = vmatprep.subr.bf16.mxu0 (!%p5669_p4), %v6340_v59  ;;  %5975 = vmatprep.subr.bf16.mxu1 (!%p5669_p4), %v6340_v59  ;;  %v6343_v22 = vld [vmem:[#allocation9 + $0x74] ss:$8 sps:$4 sm:$0xff] (!%p5669_p4)  }
 0xad0   : > { %v5802_v60 = vadd.f32 %v5801_v34, %v5800_v23 }
 0xad1   : > { %v5026_v0 = vadd.f32 %v5799_v13, %v4977_v38  ;;  %v4980_v37 = vadd.f32 %v5774_v17, %v5636_v4 }
 0xad2   : > { %5229 = vmatpush1.bf16.msra.mxu0 (!%p5669_p4), %v6342_v7  ;;  %5983 = vmatpush1.bf16.msra.mxu1 (!%p5669_p4), %v6342_v7 }
 0xad3   : > { %v5040_v54 = vadd.f32 %v5026_v0, %v7881_v53  ;;  %v5029_v19 = vadd.f32 %v5802_v60, %v4980_v37  ;;  %5230 = vmatprep.subr.bf16.mxu0 (!%p5669_p4), %v6343_v22  ;;  %5976 = vmatprep.subr.bf16.mxu1 (!%p5669_p4), %v6343_v22 }
 0xad5   : > { %5044 = vst [vmem:[#allocation2] sm:$0xff] %v5040_v54  ;;  %v5041_v61 = vadd.f32 %v5029_v19, %v7883_v25  ;;  %5054 = vadd.xlane.f32.xlu0 (!%p5669_p4), %v5040_v54 }
 0xad6   : > { %5231 = vmatpush1.bf16.msra.mxu0 (!%p5669_p4), %v6345_v6  ;;  %5984 = vmatpush1.bf16.msra.mxu1 (!%p5669_p4), %v6345_v6 }
 0xad7   : > { %5045 = vst [vmem:[#allocation2 + $0x8] sm:$0xff] %v5041_v61 }
 0xad9   : > { %v5775_v3 = vpop.f32.mrb[56].mxu0  ;;  %5056 = vadd.xlane.f32.xlu0 (!%p5669_p4), %v5041_v61 }
 0xada   : > { %v5776_v8 = vpop.f32.mrb[57].mxu0 }
 0xadb   : > { %v5777_v62 = vadd.f32 %v5776_v8, %v5775_v3  ;;  %v5778_v33 = vpop.f32.mrb[58].mxu0  ;;  %v5670_v8 = vld [vmem:[%s8280_s11] ss:$0 sm:$0xff] (!%p5669_p4) }
 0xadc   : > { %v5803_v24 = vpop.f32.mrb[48].mxu1  ;;  %v5779_v57 = vpop.f32.mrb[59].mxu0 }
 0xadd   : > { %v4985_v50 = vadd.f32 %v5777_v62, %v5636_v4  ;;  %v5804_v39 = vpop.f32.mrb[49].mxu1  ;;  %v5780_v14 = vadd.f32 %v5779_v57, %v5778_v33 }
 0xade   : > { %v5805_v27 = vadd.f32 %v5804_v39, %v5803_v24  ;;  %v5806_v55 = vpop.f32.mrb[50].mxu1 }
 0xadf   : > { %v4988_v1 = vadd.f32 %v5780_v14, %v5636_v4  ;;  %v5807_v49 = vpop.f32.mrb[51].mxu1  ;;  %v6580_v4 = vmov (!%p5669_p4), 0  }
 0xae0   : > { %v5034_v16 = vadd.f32 %v5805_v27, %v4985_v50  ;;  %v5808_v53 = vadd.f32 %v5807_v49, %v5806_v55  ;;  %5051 = sbr.rel (%p5669_p4) target bundleno = 3321 (0xcf9), region = 108  ;;  %5248 = vmatprep.mubr.bf16.mxu0 (!%p5669_p4), %v6580_v4  ;;  %5258 = vmatprep.mubr.bf16.mxu1 (!%p5669_p4), %v6580_v4  ;;  %v5671_v50 = vld [vmem:[%s8281_s7] ss:$0 sm:$0xff] (!%p5669_p4) }
 0xae2   : > { %v5042_v42 = vadd.f32 %v5034_v16, %v7886_v10  ;;  %v5037_v11 = vadd.f32 %v5808_v53, %v4988_v1 }
 0xae4   : > { %5046 = vst [vmem:[#allocation2 + $0x10] sm:$0xff] %v5042_v42  ;;  %v5043_v25 = vadd.f32 %v5037_v11, %v7889_v29  ;;  %5058 = vadd.xlane.f32.xlu1 (!%p5669_p4), %v5042_v42 }
 0xae6   : > { %5047 = vst [vmem:[#allocation2 + $0x18] sm:$0xff] %v5043_v25 }
 0xae8   : > { %5060 = vadd.xlane.f32.xlu1 %v5043_v25 }
 0xb62   : > { %v5055_v20 = vpop.xlane.xlu0 %5054 }
 0xb63   : > { %v5062_v21 = vmul.f32 0.0078125, %v5055_v20 }
 0xb65   : > { %v8128_v30 = vsub.f32 %v5040_v54, %v5062_v21 }
 0xb66   : > { %v5057_v46 = vpop.xlane.xlu0 %5056 }
 0xb67   : > { %v5063_v35 = vmul.f32 0.0078125, %v5057_v46  ;;  %v5070_v52 = vmul.f32 %v8128_v30, %v8128_v30 }
 0xb69   : > { %v8134_v2 = vsub.f32 %v5041_v61, %v5063_v35  ;;  %5074 = vadd.xlane.f32.xlu0 %v5070_v52 }
 0xb6b   : > { %v5071_v18 = vmul.f32 %v8134_v2, %v8134_v2 }
 0xb6d   : > { %5076 = vadd.xlane.f32.xlu1 %v5071_v18 }
 0xb71   : > { %v5059_v10 = vpop.xlane.xlu1 %5058 }
 0xb72   : > { %v5064_v5 = vmul.f32 0.0078125, %v5059_v10 }
 0xb74   : > { %v8130_v29 = vsub.f32 %v5042_v42, %v5064_v5 }
 0xb75   : > { %v5061_v63 = vpop.xlane.xlu1 %5060 }
 0xb76   : > { %v5065_v36 = vmul.f32 0.0078125, %v5061_v63  ;;  %v5072_v40 = vmul.f32 %v8130_v29, %v8130_v29 }
 0xb78   : > { %v8136_v26 = vsub.f32 %v5043_v25, %v5065_v36  ;;  %5078 = vadd.xlane.f32.xlu0 %v5072_v40 }
 0xb7a   : > { %v5073_v41 = vmul.f32 %v8136_v26, %v8136_v26 }
 0xb7c   : > { %5080 = vadd.xlane.f32.xlu1 %v5073_v41 }
 0xbf6   : > { %v5075_v56 = vpop.xlane.xlu0 %5074 }
 0xbf7   : > { %v5082_v13 = vmul.f32 0.0078125, %v5075_v56 }
 0xbf9   : > { %v5086_v23 = vadd.f32 1e-05, %v5082_v13 }
 0xbfa   : > { %v5077_v48 = vpop.xlane.xlu1 %5076 }
 0xbfb   : > { %6346 = vrsqrt.f32 %v5086_v23  ;;  %v5083_v17 = vmul.f32 0.0078125, %v5077_v48 }
 0xbfd   : > { %v5087_v60 = vadd.f32 1e-05, %v5083_v17 }
 0xbff   : > { %6348 = vrsqrt.f32 %v5087_v60 }
 0xc05   : > { %v5079_v38 = vpop.xlane.xlu0 %5078  ;;  %v6347_v61 = vpop.eup %6346 }
 0xc06   : > { %v5084_v34 = vmul.f32 0.0078125, %v5079_v38  ;;  %v5094_v3 = vmul.f32 %v6347_v61, %v8128_v30 }
 0xc08   : > { %v5088_v0 = vadd.f32 1e-05, %v5084_v34  ;;  %v5104_v57 = vmul.f32 %v5670_v8, %v5094_v3 }
 0xc09   : > { %v5081_v37 = vpop.xlane.xlu1 %5080  ;;  %v6349_v62 = vpop.eup %6348 }
 0xc0a   : > { %v5085_v54 = vmul.f32 0.0078125, %v5081_v37  ;;  %6350 = vrsqrt.f32 %v5088_v0  ;;  %v5095_v24 = vmul.f32 %v6349_v62, %v8134_v2  ;;  %v5114_v55 = vadd.f32 %v5671_v50, %v5104_v57 }
 0xc0c   : > { %v5089_v19 = vadd.f32 1e-05, %v5085_v54  ;;  %v5105_v14 = vmul.f32 %v5670_v8, %v5095_v24 }
 0xc0e   : > { %6352 = vrsqrt.f32 %v5089_v19  ;;  %v5115_v1 = vadd.f32 %v5671_v50, %v5105_v14 }
 0xc10   : > { %v5118_v53 = vpack.c.bf16 %v5115_v1, %v5114_v55 }
 0xc12   : > { %5249 = vmatmul.mubr.bf16.vlgmr.msra.gmra.mrb[0].mxu0 %v5118_v53 }
 0xc14   : > { %v6351_v33 = vpop.eup %6350 }
 0xc15   : > { %v5096_v39 = vmul.f32 %v6351_v33, %v8130_v29 }
 0xc17   : > { %v5106_v16 = vmul.f32 %v5670_v8, %v5096_v39 }
 0xc18   : > { %v6353_v27 = vpop.eup %6352 }
 0xc19   : > { %v5097_v49 = vmul.f32 %v6353_v27, %v8136_v26  ;;  %v5116_v11 = vadd.f32 %v5671_v50, %v5106_v16 }
 0xc1b   : > { %v5107_v42 = vmul.f32 %v5670_v8, %v5097_v49 }
 0xc1d   : > { %v5117_v25 = vadd.f32 %v5671_v50, %v5107_v42 }
 0xc1f   : > { %v5119_v9 = vpack.c.bf16 %v5117_v25, %v5116_v11 }
 0xc21   : > { %5259 = vmatmul.mubr.bf16.vlgmr.msra.gmra.mrb[0].mxu1 %v5119_v9 }
 0xce5   : > { %v5250_v32 = vpop.f32.mrb[0].mxu0 }
 0xce6   : > { %5269 = vst [vmem:[#allocation11] sm:$0xff] %v5250_v32  ;;  %v5252_v20 = vpop.f32.mrb[1].mxu0 }
 0xce7   : > { %5270 = vst [vmem:[#allocation11 + $0x8] sm:$0xff] %v5252_v20  ;;  %v5254_v10 = vpop.f32.mrb[2].mxu0 }
 0xce8   : > { %5271 = vst [vmem:[#allocation11 + $0x10] sm:$0xff] %v5254_v10  ;;  %v5256_v21 = vpop.f32.mrb[3].mxu0 }
 0xce9   : > { %5272 = vst [vmem:[#allocation11 + $0x18] sm:$0xff] %v5256_v21 }
 0xcf4   : > { %v5260_v5 = vpop.f32.mrb[0].mxu1 }
 0xcf5   : > { %5273 = vst [vmem:[#allocation11 + $0x20] sm:$0xff] %v5260_v5  ;;  %v5262_v30 = vpop.f32.mrb[1].mxu1 }
 0xcf6   : > { %5274 = vst [vmem:[#allocation11 + $0x28] sm:$0xff] %v5262_v30  ;;  %v5264_v29 = vpop.f32.mrb[2].mxu1 }
 0xcf7   : > { %5275 = vst [vmem:[#allocation11 + $0x30] sm:$0xff] %v5264_v29  ;;  %v5266_v46 = vpop.f32.mrb[3].mxu1 }
 0xcf8   : > { %5276 = vst [vmem:[#allocation11 + $0x38] sm:$0xff] %v5266_v46 }
 0xcf9 PF: > { %p6017_p6 = scmp.eq.s32.totalorder %s6775_s12, 1  ;;  %s6581_s8 = smov [#allocation11]  }
 0xcfa   : > { %s5287_s13 = sshll.u32 %s6581_s8, 4  ;;  %s5288_s13 = int_to_ptr.vmem [resolvable:$true] %s5287_s13 }
 0xcfb   : > { %s6472_s30 = scalar_lea.vmem %s5288_s13, 1024  ;;  %p6479_p5 = scmp.lt.s32.totalorder %s5288_s13, %s5288_s13 }
 0xcfc   : > { %p6473_p13 = scmp.ne.s32.totalorder %s5288_s13, %s6472_s30  ;;  %p6480_p11 = scmp.lt.s32.totalorder %s6472_s30, %s6472_s30 }
 0xcfe   : > { %p6474_p3 = pnand %p6473_p13, %p6017_p6  ;;  %p6481_p12 = por %p6480_p11, %p6479_p5 }
 0xd00   : > { %p6475_p7 = pneg %p6474_p3 }
 0xd02   : > { %p6482_p8 = pnand %p6481_p12, %p6475_p7 }
 0xd04   : > { %6485 = shalt.err (!%p6482_p8)
}
 0xd05   : > { %s8282_s0 = sld [smem:[#allocation35_spill]] }
 0xd0b   : > { %s6486_s3 = scalar_lea.hbm %s8282_s0, 1024 }
 0xd0c   : > { %p6487_p9 = scmp.ne.s32.totalorder %s8282_s0, %s6486_s3  ;;  %p6492_p0 = scmp.lt.u32.totalorder %s6486_s3, %s8282_s0 }
 0xd0e   : > { %p6488_p2 = pnand %p6487_p9, %p6017_p6 }
 0xd10   : > { %p6489_p10 = pneg %p6488_p2 }
 0xd12   : > { %p6494_p1 = pnand %p6492_p0, %p6489_p10 }
 0xd14   : > { %6497 = shalt.err (!%p6494_p1)
}
 0xd15   : > { %s6582_s1 = smov 256   ;;  %s6583_s26 = smov 16  }
 0xd16   : > { %5997 = dma.vmem_to_hbm [thread:$0]  (%p6017_p6), %s5288_s13, 1024, %s8282_s0, [#allocation5], %s6582_s1, %s6582_s1, %s6583_s26  }
 0xd17   : > { %6535 = dma.done.wait (%p6017_p6), [#allocation5], 1024  }
 0xd18   : > { %6537 = vsyncadd (%p6017_p6), [#allocation5], 4294966272 }
 0xd19 PF: > { %s8283_s16 = sld [smem:[#allocation18_spill]]  ;;  %s8284_s5 = sld [smem:[#allocation16_spill]] }
 0xd1a   : > { %s8285_s23 = sld [smem:[#allocation20_spill]]  ;;  %s8286_s24 = sld [smem:[#allocation17_spill]] }
 0xd1b   : > { %s8287_s25 = sld [smem:[#allocation19_spill]]  ;;  %s8288_s21 = smov %s6544_s22 }
 0xd1f   : > { %s34_s26 = sadd.s32 1, %s8283_s16   ;;  %s8289_s22 = smov %s8284_s5 }
 0xd20   : > { %p31_p4 = scmp.ge.s32.totalorder %s34_s26, 4  }
 0xd22   :  { %33 = sbr.rel (!%p31_p4) target bundleno = 24 (0x18), region = 185 }
 0xd29   :  { %5303 = vsyncpa [#allocation4], 1 }
 0xd2a   :  { %5305 = vsyncpa [#allocation4 + $0x1], 1 }
 0xd2b   :  { %5306 = vsyncpa [#allocation7], 1 }
 0xd2c   :  { %5308 = vsyncpa [#allocation7 + $0x1], 1 }
 0xd2d   :  { %5309 = vsyncpa [#allocation10], 1 }
 0xd2e   :  { %5310 = vsyncpa [#allocation5], 1 }
 0xd2f   :  { %5312 = vsyncpa [#allocation5 + $0x1], 1 }

</bundles_post_ra>
